<compile_context>
chip_gen: v5e
topology: v5e:2x2
jax: 0.10.0
libtpu: 0.0.40
codegen_flags: <defaults>
</compile_context>

<pallas_src>
import jax
import jax.numpy as jnp
from jax import lax
from jax.experimental import pallas as pl
from jax.experimental.pallas import tpu as pltpu

BN_EPS = 1e-5
EXPANSION = 1  # BasicBlock.expansion


# ------------------------------ fused kernel --------------------------------

def _make_fused_kernel(stride, has_proj, h, w, cin, planes, ho, wo):
    """Builds the fused BasicBlock kernel for one batch image per grid step."""

    def kernel(*refs):
        if has_proj:
            (x_ref, w1_ref, b1_ref, w2_ref, b2_ref,
             wsc_ref, bsc_ref, o_ref, xpad_ref, mid_ref) = refs
        else:
            (x_ref, w1_ref, b1_ref, w2_ref, b2_ref,
             o_ref, xpad_ref, mid_ref) = refs

        # -- stage 0: zero-padded input halo, entirely in VMEM ----------------
        xpad_ref[...] = jnp.zeros_like(xpad_ref)
        xpad_ref[pl.ds(1, h), pl.ds(1, w), :] = x_ref[...]
        mid_ref[...] = jnp.zeros_like(mid_ref)

        def in_patch(kh, kw):
            if stride == 1:
                return xpad_ref[pl.ds(kh, ho), pl.ds(kw, wo), :]
            return xpad_ref[pl.ds(kh, ho, stride=stride),
                            pl.ds(kw, wo, stride=stride), :]

        # -- stage 1: conv1 (3x3, stride) + folded bn1 + relu ------------------
        acc1 = jnp.zeros((ho * wo, planes), jnp.float32)
        for kh in range(3):
            for kw in range(3):
                p2d = in_patch(kh, kw).reshape(ho * wo, cin)
                acc1 = acc1 + jnp.dot(p2d, w1_ref[kh, kw],
                                      preferred_element_type=jnp.float32)
        mid = jnp.maximum(acc1 + b1_ref[...], 0.0)
        mid_ref[pl.ds(1, ho), pl.ds(1, wo), :] = (
            mid.reshape(ho, wo, planes).astype(mid_ref.dtype))

        # -- stage 2: conv2 (3x3, stride 1) + folded bn2 -----------------------
        acc2 = jnp.zeros((ho * wo, planes), jnp.float32)
        for kh in range(3):
            for kw in range(3):
                p2d = mid_ref[pl.ds(kh, ho), pl.ds(kw, wo), :].reshape(
                    ho * wo, planes)
                acc2 = acc2 + jnp.dot(p2d, w2_ref[kh, kw],
                                      preferred_element_type=jnp.float32)
        y = acc2 + b2_ref[...]

        # -- stage 3: shortcut + add + relu ------------------------------------
        if has_proj:
            if stride == 1:
                xs = xpad_ref[pl.ds(1, ho), pl.ds(1, wo), :]
            else:
                xs = xpad_ref[pl.ds(1, ho, stride=stride),
                              pl.ds(1, wo, stride=stride), :]
            sc = jnp.dot(xs.reshape(ho * wo, cin), wsc_ref[...],
                         preferred_element_type=jnp.float32) + bsc_ref[...]
        else:
            # identity shortcut (stride == 1 and cin == planes): no matmul.
            sc = xpad_ref[pl.ds(1, ho), pl.ds(1, wo), :].reshape(
                ho * wo, planes).astype(jnp.float32)

        y = jnp.maximum(y + sc, 0.0)
        o_ref[...] = y.reshape(ho, wo, planes).astype(o_ref.dtype)

    return kernel


# ------------------------------- parameters ---------------------------------

def _bn_params(key, c):
    k1, k2, k3, k4 = jax.random.split(key, 4)
    return {
        "gamma": 1.0 + 0.1 * jax.random.normal(k1, (c,), jnp.float32),
        "beta": 0.1 * jax.random.normal(k2, (c,), jnp.float32),
        "mean": 0.05 * jax.random.normal(k3, (c,), jnp.float32),
        "var": 0.5 + jnp.abs(jax.random.normal(k4, (c,), jnp.float32)),
    }


def init_params(key, in_planes, planes, stride=1):
    ks = jax.random.split(key, 6)
    params = {
        "w1": 0.1 * jax.random.normal(ks[0], (3, 3, in_planes, planes), jnp.float32),
        "bn1": _bn_params(ks[1], planes),
        "w2": 0.1 * jax.random.normal(ks[2], (3, 3, planes, planes), jnp.float32),
        "bn2": _bn_params(ks[3], planes),
    }
    if stride != 1 or in_planes != EXPANSION * planes:
        params["wsc"] = 0.1 * jax.random.normal(
            ks[4], (in_planes, EXPANSION * planes), jnp.float32)
        params["bnsc"] = _bn_params(ks[5], EXPANSION * planes)
    return params


def _fold_bn_into_weight(w_hwio, bn):
    # Inference-mode BN folded into the conv: W' = W * s (out-channel axis is
    # last in both HWIO and (Cin, Cout) layouts), bias b = beta - mean * s.
    s = bn["gamma"] / jnp.sqrt(bn["var"] + BN_EPS)
    wf = w_hwio * s
    b = (bn["beta"] - bn["mean"] * s).reshape(1, -1).astype(jnp.float32)
    return wf, b


# -------------------------------- forward -----------------------------------

def basic_block_forward(x, params, stride=1, compute_dtype=jnp.float32):
    """x: (N, Cin, H, W) NCHW.  Returns (N, planes, Ho, Wo) NCHW."""
    n, cin, h, w = x.shape
    planes = params["w1"].shape[-1]
    ho = (h - 1) // stride + 1
    wo = (w - 1) // stride + 1
    has_proj = "wsc" in params

    xf = jnp.transpose(x, (0, 2, 3, 1)).astype(compute_dtype)  # NHWC

    w1f, b1 = _fold_bn_into_weight(params["w1"], params["bn1"])
    w2f, b2 = _fold_bn_into_weight(params["w2"], params["bn2"])

    inputs = [xf, w1f.astype(compute_dtype), b1, w2f.astype(compute_dtype), b2]
    in_specs = [
        pl.BlockSpec((None, h, w, cin), lambda i: (i, 0, 0, 0)),
        pl.BlockSpec((3, 3, cin, planes), lambda i: (0, 0, 0, 0)),
        pl.BlockSpec((1, planes), lambda i: (0, 0)),
        pl.BlockSpec((3, 3, planes, planes), lambda i: (0, 0, 0, 0)),
        pl.BlockSpec((1, planes), lambda i: (0, 0)),
    ]
    if has_proj:
        wscf, bsc = _fold_bn_into_weight(params["wsc"], params["bnsc"])
        inputs += [wscf.astype(compute_dtype), bsc]
        in_specs += [pl.BlockSpec((cin, planes), lambda i: (0, 0)),
                     pl.BlockSpec((1, planes), lambda i: (0, 0))]

    kernel = _make_fused_kernel(stride, has_proj, h, w, cin, planes, ho, wo)

    out = pl.pallas_call(
        kernel,
        out_shape=jax.ShapeDtypeStruct((n, ho, wo, planes), compute_dtype),
        grid=(n,),
        in_specs=in_specs,
        out_specs=pl.BlockSpec((None, ho, wo, planes), lambda i: (i, 0, 0, 0)),
        scratch_shapes=[
            pltpu.VMEM((h + 2, w + 2, cin), compute_dtype),      # padded input
            pltpu.VMEM((ho + 2, wo + 2, planes), compute_dtype), # padded mid act
        ],
        compiler_params=pltpu.CompilerParams(
            dimension_semantics=("parallel",),
            vmem_limit_bytes=32 * 1024 * 1024,
        ),
    )(*inputs)

    return jnp.transpose(out, (0, 3, 1, 2))  # back to NCHW


# --------------------------- pure-JAX reference ------------------------------

def _reference_forward(x, params, stride=1):
    xf = jnp.transpose(x, (0, 2, 3, 1)).astype(jnp.float32)

    def bn(y, p):
        s = p["gamma"] / jnp.sqrt(p["var"] + BN_EPS)
        return (y - p["mean"]) * s + p["beta"]

    o = lax.conv_general_dilated(xf, params["w1"], (stride, stride),
                                 [(1, 1), (1, 1)],
                                 dimension_numbers=("NHWC", "HWIO", "NHWC"))
    o = jax.nn.relu(bn(o, params["bn1"]))
    o = lax.conv_general_dilated(o, params["w2"], (1, 1), [(1, 1), (1, 1)],
                                 dimension_numbers=("NHWC", "HWIO", "NHWC"))
    o = bn(o, params["bn2"])
    xs = xf[:, ::stride, ::stride, :]
    if "wsc" in params:
        sc = bn(jnp.einsum("nhwc,cp->nhwp", xs, params["wsc"]), params["bnsc"])
    else:
        sc = xs
    y = jax.nn.relu(o + sc)
    return jnp.transpose(y, (0, 3, 1, 2))


# ---------------------------------- main -------------------------------------

if __name__ == "__main__":
    key = jax.random.PRNGKey(0)
    kx, kp1, kp2 = jax.random.split(key, 3)

    N, C, H, W = 2, 16, 16, 16
    x = jax.random.normal(kx, (N, C, H, W), jnp.float32)

    # Config A: stride 1, identity shortcut, bf16 storage / f32 accumulation.
    planes_a = 16
    params_a = init_params(kp1, C, planes_a, stride=1)
    y_a = basic_block_forward(x, params_a, stride=1, compute_dtype=jnp.bfloat16)
    y_a = jax.block_until_ready(y_a)
    y_a_ref = _reference_forward(x, params_a, stride=1)
    assert y_a.shape == y_a_ref.shape == (N, planes_a, H, W)
    assert jnp.allclose(y_a.astype(jnp.float32), y_a_ref, atol=1.5e-1, rtol=1.5e-1)

    # Config B: stride 2, 1x1-conv + BN projection shortcut, float32.
    planes_b = 32
    params_b = init_params(kp2, C, planes_b, stride=2)
    y_b = basic_block_forward(x, params_b, stride=2, compute_dtype=jnp.float32)
    y_b = jax.block_until_ready(y_b)
    y_b_ref = _reference_forward(x, params_b, stride=2)
    assert y_b.shape == y_b_ref.shape == (N, planes_b, H // 2, W // 2)
    assert jnp.allclose(y_b, y_b_ref, atol=5e-2, rtol=5e-2)

    print("KERNEL_OK")
</pallas_src>

<mosaic_0001>
module attributes {stable_mosaic.version = 11 : i64} {
  func.func @kernel(%arg0: i32, %arg1: memref<1x16x16x16xbf16, #tpu.memory_space<vmem>>, %arg2: memref<3x3x16x16xbf16, #tpu.memory_space<vmem>>, %arg3: memref<1x16xf32, #tpu.memory_space<vmem>>, %arg4: memref<3x3x16x16xbf16, #tpu.memory_space<vmem>>, %arg5: memref<1x16xf32, #tpu.memory_space<vmem>>, %arg6: memref<1x16x16x16xbf16, #tpu.memory_space<vmem>>, %arg7: memref<18x18x16xbf16, #tpu.memory_space<vmem>>, %arg8: memref<18x18x16xbf16, #tpu.memory_space<vmem>>) attributes {dimension_semantics = [#tpu.dimension_semantics<parallel>], iteration_bounds = array<i64: 2>, scalar_prefetch = 0 : i64, scratch_operands = 2 : i64, tpu.core_type = #tpu.core_type<tc>, window_params = [{transform_indices = @transform_0, window_bounds = array<i64: 1, 16, 16, 16>}, {pipeline_mode = #tpu.pipeline_mode<synchronous>, transform_indices = @transform_1, window_bounds = array<i64: 3, 3, 16, 16>}, {pipeline_mode = #tpu.pipeline_mode<synchronous>, transform_indices = @transform_2, window_bounds = array<i64: 1, 16>}, {pipeline_mode = #tpu.pipeline_mode<synchronous>, transform_indices = @transform_3, window_bounds = array<i64: 3, 3, 16, 16>}, {pipeline_mode = #tpu.pipeline_mode<synchronous>, transform_indices = @transform_4, window_bounds = array<i64: 1, 16>}, {transform_indices = @transform_5, window_bounds = array<i64: 1, 16, 16, 16>}]} {
    %cst = arith.constant 0.000000e+00 : bf16
    %0 = vector.broadcast %cst : bf16 to vector<18x18x16xbf16>
    %c0 = arith.constant 0 : index
    %c0_0 = arith.constant 0 : index
    %c0_1 = arith.constant 0 : index
    %1 = vector.load %arg7[%c0, %c0_0, %c0_1] : memref<18x18x16xbf16, #tpu.memory_space<vmem>>, vector<18x18x16xbf16>
    tpu.vector_store %arg7[%c0, %c0_0, %c0_1], %0 {strides = array<i32>} : memref<18x18x16xbf16, #tpu.memory_space<vmem>>, vector<18x18x16xbf16>,
    %c0_2 = arith.constant 0 : index
    %c0_3 = arith.constant 0 : index
    %c0_4 = arith.constant 0 : index
    %c0_5 = arith.constant 0 : index
    %2 = vector.load %arg1[%c0_2, %c0_3, %c0_4, %c0_5] : memref<1x16x16x16xbf16, #tpu.memory_space<vmem>>, vector<1x16x16x16xbf16>
    %3 = vector.shape_cast %2 : vector<1x16x16x16xbf16> to vector<16x16x16xbf16>
    %c1 = arith.constant 1 : index
    %c1_6 = arith.constant 1 : index
    %c0_7 = arith.constant 0 : index
    %4 = vector.load %arg7[%c1, %c1_6, %c0_7] : memref<18x18x16xbf16, #tpu.memory_space<vmem>>, vector<16x16x16xbf16>
    tpu.vector_store %arg7[%c1, %c1_6, %c0_7], %3 {strides = array<i32>} : memref<18x18x16xbf16, #tpu.memory_space<vmem>>, vector<16x16x16xbf16>,
    %cst_8 = arith.constant 0.000000e+00 : bf16
    %5 = vector.broadcast %cst_8 : bf16 to vector<18x18x16xbf16>
    %c0_9 = arith.constant 0 : index
    %c0_10 = arith.constant 0 : index
    %c0_11 = arith.constant 0 : index
    %6 = vector.load %arg8[%c0_9, %c0_10, %c0_11] : memref<18x18x16xbf16, #tpu.memory_space<vmem>>, vector<18x18x16xbf16>
    tpu.vector_store %arg8[%c0_9, %c0_10, %c0_11], %5 {strides = array<i32>} : memref<18x18x16xbf16, #tpu.memory_space<vmem>>, vector<18x18x16xbf16>,
    %cst_12 = arith.constant 0.000000e+00 : f32
    %7 = vector.broadcast %cst_12 : f32 to vector<256x16xf32>
    %c0_13 = arith.constant 0 : index
    %c0_14 = arith.constant 0 : index
    %c0_15 = arith.constant 0 : index
    %8 = vector.load %arg7[%c0_13, %c0_14, %c0_15] : memref<18x18x16xbf16, #tpu.memory_space<vmem>>, vector<16x16x16xbf16>
    %9 = vector.shape_cast %8 : vector<16x16x16xbf16> to vector<256x16xbf16>
    %c0_16 = arith.constant 0 : index
    %c0_17 = arith.constant 0 : index
    %c0_18 = arith.constant 0 : index
    %c0_19 = arith.constant 0 : index
    %10 = vector.load %arg2[%c0_16, %c0_17, %c0_18, %c0_19] : memref<3x3x16x16xbf16, #tpu.memory_space<vmem>>, vector<1x1x16x16xbf16>
    %11 = vector.shape_cast %10 : vector<1x1x16x16xbf16> to vector<16x16xbf16>
    %cst_20 = arith.constant dense<0.000000e+00> : vector<256x16xf32>
    %12 = tpu.matmul %9, %11, %cst_20 {dimension_numbers = #tpu.dot_dimension_numbers<[1], [0], [0], [1], [0, 0, 1, 1], [], []>} : vector<256x16xbf16>, vector<16x16xbf16>, vector<256x16xf32> -> vector<256x16xf32>
    %13 = arith.addf %7, %12 : vector<256x16xf32>
    %c0_21 = arith.constant 0 : index
    %c1_22 = arith.constant 1 : index
    %c0_23 = arith.constant 0 : index
    %14 = vector.load %arg7[%c0_21, %c1_22, %c0_23] : memref<18x18x16xbf16, #tpu.memory_space<vmem>>, vector<16x16x16xbf16>
    %15 = vector.shape_cast %14 : vector<16x16x16xbf16> to vector<256x16xbf16>
    %c0_24 = arith.constant 0 : index
    %c1_25 = arith.constant 1 : index
    %c0_26 = arith.constant 0 : index
    %c0_27 = arith.constant 0 : index
    %16 = vector.load %arg2[%c0_24, %c1_25, %c0_26, %c0_27] : memref<3x3x16x16xbf16, #tpu.memory_space<vmem>>, vector<1x1x16x16xbf16>
    %17 = vector.shape_cast %16 : vector<1x1x16x16xbf16> to vector<16x16xbf16>
    %cst_28 = arith.constant dense<0.000000e+00> : vector<256x16xf32>
    %18 = tpu.matmul %15, %17, %cst_28 {dimension_numbers = #tpu.dot_dimension_numbers<[1], [0], [0], [1], [0, 0, 1, 1], [], []>} : vector<256x16xbf16>, vector<16x16xbf16>, vector<256x16xf32> -> vector<256x16xf32>
    %19 = arith.addf %13, %18 : vector<256x16xf32>
    %c0_29 = arith.constant 0 : index
    %c2 = arith.constant 2 : index
    %c0_30 = arith.constant 0 : index
    %20 = vector.load %arg7[%c0_29, %c2, %c0_30] : memref<18x18x16xbf16, #tpu.memory_space<vmem>>, vector<16x16x16xbf16>
    %21 = vector.shape_cast %20 : vector<16x16x16xbf16> to vector<256x16xbf16>
    %c0_31 = arith.constant 0 : index
    %c2_32 = arith.constant 2 : index
    %c0_33 = arith.constant 0 : index
    %c0_34 = arith.constant 0 : index
    %22 = vector.load %arg2[%c0_31, %c2_32, %c0_33, %c0_34] : memref<3x3x16x16xbf16, #tpu.memory_space<vmem>>, vector<1x1x16x16xbf16>
    %23 = vector.shape_cast %22 : vector<1x1x16x16xbf16> to vector<16x16xbf16>
    %cst_35 = arith.constant dense<0.000000e+00> : vector<256x16xf32>
    %24 = tpu.matmul %21, %23, %cst_35 {dimension_numbers = #tpu.dot_dimension_numbers<[1], [0], [0], [1], [0, 0, 1, 1], [], []>} : vector<256x16xbf16>, vector<16x16xbf16>, vector<256x16xf32> -> vector<256x16xf32>
    %25 = arith.addf %19, %24 : vector<256x16xf32>
    %c1_36 = arith.constant 1 : index
    %c0_37 = arith.constant 0 : index
    %c0_38 = arith.constant 0 : index
    %26 = vector.load %arg7[%c1_36, %c0_37, %c0_38] : memref<18x18x16xbf16, #tpu.memory_space<vmem>>, vector<16x16x16xbf16>
    %27 = vector.shape_cast %26 : vector<16x16x16xbf16> to vector<256x16xbf16>
    %c1_39 = arith.constant 1 : index
    %c0_40 = arith.constant 0 : index
    %c0_41 = arith.constant 0 : index
    %c0_42 = arith.constant 0 : index
    %28 = vector.load %arg2[%c1_39, %c0_40, %c0_41, %c0_42] : memref<3x3x16x16xbf16, #tpu.memory_space<vmem>>, vector<1x1x16x16xbf16>
    %29 = vector.shape_cast %28 : vector<1x1x16x16xbf16> to vector<16x16xbf16>
    %cst_43 = arith.constant dense<0.000000e+00> : vector<256x16xf32>
    %30 = tpu.matmul %27, %29, %cst_43 {dimension_numbers = #tpu.dot_dimension_numbers<[1], [0], [0], [1], [0, 0, 1, 1], [], []>} : vector<256x16xbf16>, vector<16x16xbf16>, vector<256x16xf32> -> vector<256x16xf32>
    %31 = arith.addf %25, %30 : vector<256x16xf32>
    %c1_44 = arith.constant 1 : index
    %c1_45 = arith.constant 1 : index
    %c0_46 = arith.constant 0 : index
    %32 = vector.load %arg7[%c1_44, %c1_45, %c0_46] : memref<18x18x16xbf16, #tpu.memory_space<vmem>>, vector<16x16x16xbf16>
    %33 = vector.shape_cast %32 : vector<16x16x16xbf16> to vector<256x16xbf16>
    %c1_47 = arith.constant 1 : index
    %c1_48 = arith.constant 1 : index
    %c0_49 = arith.constant 0 : index
    %c0_50 = arith.constant 0 : index
    %34 = vector.load %arg2[%c1_47, %c1_48, %c0_49, %c0_50] : memref<3x3x16x16xbf16, #tpu.memory_space<vmem>>, vector<1x1x16x16xbf16>
    %35 = vector.shape_cast %34 : vector<1x1x16x16xbf16> to vector<16x16xbf16>
    %cst_51 = arith.constant dense<0.000000e+00> : vector<256x16xf32>
    %36 = tpu.matmul %33, %35, %cst_51 {dimension_numbers = #tpu.dot_dimension_numbers<[1], [0], [0], [1], [0, 0, 1, 1], [], []>} : vector<256x16xbf16>, vector<16x16xbf16>, vector<256x16xf32> -> vector<256x16xf32>
    %37 = arith.addf %31, %36 : vector<256x16xf32>
    %c1_52 = arith.constant 1 : index
    %c2_53 = arith.constant 2 : index
    %c0_54 = arith.constant 0 : index
    %38 = vector.load %arg7[%c1_52, %c2_53, %c0_54] : memref<18x18x16xbf16, #tpu.memory_space<vmem>>, vector<16x16x16xbf16>
    %39 = vector.shape_cast %38 : vector<16x16x16xbf16> to vector<256x16xbf16>
    %c1_55 = arith.constant 1 : index
    %c2_56 = arith.constant 2 : index
    %c0_57 = arith.constant 0 : index
    %c0_58 = arith.constant 0 : index
    %40 = vector.load %arg2[%c1_55, %c2_56, %c0_57, %c0_58] : memref<3x3x16x16xbf16, #tpu.memory_space<vmem>>, vector<1x1x16x16xbf16>
    %41 = vector.shape_cast %40 : vector<1x1x16x16xbf16> to vector<16x16xbf16>
    %cst_59 = arith.constant dense<0.000000e+00> : vector<256x16xf32>
    %42 = tpu.matmul %39, %41, %cst_59 {dimension_numbers = #tpu.dot_dimension_numbers<[1], [0], [0], [1], [0, 0, 1, 1], [], []>} : vector<256x16xbf16>, vector<16x16xbf16>, vector<256x16xf32> -> vector<256x16xf32>
    %43 = arith.addf %37, %42 : vector<256x16xf32>
    %c2_60 = arith.constant 2 : index
    %c0_61 = arith.constant 0 : index
    %c0_62 = arith.constant 0 : index
    %44 = vector.load %arg7[%c2_60, %c0_61, %c0_62] : memref<18x18x16xbf16, #tpu.memory_space<vmem>>, vector<16x16x16xbf16>
    %45 = vector.shape_cast %44 : vector<16x16x16xbf16> to vector<256x16xbf16>
    %c2_63 = arith.constant 2 : index
    %c0_64 = arith.constant 0 : index
    %c0_65 = arith.constant 0 : index
    %c0_66 = arith.constant 0 : index
    %46 = vector.load %arg2[%c2_63, %c0_64, %c0_65, %c0_66] : memref<3x3x16x16xbf16, #tpu.memory_space<vmem>>, vector<1x1x16x16xbf16>
    %47 = vector.shape_cast %46 : vector<1x1x16x16xbf16> to vector<16x16xbf16>
    %cst_67 = arith.constant dense<0.000000e+00> : vector<256x16xf32>
    %48 = tpu.matmul %45, %47, %cst_67 {dimension_numbers = #tpu.dot_dimension_numbers<[1], [0], [0], [1], [0, 0, 1, 1], [], []>} : vector<256x16xbf16>, vector<16x16xbf16>, vector<256x16xf32> -> vector<256x16xf32>
    %49 = arith.addf %43, %48 : vector<256x16xf32>
    %c2_68 = arith.constant 2 : index
    %c1_69 = arith.constant 1 : index
    %c0_70 = arith.constant 0 : index
    %50 = vector.load %arg7[%c2_68, %c1_69, %c0_70] : memref<18x18x16xbf16, #tpu.memory_space<vmem>>, vector<16x16x16xbf16>
    %51 = vector.shape_cast %50 : vector<16x16x16xbf16> to vector<256x16xbf16>
    %c2_71 = arith.constant 2 : index
    %c1_72 = arith.constant 1 : index
    %c0_73 = arith.constant 0 : index
    %c0_74 = arith.constant 0 : index
    %52 = vector.load %arg2[%c2_71, %c1_72, %c0_73, %c0_74] : memref<3x3x16x16xbf16, #tpu.memory_space<vmem>>, vector<1x1x16x16xbf16>
    %53 = vector.shape_cast %52 : vector<1x1x16x16xbf16> to vector<16x16xbf16>
    %cst_75 = arith.constant dense<0.000000e+00> : vector<256x16xf32>
    %54 = tpu.matmul %51, %53, %cst_75 {dimension_numbers = #tpu.dot_dimension_numbers<[1], [0], [0], [1], [0, 0, 1, 1], [], []>} : vector<256x16xbf16>, vector<16x16xbf16>, vector<256x16xf32> -> vector<256x16xf32>
    %55 = arith.addf %49, %54 : vector<256x16xf32>
    %c2_76 = arith.constant 2 : index
    %c2_77 = arith.constant 2 : index
    %c0_78 = arith.constant 0 : index
    %56 = vector.load %arg7[%c2_76, %c2_77, %c0_78] : memref<18x18x16xbf16, #tpu.memory_space<vmem>>, vector<16x16x16xbf16>
    %57 = vector.shape_cast %56 : vector<16x16x16xbf16> to vector<256x16xbf16>
    %c2_79 = arith.constant 2 : index
    %c2_80 = arith.constant 2 : index
    %c0_81 = arith.constant 0 : index
    %c0_82 = arith.constant 0 : index
    %58 = vector.load %arg2[%c2_79, %c2_80, %c0_81, %c0_82] : memref<3x3x16x16xbf16, #tpu.memory_space<vmem>>, vector<1x1x16x16xbf16>
    %59 = vector.shape_cast %58 : vector<1x1x16x16xbf16> to vector<16x16xbf16>
    %cst_83 = arith.constant dense<0.000000e+00> : vector<256x16xf32>
    %60 = tpu.matmul %57, %59, %cst_83 {dimension_numbers = #tpu.dot_dimension_numbers<[1], [0], [0], [1], [0, 0, 1, 1], [], []>} : vector<256x16xbf16>, vector<16x16xbf16>, vector<256x16xf32> -> vector<256x16xf32>
    %61 = arith.addf %55, %60 : vector<256x16xf32>
    %c0_84 = arith.constant 0 : index
    %c0_85 = arith.constant 0 : index
    %62 = vector.load %arg3[%c0_84, %c0_85] : memref<1x16xf32, #tpu.memory_space<vmem>>, vector<1x16xf32>
    %63 = vector.broadcast %62 : vector<1x16xf32> to vector<256x16xf32>
    %64 = arith.addf %61, %63 : vector<256x16xf32>
    %cst_86 = arith.constant 0.000000e+00 : f32
    %65 = vector.broadcast %cst_86 : f32 to vector<256x16xf32>
    %66 = arith.maximumf %64, %65 : vector<256x16xf32>
    %67 = vector.shape_cast %66 : vector<256x16xf32> to vector<16x16x16xf32>
    %68 = arith.truncf %67 : vector<16x16x16xf32> to vector<16x16x16xbf16>
    %c1_87 = arith.constant 1 : index
    %c1_88 = arith.constant 1 : index
    %c0_89 = arith.constant 0 : index
    %69 = vector.load %arg8[%c1_87, %c1_88, %c0_89] : memref<18x18x16xbf16, #tpu.memory_space<vmem>>, vector<16x16x16xbf16>
    tpu.vector_store %arg8[%c1_87, %c1_88, %c0_89], %68 {strides = array<i32>} : memref<18x18x16xbf16, #tpu.memory_space<vmem>>, vector<16x16x16xbf16>,
    %cst_90 = arith.constant 0.000000e+00 : f32
    %70 = vector.broadcast %cst_90 : f32 to vector<256x16xf32>
    %c0_91 = arith.constant 0 : index
    %c0_92 = arith.constant 0 : index
    %c0_93 = arith.constant 0 : index
    %71 = vector.load %arg8[%c0_91, %c0_92, %c0_93] : memref<18x18x16xbf16, #tpu.memory_space<vmem>>, vector<16x16x16xbf16>
    %72 = vector.shape_cast %71 : vector<16x16x16xbf16> to vector<256x16xbf16>
    %c0_94 = arith.constant 0 : index
    %c0_95 = arith.constant 0 : index
    %c0_96 = arith.constant 0 : index
    %c0_97 = arith.constant 0 : index
    %73 = vector.load %arg4[%c0_94, %c0_95, %c0_96, %c0_97] : memref<3x3x16x16xbf16, #tpu.memory_space<vmem>>, vector<1x1x16x16xbf16>
    %74 = vector.shape_cast %73 : vector<1x1x16x16xbf16> to vector<16x16xbf16>
    %cst_98 = arith.constant dense<0.000000e+00> : vector<256x16xf32>
    %75 = tpu.matmul %72, %74, %cst_98 {dimension_numbers = #tpu.dot_dimension_numbers<[1], [0], [0], [1], [0, 0, 1, 1], [], []>} : vector<256x16xbf16>, vector<16x16xbf16>, vector<256x16xf32> -> vector<256x16xf32>
    %76 = arith.addf %70, %75 : vector<256x16xf32>
    %c0_99 = arith.constant 0 : index
    %c1_100 = arith.constant 1 : index
    %c0_101 = arith.constant 0 : index
    %77 = vector.load %arg8[%c0_99, %c1_100, %c0_101] : memref<18x18x16xbf16, #tpu.memory_space<vmem>>, vector<16x16x16xbf16>
    %78 = vector.shape_cast %77 : vector<16x16x16xbf16> to vector<256x16xbf16>
    %c0_102 = arith.constant 0 : index
    %c1_103 = arith.constant 1 : index
    %c0_104 = arith.constant 0 : index
    %c0_105 = arith.constant 0 : index
    %79 = vector.load %arg4[%c0_102, %c1_103, %c0_104, %c0_105] : memref<3x3x16x16xbf16, #tpu.memory_space<vmem>>, vector<1x1x16x16xbf16>
    %80 = vector.shape_cast %79 : vector<1x1x16x16xbf16> to vector<16x16xbf16>
    %cst_106 = arith.constant dense<0.000000e+00> : vector<256x16xf32>
    %81 = tpu.matmul %78, %80, %cst_106 {dimension_numbers = #tpu.dot_dimension_numbers<[1], [0], [0], [1], [0, 0, 1, 1], [], []>} : vector<256x16xbf16>, vector<16x16xbf16>, vector<256x16xf32> -> vector<256x16xf32>
    %82 = arith.addf %76, %81 : vector<256x16xf32>
    %c0_107 = arith.constant 0 : index
    %c2_108 = arith.constant 2 : index
    %c0_109 = arith.constant 0 : index
    %83 = vector.load %arg8[%c0_107, %c2_108, %c0_109] : memref<18x18x16xbf16, #tpu.memory_space<vmem>>, vector<16x16x16xbf16>
    %84 = vector.shape_cast %83 : vector<16x16x16xbf16> to vector<256x16xbf16>
    %c0_110 = arith.constant 0 : index
    %c2_111 = arith.constant 2 : index
    %c0_112 = arith.constant 0 : index
    %c0_113 = arith.constant 0 : index
    %85 = vector.load %arg4[%c0_110, %c2_111, %c0_112, %c0_113] : memref<3x3x16x16xbf16, #tpu.memory_space<vmem>>, vector<1x1x16x16xbf16>
    %86 = vector.shape_cast %85 : vector<1x1x16x16xbf16> to vector<16x16xbf16>
    %cst_114 = arith.constant dense<0.000000e+00> : vector<256x16xf32>
    %87 = tpu.matmul %84, %86, %cst_114 {dimension_numbers = #tpu.dot_dimension_numbers<[1], [0], [0], [1], [0, 0, 1, 1], [], []>} : vector<256x16xbf16>, vector<16x16xbf16>, vector<256x16xf32> -> vector<256x16xf32>
    %88 = arith.addf %82, %87 : vector<256x16xf32>
    %c1_115 = arith.constant 1 : index
    %c0_116 = arith.constant 0 : index
    %c0_117 = arith.constant 0 : index
    %89 = vector.load %arg8[%c1_115, %c0_116, %c0_117] : memref<18x18x16xbf16, #tpu.memory_space<vmem>>, vector<16x16x16xbf16>
    %90 = vector.shape_cast %89 : vector<16x16x16xbf16> to vector<256x16xbf16>
    %c1_118 = arith.constant 1 : index
    %c0_119 = arith.constant 0 : index
    %c0_120 = arith.constant 0 : index
    %c0_121 = arith.constant 0 : index
    %91 = vector.load %arg4[%c1_118, %c0_119, %c0_120, %c0_121] : memref<3x3x16x16xbf16, #tpu.memory_space<vmem>>, vector<1x1x16x16xbf16>
    %92 = vector.shape_cast %91 : vector<1x1x16x16xbf16> to vector<16x16xbf16>
    %cst_122 = arith.constant dense<0.000000e+00> : vector<256x16xf32>
    %93 = tpu.matmul %90, %92, %cst_122 {dimension_numbers = #tpu.dot_dimension_numbers<[1], [0], [0], [1], [0, 0, 1, 1], [], []>} : vector<256x16xbf16>, vector<16x16xbf16>, vector<256x16xf32> -> vector<256x16xf32>
    %94 = arith.addf %88, %93 : vector<256x16xf32>
    %c1_123 = arith.constant 1 : index
    %c1_124 = arith.constant 1 : index
    %c0_125 = arith.constant 0 : index
    %95 = vector.load %arg8[%c1_123, %c1_124, %c0_125] : memref<18x18x16xbf16, #tpu.memory_space<vmem>>, vector<16x16x16xbf16>
    %96 = vector.shape_cast %95 : vector<16x16x16xbf16> to vector<256x16xbf16>
    %c1_126 = arith.constant 1 : index
    %c1_127 = arith.constant 1 : index
    %c0_128 = arith.constant 0 : index
    %c0_129 = arith.constant 0 : index
    %97 = vector.load %arg4[%c1_126, %c1_127, %c0_128, %c0_129] : memref<3x3x16x16xbf16, #tpu.memory_space<vmem>>, vector<1x1x16x16xbf16>
    %98 = vector.shape_cast %97 : vector<1x1x16x16xbf16> to vector<16x16xbf16>
    %cst_130 = arith.constant dense<0.000000e+00> : vector<256x16xf32>
    %99 = tpu.matmul %96, %98, %cst_130 {dimension_numbers = #tpu.dot_dimension_numbers<[1], [0], [0], [1], [0, 0, 1, 1], [], []>} : vector<256x16xbf16>, vector<16x16xbf16>, vector<256x16xf32> -> vector<256x16xf32>
    %100 = arith.addf %94, %99 : vector<256x16xf32>
    %c1_131 = arith.constant 1 : index
    %c2_132 = arith.constant 2 : index
    %c0_133 = arith.constant 0 : index
    %101 = vector.load %arg8[%c1_131, %c2_132, %c0_133] : memref<18x18x16xbf16, #tpu.memory_space<vmem>>, vector<16x16x16xbf16>
    %102 = vector.shape_cast %101 : vector<16x16x16xbf16> to vector<256x16xbf16>
    %c1_134 = arith.constant 1 : index
    %c2_135 = arith.constant 2 : index
    %c0_136 = arith.constant 0 : index
    %c0_137 = arith.constant 0 : index
    %103 = vector.load %arg4[%c1_134, %c2_135, %c0_136, %c0_137] : memref<3x3x16x16xbf16, #tpu.memory_space<vmem>>, vector<1x1x16x16xbf16>
    %104 = vector.shape_cast %103 : vector<1x1x16x16xbf16> to vector<16x16xbf16>
    %cst_138 = arith.constant dense<0.000000e+00> : vector<256x16xf32>
    %105 = tpu.matmul %102, %104, %cst_138 {dimension_numbers = #tpu.dot_dimension_numbers<[1], [0], [0], [1], [0, 0, 1, 1], [], []>} : vector<256x16xbf16>, vector<16x16xbf16>, vector<256x16xf32> -> vector<256x16xf32>
    %106 = arith.addf %100, %105 : vector<256x16xf32>
    %c2_139 = arith.constant 2 : index
    %c0_140 = arith.constant 0 : index
    %c0_141 = arith.constant 0 : index
    %107 = vector.load %arg8[%c2_139, %c0_140, %c0_141] : memref<18x18x16xbf16, #tpu.memory_space<vmem>>, vector<16x16x16xbf16>
    %108 = vector.shape_cast %107 : vector<16x16x16xbf16> to vector<256x16xbf16>
    %c2_142 = arith.constant 2 : index
    %c0_143 = arith.constant 0 : index
    %c0_144 = arith.constant 0 : index
    %c0_145 = arith.constant 0 : index
    %109 = vector.load %arg4[%c2_142, %c0_143, %c0_144, %c0_145] : memref<3x3x16x16xbf16, #tpu.memory_space<vmem>>, vector<1x1x16x16xbf16>
    %110 = vector.shape_cast %109 : vector<1x1x16x16xbf16> to vector<16x16xbf16>
    %cst_146 = arith.constant dense<0.000000e+00> : vector<256x16xf32>
    %111 = tpu.matmul %108, %110, %cst_146 {dimension_numbers = #tpu.dot_dimension_numbers<[1], [0], [0], [1], [0, 0, 1, 1], [], []>} : vector<256x16xbf16>, vector<16x16xbf16>, vector<256x16xf32> -> vector<256x16xf32>
    %112 = arith.addf %106, %111 : vector<256x16xf32>
    %c2_147 = arith.constant 2 : index
    %c1_148 = arith.constant 1 : index
    %c0_149 = arith.constant 0 : index
    %113 = vector.load %arg8[%c2_147, %c1_148, %c0_149] : memref<18x18x16xbf16, #tpu.memory_space<vmem>>, vector<16x16x16xbf16>
    %114 = vector.shape_cast %113 : vector<16x16x16xbf16> to vector<256x16xbf16>
    %c2_150 = arith.constant 2 : index
    %c1_151 = arith.constant 1 : index
    %c0_152 = arith.constant 0 : index
    %c0_153 = arith.constant 0 : index
    %115 = vector.load %arg4[%c2_150, %c1_151, %c0_152, %c0_153] : memref<3x3x16x16xbf16, #tpu.memory_space<vmem>>, vector<1x1x16x16xbf16>
    %116 = vector.shape_cast %115 : vector<1x1x16x16xbf16> to vector<16x16xbf16>
    %cst_154 = arith.constant dense<0.000000e+00> : vector<256x16xf32>
    %117 = tpu.matmul %114, %116, %cst_154 {dimension_numbers = #tpu.dot_dimension_numbers<[1], [0], [0], [1], [0, 0, 1, 1], [], []>} : vector<256x16xbf16>, vector<16x16xbf16>, vector<256x16xf32> -> vector<256x16xf32>
    %118 = arith.addf %112, %117 : vector<256x16xf32>
    %c2_155 = arith.constant 2 : index
    %c2_156 = arith.constant 2 : index
    %c0_157 = arith.constant 0 : index
    %119 = vector.load %arg8[%c2_155, %c2_156, %c0_157] : memref<18x18x16xbf16, #tpu.memory_space<vmem>>, vector<16x16x16xbf16>
    %120 = vector.shape_cast %119 : vector<16x16x16xbf16> to vector<256x16xbf16>
    %c2_158 = arith.constant 2 : index
    %c2_159 = arith.constant 2 : index
    %c0_160 = arith.constant 0 : index
    %c0_161 = arith.constant 0 : index
    %121 = vector.load %arg4[%c2_158, %c2_159, %c0_160, %c0_161] : memref<3x3x16x16xbf16, #tpu.memory_space<vmem>>, vector<1x1x16x16xbf16>
    %122 = vector.shape_cast %121 : vector<1x1x16x16xbf16> to vector<16x16xbf16>
    %cst_162 = arith.constant dense<0.000000e+00> : vector<256x16xf32>
    %123 = tpu.matmul %120, %122, %cst_162 {dimension_numbers = #tpu.dot_dimension_numbers<[1], [0], [0], [1], [0, 0, 1, 1], [], []>} : vector<256x16xbf16>, vector<16x16xbf16>, vector<256x16xf32> -> vector<256x16xf32>
    %124 = arith.addf %118, %123 : vector<256x16xf32>
    %c0_163 = arith.constant 0 : index
    %c0_164 = arith.constant 0 : index
    %125 = vector.load %arg5[%c0_163, %c0_164] : memref<1x16xf32, #tpu.memory_space<vmem>>, vector<1x16xf32>
    %126 = vector.broadcast %125 : vector<1x16xf32> to vector<256x16xf32>
    %127 = arith.addf %124, %126 : vector<256x16xf32>
    %c1_165 = arith.constant 1 : index
    %c1_166 = arith.constant 1 : index
    %c0_167 = arith.constant 0 : index
    %128 = vector.load %arg7[%c1_165, %c1_166, %c0_167] : memref<18x18x16xbf16, #tpu.memory_space<vmem>>, vector<16x16x16xbf16>
    %129 = vector.shape_cast %128 : vector<16x16x16xbf16> to vector<256x16xbf16>
    %130 = arith.extf %129 : vector<256x16xbf16> to vector<256x16xf32>
    %131 = arith.addf %127, %130 : vector<256x16xf32>
    %cst_168 = arith.constant 0.000000e+00 : f32
    %132 = vector.broadcast %cst_168 : f32 to vector<256x16xf32>
    %133 = arith.maximumf %131, %132 : vector<256x16xf32>
    %134 = vector.shape_cast %133 : vector<256x16xf32> to vector<16x16x16xf32>
    %135 = arith.truncf %134 : vector<16x16x16xf32> to vector<16x16x16xbf16>
    %c0_169 = arith.constant 0 : index
    %c0_170 = arith.constant 0 : index
    %c0_171 = arith.constant 0 : index
    %c0_172 = arith.constant 0 : index
    %136 = vector.load %arg6[%c0_169, %c0_170, %c0_171, %c0_172] : memref<1x16x16x16xbf16, #tpu.memory_space<vmem>>, vector<1x16x16x16xbf16>
    %137 = vector.shape_cast %136 : vector<1x16x16x16xbf16> to vector<16x16x16xbf16>
    %138 = vector.shape_cast %135 : vector<16x16x16xbf16> to vector<1x16x16x16xbf16>
    tpu.vector_store %arg6[%c0_169, %c0_170, %c0_171, %c0_172], %138 {strides = array<i32>} : memref<1x16x16x16xbf16, #tpu.memory_space<vmem>>, vector<1x16x16x16xbf16>,
    return
  }
  func.func @transform_0(%arg0: i32) -> (i32, i32, i32, i32) {
    %c0_i32 = arith.constant 0 : i32
    %c0_i32_0 = arith.constant 0 : i32
    %c0_i32_1 = arith.constant 0 : i32
    %c0_i32_2 = arith.constant 0 : i32
    return %arg0, %c0_i32, %c0_i32_0, %c0_i32_1 : i32, i32, i32, i32
  }
  func.func @transform_1(%arg0: i32) -> (i32, i32, i32, i32) {
    %c0_i32 = arith.constant 0 : i32
    %c0_i32_0 = arith.constant 0 : i32
    %c0_i32_1 = arith.constant 0 : i32
    %c0_i32_2 = arith.constant 0 : i32
    %c0_i32_3 = arith.constant 0 : i32
    return %c0_i32, %c0_i32_0, %c0_i32_1, %c0_i32_2 : i32, i32, i32, i32
  }
  func.func @transform_2(%arg0: i32) -> (i32, i32) {
    %c0_i32 = arith.constant 0 : i32
    %c0_i32_0 = arith.constant 0 : i32
    %c0_i32_1 = arith.constant 0 : i32
    return %c0_i32, %c0_i32_0 : i32, i32
  }
  func.func @transform_3(%arg0: i32) -> (i32, i32, i32, i32) {
    %c0_i32 = arith.constant 0 : i32
    %c0_i32_0 = arith.constant 0 : i32
    %c0_i32_1 = arith.constant 0 : i32
    %c0_i32_2 = arith.constant 0 : i32
    %c0_i32_3 = arith.constant 0 : i32
    return %c0_i32, %c0_i32_0, %c0_i32_1, %c0_i32_2 : i32, i32, i32, i32
  }
  func.func @transform_4(%arg0: i32) -> (i32, i32) {
    %c0_i32 = arith.constant 0 : i32
    %c0_i32_0 = arith.constant 0 : i32
    %c0_i32_1 = arith.constant 0 : i32
    return %c0_i32, %c0_i32_0 : i32, i32
  }
  func.func @transform_5(%arg0: i32) -> (i32, i32, i32, i32) {
    %c0_i32 = arith.constant 0 : i32
    %c0_i32_0 = arith.constant 0 : i32
    %c0_i32_1 = arith.constant 0 : i32
    %c0_i32_2 = arith.constant 0 : i32
    return %arg0, %c0_i32, %c0_i32_0, %c0_i32_1 : i32, i32, i32, i32
  }
}

</mosaic_0001>

<bundles_post_ra>
// kernel: tpu_custom_call.1
= control target key start
LH: loop header
LB: loop body
LE: loop exit
PB: predicated region body
PF: predicated region fallthrough
CT: control target
= control target key end

     0   :  { %10 = vsyncpa [#allocation5], 0  ;;  %s15786_s0 = inlined_call_operand.hbm [shape: bf16[2,16,16,16], index: 0, kind: input, shape index: {}]   ;;  %s15787_s1 = inlined_call_operand.hbm [shape: bf16[3,3,16,16], index: 1, kind: input, shape index: {}]   ;;  %s15788_s2 = inlined_call_operand.vmem [shape: f32[1,16], index: 2, kind: input, shape index: {}]   ;;  %s15789_s3 = inlined_call_operand.hbm [shape: bf16[3,3,16,16], index: 3, kind: input, shape index: {}]   ;;  %s15790_s4 = inlined_call_operand.vmem [shape: f32[1,16], index: 4, kind: input, shape index: {}]   ;;  %s15791_s5 = inlined_call_operand.hbm [shape: bf16[2,16,16,16], index: 5, kind: output, shape index: {}]  }
   0x1   :  { %12 = vsyncpa [#allocation5 + $0x1], 0 }
   0x2   :  { %13 = vsyncpa [#allocation8], 0 }
   0x3   :  { %14 = vsyncpa [#allocation6], 0 }
   0x4   :  { %16 = vsyncpa [#allocation6 + $0x1], 0  ;;  %s11332_s18 = smov 0   ;;  %s11334_s19 = smov 0  }
   0x5   :  { %s11336_s20 = smov 0   ;;  %s11338_s21 = smov 0  }
   0x6 LB: > { %s11353_s22 = sadd.s32 4294967295, %s11293_s21   ;;  %s10046_s23 = sadd.s32 4294967294, %s11293_s21   ;;  %s11293_s21 = sphi %s11338_s21, %s16090_s21   ;;  %s11289_s20 = sphi %s11336_s20, %s16089_s20   ;;  %s11285_s19 = sphi %s11334_s19, %s16088_s19   ;;  %s11281_s18 = sphi %s11332_s18, %s16087_s18  }
   0x7   : > { %p42_p0 = scmp.ne.s32.totalorder %s11285_s19, %s11281_s18  ;;  %p43_p1 = scmp.eq.s32.totalorder %s11353_s22, 0 }
   0x8   : > { %p150_p2 = scmp.eq.s32.totalorder %s11353_s22, 1  ;;  %p156_p3 = scmp.eq.s32.totalorder %s10046_s23, 1 }
   0x9   : > { %p11362_p4 = por %p43_p1, %p42_p0  ;;  %p10047_p5 = scmp.ge.s32.totalorder %s11293_s21, 1 }
   0xa   : > { %p11367_p6 = por %p156_p3, %p42_p0  ;;  %p163_p7 = scmp.lt.s32.totalorder %s11293_s21, 3 }
   0xb   : > { %s174_s28 = sshll.u32 %s15787_s1, 4  ;;  %s11295_s30 = smov [#allocation7]   ;;  %s175_s28 = int_to_ptr.hbm [resolvable:$true] %s174_s28 }
   0xc   : > { %p11375_p8 = pnand %p10047_p5, %p163_p7  ;;  %s176_s6 = sshll.u32 %s11295_s30, 4  ;;  %s177_s6 = int_to_ptr.vmem [resolvable:$true] %s176_s6 }
   0xd   : > { %s191_s9 = sshll.u32 %s15789_s3, 4  ;;  %s15792_s10 = smov 64   ;;  %s192_s9 = int_to_ptr.hbm [resolvable:$true] %s191_s9 }
   0xe   : > { %p11034_p9 = pneg %p11375_p8  ;;  %s11297_s11 = smov 4  }
   0xf   : > { %s11298_s12 = smov [#allocation9]   ;;  %s11394_s14 = sadd.s32 1, %s11293_s21  }
  0x10   : > { %p11035_p10 = pnand %p11034_p9, %p43_p1  ;;  %s193_s13 = sshll.u32 %s11298_s12, 4  ;;  %s194_s13 = int_to_ptr.vmem [resolvable:$true] %s193_s13 }
  0x11   : > { %s29_s15 = sadd.s32 1, %s11289_s20  ;;  %s26_s16 = ssub.s32 %s11293_s21, %s11394_s14 }
  0x12   : > { %11037 = dma.hbm_to_vmem [thread:$0]  (!%p11035_p10), %s175_s28, 1152, %s177_s6, [#allocation8], %s15792_s10, %s15792_s10, %s11297_s11  }
  0x13   : > { %11040 = dma.hbm_to_vmem [thread:$0]  (!%p11035_p10), %s192_s9, 1152, %s194_s13, [#allocation8], %s15792_s10, %s15792_s10, %s11297_s11  }
  0x14   : > { %p36_p12 = scmp.ne.s32.totalorder %s11289_s20, %s11285_s19  ;;  %p27_p13 = scmp.eq.s32.totalorder %s26_s16, 0 }
  0x15   : > { %p37_p0 = scmp.eq.s32.totalorder %s11293_s21, 0  ;;  %p11051_p5 = scmp.lt.s32.totalorder %s11293_s21, 2 }
  0x16   : > { %p11404_p3 = por %p150_p2, %p36_p12  ;;  %s210_s26 = sand.u32 1, %s11289_s20  }
  0x17   : > { %s11410_s23 = scalar_select %p27_p13, %s11289_s20, %s29_s15  }
  0x18   : > { %p38_p7 = por %p37_p0, %p36_p12  ;;  %s10051_s27 = sshll.u32 %s210_s26, 7 }
  0x19   : > { %s10904_s28 = sshll.u32 %s11293_s21, 7  ;;  %s214_s8 = scalar_lea.vmem [#allocation4], %s10051_s27 }
  0x1a   : > { %s219_s7 = scalar_lea.hbm %s15786_s0, %s10904_s28  ;;  %s222_s9 = sshll.u32 %s214_s8, 4  ;;  %s223_s9 = int_to_ptr.vmem [resolvable:$true] %s222_s9 }
  0x1b   : > { %s220_s12 = sshll.u32 %s219_s7, 4  ;;  %p11417_p2 = pnand %p11051_p5, %p38_p7  ;;  %s221_s12 = int_to_ptr.hbm [resolvable:$true] %s220_s12 }
  0x1c   : > { %s211_s15 = scalar_lea.sflag [#allocation5], %s210_s26  ;;  %s11193_s16 = sshra.s32 %s221_s12, 4  ;;  %s11194_s16 = int_to_ptr.hbm [resolvable:$true] %s11193_s16 }
  0x1d   : > { %s11195_s10 = scalar_lea.hbm %s11194_s16, 128  ;;  %p11197_p10 = pneg %p11417_p2 }
  0x1e   : > { %p11196_p9 = scmp.ne.s32.totalorder %s11194_s16, %s11195_s10  ;;  %s11200_s30 = scalar_lea.hbm %s15786_s0, 256 }
  0x1f   : > { %p11201_p0 = scmp.lt.s32.totalorder %s11194_s16, %s15786_s0  ;;  %p11202_p5 = scmp.lt.s32.totalorder %s11200_s30, %s11195_s10 }
  0x20   : > { %p11198_p12 = pnand %p11197_p10, %p11196_p9 }
  0x21   : > { %p11203_p7 = por %p11202_p5, %p11201_p0 }
  0x22   : > { %p11199_p13 = pneg %p11198_p12 }
  0x24   : > { %p11204_p11 = pnand %p11203_p7, %p11199_p13 }
  0x26   : > { %11207 = shalt.err (!%p11204_p11)
}
  0x27   : > { %s15803_s26 = smov 64   ;;  %234 = sbr.rel (%p11375_p8) target bundleno = 1632 (0x660), region = 40 }
  0x28   : > { %11044 = dma.hbm_to_vmem [thread:$0]  (!%p11417_p2), %s221_s12, 2048, %s223_s9, %s211_s15, %s15803_s26, %s15803_s26, %s11297_s11  }
  0x2c   : > { %s11437_s8 = sand.u32 1, %s11285_s19  }
  0x2d   : > { %s10055_s10 = sshll.u32 %s11437_s8, 7  ;;  %s237_s16 = scalar_lea.sflag [#allocation5], %s11437_s8 }
  0x2e   : > { %s11443_s28 = scalar_lea.vmem [#allocation4], %s10055_s10 }
  0x2f   : > { %11268 = dma.done.wait (%p11362_p4), %s237_s16, 2048  }
  0x30   : > { %11270 = vsyncadd (%p11362_p4), %s237_s16, 4294965248 }
  0x31   : > { %11272 = dma.done.wait (%p43_p1), [#allocation8], 2304  }
  0x32   : > { %11274 = vsyncadd (%p43_p1), [#allocation8], 4294964992  ;;  %vm279_vm0 = vcmask 125952   ;;  %vm282_vm1 = vcmask 122880   ;;  %v11299_v0 = vmov 0   ;;  %v10922_v1 = vld [vmem:[#allocation7 + $0x8] sm:$0xff] }
  0x33   : > { %280 = vst.msk [vmem:[#allocation2] sm:$0xf] %vm279_vm0, %v11299_v0  ;;  %vm912_vm2 = vsmask.f32 3328  ;;  %v10921_v2 = vld [vmem:[#allocation7] sm:$0xff]  ;;  %1412 = vmatpush.bf16.msra.mxu0 %v10922_v1  ;;  %11020 = vmatpush.bf16.msra.mxu2 %v10922_v1  ;;  %vm1356_vm5 = vcmask 130048  }
  0x34   : > { %281 = vst.msk [vmem:[#allocation2 + $0x4] sm:$0xf] %vm279_vm0, %v11299_v0  ;;  %vm913_vm3 = vsmask.f32 7440  ;;  %11021 = vmatpush.bf16.msra.mxu3 %v10921_v2  ;;  %1635 = vmatpush.bf16.msra.mxu1 %v10921_v2  ;;  %v349_v26 = vld [vmem:[%s11443_s28 + $0x38] sm:$0xf] }
  0x35   : > { %283 = vst.msk [vmem:[#allocation2 + $0x8] sm:$0x1] %vm282_vm1, %v11299_v0  ;;  %vm11481_vm4 = vmor %vm912_vm2, %vm913_vm3  ;;  %v350_v27 = vld [vmem:[%s11443_s28 + $0x3c] sm:$0xf]  ;;  %v335_v28 = vld [vmem:[%s11443_s28] sm:$0xf] }
  0x36   : > { %284 = vst.msk [vmem:[#allocation2 + $0xc] sm:$0xf] %vm279_vm0, %v11299_v0  ;;  %v490_v29 = vshrl.u32 %v349_v26, 16  ;;  %v498_v30 = vshrl.u32 %v350_v27, 16  ;;  %v11652_v31 = vld [vmem:[%s11443_s28 + $0x4] sm:$0xf] }
  0x37   : > { %285 = vst.msk [vmem:[#allocation2 + $0x10] sm:$0xf] %vm279_vm0, %v11299_v0  ;;  %v371_v32 = vshrl.u32 %v335_v28, 16  ;;  %vm367_vm6 = vsmask.f32 256  ;;  %v379_v35 = vshrl.u32 %v11652_v31, 16 }
  0x38   : > { %286 = vst.msk [vmem:[#allocation2 + $0x14] sm:$0x1] %vm282_vm1, %v11299_v0  ;;  %v11659_v33 = vld [vmem:[%s11443_s28 + $0x40] sm:$0xf]  ;;  %v492_v34 = vrot.slane %v490_v29, 7  ;;  %v500_v37 = vrot.slane %v498_v30, 7  ;;  %vm11719_vm11 = vmand %vm282_vm1, %vm367_vm6 }
  0x39   : > { %287 = vst.msk [vmem:[#allocation2 + $0x18] sm:$0xf] %vm279_vm0, %v11299_v0  ;;  %v11665_v36 = vld [vmem:[%s11443_s28 + $0x44] sm:$0xf]  ;;  %vm368_vm7 = vsmask.f32 4368 }
  0x3a   : > { %v862_v3 = vld [vmem:[#allocation2] sm:$0xf]  ;;  %288 = vst.msk [vmem:[#allocation2 + $0x1c] sm:$0xf] %vm279_vm0, %v11299_v0  ;;  %v501_v38 = vshll.u32 %v350_v27, 16  ;;  %v493_v39 = vshll.u32 %v349_v26, 16  ;;  %vm11691_vm9 = vmor %vm367_vm6, %vm368_vm7 }
  0x3b   : > { %v863_v4 = vld [vmem:[#allocation2 + $0x4] sm:$0xf]  ;;  %v916_v5 = vshrl.u32 %v862_v3, 16  ;;  %v919_v6 = vshll.u32 %v862_v3, 16  ;;  %289 = vst.msk [vmem:[#allocation2 + $0x20] sm:$0x1] %vm282_vm1, %v11299_v0 }
  0x3c   : > { %v896_v7 = vld [vmem:[#allocation2 + $0x8] sm:$0x1]  ;;  %v925_v8 = vshll.u32 %v863_v4, 16  ;;  %v929_v9 = vshrl.u32 %v863_v4, 16  ;;  %290 = vst.msk [vmem:[#allocation2 + $0x24] sm:$0xf] %vm279_vm0, %v11299_v0  ;;  %v503_v48 = vor.u32 %v501_v38, %v500_v37  ;;  %v495_v54 = vor.u32 %v493_v39, %v492_v34 }
  0x3d   : > { %v918_v10 = vrot.slane %v916_v5, 4  ;;  %v921_v11 = vrot.slane %v919_v6, 5  ;;  %v935_v12 = vshll.u32 %v896_v7, 16  ;;  %291 = vst.msk [vmem:[#allocation2 + $0x28] sm:$0xf] %vm279_vm0, %v11299_v0  ;;  %v11671_v40 = vrot.slane %v371_v32, 7 }
  0x3e   : > { %v927_v13 = vrot.slane %v925_v8, 5  ;;  %v931_v14 = vrot.slane %v929_v9, 4  ;;  %292 = vst.msk [vmem:[#allocation2 + $0x2c] sm:$0x1] %vm282_vm1, %v11299_v0  ;;  %v507_v41 = vshrl.u32 %v11659_v33, 16  ;;  %v374_v42 = vshll.u32 %v335_v28, 16 }
  0x3f   : > { %v922_v15 = vor.u32 %v921_v11, %v918_v10  ;;  %293 = vst.msk [vmem:[#allocation2 + $0x30] sm:$0xf] %vm279_vm0, %v11299_v0  ;;  %v937_v18 = vrot.slane %v935_v12, 5  ;;  %vm692_vm8 = vsmask.f32 7938  ;;  %v515_v43 = vshrl.u32 %v11665_v36, 16 }
  0x40   : > { %v932_v17 = vor.u32 %v931_v14, %v927_v13  ;;  %294 = vst.msk [vmem:[#allocation2 + $0x34] sm:$0xf] %vm279_vm0, %v11299_v0  ;;  %v496_v44 = vrot.slane %v492_v34, 4  ;;  %v505_v45 = vrot.slane %v500_v37, 4  ;;  %v10923_v46 = vld [vmem:[#allocation7 + $0x10] sm:$0xff]  ;;  %v11679_v47 = vrot.slane %v379_v35, 7  ;;  %vm11705_vm10 = vmand %vm279_vm0, %vm692_vm8 }
  0x41   : > { %v923_v19 = vrot.slane %v922_v15, 4  ;;  %295 = vst.msk [vmem:[#allocation2 + $0x38] sm:$0x1] %vm282_vm1, %v11299_v0  ;;  %v382_v50 = vshll.u32 %v11652_v31, 16  ;;  %v10905_v51 = vld [vmem:[#allocation2] sm:$0xff]  ;;  %1992 = vmatpush.bf16.msrb.mxu2 %v10923_v46  ;;  %v377_v56 = vrot.slane %v11671_v40, 4  ;;  %v376_v61 = vor.u32 %v374_v42, %v11671_v40 }
  0x42   : > { %v933_v20 = vrot.slane %v932_v17, 4  ;;  %296 = vst.msk [vmem:[#allocation2 + $0x3c] sm:$0xf] %vm279_vm0, %v11299_v0  ;;  %v11685_v52 = vld [vmem:[%s11443_s28 + $0x8] sm:$0xf]  ;;  %v509_v58 = vrot.slane %v507_v41, 7  ;;  %10147 = vmatmul.msk.bf16.vlgmr.msra.gmra.mxu1 %vm1356_vm5, %v10905_v51  ;;  %v504_v7 = vsel %vm11691_vm9, %v496_v44, %v503_v48 }
  0x43   : > { %v928_v21 = vsel %vm11481_vm4, %v923_v19, %v927_v13  ;;  %297 = vst.msk [vmem:[#allocation2 + $0x40] sm:$0xf] %vm279_vm0, %v11299_v0  ;;  %v11696_v57 = vld [vmem:[#allocation2 + $0xc] sm:$0xf]  ;;  %v11699_v59 = vld [vmem:[%s11443_s28 + $0xc] sm:$0xf]  ;;  %v384_v12 = vor.u32 %v382_v50, %v11679_v47 }
  0x44   : > { %v938_v22 = vsel %vm11481_vm4, %v933_v20, %v937_v18  ;;  %v1302_v23 = vunpack.c.l.b16 %v928_v21  ;;  %298 = vst.msk [vmem:[#allocation2 + $0x44] sm:$0x1] %vm282_vm1, %v11299_v0  ;;  %v10940_v62 = vld [vmem:[#allocation7 + $0x18] sm:$0xff]  ;;  %v510_v63 = vshll.u32 %v11659_v33, 16  ;;  %v11712_v1 = vrot.slane %v515_v43, 7  ;;  %v10941_v4 = vld [vmem:[#allocation7 + $0x20] sm:$0xff] }
  0x45   : > { %v1303_v24 = vunpack.c.l.b16 %v938_v22  ;;  %299 = vst.msk [vmem:[#allocation2 + $0x48] sm:$0xf] %vm279_vm0, %v11299_v0  ;;  %v518_v2 = vshll.u32 %v11665_v36, 16  ;;  %v388_v5 = vshrl.u32 %v11685_v52, 16  ;;  %v353_v6 = vld [vmem:[%s11443_s28 + $0x48] sm:$0xf]  ;;  %2282 = vmatpush.bf16.msrb.mxu3 %v10940_v62  ;;  %2940 = vmatpush.bf16.msrb.mxu0 %v10941_v4  ;;  %v695_v19 = vsel %vm11705_vm10, %v376_v61, %v11696_v57 }
  0x46   : > { %300 = vst.msk [vmem:[#allocation2 + $0x4c] sm:$0xf] %vm279_vm0, %v11299_v0  ;;  %v396_v8 = vshrl.u32 %v11699_v59, 16  ;;  %v354_v9 = vld [vmem:[%s11443_s28 + $0x4c] sm:$0xf]  ;;  %v524_v10 = vshrl.u32 %v353_v6, 16  ;;  %v385_v36 = vsel %vm11691_vm9, %v377_v56, %v384_v12 }
  0x47   : > { %v1334_v25 = vpack.c.b16 %v1303_v24, %v1302_v23  ;;  %301 = vst.msk [vmem:[#allocation2 + $0x50] sm:$0x1] %vm282_vm1, %v11299_v0  ;;  %v386_v13 = vrot.slane %v11679_v47, 4  ;;  %v700_v14 = vld [vmem:[#allocation2 + $0x14] sm:$0x1]  ;;  %v532_v15 = vshrl.u32 %v354_v9, 16  ;;  %v512_v23 = vor.u32 %v510_v63, %v509_v58 }
  0x48   : > { %302 = vst.msk [vmem:[#allocation2 + $0x54] sm:$0xf] %vm279_vm0, %v11299_v0  ;;  %v339_v17 = vld [vmem:[%s11443_s28 + $0x10] sm:$0xf]  ;;  %v513_v20 = vrot.slane %v509_v58, 4  ;;  %v520_v24 = vor.u32 %v518_v2, %v11712_v1  ;;  %v391_v26 = vshll.u32 %v11685_v52, 16 }
  0x49   : > { %10063 = vmatmul.msk.bf16.vlgmr.msra.gmra.mxu0 %vm1356_vm5, %v1334_v25  ;;  %303 = vst.msk [vmem:[#allocation2 + $0x58] sm:$0xf] %vm279_vm0, %v11299_v0  ;;  %v405_v22 = vshrl.u32 %v339_v17, 16  ;;  %v390_v25 = vrot.slane %v388_v5, 7  ;;  %v340_v27 = vld [vmem:[%s11443_s28 + $0x14] sm:$0xf]  ;;  %v701_v37 = vsel %vm11719_vm11, %v386_v13, %v700_v14 }
  0x4a   : > { %304 = vst.msk [vmem:[#allocation2 + $0x5c] sm:$0x1] %vm282_vm1, %v11299_v0  ;;  %v398_v28 = vrot.slane %v396_v8, 7  ;;  %v399_v29 = vshll.u32 %v11699_v59, 16  ;;  %v526_v30 = vrot.slane %v524_v10, 7  ;;  %v527_v31 = vshll.u32 %v353_v6, 16 }
  0x4b   : > { %305 = vst.msk [vmem:[#allocation2 + $0x60] sm:$0xf] %vm279_vm0, %v11299_v0  ;;  %v534_v32 = vrot.slane %v532_v15, 7  ;;  %v535_v33 = vshll.u32 %v354_v9, 16  ;;  %v11753_v34 = vrot.slane %v405_v22, 7  ;;  %v408_v35 = vshll.u32 %v339_v17, 16 }
  0x4c   : > { %306 = vst.msk [vmem:[#allocation2 + $0x64] sm:$0xf] %vm279_vm0, %v11299_v0  ;;  %v413_v38 = vshrl.u32 %v340_v27, 16  ;;  %v521_v39 = vsel %vm11691_vm9, %v513_v20, %v520_v24  ;;  %v522_v40 = vrot.slane %v11712_v1, 4  ;;  %v11767_v43 = vor.u32 %v391_v26, %v390_v25  ;;  %v707_v47 = vld [vmem:[#allocation2 + $0x20] sm:$0x1] }
  0x4d   : > { %307 = vst.msk [vmem:[#allocation2 + $0x68] sm:$0x1] %vm282_vm1, %v11299_v0  ;;  %v394_v44 = vrot.slane %v390_v25, 4  ;;  %v403_v46 = vrot.slane %v398_v28, 4  ;;  %v11769_v48 = vor.u32 %v527_v31, %v526_v30  ;;  %v537_v50 = vor.u32 %v535_v33, %v534_v32  ;;  %v11779_v57 = vld [vmem:[#allocation2 + $0x24] sm:$0xf] }
  0x4e   : > { %308 = vst.msk [vmem:[#allocation2 + $0x6c] sm:$0xf] %vm279_vm0, %v11299_v0  ;;  %v11775_v52 = vor.u32 %v408_v35, %v11753_v34  ;;  %v11777_v56 = vrot.slane %v413_v38, 7  ;;  %v411_v4 = vrot.slane %v11753_v34, 4  ;;  %vm1765_vm12 = vcmask 1042432   ;;  %s15414_s30 = scalar_lea.vmem [#allocation10], %s10055_s10 }
  0x4f   : > { %309 = vst.msk [vmem:[#allocation2 + $0x70] sm:$0xf] %vm279_vm0, %v11299_v0  ;;  %v708_v1 = vsel %vm11719_vm11, %v403_v46, %v707_v47  ;;  %vm1766_vm13 = vcmask 1046532   ;;  %s11019_s26 = sshll.u32 %s11353_s22, 7  ;;  %s9951_s24 = sshll.u32 %s15414_s30, 4  ;;  %s9952_s24 = int_to_ptr.vmem [resolvable:$true] %s9951_s24 }
  0x50   : > { %310 = vst.msk [vmem:[#allocation2 + $0x74] sm:$0x1] %vm282_vm1, %v11299_v0  ;;  %v711_v10 = vsel %vm11705_vm10, %v11775_v52, %v11779_v57  ;;  %vm12057_vm14 = vmor %vm1765_vm12, %vm1766_vm13  ;;  %s9939_s22 = scalar_lea.sflag [#allocation6], %s11437_s8  ;;  %s11243_s15 = scalar_lea.hbm %s15791_s5, 256 }
  0x51   : > { %311 = vst.msk [vmem:[#allocation2 + $0x78] sm:$0xf] %vm279_vm0, %v11299_v0 }
  0x52   : > { %312 = vst.msk [vmem:[#allocation2 + $0x7c] sm:$0xf] %vm279_vm0, %v11299_v0  ;;  %v745_v49 = vld [vmem:[#allocation2 + $0x60] sm:$0xf] }
  0x53   : > { %313 = vst.msk [vmem:[#allocation2 + $0x80] sm:$0x1] %vm282_vm1, %v11299_v0  ;;  %v746_v11 = vsel %vm11705_vm10, %v495_v54, %v745_v49  ;;  %v530_v49 = vrot.slane %v526_v30, 4  ;;  %v416_v54 = vshll.u32 %v340_v27, 16 }
  0x54   : > { %314 = vst.msk [vmem:[#allocation2 + $0x84] sm:$0xf] %vm279_vm0, %v11299_v0  ;;  %v749_v55 = vld [vmem:[#allocation2 + $0x68] sm:$0x1] }
  0x55   : > { %315 = vst.msk [vmem:[#allocation2 + $0x88] sm:$0xf] %vm279_vm0, %v11299_v0  ;;  %v750_v18 = vsel %vm11719_vm11, %v505_v45, %v749_v55  ;;  %v752_v21 = vld [vmem:[#allocation2 + $0x6c] sm:$0xf]  ;;  %v401_v45 = vor.u32 %v399_v29, %v398_v28  ;;  %v539_v55 = vrot.slane %v534_v32, 4  ;;  %v11799_v9 = vsel %vm11691_vm9, %v530_v49, %v537_v50 }
  0x56   : > { %316 = vst.msk [vmem:[#allocation2 + $0x8c] sm:$0x1] %vm282_vm1, %v11299_v0  ;;  %v753_v41 = vsel %vm11705_vm10, %v512_v23, %v752_v21  ;;  %v418_v15 = vor.u32 %v416_v54, %v11777_v56  ;;  %v420_v21 = vrot.slane %v11777_v56, 4 }
  0x57   : > { %317 = vst.msk [vmem:[#allocation2 + $0x90] sm:$0xf] %vm279_vm0, %v11299_v0  ;;  %v756_v42 = vld [vmem:[#allocation2 + $0x74] sm:$0x1]  ;;  %v402_v63 = vsel %vm11691_vm9, %v394_v44, %v401_v45 }
  0x58   : > { %318 = vst.msk [vmem:[#allocation2 + $0x94] sm:$0xf] %vm279_vm0, %v11299_v0  ;;  %v11772_v51 = vld [vmem:[#allocation2 + $0x78] sm:$0xf]  ;;  %v757_v58 = vsel %vm11719_vm11, %v522_v40, %v756_v42  ;;  %v419_v42 = vsel %vm11691_vm9, %v411_v4, %v418_v15 }
  0x59   : > { %319 = vst.msk [vmem:[#allocation2 + $0x98] sm:$0x1] %vm282_vm1, %v11299_v0  ;;  %v760_v2 = vsel %vm11705_vm10, %v11769_v48, %v11772_v51 }
  0x5a   : > { %320 = vst.msk [vmem:[#allocation2 + $0x9c] sm:$0xf] %vm279_vm0, %v11299_v0  ;;  %v763_v61 = vld [vmem:[#allocation2 + $0x80] sm:$0x1] }
  0x5b   : > { %321 = vst.msk [vmem:[#allocation2 + $0xa0] sm:$0xf] %vm279_vm0, %v11299_v0  ;;  %v764_v14 = vsel %vm11719_vm11, %v539_v55, %v763_v61 }
  0x5c   : > { %322 = vst.msk [vmem:[#allocation2 + $0xa4] sm:$0x1] %vm282_vm1, %v11299_v0 }
  0x5d   : > { %323 = vst.msk [vmem:[#allocation2 + $0xa8] sm:$0xf] %vm279_vm0, %v11299_v0 }
  0x5e   : > { %324 = vst.msk [vmem:[#allocation2 + $0xac] sm:$0xf] %vm279_vm0, %v11299_v0 }
  0x5f   : > { %325 = vst.msk [vmem:[#allocation2 + $0xb0] sm:$0x1] %vm282_vm1, %v11299_v0 }
  0x60   : > { %326 = vst.msk [vmem:[#allocation2 + $0xb4] sm:$0xf] %vm279_vm0, %v11299_v0 }
  0x61   : > { %327 = vst.msk [vmem:[#allocation2 + $0xb8] sm:$0xf] %vm279_vm0, %v11299_v0 }
  0x62   : > { %328 = vst.msk [vmem:[#allocation2 + $0xbc] sm:$0x1] %vm282_vm1, %v11299_v0 }
  0x63   : > { %329 = vst.msk [vmem:[#allocation2 + $0xc0] sm:$0xf] %vm279_vm0, %v11299_v0 }
  0x64   : > { %330 = vst.msk [vmem:[#allocation2 + $0xc4] sm:$0xf] %vm279_vm0, %v11299_v0 }
  0x65   : > { %331 = vst.msk [vmem:[#allocation2 + $0xc8] sm:$0x1] %vm282_vm1, %v11299_v0 }
  0x66   : > { %332 = vst.msk [vmem:[#allocation2 + $0xcc] sm:$0xf] %vm279_vm0, %v11299_v0 }
  0x67   : > { %333 = vst.msk [vmem:[#allocation2 + $0xd0] sm:$0xf] %vm279_vm0, %v11299_v0 }
  0x68   : > { %334 = vst.msk [vmem:[#allocation2 + $0xd4] sm:$0x1] %vm282_vm1, %v11299_v0 }
  0x69   : > { %808 = vst.msk [vmem:[#allocation3] sm:$0xf] %vm279_vm0, %v11299_v0 }
  0x6a   : > { %809 = vst.msk [vmem:[#allocation3 + $0x4] sm:$0xf] %vm279_vm0, %v11299_v0 }
  0x6b   : > { %810 = vst.msk [vmem:[#allocation3 + $0x8] sm:$0x1] %vm282_vm1, %v11299_v0 }
  0x6c   : > { %811 = vst.msk [vmem:[#allocation3 + $0xc] sm:$0xf] %vm279_vm0, %v11299_v0 }
  0x6d   : > { %812 = vst.msk [vmem:[#allocation3 + $0x10] sm:$0xf] %vm279_vm0, %v11299_v0 }
  0x6e   : > { %813 = vst.msk [vmem:[#allocation3 + $0x14] sm:$0x1] %vm282_vm1, %v11299_v0 }
  0x6f   : > { %814 = vst.msk [vmem:[#allocation3 + $0x18] sm:$0xf] %vm279_vm0, %v11299_v0 }
  0x70   : > { %815 = vst.msk [vmem:[#allocation3 + $0x1c] sm:$0xf] %vm279_vm0, %v11299_v0 }
  0x71   : > { %816 = vst.msk [vmem:[#allocation3 + $0x20] sm:$0x1] %vm282_vm1, %v11299_v0 }
  0x72   : > { %817 = vst.msk [vmem:[#allocation3 + $0x24] sm:$0xf] %vm279_vm0, %v11299_v0 }
  0x73   : > { %818 = vst.msk [vmem:[#allocation3 + $0x28] sm:$0xf] %vm279_vm0, %v11299_v0 }
  0x74   : > { %819 = vst.msk [vmem:[#allocation3 + $0x2c] sm:$0x1] %vm282_vm1, %v11299_v0 }
  0x75   : > { %820 = vst.msk [vmem:[#allocation3 + $0x30] sm:$0xf] %vm279_vm0, %v11299_v0 }
  0x76   : > { %821 = vst.msk [vmem:[#allocation3 + $0x34] sm:$0xf] %vm279_vm0, %v11299_v0 }
  0x77   : > { %822 = vst.msk [vmem:[#allocation3 + $0x38] sm:$0x1] %vm282_vm1, %v11299_v0 }
  0x78   : > { %823 = vst.msk [vmem:[#allocation3 + $0x3c] sm:$0xf] %vm279_vm0, %v11299_v0 }
  0x79   : > { %824 = vst.msk [vmem:[#allocation3 + $0x40] sm:$0xf] %vm279_vm0, %v11299_v0 }
  0x7a   : > { %825 = vst.msk [vmem:[#allocation3 + $0x44] sm:$0x1] %vm282_vm1, %v11299_v0 }
  0x7b   : > { %826 = vst.msk [vmem:[#allocation3 + $0x48] sm:$0xf] %vm279_vm0, %v11299_v0 }
  0x7c   : > { %827 = vst.msk [vmem:[#allocation3 + $0x4c] sm:$0xf] %vm279_vm0, %v11299_v0 }
  0x7d   : > { %828 = vst.msk [vmem:[#allocation3 + $0x50] sm:$0x1] %vm282_vm1, %v11299_v0 }
  0x7e   : > { %829 = vst.msk [vmem:[#allocation3 + $0x54] sm:$0xf] %vm279_vm0, %v11299_v0 }
  0x7f   : > { %830 = vst.msk [vmem:[#allocation3 + $0x58] sm:$0xf] %vm279_vm0, %v11299_v0 }
  0x80   : > { %831 = vst.msk [vmem:[#allocation3 + $0x5c] sm:$0x1] %vm282_vm1, %v11299_v0 }
  0x81   : > { %832 = vst.msk [vmem:[#allocation3 + $0x60] sm:$0xf] %vm279_vm0, %v11299_v0 }
  0x82   : > { %833 = vst.msk [vmem:[#allocation3 + $0x64] sm:$0xf] %vm279_vm0, %v11299_v0 }
  0x83   : > { %834 = vst.msk [vmem:[#allocation3 + $0x68] sm:$0x1] %vm282_vm1, %v11299_v0 }
  0x84   : > { %835 = vst.msk [vmem:[#allocation3 + $0x6c] sm:$0xf] %vm279_vm0, %v11299_v0 }
  0x85   : > { %836 = vst.msk [vmem:[#allocation3 + $0x70] sm:$0xf] %vm279_vm0, %v11299_v0 }
  0x86   : > { %837 = vst.msk [vmem:[#allocation3 + $0x74] sm:$0x1] %vm282_vm1, %v11299_v0 }
  0x87   : > { %838 = vst.msk [vmem:[#allocation3 + $0x78] sm:$0xf] %vm279_vm0, %v11299_v0 }
  0x88   : > { %839 = vst.msk [vmem:[#allocation3 + $0x7c] sm:$0xf] %vm279_vm0, %v11299_v0 }
  0x89   : > { %840 = vst.msk [vmem:[#allocation3 + $0x80] sm:$0x1] %vm282_vm1, %v11299_v0 }
  0x8a   : > { %841 = vst.msk [vmem:[#allocation3 + $0x84] sm:$0xf] %vm279_vm0, %v11299_v0 }
  0x8b   : > { %842 = vst.msk [vmem:[#allocation3 + $0x88] sm:$0xf] %vm279_vm0, %v11299_v0 }
  0x8c   : > { %843 = vst.msk [vmem:[#allocation3 + $0x8c] sm:$0x1] %vm282_vm1, %v11299_v0 }
  0x8d   : > { %844 = vst.msk [vmem:[#allocation3 + $0x90] sm:$0xf] %vm279_vm0, %v11299_v0 }
  0x8e   : > { %845 = vst.msk [vmem:[#allocation3 + $0x94] sm:$0xf] %vm279_vm0, %v11299_v0 }
  0x8f   : > { %846 = vst.msk [vmem:[#allocation3 + $0x98] sm:$0x1] %vm282_vm1, %v11299_v0 }
  0x90   : > { %847 = vst.msk [vmem:[#allocation3 + $0x9c] sm:$0xf] %vm279_vm0, %v11299_v0 }
  0x91   : > { %848 = vst.msk [vmem:[#allocation3 + $0xa0] sm:$0xf] %vm279_vm0, %v11299_v0 }
  0x92   : > { %849 = vst.msk [vmem:[#allocation3 + $0xa4] sm:$0x1] %vm282_vm1, %v11299_v0 }
  0x93   : > { %850 = vst.msk [vmem:[#allocation3 + $0xa8] sm:$0xf] %vm279_vm0, %v11299_v0 }
  0x94   : > { %851 = vst.msk [vmem:[#allocation3 + $0xac] sm:$0xf] %vm279_vm0, %v11299_v0 }
  0x95   : > { %852 = vst.msk [vmem:[#allocation3 + $0xb0] sm:$0x1] %vm282_vm1, %v11299_v0 }
  0x96   : > { %853 = vst.msk [vmem:[#allocation3 + $0xb4] sm:$0xf] %vm279_vm0, %v11299_v0 }
  0x97   : > { %854 = vst.msk [vmem:[#allocation3 + $0xb8] sm:$0xf] %vm279_vm0, %v11299_v0 }
  0x98   : > { %855 = vst.msk [vmem:[#allocation3 + $0xbc] sm:$0x1] %vm282_vm1, %v11299_v0 }
  0x99   : > { %856 = vst.msk [vmem:[#allocation3 + $0xc0] sm:$0xf] %vm279_vm0, %v11299_v0 }
  0x9a   : > { %857 = vst.msk [vmem:[#allocation3 + $0xc4] sm:$0xf] %vm279_vm0, %v11299_v0 }
  0x9b   : > { %858 = vst.msk [vmem:[#allocation3 + $0xc8] sm:$0x1] %vm282_vm1, %v11299_v0 }
  0x9c   : > { %859 = vst.msk [vmem:[#allocation3 + $0xcc] sm:$0xf] %vm279_vm0, %v11299_v0 }
  0x9d   : > { %860 = vst.msk [vmem:[#allocation3 + $0xd0] sm:$0xf] %vm279_vm0, %v11299_v0 }
  0x9e   : > { %861 = vst.msk [vmem:[#allocation3 + $0xd4] sm:$0x1] %vm282_vm1, %v11299_v0  ;;  %v11760_v0 = vld [vmem:[#allocation2 + $0x18] sm:$0xf] }
  0x9f   : > { %747 = vst [vmem:[#allocation2 + $0x60] sm:$0xf] %v746_v11  ;;  %v704_v59 = vsel %vm11705_vm10, %v11767_v43, %v11760_v0  ;;  %v714_v0 = vld [vmem:[#allocation2 + $0x2c] sm:$0x1] }
  0xa0   : > { %748 = vst.msk [vmem:[#allocation2 + $0x64] sm:$0xf] %vm279_vm0, %v504_v7  ;;  %v715_v4 = vsel %vm11719_vm11, %v420_v21, %v714_v0 }
  0xa1   : > { %751 = vst [vmem:[#allocation2 + $0x68] sm:$0x1] %v750_v18 }
  0xa2   : > { %696 = vst [vmem:[#allocation2 + $0xc] sm:$0xf] %v695_v19 }
  0xa3   : > { %697 = vst.msk [vmem:[#allocation2 + $0x10] sm:$0xf] %vm279_vm0, %v385_v36 }
  0xa4   : > { %702 = vst [vmem:[#allocation2 + $0x14] sm:$0x1] %v701_v37 }
  0xa5   : > { %754 = vst [vmem:[#allocation2 + $0x6c] sm:$0xf] %v753_v41 }
  0xa6   : > { %v878_v62 = vld [vmem:[#allocation2 + $0x60] sm:$0xf]  ;;  %755 = vst.msk [vmem:[#allocation2 + $0x70] sm:$0xf] %vm279_vm0, %v521_v39 }
  0xa7   : > { %v10913_v5 = vld [vmem:[#allocation2 + $0x60] sm:$0xff]  ;;  %v1108_v7 = vshrl.u32 %v878_v62, 16  ;;  %v1111_v8 = vshll.u32 %v878_v62, 16  ;;  %758 = vst [vmem:[#allocation2 + $0x74] sm:$0x1] %v757_v58 }
  0xa8   : > { %v879_v6 = vld [vmem:[#allocation2 + $0x64] sm:$0xf]  ;;  %v904_v11 = vld [vmem:[#allocation2 + $0x68] sm:$0x1]  ;;  %10155 = vmatmul.msk.bf16.vlgmr.msra.gmra.mxu3 %vm1356_vm5, %v10913_v5  ;;  %705 = vst [vmem:[#allocation2 + $0x18] sm:$0xf] %v704_v59 }
  0xa9   : > { %v1117_v12 = vshll.u32 %v879_v6, 16  ;;  %v1121_v13 = vshrl.u32 %v879_v6, 16  ;;  %v1110_v17 = vrot.slane %v1108_v7, 4  ;;  %v1113_v18 = vrot.slane %v1111_v8, 5  ;;  %v864_v20 = vld [vmem:[#allocation2 + $0xc] sm:$0xf] }
  0xaa   : > { %v1127_v19 = vshll.u32 %v904_v11, 16  ;;  %v865_v24 = vld [vmem:[#allocation2 + $0x10] sm:$0xf]  ;;  %v940_v25 = vshrl.u32 %v864_v20, 16  ;;  %v943_v26 = vshll.u32 %v864_v20, 16 }
  0xab   : > { %v1119_v22 = vrot.slane %v1117_v12, 5  ;;  %v1123_v23 = vrot.slane %v1121_v13, 4  ;;  %v1114_v27 = vor.u32 %v1113_v18, %v1110_v17  ;;  %v897_v29 = vld [vmem:[#allocation2 + $0x14] sm:$0x1]  ;;  %v949_v30 = vshll.u32 %v865_v24, 16  ;;  %v10906_v32 = vld [vmem:[#allocation2 + $0xc] sm:$0xff] }
  0xac   : > { %v1129_v28 = vrot.slane %v1127_v19, 5  ;;  %v953_v31 = vshrl.u32 %v865_v24, 16  ;;  %v942_v34 = vrot.slane %v940_v25, 4  ;;  %v945_v35 = vrot.slane %v943_v26, 5  ;;  %v880_v37 = vld [vmem:[#allocation2 + $0x6c] sm:$0xf]  ;;  %10148 = vmatmul.msk.bf16.gmra.mxu1 %vm1356_vm5, %v10906_v32 }
  0xad   : > { %v1124_v33 = vor.u32 %v1123_v23, %v1119_v22  ;;  %v959_v36 = vshll.u32 %v897_v29, 16  ;;  %v1115_v38 = vrot.slane %v1114_v27, 4  ;;  %v951_v39 = vrot.slane %v949_v30, 5  ;;  %v881_v41 = vld [vmem:[#allocation2 + $0x70] sm:$0xf] }
  0xae   : > { %v955_v40 = vrot.slane %v953_v31, 4  ;;  %v946_v44 = vor.u32 %v945_v35, %v942_v34  ;;  %v1132_v46 = vshrl.u32 %v880_v37, 16  ;;  %v905_v49 = vld [vmem:[#allocation2 + $0x74] sm:$0x1]  ;;  %v1135_v50 = vshll.u32 %v880_v37, 16  ;;  %v10914_v15 = vld [vmem:[#allocation2 + $0x6c] sm:$0xff] }
  0xaf   : > { %v1125_v43 = vrot.slane %v1124_v33, 4  ;;  %v961_v45 = vrot.slane %v959_v36, 5  ;;  %v1120_v47 = vsel %vm11481_vm4, %v1115_v38, %v1119_v22  ;;  %v1141_v51 = vshll.u32 %v881_v41, 16  ;;  %706 = vst.msk [vmem:[#allocation2 + $0x1c] sm:$0xf] %vm279_vm0, %v402_v63 }
  0xb0   : > { %v956_v48 = vor.u32 %v955_v40, %v951_v39  ;;  %v1318_v55 = vunpack.c.l.b16 %v1120_v47  ;;  %v947_v56 = vrot.slane %v946_v44, 4  ;;  %v1134_v58 = vrot.slane %v1132_v46, 4  ;;  %709 = vst [vmem:[#allocation2 + $0x20] sm:$0x1] %v708_v1  ;;  %v11821_v5 = vld [vmem:[%s11443_s28 + $0x50] sm:$0xf] }
  0xb1   : > { %v1130_v54 = vsel %vm11481_vm4, %v1125_v43, %v1129_v28  ;;  %v1137_v59 = vrot.slane %v1135_v50, 5  ;;  %761 = vst [vmem:[#allocation2 + $0x78] sm:$0xf] %v760_v2  ;;  %v1143_v63 = vrot.slane %v1141_v51, 5  ;;  %v1145_v7 = vshrl.u32 %v881_v41, 16 }
  0xb2   : > { %v1319_v61 = vunpack.c.l.b16 %v1130_v54  ;;  %v957_v62 = vrot.slane %v956_v48, 4  ;;  %v952_v6 = vsel %vm11481_vm4, %v947_v56, %v951_v39  ;;  %v1151_v8 = vshll.u32 %v905_v49, 16  ;;  %762 = vst.msk [vmem:[#allocation2 + $0x7c] sm:$0xf] %vm279_vm0, %v11799_v9  ;;  %v866_v20 = vld [vmem:[#allocation2 + $0x18] sm:$0xf] }
  0xb3   : > { %v1304_v12 = vunpack.c.l.b16 %v952_v6  ;;  %v1138_v2 = vor.u32 %v1137_v59, %v1134_v58  ;;  %765 = vst [vmem:[#allocation2 + $0x80] sm:$0x1] %v764_v14  ;;  %v1147_v17 = vrot.slane %v1145_v7, 4  ;;  %v541_v18 = vshrl.u32 %v11821_v5, 16 }
  0xb4   : > { %v1342_v11 = vpack.c.b16 %v1319_v61, %v1318_v55  ;;  %v962_v1 = vsel %vm11481_vm4, %v957_v62, %v961_v45  ;;  %712 = vst [vmem:[#allocation2 + $0x24] sm:$0xf] %v711_v10  ;;  %v1153_v19 = vrot.slane %v1151_v8, 5  ;;  %v964_v23 = vshrl.u32 %v866_v20, 16 }
  0xb5   : > { %v1305_v13 = vunpack.c.l.b16 %v962_v1  ;;  %v1139_v9 = vrot.slane %v1138_v2, 4  ;;  %713 = vst.msk [vmem:[#allocation2 + $0x28] sm:$0xf] %vm279_vm0, %v419_v42  ;;  %v1148_v14 = vor.u32 %v1147_v17, %v1143_v63  ;;  %v967_v24 = vshll.u32 %v866_v20, 16 }
  0xb6   : > { %10071 = vmatmul.msk.bf16.vlgmr.msra.gmra.mxu2 %vm1356_vm5, %v1342_v11  ;;  %v867_v22 = vld [vmem:[#allocation2 + $0x1c] sm:$0xf]  ;;  %716 = vst [vmem:[#allocation2 + $0x2c] sm:$0x1] %v715_v4  ;;  %v544_v26 = vshll.u32 %v11821_v5, 16  ;;  %v966_v28 = vrot.slane %v964_v23, 4 }
  0xb7   : > { %v1335_v21 = vpack.c.b16 %v1305_v13, %v1304_v12  ;;  %v1144_v25 = vsel %vm11481_vm4, %v1139_v9, %v1143_v63  ;;  %v898_v52 = vld [vmem:[#allocation2 + $0x20] sm:$0x1]  ;;  %v973_v57 = vshll.u32 %v867_v22, 16  ;;  %v977_v10 = vshrl.u32 %v867_v22, 16  ;;  %v10907_v37 = vld [vmem:[#allocation2 + $0x18] sm:$0xff] }
  0xb8   : > { %v1149_v27 = vrot.slane %v1148_v14, 4  ;;  %v969_v29 = vrot.slane %v967_v24, 5  ;;  %v882_v30 = vld [vmem:[#allocation2 + $0x78] sm:$0xf]  ;;  %v11841_v31 = vrot.slane %v541_v18, 7  ;;  %10156 = vmatmul.msk.bf16.gmra.mxu3 %vm1356_vm5, %v10914_v15  ;;  %v1320_v32 = vunpack.c.l.b16 %v1144_v25 }
  0xb9   : > { %10064 = vmatmul.msk.bf16.gmra.mxu0 %vm1356_vm5, %v1335_v21  ;;  %v975_v33 = vrot.slane %v973_v57, 5  ;;  %v979_v34 = vrot.slane %v977_v10, 4  ;;  %v983_v35 = vshll.u32 %v898_v52, 16  ;;  %v883_v36 = vld [vmem:[#allocation2 + $0x7c] sm:$0xf]  ;;  %v1156_v40 = vshrl.u32 %v882_v30, 16 }
  0xba   : > { %v1154_v0 = vsel %vm11481_vm4, %v1149_v27, %v1153_v19  ;;  %v970_v38 = vor.u32 %v969_v29, %v966_v28  ;;  %v906_v39 = vld [vmem:[#allocation2 + $0x80] sm:$0x1]  ;;  %v1159_v41 = vshll.u32 %v882_v30, 16  ;;  %v1165_v45 = vshll.u32 %v883_v36, 16  ;;  %v356_v9 = vld [vmem:[%s11443_s28 + $0x54] sm:$0xf] }
  0xbb   : > { %v1321_v42 = vunpack.c.l.b16 %v1154_v0  ;;  %v980_v43 = vor.u32 %v979_v34, %v975_v33  ;;  %v985_v44 = vrot.slane %v983_v35, 5  ;;  %v1158_v47 = vrot.slane %v1156_v40, 4  ;;  %v868_v50 = vld [vmem:[#allocation2 + $0x24] sm:$0xf]  ;;  %v341_v25 = vld [vmem:[%s11443_s28 + $0x18] sm:$0xf] }
  0xbc   : > { %v971_v46 = vrot.slane %v970_v38, 4  ;;  %v1161_v48 = vrot.slane %v1159_v41, 5  ;;  %v1169_v49 = vshrl.u32 %v883_v36, 16  ;;  %v1167_v54 = vrot.slane %v1165_v45, 5  ;;  %10149 = vmatmul.msk.bf16.gmra.mxu1 %vm1356_vm5, %v10907_v37  ;;  %v869_v4 = vld [vmem:[#allocation2 + $0x28] sm:$0xf] }
  0xbd   : > { %v981_v51 = vrot.slane %v980_v43, 4  ;;  %v1175_v55 = vshll.u32 %v906_v39, 16  ;;  %v546_v56 = vor.u32 %v544_v26, %v11841_v31  ;;  %v1343_v58 = vpack.c.b16 %v1321_v42, %v1320_v32  ;;  %v899_v5 = vld [vmem:[#allocation2 + $0x2c] sm:$0x1]  ;;  %v766_v21 = vld [vmem:[#allocation2 + $0x84] sm:$0xf] }
  0xbe   : > { %v976_v61 = vsel %vm11481_vm4, %v971_v46, %v975_v33  ;;  %v1162_v62 = vor.u32 %v1161_v48, %v1158_v47  ;;  %v1171_v59 = vrot.slane %v1169_v49, 4  ;;  %v988_v8 = vshrl.u32 %v868_v50, 16  ;;  %v342_v27 = vld [vmem:[%s11443_s28 + $0x1c] sm:$0xf]  ;;  %v10915_v28 = vld [vmem:[#allocation2 + $0x78] sm:$0xff]  ;;  %v10908_v49 = vld [vmem:[#allocation2 + $0x24] sm:$0xff] }
  0xbf   : > { %v986_v6 = vsel %vm11481_vm4, %v981_v51, %v985_v44  ;;  %v1306_v63 = vunpack.c.l.b16 %v976_v61  ;;  %v1177_v7 = vrot.slane %v1175_v55, 5  ;;  %v991_v2 = vshll.u32 %v868_v50, 16  ;;  %v357_v34 = vld [vmem:[%s11443_s28 + $0x58] sm:$0xf]  ;;  %v770_v39 = vld [vmem:[#allocation2 + $0x8c] sm:$0x1] }
  0xc0   : > { %v1307_v11 = vunpack.c.l.b16 %v986_v6  ;;  %v1163_v1 = vrot.slane %v1162_v62, 4  ;;  %v1172_v12 = vor.u32 %v1171_v59, %v1167_v54  ;;  %v990_v13 = vrot.slane %v988_v8, 4  ;;  %v717_v45 = vld [vmem:[#allocation2 + $0x30] sm:$0xf]  ;;  %v358_v50 = vld [vmem:[%s11443_s28 + $0x5c] sm:$0xf] }
  0xc1   : > { %v997_v15 = vshll.u32 %v869_v4, 16  ;;  %v1001_v17 = vshrl.u32 %v869_v4, 16  ;;  %v1007_v18 = vshll.u32 %v899_v5, 16  ;;  %v993_v20 = vrot.slane %v991_v2, 5  ;;  %v721_v61 = vld [vmem:[#allocation2 + $0x38] sm:$0x1] }
  0xc2   : > { %v1173_v19 = vrot.slane %v1172_v12, 4  ;;  %v1336_v14 = vpack.c.b16 %v1307_v11, %v1306_v63  ;;  %v1168_v22 = vsel %vm11481_vm4, %v1163_v1, %v1167_v54  ;;  %v549_v26 = vshrl.u32 %v356_v9, 16  ;;  %v11883_v62 = vld [vmem:[%s11443_s28 + $0x20] sm:$0xf]  ;;  %v344_v12 = vld [vmem:[%s11443_s28 + $0x24] sm:$0xf] }
  0xc3   : > { %v999_v23 = vrot.slane %v997_v15, 5  ;;  %v1003_v24 = vrot.slane %v1001_v17, 4  ;;  %v994_v57 = vor.u32 %v993_v20, %v990_v13  ;;  %v11858_v10 = vrot.slane %v1007_v18, 5  ;;  %v773_v1 = vld [vmem:[#allocation2 + $0x90] sm:$0xf] }
  0xc4   : > { %v1178_v52 = vsel %vm11481_vm4, %v1173_v19, %v1177_v7  ;;  %v547_v30 = vrot.slane %v11841_v31, 4  ;;  %v552_v32 = vshll.u32 %v356_v9, 16  ;;  %v767_v33 = vsel %vm11705_vm10, %v546_v56, %v766_v21  ;;  %v11897_v9 = vld [vmem:[%s11443_s28 + $0x60] sm:$0xf] }
  0xc5   : > { %v1004_v29 = vor.u32 %v1003_v24, %v999_v23  ;;  %v995_v35 = vrot.slane %v994_v57, 4  ;;  %v551_v36 = vrot.slane %v549_v26, 7  ;;  %768 = vst [vmem:[#allocation2 + $0x84] sm:$0xf] %v767_v33  ;;  %v422_v37 = vshrl.u32 %v341_v25, 16 }
  0xc6   : > { %10072 = vmatmul.msk.bf16.gmra.mxu2 %vm1356_vm5, %v1343_v58  ;;  %v425_v0 = vshll.u32 %v341_v25, 16  ;;  %v430_v40 = vshrl.u32 %v342_v27, 16  ;;  %v433_v41 = vshll.u32 %v342_v27, 16  ;;  %v11867_v42 = vunpack.c.l.b16 %v1168_v22 }
  0xc7   : > { %v1005_v38 = vrot.slane %v1004_v29, 4  ;;  %v554_v31 = vor.u32 %v552_v32, %v551_v36  ;;  %v556_v43 = vrot.slane %v551_v36, 4  ;;  %v424_v44 = vrot.slane %v422_v37, 7  ;;  %v777_v29 = vld [vmem:[#allocation2 + $0x98] sm:$0x1] }
  0xc8   : > { %10157 = vmatmul.msk.bf16.gmra.mxu3 %vm1356_vm5, %v10915_v28  ;;  %v11870_v46 = vunpack.c.l.b16 %v1178_v52  ;;  %v1000_v47 = vsel %vm11481_vm4, %v995_v35, %v999_v23  ;;  %v432_v48 = vrot.slane %v430_v40, 7  ;;  %v558_v51 = vshrl.u32 %v357_v34, 16 }
  0xc9   : > { %10065 = vmatmul.msk.bf16.gmra.mxu0 %vm1356_vm5, %v1336_v14  ;;  %v1010_v54 = vsel %vm11481_vm4, %v1005_v38, %v11858_v10  ;;  %v555_v55 = vsel %vm11691_vm9, %v547_v30, %v554_v31  ;;  %v771_v56 = vsel %vm11719_vm11, %v556_v43, %v770_v39  ;;  %v427_v58 = vor.u32 %v425_v0, %v424_v44 }
  0xca   : > { %769 = vst.msk [vmem:[#allocation2 + $0x88] sm:$0xf] %vm279_vm0, %v555_v55  ;;  %v428_v59 = vrot.slane %v424_v44, 4  ;;  %v435_v4 = vor.u32 %v433_v41, %v432_v48  ;;  %v437_v5 = vrot.slane %v432_v48, 4  ;;  %v560_v6 = vrot.slane %v558_v51, 7 }
  0xcb   : > { %v11886_v63 = vunpack.c.l.b16 %v1000_v47  ;;  %772 = vst [vmem:[#allocation2 + $0x8c] sm:$0x1] %v771_v56  ;;  %v718_v7 = vsel %vm11705_vm10, %v427_v58, %v717_v45  ;;  %v561_v8 = vshll.u32 %v357_v34, 16  ;;  %v566_v11 = vshrl.u32 %v358_v50, 16 }
  0xcc   : > { %v884_v2 = vld [vmem:[#allocation2 + $0x84] sm:$0xf]  ;;  %v436_v13 = vsel %vm11691_vm9, %v428_v59, %v435_v4  ;;  %719 = vst [vmem:[#allocation2 + $0x30] sm:$0xf] %v718_v7  ;;  %v722_v15 = vsel %vm11719_vm11, %v437_v5, %v721_v61  ;;  %10150 = vmatmul.msk.bf16.gmra.mxu1 %vm1356_vm5, %v10908_v49  ;;  %v564_v17 = vrot.slane %v560_v6, 4  ;;  %v569_v18 = vshll.u32 %v358_v50, 16 }
  0xcd   : > { %v1180_v19 = vshrl.u32 %v884_v2, 16  ;;  %v1183_v20 = vshll.u32 %v884_v2, 16  ;;  %720 = vst.msk [vmem:[#allocation2 + $0x34] sm:$0xf] %vm279_vm0, %v436_v13  ;;  %v563_v21 = vor.u32 %v561_v8, %v560_v6  ;;  %v568_v14 = vrot.slane %v566_v11, 7 }
  0xce   : > { %v1309_v22 = vunpack.c.l.b16 %v1010_v54  ;;  %723 = vst [vmem:[#allocation2 + $0x38] sm:$0x1] %v722_v15  ;;  %v439_v23 = vshrl.u32 %v11883_v62, 16  ;;  %v447_v24 = vshrl.u32 %v344_v12, 16  ;;  %v450_v25 = vshll.u32 %v344_v12, 16 }
  0xcf   : > { %v1182_v52 = vrot.slane %v1180_v19, 4  ;;  %v1185_v57 = vrot.slane %v1183_v20, 5  ;;  %v571_v10 = vor.u32 %v569_v18, %v568_v14  ;;  %v573_v26 = vrot.slane %v568_v14, 4  ;;  %v724_v11 = vld [vmem:[#allocation2 + $0x3c] sm:$0xf] }
  0xd0   : > { %v1344_v27 = vpack.c.b16 %v11870_v46, %v11867_v42  ;;  %v774_v28 = vsel %vm11705_vm10, %v563_v21, %v773_v1  ;;  %v441_v30 = vrot.slane %v439_v23, 7  ;;  %v11905_v32 = vrot.slane %v447_v24, 7 }
  0xd1   : > { %v885_v33 = vld [vmem:[#allocation2 + $0x88] sm:$0xf]  ;;  %v1186_v34 = vor.u32 %v1185_v57, %v1182_v52  ;;  %v572_v35 = vsel %vm11691_vm9, %v564_v17, %v571_v10  ;;  %775 = vst [vmem:[#allocation2 + $0x90] sm:$0xf] %v774_v28  ;;  %v442_v36 = vshll.u32 %v11883_v62, 16  ;;  %v575_v37 = vshrl.u32 %v11897_v9, 16 }
  0xd2   : > { %v1337_v0 = vpack.c.b16 %v1309_v22, %v11886_v63  ;;  %v907_v38 = vld [vmem:[#allocation2 + $0x8c] sm:$0x1]  ;;  %v1189_v39 = vshll.u32 %v885_v33, 16  ;;  %v1193_v40 = vshrl.u32 %v885_v33, 16  ;;  %776 = vst.msk [vmem:[#allocation2 + $0x94] sm:$0xf] %vm279_vm0, %v572_v35  ;;  %v452_v41 = vor.u32 %v450_v25, %v11905_v32 }
  0xd3   : > { %v10916_v42 = vld [vmem:[#allocation2 + $0x84] sm:$0xff]  ;;  %v1187_v31 = vrot.slane %v1186_v34, 4  ;;  %v1199_v43 = vshll.u32 %v907_v38, 16  ;;  %v870_v44 = vld [vmem:[#allocation2 + $0x30] sm:$0xf]  ;;  %v778_v45 = vsel %vm11719_vm11, %v573_v26, %v777_v29  ;;  %v445_v46 = vrot.slane %v441_v30, 4 }
  0xd4   : > { %v1191_v47 = vrot.slane %v1189_v39, 5  ;;  %v1195_v48 = vrot.slane %v1193_v40, 4  ;;  %v871_v49 = vld [vmem:[#allocation2 + $0x34] sm:$0xf]  ;;  %v1012_v50 = vshrl.u32 %v870_v44, 16  ;;  %v1015_v51 = vshll.u32 %v870_v44, 16 }
  0xd5   : > { %v1201_v54 = vrot.slane %v1199_v43, 5  ;;  %v900_v55 = vld [vmem:[#allocation2 + $0x38] sm:$0x1]  ;;  %v1021_v56 = vshll.u32 %v871_v49, 16  ;;  %v1025_v58 = vshrl.u32 %v871_v49, 16  ;;  %v453_v61 = vsel %vm11691_vm9, %v445_v46, %v452_v41  ;;  %v10909_v17 = vld [vmem:[#allocation2 + $0x30] sm:$0xff] }
  0xd6   : > { %10073 = vmatmul.msk.bf16.gmra.mxu2 %vm1356_vm5, %v1344_v27  ;;  %v1192_v62 = vsel %vm11481_vm4, %v1187_v31, %v1191_v47  ;;  %v1196_v59 = vor.u32 %v1195_v48, %v1191_v47  ;;  %v1014_v4 = vrot.slane %v1012_v50, 4  ;;  %v1017_v5 = vrot.slane %v1015_v51, 5  ;;  %779 = vst [vmem:[#allocation2 + $0x98] sm:$0x1] %v778_v45  ;;  %v780_v46 = vld [vmem:[#allocation2 + $0x9c] sm:$0xf] }
  0xd7   : > { %v1023_v6 = vrot.slane %v1021_v56, 5  ;;  %v1027_v63 = vrot.slane %v1025_v58, 4  ;;  %v1031_v7 = vshll.u32 %v900_v55, 16  ;;  %v444_v8 = vor.u32 %v442_v36, %v441_v30  ;;  %727 = vst.msk [vmem:[#allocation2 + $0x40] sm:$0xf] %vm279_vm0, %v453_v61 }
  0xd8   : > { %10158 = vmatmul.msk.bf16.gmra.mxu3 %vm1356_vm5, %v10916_v42  ;;  %v1197_v1 = vrot.slane %v1196_v59, 4  ;;  %v1324_v12 = vunpack.c.l.b16 %v1192_v62  ;;  %v1018_v2 = vor.u32 %v1017_v5, %v1014_v4  ;;  %v886_v13 = vld [vmem:[#allocation2 + $0x90] sm:$0xf]  ;;  %v454_v15 = vrot.slane %v11905_v32, 4  ;;  %v728_v32 = vld [vmem:[#allocation2 + $0x44] sm:$0x1] }
  0xd9   : > { %10066 = vmatmul.msk.bf16.gmra.mxu0 %vm1356_vm5, %v1337_v0  ;;  %v1028_v18 = vor.u32 %v1027_v63, %v1023_v6  ;;  %v1033_v19 = vrot.slane %v1031_v7, 5  ;;  %v887_v20 = vld [vmem:[#allocation2 + $0x94] sm:$0xf]  ;;  %v1204_v21 = vshrl.u32 %v886_v13, 16  ;;  %v1207_v14 = vshll.u32 %v886_v13, 16 }
  0xda   : > { %v1202_v22 = vsel %vm11481_vm4, %v1197_v1, %v1201_v54  ;;  %v1019_v23 = vrot.slane %v1018_v2, 4  ;;  %v1213_v24 = vshll.u32 %v887_v20, 16  ;;  %v1217_v25 = vshrl.u32 %v887_v20, 16  ;;  %v360_v42 = vld [vmem:[%s11443_s28 + $0x64] sm:$0xf] }
  0xdb   : > { %v1325_v52 = vunpack.c.l.b16 %v1202_v22  ;;  %v1029_v57 = vrot.slane %v1028_v18, 4  ;;  %v1206_v10 = vrot.slane %v1204_v21, 4  ;;  %v1209_v26 = vrot.slane %v1207_v14, 5  ;;  %v345_v47 = vld [vmem:[%s11443_s28 + $0x28] sm:$0xf]  ;;  %v10917_v5 = vld [vmem:[#allocation2 + $0x90] sm:$0xff] }
  0xdc   : > { %v1024_v27 = vsel %vm11481_vm4, %v1019_v23, %v1023_v6  ;;  %v1215_v28 = vrot.slane %v1213_v24, 5  ;;  %v1219_v29 = vrot.slane %v1217_v25, 4  ;;  %v725_v30 = vsel %vm11705_vm10, %v444_v8, %v724_v11  ;;  %10151 = vmatmul.msk.bf16.gmra.mxu1 %vm1356_vm5, %v10909_v17  ;;  %v346_v61 = vld [vmem:[%s11443_s28 + $0x2c] sm:$0xf]  ;;  %v784_v7 = vld [vmem:[#allocation2 + $0xa4] sm:$0x1] }
  0xdd   : > { %v1034_v33 = vsel %vm11481_vm4, %v1029_v57, %v1033_v19  ;;  %v908_v34 = vld [vmem:[#allocation2 + $0x98] sm:$0x1]  ;;  %v1210_v35 = vor.u32 %v1209_v26, %v1206_v10  ;;  %726 = vst [vmem:[#allocation2 + $0x3c] sm:$0xf] %v725_v30  ;;  %v578_v36 = vshll.u32 %v11897_v9, 16  ;;  %v1310_v0 = vunpack.c.l.b16 %v1024_v27 }
  0xde   : > { %v1311_v38 = vunpack.c.l.b16 %v1034_v33  ;;  %v1220_v39 = vor.u32 %v1219_v29, %v1215_v28  ;;  %v1223_v40 = vshll.u32 %v908_v34, 16  ;;  %v873_v41 = vld [vmem:[#allocation2 + $0x40] sm:$0xf]  ;;  %v729_v43 = vsel %vm11719_vm11, %v454_v15, %v728_v32  ;;  %v361_v13 = vld [vmem:[%s11443_s28 + $0x68] sm:$0xf] }
  0xdf   : > { %v1211_v31 = vrot.slane %v1210_v35, 4  ;;  %v1045_v44 = vshll.u32 %v873_v41, 16  ;;  %v1049_v45 = vshrl.u32 %v873_v41, 16  ;;  %v1345_v48 = vpack.c.b16 %v1325_v52, %v1324_v12  ;;  %730 = vst [vmem:[#allocation2 + $0x44] sm:$0x1] %v729_v43 }
  0xe0   : > { %v1221_v49 = vrot.slane %v1220_v39, 4  ;;  %v1225_v50 = vrot.slane %v1223_v40, 5  ;;  %v577_v51 = vrot.slane %v575_v37, 7  ;;  %v583_v58 = vshrl.u32 %v360_v42, 16  ;;  %v731_v23 = vld [vmem:[#allocation2 + $0x48] sm:$0xf] }
  0xe1   : > { %v1216_v54 = vsel %vm11481_vm4, %v1211_v31, %v1215_v28  ;;  %v11943_v55 = vrot.slane %v1045_v44, 5  ;;  %v1051_v56 = vrot.slane %v1049_v45, 4  ;;  %v1338_v62 = vpack.c.b16 %v1311_v38, %v1310_v0  ;;  %v362_v32 = vld [vmem:[%s11443_s28 + $0x6c] sm:$0xf]  ;;  %v735_v0 = vld [vmem:[#allocation2 + $0x50] sm:$0x1] }
  0xe2   : > { %v1226_v59 = vsel %vm11481_vm4, %v1221_v49, %v1225_v50  ;;  %v580_v4 = vor.u32 %v578_v36, %v577_v51  ;;  %v11948_v6 = vunpack.c.l.b16 %v1216_v54  ;;  %v581_v63 = vrot.slane %v577_v51, 4  ;;  %v787_v45 = vld [vmem:[#allocation2 + $0xa8] sm:$0xf] }
  0xe3   : > { %v585_v9 = vrot.slane %v583_v58, 7  ;;  %v586_v37 = vshll.u32 %v360_v42, 16  ;;  %v1052_v11 = vor.u32 %v1051_v56, %v11943_v55  ;;  %v456_v12 = vshrl.u32 %v345_v47, 16 }
  0xe4   : > { %v872_v8 = vld [vmem:[#allocation2 + $0x3c] sm:$0xf]  ;;  %v781_v1 = vsel %vm11705_vm10, %v580_v4, %v780_v46  ;;  %v464_v2 = vshrl.u32 %v346_v61, 16  ;;  %v11955_v15 = vunpack.c.l.b16 %v1226_v59  ;;  %v459_v19 = vshll.u32 %v345_v47, 16  ;;  %v347_v46 = vld [vmem:[%s11443_s28 + $0x30] sm:$0xf] }
  0xe5   : > { %v1036_v17 = vshrl.u32 %v872_v8, 16  ;;  %v1039_v18 = vshll.u32 %v872_v8, 16  ;;  %782 = vst [vmem:[#allocation2 + $0x9c] sm:$0xf] %v781_v1  ;;  %v588_v20 = vor.u32 %v586_v37, %v585_v9  ;;  %v590_v21 = vrot.slane %v585_v9, 4  ;;  %v10910_v30 = vld [vmem:[#allocation2 + $0x3c] sm:$0xff] }
  0xe6   : > { %10074 = vmatmul.msk.bf16.gmra.mxu2 %vm1356_vm5, %v1345_v48  ;;  %v458_v14 = vrot.slane %v456_v12, 7  ;;  %v466_v22 = vrot.slane %v464_v2, 7  ;;  %v901_v24 = vld [vmem:[#allocation2 + $0x44] sm:$0x1]  ;;  %v467_v57 = vshll.u32 %v346_v61, 16  ;;  %v592_v10 = vshrl.u32 %v361_v13, 16 }
  0xe7   : > { %v1038_v25 = vrot.slane %v1036_v17, 4  ;;  %v1041_v52 = vrot.slane %v1039_v18, 5  ;;  %v1053_v26 = vrot.slane %v1052_v11, 4  ;;  %v1055_v27 = vshll.u32 %v901_v24, 16  ;;  %v348_v37 = vld [vmem:[%s11443_s28 + $0x34] sm:$0xf] }
  0xe8   : > { %10159 = vmatmul.msk.bf16.gmra.mxu3 %vm1356_vm5, %v10917_v5  ;;  %v589_v28 = vsel %vm11691_vm9, %v581_v63, %v588_v20  ;;  %v785_v29 = vsel %vm11719_vm11, %v590_v21, %v784_v7  ;;  %v461_v34 = vor.u32 %v459_v19, %v458_v14  ;;  %v462_v35 = vrot.slane %v458_v14, 4  ;;  %v791_v12 = vld [vmem:[#allocation2 + $0xb0] sm:$0x1] }
  0xe9   : > { %10067 = vmatmul.msk.bf16.gmra.mxu0 %vm1356_vm5, %v1338_v62  ;;  %v1042_v33 = vor.u32 %v1041_v52, %v1038_v25  ;;  %783 = vst.msk [vmem:[#allocation2 + $0xa0] sm:$0xf] %vm279_vm0, %v589_v28  ;;  %v469_v36 = vor.u32 %v467_v57, %v466_v22  ;;  %v1057_v38 = vrot.slane %v1055_v27, 5  ;;  %v471_v39 = vrot.slane %v466_v22, 4 }
  0xea   : > { %786 = vst [vmem:[#allocation2 + $0xa4] sm:$0x1] %v785_v29  ;;  %v594_v40 = vrot.slane %v592_v10, 7  ;;  %v595_v41 = vshll.u32 %v361_v13, 16  ;;  %v732_v43 = vsel %vm11705_vm10, %v461_v34, %v731_v23  ;;  %v600_v44 = vshrl.u32 %v362_v32, 16 }
  0xeb   : > { %v1043_v42 = vrot.slane %v1042_v33, 4  ;;  %v470_v31 = vsel %vm11691_vm9, %v462_v35, %v469_v36  ;;  %v1058_v47 = vsel %vm11481_vm4, %v1053_v26, %v1057_v38  ;;  %733 = vst [vmem:[#allocation2 + $0x48] sm:$0xf] %v732_v43  ;;  %v736_v49 = vsel %vm11719_vm11, %v471_v39, %v735_v0 }
  0xec   : > { %v888_v48 = vld [vmem:[#allocation2 + $0x9c] sm:$0xf]  ;;  %10152 = vmatmul.msk.bf16.gmra.mxu1 %vm1356_vm5, %v10910_v30  ;;  %v597_v50 = vor.u32 %v595_v41, %v594_v40  ;;  %v598_v51 = vrot.slane %v594_v40, 4  ;;  %v1313_v56 = vunpack.c.l.b16 %v1058_v47  ;;  %734 = vst.msk [vmem:[#allocation2 + $0x4c] sm:$0xf] %vm279_vm0, %v470_v31  ;;  %v602_v59 = vrot.slane %v600_v44, 7 }
  0xed   : > { %v1048_v54 = vsel %vm11481_vm4, %v1043_v42, %v11943_v55  ;;  %v1228_v58 = vshrl.u32 %v888_v48, 16  ;;  %v1231_v61 = vshll.u32 %v888_v48, 16  ;;  %737 = vst [vmem:[#allocation2 + $0x50] sm:$0x1] %v736_v49  ;;  %v603_v4 = vshll.u32 %v362_v32, 16 }
  0xee   : > { %v1312_v62 = vunpack.c.l.b16 %v1048_v54  ;;  %v788_v5 = vsel %vm11705_vm10, %v597_v50, %v787_v45  ;;  %v473_v7 = vshrl.u32 %v347_v46, 16  ;;  %v1346_v55 = vpack.c.b16 %v11955_v15, %v11948_v6  ;;  %v363_v54 = vld [vmem:[%s11443_s28 + $0x70] sm:$0xf] }
  0xef   : > { %v1230_v63 = vrot.slane %v1228_v58, 4  ;;  %v1233_v9 = vrot.slane %v1231_v61, 5  ;;  %789 = vst [vmem:[#allocation2 + $0xa8] sm:$0xf] %v788_v5  ;;  %v605_v11 = vor.u32 %v603_v4, %v602_v59  ;;  %v607_v1 = vrot.slane %v602_v59, 4 }
  0xf0   : > { %v889_v8 = vld [vmem:[#allocation2 + $0xa0] sm:$0xf]  ;;  %v476_v19 = vshll.u32 %v347_v46, 16  ;;  %v1339_v20 = vpack.c.b16 %v1313_v56, %v1312_v62  ;;  %v11986_v22 = vrot.slane %v473_v7, 7  ;;  %v481_v28 = vshrl.u32 %v348_v37, 16 }
  0xf1   : > { %v909_v2 = vld [vmem:[#allocation2 + $0xa4] sm:$0x1]  ;;  %v1234_v13 = vor.u32 %v1233_v9, %v1230_v63  ;;  %v1237_v17 = vshll.u32 %v889_v8, 16  ;;  %v1241_v18 = vshrl.u32 %v889_v8, 16  ;;  %v606_v14 = vsel %vm11691_vm9, %v598_v51, %v605_v11  ;;  %v10918_v23 = vld [vmem:[#allocation2 + $0x9c] sm:$0xff] }
  0xf2   : > { %v1247_v21 = vshll.u32 %v909_v2, 16  ;;  %v874_v15 = vld [vmem:[#allocation2 + $0x48] sm:$0xf]  ;;  %v792_v52 = vsel %vm11719_vm11, %v607_v1, %v791_v12  ;;  %790 = vst.msk [vmem:[#allocation2 + $0xac] sm:$0xf] %vm279_vm0, %v606_v14  ;;  %v478_v0 = vor.u32 %v476_v19, %v11986_v22  ;;  %v483_v50 = vrot.slane %v481_v28, 7 }
  0xf3   : > { %v1235_v24 = vrot.slane %v1234_v13, 4  ;;  %v1239_v25 = vrot.slane %v1237_v17, 5  ;;  %v1243_v6 = vrot.slane %v1241_v18, 4  ;;  %v875_v10 = vld [vmem:[#allocation2 + $0x4c] sm:$0xf]  ;;  %v1060_v26 = vshrl.u32 %v874_v15, 16 }
  0xf4   : > { %v1249_v57 = vrot.slane %v1247_v21, 5  ;;  %v1063_v27 = vshll.u32 %v874_v15, 16  ;;  %v902_v30 = vld [vmem:[#allocation2 + $0x50] sm:$0x1]  ;;  %v1069_v32 = vshll.u32 %v875_v10, 16  ;;  %v1073_v33 = vshrl.u32 %v875_v10, 16 }
  0xf5   : > { %v1244_v29 = vor.u32 %v1243_v6, %v1239_v25  ;;  %v1062_v34 = vrot.slane %v1060_v26, 4  ;;  %v1079_v36 = vshll.u32 %v902_v30, 16  ;;  %793 = vst [vmem:[#allocation2 + $0xb0] sm:$0x1] %v792_v52  ;;  %v1240_v38 = vsel %vm11481_vm4, %v1235_v24, %v1239_v25  ;;  %v738_v46 = vld [vmem:[#allocation2 + $0x54] sm:$0xf] }
  0xf6   : > { %10075 = vmatmul.msk.bf16.gmra.mxu2 %vm1356_vm5, %v1346_v55  ;;  %v1065_v35 = vrot.slane %v1063_v27, 5  ;;  %v1071_v40 = vrot.slane %v1069_v32, 5  ;;  %v1075_v41 = vrot.slane %v1073_v33, 4  ;;  %v890_v42 = vld [vmem:[#allocation2 + $0xa8] sm:$0xf]  ;;  %v484_v51 = vshll.u32 %v348_v37, 16 }
  0xf7   : > { %v1245_v39 = vrot.slane %v1244_v29, 4  ;;  %v1081_v43 = vrot.slane %v1079_v36, 5  ;;  %v1252_v44 = vshrl.u32 %v890_v42, 16  ;;  %v1255_v45 = vshll.u32 %v890_v42, 16  ;;  %v10911_v47 = vld [vmem:[#allocation2 + $0x48] sm:$0xff] }
  0xf8   : > { %10160 = vmatmul.msk.bf16.gmra.mxu3 %vm1356_vm5, %v10918_v23  ;;  %v1066_v31 = vor.u32 %v1065_v35, %v1062_v34  ;;  %v1076_v49 = vor.u32 %v1075_v41, %v1071_v40  ;;  %v1328_v56 = vunpack.c.l.b16 %v1240_v38  ;;  %v479_v62 = vrot.slane %v11986_v22, 4  ;;  %v742_v9 = vld [vmem:[#allocation2 + $0x5c] sm:$0x1]  ;;  %v364_v19 = vld [vmem:[%s11443_s28 + $0x74] sm:$0xf] }
  0xf9   : > { %10068 = vmatmul.msk.bf16.gmra.mxu0 %vm1356_vm5, %v1339_v20  ;;  %v1250_v48 = vsel %vm11481_vm4, %v1245_v39, %v1249_v57  ;;  %v1254_v61 = vrot.slane %v1252_v44, 4  ;;  %v486_v4 = vor.u32 %v484_v51, %v483_v50  ;;  %v488_v5 = vrot.slane %v483_v50, 4  ;;  %v891_v8 = vld [vmem:[#allocation2 + $0xac] sm:$0xf]  ;;  %v794_v15 = vld [vmem:[#allocation2 + $0xb4] sm:$0xf] }
  0xfa   : > { %v1067_v58 = vrot.slane %v1066_v31, 4  ;;  %v1077_v59 = vrot.slane %v1076_v49, 4  ;;  %v739_v63 = vsel %vm11705_vm10, %v478_v0, %v738_v46  ;;  %v1329_v7 = vunpack.c.l.b16 %v1250_v48  ;;  %v10919_v33 = vld [vmem:[#allocation2 + $0xa8] sm:$0xff]  ;;  %v798_v38 = vld [vmem:[#allocation2 + $0xbc] sm:$0x1] }
  0xfb   : > { %v1257_v37 = vrot.slane %v1255_v45, 5  ;;  %740 = vst [vmem:[#allocation2 + $0x54] sm:$0xf] %v739_v63  ;;  %v609_v11 = vshrl.u32 %v363_v54, 16  ;;  %v1261_v12 = vshll.u32 %v891_v8, 16  ;;  %v1265_v2 = vshrl.u32 %v891_v8, 16 }
  0xfc   : > { %v1072_v55 = vsel %vm11481_vm4, %v1067_v58, %v1071_v40  ;;  %10153 = vmatmul.msk.bf16.gmra.mxu1 %vm1356_vm5, %v10911_v47  ;;  %v1082_v1 = vsel %vm11481_vm4, %v1077_v59, %v1081_v43  ;;  %v910_v18 = vld [vmem:[#allocation2 + $0xb0] sm:$0x1]  ;;  %v487_v14 = vsel %vm11691_vm9, %v479_v62, %v486_v4  ;;  %v743_v22 = vsel %vm11719_vm11, %v488_v5, %v742_v9  ;;  %v2396_v44 = vld [vmem:[#allocation2 + $0xc] sm:$0xf] }
  0xfd   : > { %v1314_v13 = vunpack.c.l.b16 %v1072_v55  ;;  %v1315_v17 = vunpack.c.l.b16 %v1082_v1  ;;  %v1263_v20 = vrot.slane %v1261_v12, 5  ;;  %v1267_v21 = vrot.slane %v1265_v2, 4  ;;  %741 = vst.msk [vmem:[#allocation2 + $0x58] sm:$0xf] %vm279_vm0, %v487_v14  ;;  %v12022_v49 = vld [vmem:[#allocation2 + $0x10] sm:$0xf] }
  0xfe   : > { %v1347_v23 = vpack.c.b16 %v1329_v7, %v1328_v56  ;;  %v1258_v24 = vor.u32 %v1257_v37, %v1254_v61  ;;  %v611_v25 = vrot.slane %v609_v11, 7  ;;  %v612_v6 = vshll.u32 %v363_v54, 16  ;;  %744 = vst [vmem:[#allocation2 + $0x5c] sm:$0x1] %v743_v22 }
  0xff   : > { %v1268_v52 = vor.u32 %v1267_v21, %v1263_v20  ;;  %v1271_v57 = vshll.u32 %v910_v18, 16  ;;  %v617_v10 = vshrl.u32 %v364_v19, 16  ;;  %v620_v26 = vshll.u32 %v364_v19, 16 }
 0x100   : > { %v614_v27 = vor.u32 %v612_v6, %v611_v25  ;;  %v1340_v28 = vpack.c.b16 %v1315_v17, %v1314_v13  ;;  %v615_v30 = vrot.slane %v611_v25, 4  ;;  %v1259_v34 = vrot.slane %v1258_v24, 4 }
 0x101   : > { %v619_v32 = vrot.slane %v617_v10, 7  ;;  %v1269_v39 = vrot.slane %v1268_v52, 4  ;;  %v1273_v40 = vrot.slane %v1271_v57, 5  ;;  %v2445_v59 = vshrl.u32 %v2396_v44, 16 }
 0x102   : > { %v876_v29 = vld [vmem:[#allocation2 + $0x54] sm:$0xf]  ;;  %v795_v0 = vsel %vm11705_vm10, %v614_v27, %v794_v15  ;;  %v1264_v50 = vsel %vm11481_vm4, %v1259_v34, %v1263_v20  ;;  %v2448_v4 = vshll.u32 %v2396_v44, 16  ;;  %v2454_v7 = vshll.u32 %v12022_v49, 16 }
 0x103   : > { %v1084_v35 = vshrl.u32 %v876_v29, 16  ;;  %v1087_v36 = vshll.u32 %v876_v29, 16  ;;  %v622_v41 = vor.u32 %v620_v26, %v619_v32  ;;  %v624_v42 = vrot.slane %v619_v32, 4  ;;  %796 = vst [vmem:[#allocation2 + $0xb4] sm:$0xf] %v795_v0 }
 0x104   : > { %v877_v45 = vld [vmem:[#allocation2 + $0x58] sm:$0xf]  ;;  %v1274_v61 = vsel %vm11481_vm4, %v1269_v39, %v1273_v40  ;;  %v1330_v55 = vunpack.c.l.b16 %v1264_v50  ;;  %v2458_v8 = vshrl.u32 %v12022_v49, 16  ;;  %v2447_v18 = vrot.slane %v2445_v59, 4  ;;  %v2398_v26 = vld [vmem:[#allocation2 + $0x14] sm:$0x1] }
 0x105   : > { %v1086_v31 = vrot.slane %v1084_v35, 4  ;;  %v1089_v43 = vrot.slane %v1087_v36, 5  ;;  %v623_v46 = vsel %vm11691_vm9, %v615_v30, %v622_v41  ;;  %v799_v47 = vsel %vm11719_vm11, %v624_v42, %v798_v38  ;;  %v10912_v48 = vld [vmem:[#allocation2 + $0x54] sm:$0xff]  ;;  %v903_v51 = vld [vmem:[#allocation2 + $0x5c] sm:$0x1]  ;;  %v1414_v38 = vpop.f32.mrf.mxu0  ;;  %v1637_v41 = vpop.f32.mrf.mxu1  ;;  %v10959_v42 = vld [vmem:[#allocation7 + $0x30] sm:$0xff] }
 0x106   : > { %10076 = vmatmul.msk.bf16.gmra.mxu2 %vm1356_vm5, %v1347_v23  ;;  %v1093_v56 = vshll.u32 %v877_v45, 16  ;;  %v1097_v58 = vshrl.u32 %v877_v45, 16  ;;  %797 = vst.msk [vmem:[#allocation2 + $0xb8] sm:$0xf] %vm279_vm0, %v623_v46  ;;  %v1103_v62 = vshll.u32 %v903_v51, 16  ;;  %v1331_v37 = vunpack.c.l.b16 %v1274_v61  ;;  %v10960_v50 = vld [vmem:[#allocation7 + $0x38] sm:$0xff] }
 0x107   : > { %v1090_v54 = vor.u32 %v1089_v43, %v1086_v31  ;;  %800 = vst [vmem:[#allocation2 + $0xbc] sm:$0x1] %v799_v47  ;;  %v2450_v19 = vrot.slane %v2448_v4, 5  ;;  %v12035_v21 = vrot.slane %v2454_v7, 5  ;;  %v2460_v25 = vrot.slane %v2458_v8, 4  ;;  %3633 = vmatpush.bf16.msra.mxu2 %v10959_v42  ;;  %4291 = vmatpush.bf16.msra.mxu3 %v10960_v50 }
 0x108   : > { %10161 = vmatmul.msk.bf16.gmra.mxu3 %vm1356_vm5, %v10919_v33  ;;  %v1095_v63 = vrot.slane %v1093_v56, 5  ;;  %v1099_v9 = vrot.slane %v1097_v58, 4  ;;  %v1105_v12 = vrot.slane %v1103_v62, 5  ;;  %v1348_v6 = vpack.c.b16 %v1331_v37, %v1330_v55  ;;  %v3054_v62 = vld [vmem:[#allocation2 + $0xc] sm:$0xe] }
 0x109   : > { %10069 = vmatmul.msk.bf16.gmra.mxu0 %vm1356_vm5, %v1340_v28  ;;  %v1091_v5 = vrot.slane %v1090_v54, 4  ;;  %v2451_v30 = vor.u32 %v2450_v19, %v2447_v18  ;;  %v2461_v35 = vor.u32 %v2460_v25, %v12035_v21  ;;  %v2464_v36 = vshll.u32 %v2398_v26, 16  ;;  %v12047_v54 = vld [vmem:[#allocation2 + $0x1c] sm:$0xf] }
 0x10a   : > { %v1100_v1 = vor.u32 %v1099_v9, %v1095_v63  ;;  %v892_v2 = vld [vmem:[#allocation2 + $0xb4] sm:$0xf]  ;;  %v12041_v44 = vadd.f32 %v1637_v41, %v1414_v38  ;;  %v3120_v56 = vrot.slane %v12022_v49, 5  ;;  %v10303_v4 = vrot.slane %v3054_v62, 9  ;;  %v12075_v41 = vld [vmem:[#allocation2 + $0x28] sm:$0xf] }
 0x10b   : > { %v1096_v11 = vsel %vm11481_vm4, %v1091_v5, %v1095_v63  ;;  %v1276_v13 = vshrl.u32 %v892_v2, 16  ;;  %v1279_v17 = vshll.u32 %v892_v2, 16  ;;  %v2452_v43 = vrot.slane %v2451_v30, 4 }
 0x10c   : > { %10154 = vmatmul.msk.bf16.gmra.mxu1 %vm1356_vm5, %v10912_v48  ;;  %v1101_v20 = vrot.slane %v1100_v1, 4  ;;  %v1316_v14 = vunpack.c.l.b16 %v1096_v11  ;;  %v2462_v46 = vrot.slane %v2461_v35, 4  ;;  %v2466_v47 = vrot.slane %v2464_v36, 5  ;;  %v2399_v48 = vld [vmem:[#allocation2 + $0x18] sm:$0xf] }
 0x10d   : > { %v893_v22 = vld [vmem:[#allocation2 + $0xb8] sm:$0xf]  ;;  %v1278_v23 = vrot.slane %v1276_v13, 4  ;;  %v1281_v24 = vrot.slane %v1279_v17, 5  ;;  %v2457_v61 = vsel %vm11481_vm4, %v2452_v43, %v12035_v21  ;;  %v2469_v59 = vshrl.u32 %v2399_v48, 16 }
 0x10e   : > { %v1106_v15 = vsel %vm11481_vm4, %v1101_v20, %v1105_v12  ;;  %v911_v52 = vld [vmem:[#allocation2 + $0xbc] sm:$0x1]  ;;  %v1285_v57 = vshll.u32 %v893_v22, 16  ;;  %v1289_v10 = vshrl.u32 %v893_v22, 16  ;;  %v10920_v0 = vld [vmem:[#allocation2 + $0xb4] sm:$0xff]  ;;  %v3122_v5 = vrot.slane %v3120_v56, 4  ;;  %v12067_v22 = vpop.f32.mrf.mxu1 }
 0x10f   : > { %v1317_v27 = vunpack.c.l.b16 %v1106_v15  ;;  %v1282_v28 = vor.u32 %v1281_v24, %v1278_v23  ;;  %v1295_v29 = vshll.u32 %v911_v52, 16  ;;  %v3123_v63 = vrot.slane %v2398_v26, 5  ;;  %v10942_v1 = vld [vmem:[#allocation7 + $0x28] sm:$0xff]  ;;  %v10961_v12 = vld [vmem:[#allocation7 + $0x40] sm:$0xff]  ;;  %v1717_v15 = vld [vmem:[#allocation2] sm:$0xe] }
 0x110   : > { %v1287_v32 = vrot.slane %v1285_v57, 5  ;;  %v1291_v33 = vrot.slane %v1289_v10, 4  ;;  %v2467_v7 = vsel %vm11481_vm4, %v2462_v46, %v2466_v47  ;;  %v2472_v49 = vshll.u32 %v2399_v48, 16  ;;  %3342 = vmatpush.bf16.msrb.mxu1 %v10942_v1  ;;  %4693 = vmatpush.bf16.msra.mxu0 %v10961_v12  ;;  %v11096_v52 = vld [vmem:[#allocation2 + $0x4] sm:$0xf]  ;;  %v12080_v48 = vpop.f32.mrf.mxu0 }
 0x111   : > { %v1341_v34 = vpack.c.b16 %v1317_v27, %v1316_v14  ;;  %v1283_v39 = vrot.slane %v1282_v28, 4  ;;  %v1297_v31 = vrot.slane %v1295_v29, 5  ;;  %v2478_v8 = vshll.u32 %v12047_v54, 16  ;;  %v2401_v10 = vld [vmem:[#allocation2 + $0x20] sm:$0x1]  ;;  %v10924_v28 = vld [vmem:[#allocation2 + $0xc] sm:$0xff] }
 0x112   : > { %v1292_v40 = vor.u32 %v1291_v33, %v1287_v32  ;;  %v2482_v11 = vshrl.u32 %v12047_v54, 16  ;;  %v3121_v2 = vsel %vm12057_vm14, %v10303_v4, %v3120_v56  ;;  %v3124_v13 = vsel %vm12057_vm14, %v3122_v5, %v3123_v63  ;;  %v11097_v33 = vld [vmem:[#allocation2 + $0x8] sm:$0x1]  ;;  %v2402_v36 = vld [vmem:[#allocation2 + $0x24] sm:$0xf] }
 0x113   : > { %v1288_v51 = vsel %vm11481_vm4, %v1283_v39, %v1287_v32  ;;  %v3233_v17 = vunpack.c.l.b16 %v3121_v2  ;;  %v3234_v18 = vunpack.c.l.b16 %v3124_v13  ;;  %v2831_v19 = vunpack.c.l.b16 %v2457_v61  ;;  %v3055_v47 = vld [vmem:[#allocation2 + $0x18] sm:$0xe] }
 0x114   : > { %v1293_v45 = vrot.slane %v1292_v40, 4  ;;  %v1332_v9 = vunpack.c.l.b16 %v1288_v51  ;;  %v2832_v20 = vunpack.c.l.b16 %v2467_v7  ;;  %v2471_v21 = vrot.slane %v2469_v59, 4 }
 0x115   : > { %v2474_v14 = vrot.slane %v2472_v49, 5  ;;  %v2480_v24 = vrot.slane %v2478_v8, 5  ;;  %v2484_v25 = vrot.slane %v2482_v11, 4  ;;  %v1770_v57 = vrot.slane %v11096_v52, 5 }
 0x116   : > { %10077 = vmatmul.msk.bf16.gmra.mxu2 %vm1356_vm5, %v1348_v6  ;;  %v1298_v58 = vsel %vm11481_vm4, %v1293_v45, %v1297_v31  ;;  %v3265_v6 = vpack.c.b16 %v3234_v18, %v3233_v17  ;;  %v2863_v26 = vpack.c.b16 %v2832_v20, %v2831_v19  ;;  %v10163_v29 = vrot.slane %v1717_v15, 9  ;;  %v2404_v18 = vld [vmem:[#allocation2 + $0x2c] sm:$0x1]  ;;  %v1718_v19 = vld [vmem:[#allocation2 + $0xc] sm:$0xe] }
 0x117   : > { %v1333_v37 = vunpack.c.l.b16 %v1298_v58  ;;  %v2475_v27 = vor.u32 %v2474_v14, %v2471_v21  ;;  %v2485_v30 = vor.u32 %v2484_v25, %v2480_v24  ;;  %v2488_v32 = vshll.u32 %v2401_v10, 16  ;;  %v11098_v20 = vld [vmem:[#allocation2 + $0x10] sm:$0xf] }
 0x118   : > { %10162 = vmatmul.msk.bf16.gmra.mxu3 %vm1356_vm5, %v10920_v0  ;;  %v1772_v35 = vrot.slane %v1770_v57, 4  ;;  %v1771_v38 = vsel %vm12057_vm14, %v10163_v29, %v1770_v57  ;;  %v3127_v42 = vrot.slane %v12047_v54, 5  ;;  %v2493_v45 = vshrl.u32 %v2402_v36, 16  ;;  %v10925_v57 = vld [vmem:[#allocation2 + $0x18] sm:$0xff] }
 0x119   : > { %10070 = vmatmul.msk.bf16.gmra.mxu0 %vm1356_vm5, %v1341_v34  ;;  %v1349_v23 = vpack.c.b16 %v1333_v37, %v1332_v9  ;;  %v1773_v34 = vrot.slane %v11097_v33, 5  ;;  %v2476_v0 = vrot.slane %v2475_v27, 4  ;;  %v2486_v39 = vrot.slane %v2485_v30, 4 }
 0x11a   : > { %v2490_v40 = vrot.slane %v2488_v32, 5  ;;  %v2496_v46 = vshll.u32 %v2402_v36, 16  ;;  %v10304_v50 = vrot.slane %v3055_v47, 9  ;;  %v3129_v51 = vrot.slane %v3127_v42, 4 }
 0x11b   : > { %v1774_v31 = vsel %vm12057_vm14, %v1772_v35, %v1773_v34  ;;  %v3130_v56 = vrot.slane %v2401_v10, 5  ;;  %v1883_v61 = vunpack.c.l.b16 %v1771_v38  ;;  %v2481_v62 = vsel %vm11481_vm4, %v2476_v0, %v2480_v24  ;;  %v2405_v35 = vld [vmem:[#allocation2 + $0x30] sm:$0xf]  ;;  %v12100_v0 = vld [vmem:[#allocation2 + $0x34] sm:$0xf] }
 0x11c   : > { %10323 = vmatmul.msk.bf16.vlgmr.msrb.gmra.mxu1 %vm1356_vm5, %v3265_v6  ;;  %v2502_v59 = vshll.u32 %v12075_v41, 16  ;;  %v2506_v54 = vshrl.u32 %v12075_v41, 16  ;;  %v1884_v4 = vunpack.c.l.b16 %v1774_v31  ;;  %v2491_v5 = vsel %vm11481_vm4, %v2486_v39, %v2490_v40 }
 0x11d   : > { %v3128_v63 = vsel %vm12057_vm14, %v10304_v50, %v3127_v42  ;;  %v3131_v9 = vsel %vm12057_vm14, %v3129_v51, %v3130_v56  ;;  %v2495_v7 = vrot.slane %v2493_v45, 4  ;;  %v2498_v49 = vrot.slane %v2496_v46, 5 }
 0x11e   : > { %v3235_v8 = vunpack.c.l.b16 %v3128_v63  ;;  %v3236_v37 = vunpack.c.l.b16 %v3131_v9  ;;  %v2833_v11 = vunpack.c.l.b16 %v2481_v62  ;;  %v2834_v1 = vunpack.c.l.b16 %v2491_v5 }
 0x11f   : > { %v2504_v12 = vrot.slane %v2502_v59, 5  ;;  %v2508_v2 = vrot.slane %v2506_v54, 4  ;;  %v1915_v17 = vpack.c.b16 %v1884_v4, %v1883_v61  ;;  %v1777_v21 = vrot.slane %v11098_v20, 5 }
 0x120   : > { %v3266_v13 = vpack.c.b16 %v3236_v37, %v3235_v8  ;;  %v2499_v14 = vor.u32 %v2498_v49, %v2495_v7  ;;  %v2864_v25 = vpack.c.b16 %v2834_v1, %v2833_v11  ;;  %v2512_v15 = vshll.u32 %v2404_v18, 16  ;;  %v11100_v37 = vld [vmem:[#allocation2 + $0x1c] sm:$0xf] }
 0x121   : > { %v2509_v6 = vor.u32 %v2508_v2, %v2504_v12  ;;  %v10164_v10 = vrot.slane %v1718_v19, 9  ;;  %v1779_v27 = vrot.slane %v1777_v21, 4  ;;  %v3134_v38 = vrot.slane %v12075_v41, 5  ;;  %v1719_v2 = vld [vmem:[#allocation2 + $0x18] sm:$0xe] }
 0x122   : > { %v2500_v30 = vrot.slane %v2499_v14, 4  ;;  %v2514_v34 = vrot.slane %v2512_v15, 5  ;;  %v2517_v45 = vshrl.u32 %v2405_v35, 16  ;;  %v3137_v50 = vrot.slane %v2404_v18, 5  ;;  %v2407_v14 = vld [vmem:[#allocation2 + $0x38] sm:$0x1] }
 0x123   : > { %v2510_v33 = vrot.slane %v2509_v6, 4  ;;  %v1778_v39 = vsel %vm12057_vm14, %v10164_v10, %v1777_v21  ;;  %v3136_v47 = vrot.slane %v3134_v38, 4  ;;  %v2520_v41 = vshll.u32 %v2405_v35, 16 }
 0x124   : > { %v2505_v42 = vsel %vm11481_vm4, %v2500_v30, %v2504_v12  ;;  %v2530_v61 = vshrl.u32 %v12100_v0, 16  ;;  %v1885_v59 = vunpack.c.l.b16 %v1778_v39  ;;  %v1784_v11 = vrot.slane %v11100_v37, 5 }
 0x125   : > { %v2515_v56 = vsel %vm11481_vm4, %v2510_v33, %v2514_v34  ;;  %v3138_v5 = vsel %vm12057_vm14, %v3136_v47, %v3137_v50  ;;  %v2835_v49 = vunpack.c.l.b16 %v2505_v42  ;;  %v2519_v1 = vrot.slane %v2517_v45, 4  ;;  %v12134_v47 = vld [vmem:[#allocation2 + $0x40] sm:$0xf]  ;;  %v3057_v50 = vld [vmem:[#allocation2 + $0x30] sm:$0xe] }
 0x126   : > { %10078 = vmatmul.msk.bf16.gmra.mxu2 %vm1356_vm5, %v1349_v23  ;;  %v3238_v7 = vunpack.c.l.b16 %v3138_v5  ;;  %v2836_v8 = vunpack.c.l.b16 %v2515_v56  ;;  %v2532_v18 = vrot.slane %v2530_v61, 4  ;;  %v10165_v6 = vrot.slane %v1719_v2, 9 }
 0x127   : > { %v1786_v15 = vrot.slane %v1784_v11, 4  ;;  %v3144_v61 = vrot.slane %v2407_v14, 5 }
 0x128   : > { %10267 = vmatmul.msk.bf16.vlgmr.msrb.gmra.mxu3 %vm1356_vm5, %v10924_v28  ;;  %v11099_v28 = vld [vmem:[#allocation2 + $0x14] sm:$0x1]  ;;  %v1785_v33 = vsel %vm12057_vm14, %v10165_v6, %v1784_v11 }
 0x129   : > { %10287 = vmatmul.msk.bf16.vlgmr.msrb.gmra.mxu0 %vm1356_vm5, %v2863_v26  ;;  %v1642_v43 = vpop.f32.mrf.mxu1  ;;  %v1780_v29 = vrot.slane %v11099_v28, 5  ;;  %v1887_v45 = vunpack.c.l.b16 %v1785_v33 }
 0x12b   : > { %v1677_v58 = vpop.f32.mrf.mxu3  ;;  %v1781_v40 = vsel %vm12057_vm14, %v1779_v27, %v1780_v29  ;;  %v2536_v29 = vshll.u32 %v2407_v14, 16 }
 0x12c   : > { %10324 = vmatmul.msk.bf16.gmra.mxu1 %vm1356_vm5, %v3266_v13  ;;  %v1886_v54 = vunpack.c.l.b16 %v1781_v40  ;;  %v2522_v13 = vrot.slane %v2520_v41, 5  ;;  %v10306_v41 = vrot.slane %v3057_v50, 9 }
 0x12d   : > { %v2538_v40 = vrot.slane %v2536_v29, 5 }
 0x12e   : > { %v1916_v21 = vpack.c.b16 %v1886_v54, %v1885_v59  ;;  %v2523_v27 = vor.u32 %v2522_v13, %v2519_v1  ;;  %v1720_v13 = vld [vmem:[#allocation2 + $0x24] sm:$0xe] }
 0x131   : > { %v1644_v23 = vpop.f32.mrf.mxu1 }
 0x133   : > { %v1679_v24 = vpop.f32.mrf.mxu3 }
 0x136   : > { %v1419_v52 = vpop.f32.mrf.mxu0  ;;  %10183 = vmatmul.msk.bf16.vlgmr.msrb.gmra.mxu2 %vm1356_vm5, %v1915_v17 }
 0x137   : > { %v12094_v26 = vadd.f32 %v1642_v43, %v1419_v52  ;;  %v3056_v43 = vld [vmem:[#allocation2 + $0x24] sm:$0xe] }
 0x138   : > { %10268 = vmatmul.msk.bf16.gmra.mxu3 %vm1356_vm5, %v10925_v57  ;;  %v10305_v46 = vrot.slane %v3056_v43, 9  ;;  %v11101_v57 = vld [vmem:[#allocation2 + $0x20] sm:$0x1]  ;;  %v2408_v43 = vld [vmem:[#allocation2 + $0x3c] sm:$0xf] }
 0x139   : > { %10288 = vmatmul.msk.bf16.gmra.mxu0 %vm1356_vm5, %v2864_v25  ;;  %v1454_v32 = vpop.f32.mrf.mxu2  ;;  %v1647_v31 = vpop.f32.mrf.mxu1  ;;  %v1787_v10 = vrot.slane %v11101_v57, 5  ;;  %v2541_v54 = vshrl.u32 %v2408_v43, 16 }
 0x13a   : > { %v12097_v36 = vadd.f32 %v1677_v58, %v1454_v32  ;;  %v2526_v58 = vshll.u32 %v12100_v0, 16  ;;  %v3135_v4 = vsel %vm12057_vm14, %v10305_v46, %v3134_v38  ;;  %v10926_v32 = vld [vmem:[#allocation2 + $0x24] sm:$0xff]  ;;  %v2524_v38 = vrot.slane %v2523_v27, 4 }
 0x13b   : > { %v1682_v51 = vpop.f32.mrf.mxu3  ;;  %v3237_v9 = vunpack.c.l.b16 %v3135_v4  ;;  %v1788_v35 = vsel %vm12057_vm14, %v1786_v15, %v1787_v10  ;;  %v2544_v4 = vshll.u32 %v2408_v43, 16  ;;  %v2410_v15 = vld [vmem:[#allocation2 + $0x44] sm:$0x1]  ;;  %v2411_v43 = vld [vmem:[#allocation2 + $0x48] sm:$0xf] }
 0x13c   : > { %v2528_v17 = vrot.slane %v2526_v58, 5  ;;  %v1888_v56 = vunpack.c.l.b16 %v1788_v35  ;;  %v2560_v35 = vshll.u32 %v2410_v15, 16 }
 0x13d   : > { %v3267_v19 = vpack.c.b16 %v3238_v7, %v3237_v9  ;;  %v2554_v9 = vshrl.u32 %v12134_v47, 16 }
 0x13e   : > { %v1421_v62 = vpop.f32.mrf.mxu0  ;;  %v2533_v28 = vor.u32 %v2532_v18, %v2528_v17  ;;  %v2529_v59 = vsel %vm11481_vm4, %v2524_v38, %v2528_v17  ;;  %v11102_v17 = vld [vmem:[#allocation2 + $0x28] sm:$0xf]  ;;  %v1917_v6 = vpack.c.b16 %v1888_v56, %v1887_v45 }
 0x13f   : > { %v12117_v63 = vadd.f32 %v1644_v23, %v1421_v62  ;;  %v2865_v23 = vpack.c.b16 %v2836_v8, %v2835_v49  ;;  %10325 = vmatmul.msk.bf16.gmra.mxu1 %vm1356_vm5, %v3267_v19  ;;  %v2837_v1 = vunpack.c.l.b16 %v2529_v59  ;;  %v1791_v18 = vrot.slane %v11102_v17, 5  ;;  %v12162_v59 = vld [vmem:[#allocation2 + $0x4c] sm:$0xf] }
 0x140   : > { %v2534_v39 = vrot.slane %v2533_v28, 4  ;;  %v2543_v19 = vrot.slane %v2541_v54, 4  ;;  %v2556_v10 = vrot.slane %v2554_v9, 4  ;;  %v10166_v28 = vrot.slane %v1720_v13, 9 }
 0x141   : > { %v1456_v12 = vpop.f32.mrf.mxu2  ;;  %v1649_v25 = vpop.f32.mrf.mxu1 }
 0x142   : > { %v12119_v20 = vadd.f32 %v1679_v24, %v1456_v12  ;;  %v1792_v45 = vsel %vm12057_vm14, %v10166_v28, %v1791_v18 }
 0x143   : > { %v1684_v52 = vpop.f32.mrf.mxu3 }
 0x146   : > { %v1424_v30 = vpop.f32.mrf.mxu0  ;;  %10184 = vmatmul.msk.bf16.gmra.mxu2 %vm1356_vm5, %v1916_v21  ;;  %v2546_v21 = vrot.slane %v2544_v4, 5  ;;  %v2568_v4 = vshll.u32 %v2411_v43, 16 }
 0x147   : > { %v12123_v24 = vadd.f32 %v1647_v31, %v1424_v30  ;;  %v3141_v31 = vrot.slane %v12100_v0, 5  ;;  %v2550_v0 = vshll.u32 %v12134_v47, 16  ;;  %v1793_v30 = vrot.slane %v1791_v18, 4 }
 0x148   : > { %10269 = vmatmul.msk.bf16.gmra.mxu3 %vm1356_vm5, %v10926_v32  ;;  %v11103_v32 = vld [vmem:[#allocation2 + $0x2c] sm:$0x1] }
 0x149   : > { %10289 = vmatmul.msk.bf16.gmra.mxu0 %vm1356_vm5, %v2865_v23  ;;  %v1459_v34 = vpop.f32.mrf.mxu2  ;;  %v1652_v46 = vpop.f32.mrf.mxu1  ;;  %v3143_v58 = vrot.slane %v3141_v31, 4  ;;  %v3142_v7 = vsel %vm12057_vm14, %v10306_v41, %v3141_v31  ;;  %v2552_v57 = vrot.slane %v2550_v0, 5  ;;  %v1794_v33 = vrot.slane %v11103_v32, 5 }
 0x14a   : > { %v12130_v42 = vadd.f32 %v1682_v51, %v1459_v34  ;;  %v2539_v51 = vsel %vm11481_vm4, %v2534_v39, %v2538_v40  ;;  %v3239_v37 = vunpack.c.l.b16 %v3142_v7  ;;  %v2547_v34 = vor.u32 %v2546_v21, %v2543_v19 }
 0x14b   : > { %v1687_v62 = vpop.f32.mrf.mxu3  ;;  %v3145_v49 = vsel %vm12057_vm14, %v3143_v58, %v3144_v61  ;;  %v2838_v12 = vunpack.c.l.b16 %v2539_v51  ;;  %v2557_v39 = vor.u32 %v2556_v10, %v2552_v57  ;;  %v1795_v50 = vsel %vm12057_vm14, %v1793_v30, %v1794_v33 }
 0x14c   : > { %v3240_v11 = vunpack.c.l.b16 %v3145_v49  ;;  %v2548_v56 = vrot.slane %v2547_v34, 4  ;;  %v2562_v41 = vrot.slane %v2560_v35, 5  ;;  %v3148_v51 = vrot.slane %v12134_v47, 5  ;;  %v2413_v34 = vld [vmem:[#allocation2 + $0x50] sm:$0x1] }
 0x14d   : > { %v2558_v61 = vrot.slane %v2557_v39, 4  ;;  %v1889_v0 = vunpack.c.l.b16 %v1792_v45  ;;  %v3151_v49 = vrot.slane %v2410_v15, 5  ;;  %v2570_v21 = vrot.slane %v2568_v4, 5  ;;  %v11104_v35 = vld [vmem:[#allocation2 + $0x34] sm:$0xf] }
 0x14e   : > { %v1426_v5 = vpop.f32.mrf.mxu0  ;;  %v3268_v14 = vpack.c.b16 %v3240_v11, %v3239_v37  ;;  %v3150_v7 = vrot.slane %v3148_v51, 4  ;;  %v1890_v11 = vunpack.c.l.b16 %v1795_v50  ;;  %v2584_v50 = vshll.u32 %v2413_v34, 16 }
 0x14f   : > { %v12146_v8 = vadd.f32 %v1649_v25, %v1426_v5  ;;  %v2866_v25 = vpack.c.b16 %v2838_v12, %v2837_v1  ;;  %v3058_v5 = vld [vmem:[#allocation2 + $0x3c] sm:$0xe]  ;;  %v2574_v1 = vshll.u32 %v12162_v59, 16  ;;  %v2578_v12 = vshrl.u32 %v12162_v59, 16 }
 0x150   : > { %10326 = vmatmul.msk.bf16.gmra.mxu1 %vm1356_vm5, %v3268_v14  ;;  %v10307_v9 = vrot.slane %v3058_v5, 9  ;;  %v2563_v47 = vsel %vm11481_vm4, %v2558_v61, %v2562_v41  ;;  %v3152_v18 = vsel %vm12057_vm14, %v3150_v7, %v3151_v49  ;;  %v1918_v33 = vpack.c.b16 %v1890_v11, %v1889_v0  ;;  %v2414_v49 = vld [vmem:[#allocation2 + $0x54] sm:$0xf] }
 0x151   : > { %v1461_v2 = vpop.f32.mrf.mxu2  ;;  %v1654_v27 = vpop.f32.mrf.mxu1  ;;  %v2840_v10 = vunpack.c.l.b16 %v2563_v47  ;;  %v2580_v28 = vrot.slane %v2578_v12, 4  ;;  %v2586_v7 = vrot.slane %v2584_v50, 5 }
 0x152   : > { %v12148_v23 = vadd.f32 %v1684_v52, %v1461_v2  ;;  %v10927_v52 = vld [vmem:[#allocation2 + $0x30] sm:$0xff]  ;;  %v3149_v17 = vsel %vm12057_vm14, %v10307_v9, %v3148_v51 }
 0x153   : > { %v1689_v29 = vpop.f32.mrf.mxu3  ;;  %v3241_v14 = vunpack.c.l.b16 %v3149_v17  ;;  %v2589_v17 = vshrl.u32 %v2414_v49, 16 }
 0x155   : > { %v2591_v50 = vrot.slane %v2589_v17, 4 }
 0x156   : > { %v1429_v38 = vpop.f32.mrf.mxu0  ;;  %10185 = vmatmul.msk.bf16.gmra.mxu2 %vm1356_vm5, %v1917_v6  ;;  %v3242_v6 = vunpack.c.l.b16 %v3152_v18 }
 0x157   : > { %v12152_v40 = vadd.f32 %v1652_v46, %v1429_v38  ;;  %v2565_v46 = vshrl.u32 %v2411_v43, 16  ;;  %v1798_v38 = vrot.slane %v11104_v35, 5  ;;  %v1721_v43 = vld [vmem:[#allocation2 + $0x30] sm:$0xe] }
 0x158   : > { %10270 = vmatmul.msk.bf16.gmra.mxu3 %vm1356_vm5, %v10927_v52  ;;  %v3269_v30 = vpack.c.b16 %v3242_v6, %v3241_v14  ;;  %v10167_v51 = vrot.slane %v1721_v43, 9 }
 0x159   : > { %10290 = vmatmul.msk.bf16.gmra.mxu0 %vm1356_vm5, %v2866_v25  ;;  %v1464_v31 = vpop.f32.mrf.mxu2  ;;  %v1657_v54 = vpop.f32.mrf.mxu1  ;;  %v2567_v13 = vrot.slane %v2565_v46, 4  ;;  %v2576_v25 = vrot.slane %v2574_v1, 5  ;;  %v1800_v4 = vrot.slane %v1798_v38, 4  ;;  %v3155_v1 = vrot.slane %v12162_v59, 5 }
 0x15a   : > { %v12159_v58 = vadd.f32 %v1687_v62, %v1464_v31  ;;  %v2553_v62 = vsel %vm11481_vm4, %v2548_v56, %v2552_v57  ;;  %v11105_v56 = vld [vmem:[#allocation2 + $0x38] sm:$0x1]  ;;  %v2592_v59 = vshll.u32 %v2414_v49, 16 }
 0x15b   : > { %v1692_v37 = vpop.f32.mrf.mxu3  ;;  %v2839_v15 = vunpack.c.l.b16 %v2553_v62  ;;  %v2571_v52 = vor.u32 %v2570_v21, %v2567_v13  ;;  %v2581_v45 = vor.u32 %v2580_v28, %v2576_v25  ;;  %v1801_v41 = vrot.slane %v11105_v56, 5  ;;  %v12187_v62 = vld [vmem:[#allocation2 + $0x58] sm:$0xf]  ;;  %v3059_v13 = vld [vmem:[#allocation2 + $0x48] sm:$0xe] }
 0x15c   : > { %v3157_v18 = vrot.slane %v3155_v1, 4  ;;  %v3158_v21 = vrot.slane %v2413_v34, 5 }
 0x15d   : > { %v2867_v31 = vpack.c.b16 %v2840_v10, %v2839_v15  ;;  %v2572_v5 = vrot.slane %v2571_v52, 4  ;;  %v2582_v9 = vrot.slane %v2581_v45, 4  ;;  %v1802_v12 = vsel %vm12057_vm14, %v1800_v4, %v1801_v41  ;;  %v1722_v41 = vld [vmem:[#allocation2 + $0x3c] sm:$0xe] }
 0x15e   : > { %v1431_v2 = vpop.f32.mrf.mxu0  ;;  %v2598_v15 = vshll.u32 %v12187_v62, 16 }
 0x15f   : > { %v12175_v19 = vadd.f32 %v1654_v27, %v1431_v2  ;;  %v2577_v2 = vsel %vm11481_vm4, %v2572_v5, %v2576_v25  ;;  %v2587_v6 = vsel %vm11481_vm4, %v2582_v9, %v2586_v7  ;;  %v2416_v9 = vld [vmem:[#allocation2 + $0x5c] sm:$0x1] }
 0x160   : > { %10327 = vmatmul.msk.bf16.gmra.mxu1 %vm1356_vm5, %v3269_v30  ;;  %v1892_v30 = vunpack.c.l.b16 %v1802_v12  ;;  %v2841_v52 = vunpack.c.l.b16 %v2577_v2  ;;  %v2842_v43 = vunpack.c.l.b16 %v2587_v6 }
 0x161   : > { %v1466_v57 = vpop.f32.mrf.mxu2  ;;  %v1659_v39 = vpop.f32.mrf.mxu1 }
 0x162   : > { %v12177_v32 = vadd.f32 %v1689_v29, %v1466_v57  ;;  %v10928_v29 = vld [vmem:[#allocation2 + $0x3c] sm:$0xff]  ;;  %v2602_v57 = vshrl.u32 %v12187_v62, 16 }
 0x163   : > { %v1694_v27 = vpop.f32.mrf.mxu3 }
 0x164   : > { %15814 = vst [vmem:[#allocation14_spill] sm:$0xff] %v12177_v32 }
 0x166   : > { %v1434_v61 = vpop.f32.mrf.mxu0  ;;  %10186 = vmatmul.msk.bf16.gmra.mxu2 %vm1356_vm5, %v1918_v33  ;;  %v3159_v33 = vsel %vm12057_vm14, %v3157_v18, %v3158_v21  ;;  %v10929_v21 = vld [vmem:[#allocation2 + $0x48] sm:$0xff] }
 0x167   : > { %v12181_v46 = vadd.f32 %v1657_v54, %v1434_v61  ;;  %v1799_v54 = vsel %vm12057_vm14, %v10167_v51, %v1798_v38  ;;  %v3244_v38 = vunpack.c.l.b16 %v3159_v33  ;;  %v2594_v61 = vrot.slane %v2592_v59, 5 }
 0x168   : > { %10271 = vmatmul.msk.bf16.gmra.mxu3 %vm1356_vm5, %v10928_v29  ;;  %v1891_v28 = vunpack.c.l.b16 %v1799_v54  ;;  %v2600_v29 = vrot.slane %v2598_v15, 5  ;;  %v2604_v51 = vrot.slane %v2602_v57, 4  ;;  %v10168_v54 = vrot.slane %v1722_v41, 9 }
 0x169   : > { %10291 = vmatmul.msk.bf16.gmra.mxu0 %vm1356_vm5, %v2867_v31  ;;  %v1469_v0 = vpop.f32.mrf.mxu2  ;;  %v1662_v47 = vpop.f32.mrf.mxu1  ;;  %v11106_v31 = vld [vmem:[#allocation2 + $0x40] sm:$0xf] }
 0x16a   : > { %v12184_v11 = vadd.f32 %v1692_v37, %v1469_v0  ;;  %v10308_v37 = vrot.slane %v3059_v13, 9  ;;  %v1805_v45 = vrot.slane %v11106_v31, 5  ;;  %v1919_v0 = vpack.c.b16 %v1892_v30, %v1891_v28 }
 0x16b   : > { %v1697_v14 = vpop.f32.mrf.mxu3  ;;  %v2595_v13 = vor.u32 %v2594_v61, %v2591_v50  ;;  %v2605_v17 = vor.u32 %v2604_v51, %v2600_v29  ;;  %v3165_v50 = vrot.slane %v2416_v9, 5 }
 0x16c   : > { %15815 = vst [vmem:[#allocation15_spill] sm:$0xff] %v12184_v11  ;;  %v3156_v25 = vsel %vm12057_vm14, %v10308_v37, %v3155_v1  ;;  %v2868_v1 = vpack.c.b16 %v2842_v43, %v2841_v52  ;;  %v1807_v2 = vrot.slane %v1805_v45, 4  ;;  %v2608_v37 = vshll.u32 %v2416_v9, 16  ;;  %v3060_v52 = vld [vmem:[#allocation2 + $0x54] sm:$0xe] }
 0x16d   : > { %v3243_v34 = vunpack.c.l.b16 %v3156_v25  ;;  %v1806_v6 = vsel %vm12057_vm14, %v10168_v54, %v1805_v45  ;;  %v2596_v57 = vrot.slane %v2595_v13, 4  ;;  %v2417_v25 = vld [vmem:[#allocation2 + $0x60] sm:$0xf]  ;;  %v10309_v31 = vrot.slane %v3060_v52, 9  ;;  %v2428_v11 = vld [vmem:[#allocation2 + $0x8c] sm:$0x1] }
 0x16e   : > { %v1436_v10 = vpop.f32.mrf.mxu0  ;;  %v2610_v28 = vrot.slane %v2608_v37, 5  ;;  %v1893_v33 = vunpack.c.l.b16 %v1806_v6  ;;  %v2613_v61 = vshrl.u32 %v2417_v25, 16  ;;  %v2616_v51 = vshll.u32 %v2417_v25, 16 }
 0x16f   : > { %v12204_v35 = vadd.f32 %v1659_v39, %v1436_v10  ;;  %v3270_v4 = vpack.c.b16 %v3244_v38, %v3243_v34  ;;  %v11107_v39 = vld [vmem:[#allocation2 + $0x44] sm:$0x1]  ;;  %v2606_v10 = vrot.slane %v2605_v17, 4  ;;  %v2601_v41 = vsel %vm11481_vm4, %v2596_v57, %v2600_v29  ;;  %v11108_v17 = vld [vmem:[#allocation2 + $0x4c] sm:$0xf] }
 0x170   : > { %v1808_v49 = vrot.slane %v11107_v39, 5  ;;  %v12221_v38 = vld [vmem:[#allocation2 + $0x64] sm:$0xf]  ;;  %v2843_v54 = vunpack.c.l.b16 %v2601_v41  ;;  %v1812_v37 = vrot.slane %v11108_v17, 5  ;;  %v1723_v57 = vld [vmem:[#allocation2 + $0x48] sm:$0xe] }
 0x171   : > { %v1471_v56 = vpop.f32.mrf.mxu2  ;;  %v1664_v7 = vpop.f32.mrf.mxu1  ;;  %10328 = vmatmul.msk.bf16.gmra.mxu1 %vm1356_vm5, %v3270_v4 }
 0x172   : > { %v12206_v5 = vadd.f32 %v1694_v27, %v1471_v56  ;;  %v1809_v15 = vsel %vm12057_vm14, %v1807_v2, %v1808_v49 }
 0x173   : > { %v1699_v12 = vpop.f32.mrf.mxu3  ;;  %v1894_v43 = vunpack.c.l.b16 %v1809_v15 }
 0x174   : > { %15816 = vst [vmem:[#allocation16_spill] sm:$0xff] %v12206_v5 }
 0x175   : > { %v1920_v15 = vpack.c.b16 %v1894_v43, %v1893_v33 }
 0x176   : > { %v1439_v18 = vpop.f32.mrf.mxu0  ;;  %10187 = vmatmul.msk.bf16.gmra.mxu2 %vm1356_vm5, %v1919_v0  ;;  %v2626_v0 = vshrl.u32 %v12221_v38, 16 }
 0x177   : > { %v12210_v27 = vadd.f32 %v1662_v47, %v1439_v18  ;;  %v3162_v47 = vrot.slane %v12187_v62, 5  ;;  %v2622_v62 = vshll.u32 %v12221_v38, 16  ;;  %v2615_v18 = vrot.slane %v2613_v61, 4 }
 0x178   : > { %10272 = vmatmul.msk.bf16.gmra.mxu3 %vm1356_vm5, %v10929_v21  ;;  %v2618_v21 = vrot.slane %v2616_v51, 5  ;;  %v2628_v25 = vrot.slane %v2626_v0, 4 }
 0x179   : > { %10292 = vmatmul.msk.bf16.gmra.mxu0 %vm1356_vm5, %v2868_v1  ;;  %v1474_v59 = vpop.f32.mrf.mxu2  ;;  %v1667_v34 = vpop.f32.mrf.mxu1  ;;  %v3164_v45 = vrot.slane %v3162_v47, 4  ;;  %v3163_v39 = vsel %vm12057_vm14, %v10309_v31, %v3162_v47  ;;  %v11109_v47 = vld [vmem:[#allocation2 + $0x50] sm:$0x1] }
 0x17a   : > { %v12217_v30 = vadd.f32 %v1697_v14, %v1474_v59  ;;  %v2611_v14 = vsel %vm11481_vm4, %v2606_v10, %v2610_v28  ;;  %v3245_v1 = vunpack.c.l.b16 %v3163_v39  ;;  %v2419_v10 = vld [vmem:[#allocation2 + $0x68] sm:$0x1]  ;;  %v2624_v28 = vrot.slane %v2622_v62, 5 }
 0x17b   : > { %v1702_v56 = vpop.f32.mrf.mxu3  ;;  %v3166_v9 = vsel %vm12057_vm14, %v3164_v45, %v3165_v50  ;;  %v2844_v2 = vunpack.c.l.b16 %v2611_v14  ;;  %v10169_v45 = vrot.slane %v1723_v57, 9  ;;  %v1814_v50 = vrot.slane %v1812_v37, 4 }
 0x17c   : > { %15817 = vst [vmem:[#allocation17_spill] sm:$0xff] %v12217_v30  ;;  %v3246_v29 = vunpack.c.l.b16 %v3166_v9  ;;  %v2619_v41 = vor.u32 %v2618_v21, %v2615_v18  ;;  %v2632_v14 = vshll.u32 %v2419_v10, 16  ;;  %v2629_v33 = vor.u32 %v2628_v25, %v2624_v28  ;;  %v3061_v18 = vld [vmem:[#allocation2 + $0x60] sm:$0xe] }
 0x17d   : > { %v2869_v52 = vpack.c.b16 %v2844_v2, %v2843_v54  ;;  %v1813_v0 = vsel %vm12057_vm14, %v10169_v45, %v1812_v37  ;;  %v12249_v2 = vld [vmem:[#allocation2 + $0x70] sm:$0xf] }
 0x17e   : > { %v1441_v4 = vpop.f32.mrf.mxu0  ;;  %v3271_v6 = vpack.c.b16 %v3246_v29, %v3245_v1  ;;  %v2620_v9 = vrot.slane %v2619_v41, 4  ;;  %v2634_v1 = vrot.slane %v2632_v14, 5  ;;  %v2630_v54 = vrot.slane %v2629_v33, 4 }
 0x17f   : > { %v12233_v49 = vadd.f32 %v1664_v7, %v1441_v4  ;;  %v1815_v7 = vrot.slane %v11109_v47, 5  ;;  %v2420_v4 = vld [vmem:[#allocation2 + $0x6c] sm:$0xf]  ;;  %v1895_v21 = vunpack.c.l.b16 %v1813_v0  ;;  %v2646_v47 = vshll.u32 %v12249_v2, 16 }
 0x180   : > { %v2640_v17 = vshll.u32 %v2420_v4, 16  ;;  %v2635_v45 = vsel %vm11481_vm4, %v2630_v54, %v2634_v1 }
 0x181   : > { %v1476_v13 = vpop.f32.mrf.mxu2  ;;  %10329 = vmatmul.msk.bf16.gmra.mxu1 %vm1356_vm5, %v3271_v6  ;;  %v1669_v61 = vpop.f32.mrf.mxu1  ;;  %v1816_v39 = vsel %vm12057_vm14, %v1814_v50, %v1815_v7  ;;  %v10310_v6 = vrot.slane %v3061_v18, 9  ;;  %v2650_v7 = vshrl.u32 %v12249_v2, 16  ;;  %v2648_v0 = vrot.slane %v2646_v47, 5  ;;  %v10931_v47 = vld [vmem:[#allocation2 + $0x60] sm:$0xff] }
 0x182   : > { %v12235_v59 = vadd.f32 %v1699_v12, %v1476_v13  ;;  %v10930_v12 = vld [vmem:[#allocation2 + $0x54] sm:$0xff]  ;;  %v3169_v13 = vrot.slane %v12221_v38, 5  ;;  %v1896_v25 = vunpack.c.l.b16 %v1816_v39 }
 0x183   : > { %v1704_v31 = vpop.f32.mrf.mxu3  ;;  %v2652_v39 = vrot.slane %v2650_v7, 4 }
 0x184   : > { %15818 = vst [vmem:[#allocation18_spill] sm:$0xff] %v12235_v59  ;;  %v3171_v37 = vrot.slane %v3169_v13, 4  ;;  %v3170_v50 = vsel %vm12057_vm14, %v10310_v6, %v3169_v13  ;;  %v1921_v54 = vpack.c.b16 %v1896_v25, %v1895_v21  ;;  %v11110_v13 = vld [vmem:[#allocation2 + $0x58] sm:$0xf] }
 0x185   : > { %v1819_v18 = vrot.slane %v11110_v13, 5 }
 0x186   : > { %v1444_v51 = vpop.f32.mrf.mxu0  ;;  %10188 = vmatmul.msk.bf16.gmra.mxu2 %vm1356_vm5, %v1920_v15  ;;  %v3172_v15 = vrot.slane %v2419_v10, 5 }
 0x187   : > { %v12239_v43 = vadd.f32 %v1667_v34, %v1444_v51  ;;  %v2637_v34 = vshrl.u32 %v2420_v4, 16  ;;  %v2642_v51 = vrot.slane %v2640_v17, 5  ;;  %v1821_v25 = vrot.slane %v1819_v18, 4 }
 0x188   : > { %10273 = vmatmul.msk.bf16.gmra.mxu3 %vm1356_vm5, %v10930_v12  ;;  %v3173_v10 = vsel %vm12057_vm14, %v3171_v37, %v3172_v15  ;;  %v1724_v37 = vld [vmem:[#allocation2 + $0x54] sm:$0xe]  ;;  %v2653_v15 = vor.u32 %v2652_v39, %v2648_v0 }
 0x189   : > { %10293 = vmatmul.msk.bf16.gmra.mxu0 %vm1356_vm5, %v2869_v52  ;;  %v1479_v62 = vpop.f32.mrf.mxu2  ;;  %v2639_v38 = vrot.slane %v2637_v34, 4  ;;  %v1672_v14 = vpop.f32.mrf.mxu1  ;;  %v3248_v12 = vunpack.c.l.b16 %v3173_v10  ;;  %v2422_v34 = vld [vmem:[#allocation2 + $0x74] sm:$0x1]  ;;  %v10170_v21 = vrot.slane %v1724_v37, 9 }
 0x18a   : > { %v12246_v29 = vadd.f32 %v1702_v56, %v1479_v62  ;;  %v2625_v56 = vsel %vm11481_vm4, %v2620_v9, %v2624_v28  ;;  %v3247_v28 = vunpack.c.l.b16 %v3170_v50  ;;  %v2846_v62 = vunpack.c.l.b16 %v2635_v45 }
 0x18b   : > { %v1707_v57 = vpop.f32.mrf.mxu3  ;;  %v2845_v33 = vunpack.c.l.b16 %v2625_v56  ;;  %v2643_v6 = vor.u32 %v2642_v51, %v2639_v38  ;;  %v11111_v56 = vld [vmem:[#allocation2 + $0x5c] sm:$0x1]  ;;  %v2654_v10 = vrot.slane %v2653_v15, 4  ;;  %v3179_v37 = vrot.slane %v2422_v34, 5 }
 0x18c   : > { %15819 = vst [vmem:[#allocation19_spill] sm:$0xff] %v12246_v29  ;;  %v3272_v9 = vpack.c.b16 %v3248_v12, %v3247_v28  ;;  %v1822_v50 = vrot.slane %v11111_v56, 5  ;;  %v2423_v12 = vld [vmem:[#allocation2 + $0x78] sm:$0xf] }
 0x18d   : > { %v2870_v17 = vpack.c.b16 %v2846_v62, %v2845_v33  ;;  %v2644_v7 = vrot.slane %v2643_v6, 4  ;;  %v3176_v62 = vrot.slane %v12249_v2, 5  ;;  %v2661_v13 = vshrl.u32 %v2423_v12, 16 }
 0x18e   : > { %v1446_v52 = vpop.f32.mrf.mxu0  ;;  %v1823_v39 = vsel %vm12057_vm14, %v1821_v25, %v1822_v50 }
 0x18f   : > { %v12262_v41 = vadd.f32 %v1669_v61, %v1446_v52  ;;  %v2656_v52 = vshll.u32 %v2422_v34, 16  ;;  %v1898_v50 = vunpack.c.l.b16 %v1823_v39 }
 0x191   : > { %v1481_v4 = vpop.f32.mrf.mxu2  ;;  %10330 = vmatmul.msk.bf16.gmra.mxu1 %vm1356_vm5, %v3272_v9  ;;  %v2658_v51 = vrot.slane %v2656_v52, 5  ;;  %v1674_v28 = vpop.f32.mrf.mxu1  ;;  %v2649_v9 = vsel %vm11481_vm4, %v2644_v7, %v2648_v0  ;;  %v2664_v52 = vshll.u32 %v2423_v12, 16  ;;  %v2663_v12 = vrot.slane %v2661_v13, 4 }
 0x192   : > { %v12264_v1 = vadd.f32 %v1704_v31, %v1481_v4  ;;  %v12274_v4 = vld [vmem:[#allocation2 + $0x7c] sm:$0xf]  ;;  %v2847_v7 = vunpack.c.l.b16 %v2649_v9 }
 0x193   : > { %v1709_v61 = vpop.f32.mrf.mxu3  ;;  %v2659_v15 = vsel %vm11481_vm4, %v2654_v10, %v2658_v51  ;;  %v2670_v2 = vshll.u32 %v12274_v4, 16  ;;  %v11112_v10 = vld [vmem:[#allocation2 + $0x64] sm:$0xf] }
 0x194   : > { %15820 = vst [vmem:[#allocation20_spill] sm:$0xff] %v12264_v1  ;;  %v1826_v51 = vrot.slane %v11112_v10, 5  ;;  %v2666_v1 = vrot.slane %v2664_v52, 5 }
 0x196   : > { %v1449_v45 = vpop.f32.mrf.mxu0  ;;  %10189 = vmatmul.msk.bf16.gmra.mxu2 %vm1356_vm5, %v1921_v54  ;;  %v3062_v54 = vld [vmem:[#allocation2 + $0x6c] sm:$0xe]  ;;  %v1828_v13 = vrot.slane %v1826_v51, 4 }
 0x197   : > { %v12268_v31 = vadd.f32 %v1672_v14, %v1449_v45  ;;  %v1820_v14 = vsel %vm12057_vm14, %v10170_v21, %v1819_v18  ;;  %v10311_v6 = vrot.slane %v3062_v54, 9  ;;  %v2674_v18 = vshrl.u32 %v12274_v4, 16 }
 0x198   : > { %10274 = vmatmul.msk.bf16.gmra.mxu3 %vm1356_vm5, %v10931_v47  ;;  %v1897_v45 = vunpack.c.l.b16 %v1820_v14  ;;  %v2672_v14 = vrot.slane %v2670_v2, 5 }
 0x199   : > { %10294 = vmatmul.msk.bf16.gmra.mxu0 %vm1356_vm5, %v2870_v17  ;;  %v1484_v38 = vpop.f32.mrf.mxu2  ;;  %v3177_v0 = vsel %vm12057_vm14, %v10311_v6, %v3176_v62  ;;  %v2676_v39 = vrot.slane %v2674_v18, 4  ;;  %v12293_v29 = vpop.f32.mrf.mxu1  ;;  %v10932_v18 = vld [vmem:[#allocation2 + $0x6c] sm:$0xff] }
 0x19a   : > { %v12271_v33 = vadd.f32 %v1707_v57, %v1484_v38  ;;  %v3178_v57 = vrot.slane %v3176_v62, 4  ;;  %v3249_v34 = vunpack.c.l.b16 %v3177_v0  ;;  %v2848_v38 = vunpack.c.l.b16 %v2659_v15 }
 0x19b   : > { %v1712_v17 = vpop.f32.mrf.mxu3  ;;  %v2677_v10 = vor.u32 %v2676_v39, %v2672_v14  ;;  %v3063_v39 = vld [vmem:[#allocation2 + $0x78] sm:$0xe] }
 0x19c   : > { %15821 = vst [vmem:[#allocation21_spill] sm:$0xff] %v12271_v33  ;;  %v3180_v47 = vsel %vm12057_vm14, %v3178_v57, %v3179_v37  ;;  %v1725_v33 = vld [vmem:[#allocation2 + $0x60] sm:$0xe]  ;;  %v1922_v57 = vpack.c.b16 %v1898_v50, %v1897_v45  ;;  %v11113_v37 = vld [vmem:[#allocation2 + $0x68] sm:$0x1]  ;;  %v2871_v0 = vpack.c.b16 %v2848_v38, %v2847_v7 }
 0x19d   : > { %v3250_v25 = vunpack.c.l.b16 %v3180_v47  ;;  %v10171_v9 = vrot.slane %v1725_v33, 9  ;;  %v2667_v47 = vor.u32 %v2666_v1, %v2663_v12  ;;  %v2426_v38 = vld [vmem:[#allocation2 + $0x84] sm:$0xf]  ;;  %v3183_v12 = vrot.slane %v12274_v4, 5 }
 0x19e   : > { %v1451_v56 = vpop.f32.mrf.mxu0 }
 0x19f   : > { %v12291_v21 = vadd.f32 %v1674_v28, %v1451_v56  ;;  %v3273_v62 = vpack.c.b16 %v3250_v25, %v3249_v34  ;;  %v2425_v28 = vld [vmem:[#allocation2 + $0x80] sm:$0x1]  ;;  %v1829_v56 = vrot.slane %v11113_v37, 5  ;;  %v2668_v50 = vrot.slane %v2667_v47, 4 }
 0x1a0   : > { %v2680_v52 = vshll.u32 %v2425_v28, 16  ;;  %v2678_v34 = vrot.slane %v2677_v10, 4  ;;  %v3185_v37 = vrot.slane %v3183_v12, 4  ;;  %v2688_v47 = vshll.u32 %v2426_v38, 16 }
 0x1a1   : > { %v1486_v54 = vpop.f32.mrf.mxu2  ;;  %10331 = vmatmul.msk.bf16.gmra.mxu1 %vm1356_vm5, %v3273_v62  ;;  %v1830_v33 = vsel %vm12057_vm14, %v1828_v13, %v1829_v56  ;;  %v12306_v1 = vpop.f32.mrf.mxu1  ;;  %v3186_v56 = vrot.slane %v2425_v28, 5  ;;  %v2685_v13 = vshrl.u32 %v2426_v38, 16 }
 0x1a2   : > { %v12295_v6 = vadd.f32 %v1709_v61, %v1486_v54  ;;  %v1827_v61 = vsel %vm12057_vm14, %v10171_v9, %v1826_v51  ;;  %v2682_v25 = vrot.slane %v2680_v52, 5  ;;  %v12312_v51 = vld [vmem:[#allocation2 + $0x88] sm:$0xf]  ;;  %v1900_v62 = vunpack.c.l.b16 %v1830_v33 }
 0x1a3   : > { %v1714_v15 = vpop.f32.mrf.mxu3  ;;  %v1899_v54 = vunpack.c.l.b16 %v1827_v61  ;;  %v2673_v9 = vsel %vm11481_vm4, %v2668_v50, %v2672_v14  ;;  %v2694_v4 = vshll.u32 %v12312_v51, 16  ;;  %v2698_v52 = vshrl.u32 %v12312_v51, 16 }
 0x1a4   : > { %15822 = vst [vmem:[#allocation22_spill] sm:$0xff] %v12295_v6  ;;  %v3187_v28 = vsel %vm12057_vm14, %v3185_v37, %v3186_v56  ;;  %v2849_v14 = vunpack.c.l.b16 %v2673_v9  ;;  %v11115_v56 = vld [vmem:[#allocation2 + $0x74] sm:$0x1] }
 0x1a5   : > { %v1923_v5 = vpack.c.b16 %v1900_v62, %v1899_v54  ;;  %v1836_v9 = vrot.slane %v11115_v56, 5  ;;  %v2704_v54 = vshll.u32 %v2428_v11, 16  ;;  %v10979_v56 = vld [vmem:[#allocation9 + $0x8] sm:$0xff] }
 0x1a6   : > { %v12298_v2 = vpop.f32.mrf.mxu0  ;;  %10190 = vmatmul.msk.bf16.gmra.mxu2 %vm1356_vm5, %v1922_v57  ;;  %v10312_v57 = vrot.slane %v3063_v39, 9  ;;  %v2687_v39 = vrot.slane %v2685_v13, 4  ;;  %5886 = vmatpush.bf16.msra.mxu1 %v10979_v56 }
 0x1a8   : > { %10275 = vmatmul.msk.bf16.gmra.mxu3 %vm1356_vm5, %v10932_v18  ;;  %v3184_v18 = vsel %vm12057_vm14, %v10312_v57, %v3183_v12  ;;  %v2696_v12 = vrot.slane %v2694_v4, 5  ;;  %v2700_v57 = vrot.slane %v2698_v52, 4  ;;  %v2429_v4 = vld [vmem:[#allocation2 + $0x90] sm:$0xf] }
 0x1a9   : > { %10295 = vmatmul.msk.bf16.gmra.mxu0 %vm1356_vm5, %v2871_v0  ;;  %v1489_v45 = vpop.f32.mrf.mxu2  ;;  %v3251_v61 = vunpack.c.l.b16 %v3184_v18  ;;  %v12326_v6 = vpop.f32.mrf.mxu1 }
 0x1aa   : > { %v12308_v7 = vadd.f32 %v1712_v17, %v1489_v45  ;;  %v2683_v17 = vsel %vm11481_vm4, %v2678_v34, %v2682_v25  ;;  %v3252_v45 = vunpack.c.l.b16 %v3187_v28  ;;  %v1726_v34 = vld [vmem:[#allocation2 + $0x6c] sm:$0xe]  ;;  %v11114_v25 = vld [vmem:[#allocation2 + $0x70] sm:$0xf] }
 0x1ab   : > { %v2284_v0 = vpop.f32.mrf.mxu3  ;;  %v2850_v33 = vunpack.c.l.b16 %v2683_v17  ;;  %v1833_v38 = vrot.slane %v11114_v25, 5  ;;  %v10172_v37 = vrot.slane %v1726_v34, 9  ;;  %v3190_v34 = vrot.slane %v12312_v51, 5 }
 0x1ac   : > { %15823 = vst [vmem:[#allocation23_spill] sm:$0xff] %v12308_v7  ;;  %v2690_v7 = vrot.slane %v2688_v47, 5  ;;  %v3274_v59 = vpack.c.b16 %v3252_v45, %v3251_v61  ;;  %v2701_v61 = vor.u32 %v2700_v57, %v2696_v12  ;;  %v3064_v57 = vld [vmem:[#allocation2 + $0x84] sm:$0xe] }
 0x1ad   : > { %v2872_v18 = vpack.c.b16 %v2850_v33, %v2849_v14  ;;  %v1835_v28 = vrot.slane %v1833_v38, 4  ;;  %v1834_v62 = vsel %vm12057_vm14, %v10172_v37, %v1833_v38  ;;  %v2706_v33 = vrot.slane %v2704_v54, 5 }
 0x1ae   : > { %v12318_v10 = vpop.f32.mrf.mxu0  ;;  %v2691_v13 = vor.u32 %v2690_v7, %v2687_v39  ;;  %v1901_v25 = vunpack.c.l.b16 %v1834_v62  ;;  %v2709_v38 = vshrl.u32 %v2429_v4, 16  ;;  %v2712_v39 = vshll.u32 %v2429_v4, 16 }
 0x1af   : > { %v1837_v52 = vsel %vm12057_vm14, %v1835_v28, %v1836_v9  ;;  %v10313_v9 = vrot.slane %v3064_v57, 9  ;;  %v3193_v28 = vrot.slane %v2428_v11, 5 }
 0x1b0   : > { %v2692_v45 = vrot.slane %v2691_v13, 4 }
 0x1b1   : > { %v1491_v50 = vpop.f32.mrf.mxu2  ;;  %10332 = vmatmul.msk.bf16.gmra.mxu1 %vm1356_vm5, %v3274_v59  ;;  %v12341_v14 = vpop.f32.mrf.mxu1  ;;  %v3191_v11 = vsel %vm12057_vm14, %v10313_v9, %v3190_v34 }
 0x1b2   : > { %v12328_v30 = vadd.f32 %v1714_v15, %v1491_v50  ;;  %v10933_v15 = vld [vmem:[#allocation2 + $0x78] sm:$0xff]  ;;  %v12345_v50 = vld [vmem:[#allocation2 + $0x94] sm:$0xf] }
 0x1b3   : > { %v12331_v17 = vpop.f32.mrf.mxu3  ;;  %v2722_v54 = vshrl.u32 %v12345_v50, 16 }
 0x1b4   : > { %15824 = vst [vmem:[#allocation24_spill] sm:$0xff] %v12328_v30  ;;  %v1727_v30 = vld [vmem:[#allocation2 + $0x78] sm:$0xe] }
 0x1b5   : > { %v2724_v9 = vrot.slane %v2722_v54, 4 }
 0x1b6   : > { %v12333_v47 = vpop.f32.mrf.mxu0  ;;  %10191 = vmatmul.msk.bf16.gmra.mxu2 %vm1356_vm5, %v1923_v5  ;;  %v2702_v5 = vrot.slane %v2701_v61, 4  ;;  %v2718_v61 = vshll.u32 %v12345_v50, 16 }
 0x1b8   : > { %10276 = vmatmul.msk.bf16.gmra.mxu3 %vm1356_vm5, %v10933_v15  ;;  %v2697_v15 = vsel %vm11481_vm4, %v2692_v45, %v2696_v12  ;;  %v2714_v12 = vrot.slane %v2712_v39, 5 }
 0x1b9   : > { %10296 = vmatmul.msk.bf16.gmra.mxu0 %vm1356_vm5, %v2872_v18  ;;  %v1994_v59 = vpop.f32.mrf.mxu2  ;;  %v3192_v18 = vrot.slane %v3190_v34, 4  ;;  %v2720_v34 = vrot.slane %v2718_v61, 5 }
 0x1ba   : > { %v2074_v7 = vadd.f32 %v1994_v59, %v12041_v44  ;;  %v1902_v44 = vunpack.c.l.b16 %v1837_v52  ;;  %v2711_v59 = vrot.slane %v2709_v38, 4  ;;  %v3253_v52 = vunpack.c.l.b16 %v3191_v11 }
 0x1bb   : > { %v12348_v13 = vpop.f32.mrf.mxu3  ;;  %v3194_v4 = vsel %vm12057_vm14, %v3192_v18, %v3193_v28  ;;  %v2431_v28 = vld [vmem:[#allocation2 + $0x98] sm:$0x1] }
 0x1bc   : > { %v2364_v37 = vadd.f32 %v2284_v0, %v2074_v7  ;;  %v2707_v0 = vsel %vm11481_vm4, %v2702_v5, %v2706_v33  ;;  %v3254_v45 = vunpack.c.l.b16 %v3194_v4  ;;  %v1640_v7 = vadd.f32 %v12067_v22, %v12080_v48  ;;  %v12368_v32 = vpop.f32.mrf.mxu1  ;;  %v11117_v4 = vld [vmem:[#allocation2 + $0x80] sm:$0x1] }
 0x1bd   : > { %v2852_v56 = vunpack.c.l.b16 %v2707_v0  ;;  %v1924_v18 = vpack.c.b16 %v1902_v44, %v1901_v25  ;;  %v2715_v11 = vor.u32 %v2714_v12, %v2711_v59  ;;  %v1843_v22 = vrot.slane %v11117_v4, 5  ;;  %v10934_v44 = vld [vmem:[#allocation2 + $0x84] sm:$0xff] }
 0x1be   : > { %v12354_v51 = vpop.f32.mrf.mxu0  ;;  %v3022_v62 = vadd.f32 %v12298_v2, %v2364_v37  ;;  %v2851_v2 = vunpack.c.l.b16 %v2697_v15  ;;  %v11116_v37 = vld [vmem:[#allocation2 + $0x7c] sm:$0xf]  ;;  %v3275_v38 = vpack.c.b16 %v3254_v45, %v3253_v52  ;;  %v2728_v61 = vshll.u32 %v2431_v28, 16 }
 0x1bf   : > { %v1840_v5 = vrot.slane %v11116_v37, 5  ;;  %v2725_v37 = vor.u32 %v2724_v9, %v2720_v34  ;;  %v2716_v59 = vrot.slane %v2715_v11, 4 }
 0x1c0   : > { %v12366_v57 = vadd.f32 %v12293_v29, %v3022_v62  ;;  %v10173_v29 = vrot.slane %v1727_v30, 9  ;;  %v2873_v0 = vpack.c.b16 %v2852_v56, %v2851_v2  ;;  %v3197_v56 = vrot.slane %v12345_v50, 5 }
 0x1c1   : > { %v1996_v33 = vpop.f32.mrf.mxu2  ;;  %v1842_v15 = vrot.slane %v1840_v5, 4  ;;  %10333 = vmatmul.msk.bf16.gmra.mxu1 %vm1356_vm5, %v3275_v38  ;;  %v2726_v45 = vrot.slane %v2725_v37, 4  ;;  %v2721_v38 = vsel %vm11481_vm4, %v2716_v59, %v2720_v34 }
 0x1c2   : > { %v2075_v39 = vadd.f32 %v1996_v33, %v1640_v7  ;;  %v1841_v30 = vsel %vm12057_vm14, %v10173_v29, %v1840_v5  ;;  %v2730_v7 = vrot.slane %v2728_v61, 5  ;;  %v2432_v33 = vld [vmem:[#allocation2 + $0x9c] sm:$0xf]  ;;  %v3199_v4 = vrot.slane %v3197_v56, 4 }
 0x1c3   : > { %v2291_v62 = vpop.f32.mrf.mxu3  ;;  %v1903_v5 = vunpack.c.l.b16 %v1841_v30  ;;  %v2733_v29 = vshrl.u32 %v2432_v33, 16  ;;  %v2853_v59 = vunpack.c.l.b16 %v2721_v38  ;;  %v11119_v38 = vld [vmem:[#allocation2 + $0x8c] sm:$0x1] }
 0x1c4   : > { %v2365_v48 = vadd.f32 %v12331_v17, %v2075_v39  ;;  %v1844_v17 = vsel %vm12057_vm14, %v1842_v15, %v1843_v22  ;;  %v12384_v2 = vpop.f32.mrf.mxu1  ;;  %v3065_v39 = vld [vmem:[#allocation2 + $0x90] sm:$0xe]  ;;  %v3200_v22 = vrot.slane %v2431_v28, 5  ;;  %v2736_v15 = vshll.u32 %v2432_v33, 16 }
 0x1c5   : > { %v1904_v9 = vunpack.c.l.b16 %v1844_v17  ;;  %v10314_v11 = vrot.slane %v3065_v39, 9 }
 0x1c6   : > { %v12372_v54 = vpop.f32.mrf.mxu0  ;;  %10192 = vmatmul.msk.bf16.gmra.mxu2 %vm1356_vm5, %v1924_v18  ;;  %v3023_v25 = vadd.f32 %v12318_v10, %v2365_v48  ;;  %v3201_v28 = vsel %vm12057_vm14, %v3199_v4, %v3200_v22  ;;  %v2434_v22 = vld [vmem:[#allocation2 + $0xa4] sm:$0x1] }
 0x1c8   : > { %v12377_v12 = vadd.f32 %v12306_v1, %v3023_v25  ;;  %10277 = vmatmul.msk.bf16.gmra.mxu3 %vm1356_vm5, %v10934_v44  ;;  %v12388_v1 = vld [vmem:[#allocation2 + $0xa0] sm:$0xf]  ;;  %v3256_v25 = vunpack.c.l.b16 %v3201_v28 }
 0x1c9   : > { %10297 = vmatmul.msk.bf16.gmra.mxu0 %vm1356_vm5, %v2873_v0  ;;  %v1999_v52 = vpop.f32.mrf.mxu2  ;;  %v2742_v0 = vshll.u32 %v12388_v1, 16  ;;  %v2746_v34 = vshrl.u32 %v12388_v1, 16 }
 0x1ca   : > { %v2076_v10 = vadd.f32 %v1999_v52, %v12094_v26  ;;  %v2731_v26 = vsel %vm11481_vm4, %v2726_v45, %v2730_v7  ;;  %v1728_v52 = vld [vmem:[#allocation2 + $0x84] sm:$0xe]  ;;  %v11118_v45 = vld [vmem:[#allocation2 + $0x88] sm:$0xf] }
 0x1cb   : > { %v2294_v48 = vpop.f32.mrf.mxu3  ;;  %v2854_v30 = vunpack.c.l.b16 %v2731_v26  ;;  %v1847_v7 = vrot.slane %v11118_v45, 5  ;;  %v2748_v4 = vrot.slane %v2746_v34, 4  ;;  %v1850_v26 = vrot.slane %v11119_v38, 5 }
 0x1cc   : > { %v2366_v18 = vadd.f32 %v12348_v13, %v2076_v10  ;;  %v3198_v13 = vsel %vm12057_vm14, %v10314_v11, %v3197_v56  ;;  %v2738_v10 = vrot.slane %v2736_v15, 5  ;;  %v2744_v11 = vrot.slane %v2742_v0, 5 }
 0x1cd   : > { %v3255_v61 = vunpack.c.l.b16 %v3198_v13  ;;  %v12408_v33 = vpop.f32.mrf.mxu1  ;;  %v2874_v28 = vpack.c.b16 %v2854_v30, %v2853_v59  ;;  %v2752_v0 = vshll.u32 %v2434_v22, 16  ;;  %v3207_v38 = vrot.slane %v2434_v22, 5 }
 0x1ce   : > { %v12397_v50 = vpop.f32.mrf.mxu0  ;;  %v3024_v37 = vadd.f32 %v12333_v47, %v2366_v18  ;;  %v2735_v47 = vrot.slane %v2733_v29, 4  ;;  %v1925_v18 = vpack.c.b16 %v1904_v9, %v1903_v5  ;;  %v1849_v29 = vrot.slane %v1847_v7, 4  ;;  %v10935_v5 = vld [vmem:[#allocation2 + $0x90] sm:$0xff] }
 0x1cf   : > { %v3276_v39 = vpack.c.b16 %v3256_v25, %v3255_v61  ;;  %v2749_v9 = vor.u32 %v2748_v4, %v2744_v11  ;;  %v2435_v61 = vld [vmem:[#allocation2 + $0xa8] sm:$0xf] }
 0x1d0   : > { %v12406_v44 = vadd.f32 %v12326_v6, %v3024_v37  ;;  %v10174_v6 = vrot.slane %v1728_v52, 9  ;;  %v2739_v15 = vor.u32 %v2738_v10, %v2735_v47  ;;  %v1851_v59 = vsel %vm12057_vm14, %v1849_v29, %v1850_v26  ;;  %v12430_v47 = vld [vmem:[#allocation2 + $0xac] sm:$0xf] }
 0x1d1   : > { %v2001_v17 = vpop.f32.mrf.mxu2  ;;  %10334 = vmatmul.msk.bf16.gmra.mxu1 %vm1356_vm5, %v3276_v39  ;;  %v2750_v52 = vrot.slane %v2749_v9, 4  ;;  %v2757_v39 = vshrl.u32 %v2435_v61, 16  ;;  %v2766_v29 = vshll.u32 %v12430_v47, 16  ;;  %v1729_v9 = vld [vmem:[#allocation2 + $0x90] sm:$0xe] }
 0x1d2   : > { %v2077_v56 = vadd.f32 %v2001_v17, %v12117_v63  ;;  %v1848_v34 = vsel %vm12057_vm14, %v10174_v6, %v1847_v7  ;;  %v2740_v30 = vrot.slane %v2739_v15, 4  ;;  %v3204_v7 = vrot.slane %v12388_v1, 5 }
 0x1d3   : > { %v12412_v37 = vpop.f32.mrf.mxu3  ;;  %v1905_v10 = vunpack.c.l.b16 %v1848_v34  ;;  %v2770_v15 = vshrl.u32 %v12430_v47, 16 }
 0x1d4   : > { %v2367_v13 = vadd.f32 %v2291_v62, %v2077_v56  ;;  %v2760_v56 = vshll.u32 %v2435_v61, 16  ;;  %v3206_v6 = vrot.slane %v3204_v7, 4 }
 0x1d5   : > { %v12426_v17 = vpop.f32.mrf.mxu1 }
 0x1d6   : > { %v12414_v45 = vpop.f32.mrf.mxu0  ;;  %10193 = vmatmul.msk.bf16.gmra.mxu2 %vm1356_vm5, %v1925_v18  ;;  %v3025_v63 = vadd.f32 %v12354_v51, %v2367_v13  ;;  %v3066_v18 = vld [vmem:[#allocation2 + $0x9c] sm:$0xe] }
 0x1d7   : > { %v10315_v13 = vrot.slane %v3066_v18, 9  ;;  %v12452_v18 = vrot.slane %v2766_v29, 5 }
 0x1d8   : > { %v12419_v62 = vadd.f32 %v12341_v14, %v3025_v63  ;;  %10278 = vmatmul.msk.bf16.gmra.mxu3 %vm1356_vm5, %v10935_v5  ;;  %v2754_v14 = vrot.slane %v2752_v0, 5  ;;  %v3208_v5 = vsel %vm12057_vm14, %v3206_v6, %v3207_v38  ;;  %v2759_v0 = vrot.slane %v2757_v39, 4  ;;  %v12457_v38 = vld [vmem:[#allocation2 + $0xb0] sm:$0x1] }
 0x1d9   : > { %10298 = vmatmul.msk.bf16.gmra.mxu0 %vm1356_vm5, %v2874_v28  ;;  %v2004_v25 = vpop.f32.mrf.mxu2  ;;  %v2745_v28 = vsel %vm11481_vm4, %v2740_v30, %v2744_v11  ;;  %v3205_v22 = vsel %vm12057_vm14, %v10315_v13, %v3204_v7  ;;  %v2762_v11 = vrot.slane %v2760_v56, 5  ;;  %v3258_v61 = vunpack.c.l.b16 %v3208_v5  ;;  %v11120_v30 = vld [vmem:[#allocation2 + $0x94] sm:$0xf] }
 0x1da   : > { %v2078_v51 = vadd.f32 %v2004_v25, %v12123_v24  ;;  %v1906_v24 = vunpack.c.l.b16 %v1851_v59  ;;  %v3257_v34 = vunpack.c.l.b16 %v3205_v22  ;;  %v365_v25 = vld [vmem:[%s11443_s28 + $0x78] sm:$0xf]  ;;  %v2772_v7 = vrot.slane %v2770_v15, 4  ;;  %v366_v22 = vld [vmem:[%s11443_s28 + $0x7c] sm:$0xf]  ;;  %s9950_s28 = scalar_lea.hbm %s15791_s5, %s11019_s26 }
 0x1db   : > { %v12433_v26 = vpop.f32.mrf.mxu3  ;;  %v10175_v6 = vrot.slane %v1729_v9, 9  ;;  %v2763_v5 = vor.u32 %v2762_v11, %v2759_v0  ;;  %v629_v15 = vshll.u32 %v365_v25, 16  ;;  %v801_v9 = vld [vmem:[#allocation2 + $0xc0] sm:$0xf]  ;;  %s9953_s29 = sshll.u32 %s9950_s28, 4  ;;  %s9954_s29 = int_to_ptr.hbm [resolvable:$true] %s9953_s29 }
 0x1dc   : > { %v2368_v4 = vadd.f32 %v2294_v48, %v2078_v51  ;;  %v2755_v48 = vsel %vm11481_vm4, %v2750_v52, %v2754_v14  ;;  %v1854_v51 = vrot.slane %v11120_v30, 5  ;;  %v3277_v13 = vpack.c.b16 %v3258_v61, %v3257_v34  ;;  %v10936_v0 = vld [vmem:[#allocation2 + $0x9c] sm:$0xff]  ;;  %s11237_s11 = sshra.s32 %s9954_s29, 4  ;;  %s11238_s11 = int_to_ptr.hbm [resolvable:$true] %s11237_s11 }
 0x1dd   : > { %v2856_v14 = vunpack.c.l.b16 %v2755_v48  ;;  %v1926_v56 = vpack.c.b16 %v1906_v24, %v1905_v10  ;;  %v2776_v10 = vshll.u32 %v12457_v38, 16  ;;  %v634_v24 = vshrl.u32 %v366_v22, 16  ;;  %s11239_s9 = scalar_lea.hbm %s11238_s11, 128  ;;  %p11244_p11 = scmp.lt.s32.totalorder %s11238_s11, %s15791_s5 }
 0x1de   : > { %v12439_v1 = vpop.f32.mrf.mxu0  ;;  %v3026_v63 = vadd.f32 %v12372_v54, %v2368_v4  ;;  %v2855_v54 = vunpack.c.l.b16 %v2745_v28  ;;  %v12454_v4 = vpop.f32.mrf.mxu1  ;;  %v1856_v48 = vrot.slane %v1854_v51, 4  ;;  %v1855_v11 = vsel %vm12057_vm14, %v10175_v6, %v1854_v51  ;;  %p11240_p1 = scmp.ne.s32.totalorder %s11238_s11, %s11239_s9  ;;  %p11245_p2 = scmp.lt.s32.totalorder %s11243_s15, %s11239_s9 }
 0x1df   : > { %v2778_v51 = vrot.slane %v2776_v10, 5 }
 0x1e0   : > { %v12450_v59 = vadd.f32 %v12368_v32, %v3026_v63  ;;  %v626_v32 = vshrl.u32 %v365_v25, 16  ;;  %v11121_v63 = vld [vmem:[#allocation2 + $0x98] sm:$0x1]  ;;  %v2875_v34 = vpack.c.b16 %v2856_v14, %v2855_v54  ;;  %v636_v54 = vrot.slane %v634_v24, 7  ;;  %p11241_p4 = pnand %p11240_p1, %p11404_p3  ;;  %p11246_p9 = por %p11245_p2, %p11244_p11 }
 0x1e1   : > { %v2006_v52 = vpop.f32.mrf.mxu2  ;;  %v1857_v28 = vrot.slane %v11121_v63, 5  ;;  %10335 = vmatmul.msk.bf16.gmra.mxu1 %vm1356_vm5, %v3277_v13  ;;  %v637_v14 = vshll.u32 %v366_v22, 16  ;;  %v1907_v22 = vunpack.c.l.b16 %v1855_v11 }
 0x1e2   : > { %15825 = vst [vmem:[#allocation25_spill] sm:$0xff] %v12450_v59  ;;  %v2079_v39 = vadd.f32 %v2006_v52, %v12146_v8  ;;  %v628_v29 = vrot.slane %v626_v32, 7  ;;  %v2773_v8 = vor.u32 %v2772_v7, %v12452_v18  ;;  %v2764_v52 = vrot.slane %v2763_v5, 4  ;;  %v805_v32 = vld [vmem:[#allocation2 + $0xc8] sm:$0x1]  ;;  %p11242_p8 = pneg %p11241_p4 }
 0x1e3   : > { %v12462_v59 = vpop.f32.mrf.mxu3  ;;  %v639_v5 = vor.u32 %v637_v14, %v636_v54 }
 0x1e4   : > { %v2369_v30 = vadd.f32 %v12412_v37, %v2079_v39  ;;  %v631_v25 = vor.u32 %v629_v15, %v628_v29  ;;  %v632_v13 = vrot.slane %v628_v29, 4  ;;  %v1858_v39 = vsel %vm12057_vm14, %v1856_v48, %v1857_v28  ;;  %v2438_v28 = vld [vmem:[#allocation2 + $0xb4] sm:$0xf]  ;;  %v12484_v48 = vld [vmem:[#allocation2 + $0xb8] sm:$0xf]  ;;  %p11247_p10 = pnand %p11246_p9, %p11242_p8 }
 0x1e5   : > { %v2774_v63 = vrot.slane %v2773_v8, 4  ;;  %v3211_v29 = vrot.slane %v12430_v47, 5  ;;  %v1908_v15 = vunpack.c.l.b16 %v1858_v39  ;;  %v3067_v8 = vld [vmem:[#allocation2 + $0xa8] sm:$0xe] }
 0x1e6   : > { %v12466_v61 = vpop.f32.mrf.mxu0  ;;  %10194 = vmatmul.msk.bf16.gmra.mxu2 %vm1356_vm5, %v1926_v56  ;;  %v3027_v37 = vadd.f32 %v12397_v50, %v2369_v30  ;;  %v802_v56 = vsel %vm11705_vm10, %v631_v25, %v801_v9  ;;  %v12480_v6 = vpop.f32.mrf.mxu1  ;;  %v641_v30 = vrot.slane %v636_v54, 4  ;;  %v640_v10 = vsel %vm11691_vm9, %v632_v13, %v639_v5  ;;  %v11122_v5 = vld [vmem:[#allocation2 + $0xa0] sm:$0xf] }
 0x1e7   : > { %803 = vst [vmem:[#allocation2 + $0xc0] sm:$0xf] %v802_v56  ;;  %v10316_v9 = vrot.slane %v3067_v8, 9  ;;  %v2779_v11 = vsel %vm11481_vm4, %v2774_v63, %v2778_v51  ;;  %v2784_v25 = vshll.u32 %v2438_v28, 16 }
 0x1e8   : > { %v12473_v7 = vadd.f32 %v12384_v2, %v3027_v37  ;;  %10279 = vmatmul.msk.bf16.gmra.mxu3 %vm1356_vm5, %v10936_v0  ;;  %v3213_v37 = vrot.slane %v3211_v29, 4  ;;  %v3214_v0 = vrot.slane %v12457_v38, 5  ;;  %804 = vst.msk [vmem:[#allocation2 + $0xc4] sm:$0xf] %vm279_vm0, %v640_v10  ;;  %v2858_v63 = vunpack.c.l.b16 %v2779_v11 }
 0x1e9   : > { %10299 = vmatmul.msk.bf16.gmra.mxu0 %vm1356_vm5, %v2875_v34  ;;  %v2009_v50 = vpop.f32.mrf.mxu2  ;;  %v2769_v34 = vsel %vm11481_vm4, %v2764_v52, %v12452_v18  ;;  %v2781_v18 = vshrl.u32 %v2438_v28, 16  ;;  %v2790_v52 = vshll.u32 %v12484_v48, 16  ;;  %v3212_v38 = vsel %vm12057_vm14, %v10316_v9, %v3211_v29 }
 0x1ea   : > { %v2080_v2 = vadd.f32 %v2009_v50, %v12152_v40  ;;  %v806_v40 = vsel %vm11719_vm11, %v641_v30, %v805_v32  ;;  %v3215_v14 = vsel %vm12057_vm14, %v3213_v37, %v3214_v0  ;;  %v3259_v39 = vunpack.c.l.b16 %v3212_v38  ;;  %v2440_v37 = vld [vmem:[#allocation2 + $0xbc] sm:$0x1]  ;;  %v11123_v0 = vld [vmem:[#allocation2 + $0xa4] sm:$0x1] }
 0x1eb   : > { %v2304_v47 = vpop.f32.mrf.mxu3  ;;  %807 = vst [vmem:[#allocation2 + $0xc8] sm:$0x1] %v806_v40  ;;  %v3260_v56 = vunpack.c.l.b16 %v3215_v14  ;;  %v2857_v50 = vunpack.c.l.b16 %v2769_v34  ;;  %v1861_v30 = vrot.slane %v11122_v5, 5  ;;  %v1927_v10 = vpack.c.b16 %v1908_v15, %v1907_v22  ;;  %v1730_v40 = vld [vmem:[#allocation2 + $0x9c] sm:$0xe]  ;;  %v10937_v22 = vld [vmem:[#allocation2 + $0xa8] sm:$0xff] }
 0x1ec   : > { %v2370_v24 = vadd.f32 %v12433_v26, %v2080_v2  ;;  %v2794_v26 = vshrl.u32 %v12484_v48, 16  ;;  %v2783_v2 = vrot.slane %v2781_v18, 4 }
 0x1ed   : > { %v3278_v8 = vpack.c.b16 %v3260_v56, %v3259_v39  ;;  %v2876_v18 = vpack.c.b16 %v2858_v63, %v2857_v50 }
 0x1ee   : > { %v12500_v13 = vpop.f32.mrf.mxu0  ;;  %v3028_v54 = vadd.f32 %v12414_v45, %v2370_v24  ;;  %v2786_v45 = vrot.slane %v2784_v25, 5  ;;  %v12511_v28 = vpop.f32.mrf.mxu1  ;;  %v2792_v24 = vrot.slane %v2790_v52, 5  ;;  %v2796_v9 = vrot.slane %v2794_v26, 4 }
 0x1ef   : > { %v10176_v25 = vrot.slane %v1730_v40, 9  ;;  %v2800_v52 = vshll.u32 %v2440_v37, 16 }
 0x1f0   : > { %v12509_v32 = vadd.f32 %v12408_v33, %v3028_v54  ;;  %v1864_v33 = vrot.slane %v11123_v0, 5  ;;  %v1863_v54 = vrot.slane %v1861_v30, 4  ;;  %v2787_v38 = vor.u32 %v2786_v45, %v2783_v2  ;;  %v12534_v2 = vld [vmem:[#allocation2 + $0xc4] sm:$0xf] }
 0x1f1   : > { %v2011_v51 = vpop.f32.mrf.mxu2  ;;  %10336 = vmatmul.msk.bf16.gmra.mxu1 %vm1356_vm5, %v3278_v8  ;;  %v2797_v15 = vor.u32 %v2796_v9, %v2792_v24  ;;  %v1862_v56 = vsel %vm12057_vm14, %v10176_v25, %v1861_v30  ;;  %v3218_v45 = vrot.slane %v12484_v48, 5  ;;  %v3221_v25 = vrot.slane %v2440_v37, 5 }
 0x1f2   : > { %v2081_v29 = vadd.f32 %v2011_v51, %v12175_v19  ;;  %v1865_v50 = vsel %vm12057_vm14, %v1863_v54, %v1864_v33  ;;  %v2788_v63 = vrot.slane %v2787_v38, 4  ;;  %v1909_v40 = vunpack.c.l.b16 %v1862_v56 }
 0x1f3   : > { %v12516_v11 = vpop.f32.mrf.mxu3  ;;  %v2798_v5 = vrot.slane %v2797_v15, 4  ;;  %v3220_v0 = vrot.slane %v3218_v45, 4 }
 0x1f4   : > { %v2371_v34 = vadd.f32 %v12462_v59, %v2081_v29  ;;  %v2441_v59 = vld [vmem:[#allocation2 + $0xc0] sm:$0xf]  ;;  %v2793_v48 = vsel %vm11481_vm4, %v2788_v63, %v2792_v24 }
 0x1f5   : > { %v2805_v8 = vshrl.u32 %v2441_v59, 16  ;;  %v2808_v29 = vshll.u32 %v2441_v59, 16  ;;  %v2859_v24 = vunpack.c.l.b16 %v2793_v48 }
 0x1f6   : > { %v12518_v14 = vpop.f32.mrf.mxu0  ;;  %10195 = vmatmul.msk.bf16.gmra.mxu2 %vm1356_vm5, %v1927_v10  ;;  %v3029_v19 = vadd.f32 %v12439_v1, %v2371_v34  ;;  %v12530_v51 = vpop.f32.mrf.mxu1  ;;  %v3068_v10 = vld [vmem:[#allocation2 + $0xb4] sm:$0xe]  ;;  %v1910_v34 = vunpack.c.l.b16 %v1865_v50 }
 0x1f7   : > { %v10317_v9 = vrot.slane %v3068_v10, 9  ;;  %v2810_v15 = vrot.slane %v2808_v29, 5  ;;  %v2443_v29 = vld [vmem:[#allocation2 + $0xc8] sm:$0x1] }
 0x1f8   : > { %v12523_v26 = vadd.f32 %v12426_v17, %v3029_v19  ;;  %10280 = vmatmul.msk.bf16.gmra.mxu3 %vm1356_vm5, %v10937_v22  ;;  %v2802_v17 = vrot.slane %v2800_v52, 5  ;;  %v2807_v22 = vrot.slane %v2805_v8, 4  ;;  %v3222_v52 = vsel %vm12057_vm14, %v3220_v0, %v3221_v25  ;;  %v11125_v0 = vld [vmem:[#allocation2 + $0xb0] sm:$0x1] }
 0x1f9   : > { %10300 = vmatmul.msk.bf16.gmra.mxu0 %vm1356_vm5, %v2876_v18  ;;  %v2014_v39 = vpop.f32.mrf.mxu2  ;;  %v2814_v18 = vshll.u32 %v12534_v2, 16  ;;  %v3219_v19 = vsel %vm12057_vm14, %v10317_v9, %v3218_v45  ;;  %v3262_v56 = vunpack.c.l.b16 %v3222_v52  ;;  %v1928_v8 = vpack.c.b16 %v1910_v34, %v1909_v40  ;;  %v10938_v40 = vld [vmem:[#allocation2 + $0xb4] sm:$0xff] }
 0x1fa   : > { %v2082_v1 = vadd.f32 %v2014_v39, %v12181_v46  ;;  %v2818_v46 = vshrl.u32 %v12534_v2, 16  ;;  %v3261_v59 = vunpack.c.l.b16 %v3219_v19  ;;  %v11124_v39 = vld [vmem:[#allocation2 + $0xac] sm:$0xf]  ;;  %v2811_v9 = vor.u32 %v2810_v15, %v2807_v22 }
 0x1fb   : > { %v2309_v33 = vpop.f32.mrf.mxu3 }
 0x1fc   : > { %v2372_v30 = vadd.f32 %v2304_v47, %v2082_v1  ;;  %v2803_v47 = vsel %vm11481_vm4, %v2798_v5, %v2802_v17  ;;  %v1731_v1 = vld [vmem:[#allocation2 + $0xa8] sm:$0xe]  ;;  %v2816_v5 = vrot.slane %v2814_v18, 5  ;;  %v2820_v17 = vrot.slane %v2818_v46, 4 }
 0x1fd   : > { %v2860_v63 = vunpack.c.l.b16 %v2803_v47  ;;  %v2824_v46 = vshll.u32 %v2443_v29, 16  ;;  %v2812_v34 = vrot.slane %v2811_v9, 4 }
 0x1fe   : > { %v12539_v54 = vpop.f32.mrf.mxu0  ;;  %v3030_v38 = vadd.f32 %v12466_v61, %v2372_v30  ;;  %v1868_v61 = vrot.slane %v11124_v39, 5  ;;  %v12553_v10 = vpop.f32.mrf.mxu1  ;;  %v3279_v30 = vpack.c.b16 %v3262_v56, %v3261_v59  ;;  %v2821_v18 = vor.u32 %v2820_v17, %v2816_v5 }
 0x1ff   : > { %v2877_v47 = vpack.c.b16 %v2860_v63, %v2859_v24  ;;  %v2826_v39 = vrot.slane %v2824_v46, 5  ;;  %v3747_v24 = vld [vmem:[#allocation2 + $0x18] sm:$0xf]  ;;  %v3225_v63 = vrot.slane %v12534_v2, 5  ;;  %v2817_v17 = vsel %vm11481_vm4, %v2812_v34, %v2816_v5 }
 0x200   : > { %v12551_v37 = vadd.f32 %v12454_v4, %v3030_v38  ;;  %v1871_v4 = vrot.slane %v11125_v0, 5  ;;  %v10177_v38 = vrot.slane %v1731_v1, 9  ;;  %v1870_v19 = vrot.slane %v1868_v61, 4 }
 0x201   : > { %v2016_v50 = vpop.f32.mrf.mxu2  ;;  %10337 = vmatmul.msk.bf16.gmra.mxu1 %vm1356_vm5, %v3279_v30  ;;  %v2822_v59 = vrot.slane %v2821_v18, 4  ;;  %v3227_v9 = vrot.slane %v3225_v63, 4  ;;  %v3228_v0 = vrot.slane %v2443_v29, 5 }
 0x202   : > { %v2083_v45 = vadd.f32 %v2016_v50, %v12204_v35  ;;  %v1872_v22 = vsel %vm12057_vm14, %v1870_v19, %v1871_v4 }
 0x203   : > { %v2311_v48 = vpop.f32.mrf.mxu3  ;;  %v1912_v1 = vunpack.c.l.b16 %v1872_v22  ;;  %v3229_v5 = vsel %vm12057_vm14, %v3227_v9, %v3228_v0  ;;  %v3749_v0 = vld [vmem:[#allocation2 + $0x20] sm:$0x1] }
 0x204   : > { %v2373_v25 = vadd.f32 %v12516_v11, %v2083_v45  ;;  %v1869_v11 = vsel %vm12057_vm14, %v10177_v38, %v1868_v61  ;;  %v3069_v45 = vld [vmem:[#allocation2 + $0xc0] sm:$0xe]  ;;  %v3799_v38 = vshll.u32 %v3747_v24, 16  ;;  %v3264_v46 = vunpack.c.l.b16 %v3229_v5 }
 0x205   : > { %v1911_v61 = vunpack.c.l.b16 %v1869_v11  ;;  %v10318_v30 = vrot.slane %v3069_v45, 9  ;;  %v2861_v11 = vunpack.c.l.b16 %v2817_v17 }
 0x206   : > { %v12558_v52 = vpop.f32.mrf.mxu0  ;;  %10196 = vmatmul.msk.bf16.gmra.mxu2 %vm1356_vm5, %v1928_v8  ;;  %v12562_v35 = vadd.f32 %v12500_v13, %v2373_v25  ;;  %v12569_v56 = vpop.f32.mrf.mxu1  ;;  %v12573_v13 = vld [vmem:[#allocation2 + $0x1c] sm:$0xf]  ;;  %v3796_v25 = vshrl.u32 %v3747_v24, 16 }
 0x207   : > { %v3805_v19 = vshll.u32 %v12573_v13, 16  ;;  %v3809_v18 = vshrl.u32 %v12573_v13, 16  ;;  %v1929_v34 = vpack.c.b16 %v1912_v1, %v1911_v61  ;;  %v11127_v61 = vld [vmem:[#allocation2 + $0xbc] sm:$0x1] }
 0x208   : > { %10281 = vmatmul.msk.bf16.gmra.mxu3 %vm1356_vm5, %v10938_v40  ;;  %v1878_v1 = vrot.slane %v11127_v61, 5 }
 0x209   : > { %10301 = vmatmul.msk.bf16.gmra.mxu0 %vm1356_vm5, %v2877_v47  ;;  %v2019_v15 = vpop.f32.mrf.mxu2  ;;  %v3811_v9 = vrot.slane %v3809_v18, 4 }
 0x20a   : > { %v2084_v50 = vadd.f32 %v2019_v15, %v12210_v27  ;;  %v2827_v27 = vsel %vm11481_vm4, %v2822_v59, %v2826_v39  ;;  %v1732_v59 = vld [vmem:[#allocation2 + $0xb4] sm:$0xe]  ;;  %v11126_v39 = vld [vmem:[#allocation2 + $0xb8] sm:$0xf] }
 0x20b   : > { %v2314_v4 = vpop.f32.mrf.mxu3  ;;  %v2862_v15 = vunpack.c.l.b16 %v2827_v27 }
 0x20c   : > { %v2374_v8 = vadd.f32 %v2309_v33, %v2084_v50  ;;  %v3226_v33 = vsel %vm12057_vm14, %v10318_v30, %v3225_v63  ;;  %v3798_v50 = vrot.slane %v3796_v25, 4  ;;  %v3807_v30 = vrot.slane %v3805_v19, 5  ;;  %v4405_v19 = vld [vmem:[#allocation2 + $0x18] sm:$0xe] }
 0x20d   : > { %v3263_v29 = vunpack.c.l.b16 %v3226_v33  ;;  %v2878_v27 = vpack.c.b16 %v2862_v15, %v2861_v11  ;;  %v4471_v25 = vrot.slane %v12573_v13, 5 }
 0x20e   : > { %v12581_v47 = vpop.f32.mrf.mxu0  ;;  %v3032_v2 = vadd.f32 %v12518_v14, %v2374_v8  ;;  %v1875_v14 = vrot.slane %v11126_v39, 5  ;;  %v12592_v24 = vpop.f32.mrf.mxu1  ;;  %v3801_v8 = vrot.slane %v3799_v38, 5  ;;  %v10939_v38 = vld [vmem:[#allocation2 + $0xc0] sm:$0xff]  ;;  %v3812_v18 = vor.u32 %v3811_v9, %v3807_v30 }
 0x20f   : > { %v3280_v45 = vpack.c.b16 %v3264_v46, %v3263_v29  ;;  %v3815_v29 = vshll.u32 %v3749_v0, 16  ;;  %v4473_v15 = vrot.slane %v4471_v25, 4 }
 0x210   : > { %v12590_v40 = vadd.f32 %v12511_v28, %v3032_v2  ;;  %v10178_v28 = vrot.slane %v1732_v59, 9  ;;  %v1877_v2 = vrot.slane %v1875_v14, 4 }
 0x211   : > { %v2021_v22 = vpop.f32.mrf.mxu2  ;;  %10338 = vmatmul.msk.bf16.gmra.mxu1 %vm1356_vm5, %v3280_v45  ;;  %v3817_v45 = vrot.slane %v3815_v29, 5 }
 0x212   : > { %v2085_v63 = vadd.f32 %v2021_v22, %v12233_v49  ;;  %v1876_v46 = vsel %vm12057_vm14, %v10178_v28, %v1875_v14  ;;  %v1879_v13 = vsel %vm12057_vm14, %v1877_v2, %v1878_v1  ;;  %v10443_v22 = vrot.slane %v4405_v19, 9  ;;  %v3751_v14 = vld [vmem:[#allocation2 + $0x28] sm:$0xf] }
 0x213   : > { %v2316_v17 = vpop.f32.mrf.mxu3  ;;  %v1914_v28 = vunpack.c.l.b16 %v1879_v13  ;;  %v3829_v19 = vshll.u32 %v3751_v14, 16 }
 0x214   : > { %v2375_v33 = vadd.f32 %v2311_v48, %v2085_v63  ;;  %v3802_v48 = vor.u32 %v3801_v8, %v3798_v50  ;;  %v3813_v50 = vrot.slane %v3812_v18, 4  ;;  %v3750_v8 = vld [vmem:[#allocation2 + $0x24] sm:$0xf]  ;;  %v4472_v61 = vsel %vm12057_vm14, %v10443_v22, %v4471_v25 }
 0x215   : > { %v3820_v2 = vshrl.u32 %v3750_v8, 16  ;;  %v4584_v29 = vunpack.c.l.b16 %v4472_v61 }
 0x216   : > { %v12597_v5 = vpop.f32.mrf.mxu0  ;;  %10197 = vmatmul.msk.bf16.gmra.mxu2 %vm1356_vm5, %v1929_v34  ;;  %v12601_v49 = vadd.f32 %v12539_v54, %v2375_v33  ;;  %v4474_v34 = vrot.slane %v3749_v0, 5  ;;  %v12608_v59 = vpop.f32.mrf.mxu1  ;;  %v3803_v39 = vrot.slane %v3802_v48, 4  ;;  %v1913_v33 = vunpack.c.l.b16 %v1876_v46 }
 0x217   : > { %15826 = vst [vmem:[#allocation26_spill] sm:$0xff] %v12608_v59  ;;  %v3833_v48 = vshrl.u32 %v3751_v14, 16 }
 0x218   : > { %10282 = vmatmul.msk.bf16.gmra.mxu3 %vm1356_vm5, %v10939_v38  ;;  %v3823_v38 = vshll.u32 %v3750_v8, 16  ;;  %v1930_v13 = vpack.c.b16 %v1914_v28, %v1913_v33 }
 0x219   : > { %10302 = vmatmul.msk.bf16.gmra.mxu0 %vm1356_vm5, %v2878_v27  ;;  %v2024_v11 = vpop.f32.mrf.mxu2  ;;  %v3808_v27 = vsel %vm11481_vm4, %v3803_v39, %v3807_v30  ;;  %v3835_v39 = vrot.slane %v3833_v48, 4 }
 0x21a   : > { %v2086_v54 = vadd.f32 %v2024_v11, %v12239_v43  ;;  %v4475_v43 = vsel %vm12057_vm14, %v4473_v15, %v4474_v34  ;;  %v4182_v22 = vunpack.c.l.b16 %v3808_v27  ;;  %v3822_v15 = vrot.slane %v3820_v2, 4 }
 0x21b   : > { %v2319_v9 = vpop.f32.mrf.mxu3  ;;  %v4585_v46 = vunpack.c.l.b16 %v4475_v43  ;;  %v3825_v34 = vrot.slane %v3823_v38, 5  ;;  %v3754_v38 = vld [vmem:[#allocation2 + $0x34] sm:$0xf] }
 0x21c   : > { %v2376_v63 = vadd.f32 %v2314_v4, %v2086_v54  ;;  %v3818_v4 = vsel %vm11481_vm4, %v3813_v50, %v3817_v45  ;;  %v3831_v54 = vrot.slane %v3829_v19, 5  ;;  %v3752_v45 = vld [vmem:[#allocation2 + $0x2c] sm:$0x1]  ;;  %v3753_v19 = vld [vmem:[#allocation2 + $0x30] sm:$0xf] }
 0x21d   : > { %v4183_v30 = vunpack.c.l.b16 %v3818_v4  ;;  %v3826_v33 = vor.u32 %v3825_v34, %v3822_v15  ;;  %v3839_v43 = vshll.u32 %v3752_v45, 16  ;;  %v4481_v2 = vrot.slane %v3752_v45, 5 }
 0x21e   : > { %v12614_v1 = vpop.f32.mrf.mxu0  ;;  %v3034_v0 = vadd.f32 %v12558_v52, %v2376_v63  ;;  %v12626_v52 = vpop.f32.mrf.mxu1  ;;  %v4478_v63 = vrot.slane %v3751_v14, 5  ;;  %v3836_v28 = vor.u32 %v3835_v39, %v3831_v54  ;;  %v3847_v15 = vshll.u32 %v3753_v19, 16 }
 0x21f   : > { %v3827_v48 = vrot.slane %v3826_v33, 4  ;;  %v3857_v34 = vshrl.u32 %v3754_v38, 16 }
 0x220   : > { %v12624_v18 = vadd.f32 %v12553_v10, %v3034_v0  ;;  %v4616_v10 = vpack.c.b16 %v4585_v46, %v4584_v29  ;;  %v4406_v0 = vld [vmem:[#allocation2 + $0x24] sm:$0xe]  ;;  %v4480_v4 = vrot.slane %v4478_v63, 4 }
 0x221   : > { %v2026_v25 = vpop.f32.mrf.mxu2  ;;  %v10444_v27 = vrot.slane %v4406_v0, 9  ;;  %v3832_v45 = vsel %vm11481_vm4, %v3827_v48, %v3831_v54 }
 0x222   : > { %v2087_v11 = vadd.f32 %v2026_v25, %v12262_v41  ;;  %v4214_v41 = vpack.c.b16 %v4183_v30, %v4182_v22  ;;  %v3837_v25 = vrot.slane %v3836_v28, 4  ;;  %v3844_v30 = vshrl.u32 %v3753_v19, 16 }
 0x223   : > { %v2321_v8 = vpop.f32.mrf.mxu3  ;;  %v3849_v28 = vrot.slane %v3847_v15, 5  ;;  %v4485_v19 = vrot.slane %v3754_v38, 5 }
 0x224   : > { %v2377_v50 = vadd.f32 %v2316_v17, %v2087_v11  ;;  %v4479_v11 = vsel %vm12057_vm14, %v10444_v27, %v4478_v63  ;;  %v3846_v33 = vrot.slane %v3844_v30, 4  ;;  %v3859_v27 = vrot.slane %v3857_v34, 4 }
 0x225   : > { %v4487_v34 = vrot.slane %v4485_v19, 4 }
 0x226   : > { %v12629_v59 = vpop.f32.mrf.mxu0  ;;  %10198 = vmatmul.msk.bf16.gmra.mxu2 %vm1356_vm5, %v1930_v13  ;;  %v12633_v61 = vadd.f32 %v12581_v47, %v2377_v50  ;;  %v3841_v47 = vrot.slane %v3839_v43, 5  ;;  %v12638_v29 = vpop.f32.mrf.mxu1  ;;  %v4482_v13 = vsel %vm12057_vm14, %v4480_v4, %v4481_v2  ;;  %v10943_v2 = vld [vmem:[#allocation2 + $0x18] sm:$0xff] }
 0x227   : > { %v4587_v0 = vunpack.c.l.b16 %v4482_v13 }
 0x228   : > { %10427 = vmatmul.msk.bf16.vlgmr.msra.gmra.mxu3 %vm1356_vm5, %v4214_v41 }
 0x229   : > { %10463 = vmatmul.msk.bf16.vlgmr.msra.gmra.mxu0 %vm1356_vm5, %v4616_v10  ;;  %v2029_v17 = vpop.f32.mrf.mxu2  ;;  %v4586_v10 = vunpack.c.l.b16 %v4479_v11 }
 0x22a   : > { %v2088_v14 = vadd.f32 %v2029_v17, %v12268_v31  ;;  %v3853_v31 = vshll.u32 %v3754_v38, 16 }
 0x22b   : > { %v2324_v22 = vpop.f32.mrf.mxu3 }
 0x22c   : > { %v2378_v46 = vadd.f32 %v2319_v9, %v2088_v14  ;;  %v3842_v9 = vsel %vm11481_vm4, %v3837_v25, %v3841_v47  ;;  %v3855_v43 = vrot.slane %v3853_v31, 5  ;;  %v3755_v14 = vld [vmem:[#allocation2 + $0x38] sm:$0x1]  ;;  %v4617_v25 = vpack.c.b16 %v4587_v0, %v4586_v10  ;;  %v4407_v47 = vld [vmem:[#allocation2 + $0x30] sm:$0xe] }
 0x22d   : > { %v4185_v17 = vunpack.c.l.b16 %v3842_v9  ;;  %v3863_v11 = vshll.u32 %v3755_v14, 16  ;;  %v10445_v31 = vrot.slane %v4407_v47, 9  ;;  %v4488_v38 = vrot.slane %v3755_v14, 5  ;;  %v3756_v0 = vld [vmem:[#allocation2 + $0x3c] sm:$0xf] }
 0x22e   : > { %v12644_v39 = vpop.f32.mrf.mxu0  ;;  %v3036_v50 = vadd.f32 %v12597_v5, %v2378_v46  ;;  %v4184_v5 = vunpack.c.l.b16 %v3832_v45  ;;  %v3860_v46 = vor.u32 %v3859_v27, %v3855_v43  ;;  %v12655_v13 = vpop.f32.mrf.mxu1  ;;  %v3871_v14 = vshll.u32 %v3756_v0, 16 }
 0x22f   : > { %v3865_v9 = vrot.slane %v3863_v11, 5  ;;  %v4489_v27 = vsel %vm12057_vm14, %v4487_v34, %v4488_v38  ;;  %v10944_v34 = vld [vmem:[#allocation2 + $0x24] sm:$0xff] }
 0x230   : > { %v12652_v63 = vadd.f32 %v12592_v24, %v3036_v50  ;;  %v3850_v24 = vor.u32 %v3849_v28, %v3846_v33  ;;  %v4215_v15 = vpack.c.b16 %v4185_v17, %v4184_v5  ;;  %v3861_v45 = vrot.slane %v3860_v46, 4 }
 0x231   : > { %v2031_v41 = vpop.f32.mrf.mxu2  ;;  %v3868_v5 = vshrl.u32 %v3756_v0, 16  ;;  %v4589_v46 = vunpack.c.l.b16 %v4489_v27  ;;  %v4408_v27 = vld [vmem:[#allocation2 + $0x3c] sm:$0xe] }
 0x232   : > { %v2089_v4 = vadd.f32 %v2031_v41, %v12291_v21  ;;  %v3851_v50 = vrot.slane %v3850_v24, 4  ;;  %v3757_v41 = vld [vmem:[#allocation2 + $0x40] sm:$0xf] }
 0x233   : > { %v2326_v48 = vpop.f32.mrf.mxu3 }
 0x234   : > { %v2379_v54 = vadd.f32 %v2321_v8, %v2089_v4  ;;  %v3856_v4 = vsel %vm11481_vm4, %v3851_v50, %v3855_v43  ;;  %v3758_v50 = vld [vmem:[#allocation2 + $0x44] sm:$0x1] }
 0x235   : > { %v4186_v43 = vunpack.c.l.b16 %v3856_v4 }
 0x236   : > { %v12657_v30 = vpop.f32.mrf.mxu0  ;;  %10407 = vmatmul.msk.bf16.vlgmr.msra.gmra.mxu2 %vm1356_vm5, %v10943_v2  ;;  %v12661_v21 = vadd.f32 %v12614_v1, %v2379_v54  ;;  %v4486_v1 = vsel %vm12057_vm14, %v10445_v31, %v4485_v19  ;;  %v3866_v2 = vsel %vm11481_vm4, %v3861_v45, %v3865_v9  ;;  %v3881_v54 = vshrl.u32 %v3757_v41, 16 }
 0x237   : > { %v4588_v47 = vunpack.c.l.b16 %v4486_v1  ;;  %v4187_v11 = vunpack.c.l.b16 %v3866_v2  ;;  %v3887_v2 = vshll.u32 %v3758_v50, 16 }
 0x238   : > { %10428 = vmatmul.msk.bf16.gmra.mxu3 %vm1356_vm5, %v4215_v15  ;;  %v3870_v15 = vrot.slane %v3868_v5, 4 }
 0x239   : > { %10464 = vmatmul.msk.bf16.gmra.mxu0 %vm1356_vm5, %v4617_v25  ;;  %v2034_v8 = vpop.f32.mrf.mxu2  ;;  %v12677_v25 = vpop.f32.mrf.mxu1  ;;  %v4216_v0 = vpack.c.b16 %v4187_v11, %v4186_v43  ;;  %v3759_v43 = vld [vmem:[#allocation2 + $0x48] sm:$0xf] }
 0x23a   : > { %v2090_v10 = vadd.f32 %v2034_v8, %v12097_v36  ;;  %15827 = vst [vmem:[#allocation27_spill] sm:$0xff] %v12677_v25  ;;  %v3873_v8 = vrot.slane %v3871_v14, 5  ;;  %v4495_v14 = vrot.slane %v3758_v50, 5  ;;  %v3895_v50 = vshll.u32 %v3759_v43, 16 }
 0x23b   : > { %v2329_v28 = vpop.f32.mrf.mxu3 }
 0x23c   : > { %v2380_v33 = vadd.f32 %v2324_v22, %v2090_v10  ;;  %v3877_v22 = vshll.u32 %v3757_v41, 16  ;;  %v4618_v10 = vpack.c.b16 %v4589_v46, %v4588_v47  ;;  %v3874_v4 = vor.u32 %v3873_v8, %v3870_v15  ;;  %v3760_v46 = vld [vmem:[#allocation2 + $0x4c] sm:$0xf] }
 0x23e   : > { %v12674_v36 = vpop.f32.mrf.mxu0  ;;  %v3038_v17 = vadd.f32 %v12629_v59, %v2380_v33  ;;  %v3879_v38 = vrot.slane %v3877_v22, 5  ;;  %v3883_v59 = vrot.slane %v3881_v54, 4  ;;  %v4492_v33 = vrot.slane %v3757_v41, 5 }
 0x23f   : > { %v3875_v54 = vrot.slane %v3874_v4, 4 }
 0x240   : > { %v12680_v19 = vadd.f32 %v12626_v52, %v3038_v17  ;;  %v10446_v17 = vrot.slane %v4408_v27, 9 }
 0x241   : > { %v2036_v24 = vpop.f32.mrf.mxu2  ;;  %v12690_v22 = vpop.f32.mrf.mxu1 }
 0x242   : > { %v2091_v31 = vadd.f32 %v2036_v24, %v12119_v20  ;;  %v3884_v20 = vor.u32 %v3883_v59, %v3879_v38  ;;  %v4493_v15 = vsel %vm12057_vm14, %v10446_v17, %v4492_v33 }
 0x243   : > { %v2331_v9 = vpop.f32.mrf.mxu3  ;;  %v4590_v27 = vunpack.c.l.b16 %v4493_v15 }
 0x244   : > { %v2381_v45 = vadd.f32 %v2326_v48, %v2091_v31  ;;  %v4494_v48 = vrot.slane %v4492_v33, 4  ;;  %v3885_v47 = vrot.slane %v3884_v20, 4  ;;  %v10945_v20 = vld [vmem:[#allocation2 + $0x30] sm:$0xff] }
 0x246   : > { %v12683_v52 = vpop.f32.mrf.mxu0  ;;  %10408 = vmatmul.msk.bf16.gmra.mxu2 %vm1356_vm5, %v10944_v34  ;;  %v12687_v1 = vadd.f32 %v12644_v39, %v2381_v45  ;;  %v3889_v39 = vrot.slane %v3887_v2, 5  ;;  %v4496_v8 = vsel %vm12057_vm14, %v4494_v48, %v4495_v14  ;;  %v3901_v45 = vshll.u32 %v3760_v46, 16 }
 0x247   : > { %v4591_v4 = vunpack.c.l.b16 %v4496_v8  ;;  %v3897_v48 = vrot.slane %v3895_v50, 5 }
 0x248   : > { %10429 = vmatmul.msk.bf16.gmra.mxu3 %vm1356_vm5, %v4216_v0  ;;  %v3890_v59 = vsel %vm11481_vm4, %v3885_v47, %v3889_v39  ;;  %v3903_v14 = vrot.slane %v3901_v45, 5  ;;  %v3761_v47 = vld [vmem:[#allocation2 + $0x50] sm:$0x1]  ;;  %v4499_v39 = vrot.slane %v3760_v46, 5 }
 0x249   : > { %10465 = vmatmul.msk.bf16.gmra.mxu0 %vm1356_vm5, %v4618_v10  ;;  %v2039_v5 = vpop.f32.mrf.mxu2  ;;  %v3905_v10 = vshrl.u32 %v3760_v46, 16  ;;  %v12709_v17 = vpop.f32.mrf.mxu1  ;;  %v4502_v45 = vrot.slane %v3761_v47, 5 }
 0x24a   : > { %v2092_v41 = vadd.f32 %v2039_v5, %v12130_v42  ;;  %v3880_v42 = vsel %vm11481_vm4, %v3875_v54, %v3879_v38  ;;  %v4189_v5 = vunpack.c.l.b16 %v3890_v59  ;;  %15829 = vst [vmem:[#allocation29_spill] sm:$0xff] %v12709_v17  ;;  %v3911_v59 = vshll.u32 %v3761_v47, 16  ;;  %v3764_v17 = vld [vmem:[#allocation2 + $0x5c] sm:$0x1] }
 0x24b   : > { %v2334_v11 = vpop.f32.mrf.mxu3  ;;  %v4188_v2 = vunpack.c.l.b16 %v3880_v42  ;;  %v4501_v50 = vrot.slane %v4499_v39, 4 }
 0x24c   : > { %v2382_v24 = vadd.f32 %v2329_v28, %v2092_v41  ;;  %v3892_v28 = vshrl.u32 %v3759_v43, 16  ;;  %v3907_v41 = vrot.slane %v3905_v10, 4  ;;  %v4409_v43 = vld [vmem:[#allocation2 + $0x48] sm:$0xe]  ;;  %v3763_v10 = vld [vmem:[#allocation2 + $0x58] sm:$0xf] }
 0x24d   : > { %v4217_v15 = vpack.c.b16 %v4189_v5, %v4188_v2  ;;  %v4503_v2 = vsel %vm12057_vm14, %v4501_v50, %v4502_v45 }
 0x24e   : > { %v12696_v31 = vpop.f32.mrf.mxu0  ;;  %v3040_v34 = vadd.f32 %v12657_v30, %v2382_v24  ;;  %v3894_v38 = vrot.slane %v3892_v28, 4  ;;  %v3908_v42 = vor.u32 %v3907_v41, %v3903_v14  ;;  %v10447_v28 = vrot.slane %v4409_v43, 9 }
 0x250   : > { %v12706_v0 = vadd.f32 %v12655_v13, %v3040_v34  ;;  %v4619_v13 = vpack.c.b16 %v4591_v4, %v4590_v27  ;;  %v3898_v8 = vor.u32 %v3897_v48, %v3894_v38  ;;  %v3909_v4 = vrot.slane %v3908_v42, 4 }
 0x251   : > { %v2041_v33 = vpop.f32.mrf.mxu2  ;;  %v3399_v38 = vpop.f32.mrf.mxu1 }
 0x252   : > { %15828 = vst [vmem:[#allocation28_spill] sm:$0xff] %v12706_v0  ;;  %v2093_v30 = vadd.f32 %v2041_v33, %v12148_v23  ;;  %v3762_v33 = vld [vmem:[#allocation2 + $0x54] sm:$0xf]  ;;  %v3899_v27 = vrot.slane %v3898_v8, 4  ;;  %v4593_v8 = vunpack.c.l.b16 %v4503_v2 }
 0x253   : > { %v2336_v24 = vpop.f32.mrf.mxu3  ;;  %v3916_v48 = vshrl.u32 %v3762_v33, 16  ;;  %v3919_v41 = vshll.u32 %v3762_v33, 16  ;;  %v10946_v33 = vld [vmem:[#allocation2 + $0x3c] sm:$0xff] }
 0x254   : > { %v2383_v54 = vadd.f32 %v2331_v9, %v2093_v30  ;;  %v3904_v43 = vsel %vm11481_vm4, %v3899_v27, %v3903_v14  ;;  %v4506_v27 = vrot.slane %v3763_v10, 5 }
 0x256   : > { %v12711_v34 = vpop.f32.mrf.mxu0  ;;  %10409 = vmatmul.msk.bf16.gmra.mxu2 %vm1356_vm5, %v10945_v20  ;;  %v12715_v23 = vadd.f32 %v12674_v36, %v2383_v54  ;;  %v3913_v36 = vrot.slane %v3911_v59, 5  ;;  %v4500_v20 = vsel %vm12057_vm14, %v10447_v28, %v4499_v39  ;;  %v3925_v54 = vshll.u32 %v3763_v10, 16 }
 0x257   : > { %v3918_v59 = vrot.slane %v3916_v48, 4  ;;  %v3921_v28 = vrot.slane %v3919_v41, 5 }
 0x258   : > { %15830 = vst [vmem:[#allocation30_spill] sm:$0xff] %v12715_v23  ;;  %10430 = vmatmul.msk.bf16.gmra.mxu3 %vm1356_vm5, %v4217_v15  ;;  %v4592_v15 = vunpack.c.l.b16 %v4500_v20  ;;  %v3927_v50 = vrot.slane %v3925_v54, 5  ;;  %v3935_v20 = vshll.u32 %v3764_v17, 16 }
 0x259   : > { %10466 = vmatmul.msk.bf16.gmra.mxu0 %vm1356_vm5, %v4619_v13  ;;  %v2044_v9 = vpop.f32.mrf.mxu2  ;;  %v12741_v54 = vpop.f32.mrf.mxu1 }
 0x25a   : > { %v2094_v46 = vadd.f32 %v2044_v9, %v12159_v58  ;;  %v3929_v58 = vshrl.u32 %v3763_v10, 16  ;;  %v15832_v9 = vld [vmem:[#allocation14_spill] sm:$0xff]  ;;  %15834 = vst [vmem:[#allocation32_spill] sm:$0xff] %v12741_v54  ;;  %v4509_v10 = vrot.slane %v3764_v17, 5  ;;  %v3767_v54 = vld [vmem:[#allocation2 + $0x68] sm:$0x1] }
 0x25b   : > { %v2339_v5 = vpop.f32.mrf.mxu3 }
 0x25c   : > { %v2384_v30 = vadd.f32 %v2334_v11, %v2094_v46  ;;  %v3914_v11 = vsel %vm11481_vm4, %v3909_v4, %v3913_v36  ;;  %v3931_v45 = vrot.slane %v3929_v58, 4  ;;  %v4620_v4 = vpack.c.b16 %v4593_v8, %v4592_v15  ;;  %v4410_v36 = vld [vmem:[#allocation2 + $0x54] sm:$0xe] }
 0x25d   : > { %v10448_v58 = vrot.slane %v4410_v36, 9  ;;  %v3937_v8 = vrot.slane %v3935_v20, 5 }
 0x25e   : > { %v12724_v47 = vpop.f32.mrf.mxu0  ;;  %v3042_v13 = vadd.f32 %v12683_v52, %v2384_v30  ;;  %v4190_v52 = vunpack.c.l.b16 %v3904_v43  ;;  %v4191_v30 = vunpack.c.l.b16 %v3914_v11  ;;  %v4508_v43 = vrot.slane %v4506_v27, 4 }
 0x260   : > { %v12732_v39 = vadd.f32 %v12690_v22, %v3042_v13  ;;  %v3922_v22 = vor.u32 %v3921_v28, %v3918_v59  ;;  %v3932_v13 = vor.u32 %v3931_v45, %v3927_v50  ;;  %v4218_v41 = vpack.c.b16 %v4191_v30, %v4190_v52  ;;  %v3765_v28 = vld [vmem:[#allocation2 + $0x60] sm:$0xf]  ;;  %v3766_v45 = vld [vmem:[#allocation2 + $0x64] sm:$0xf] }
 0x261   : > { %v2046_v42 = vpop.f32.mrf.mxu2  ;;  %v3940_v30 = vshrl.u32 %v3765_v28, 16  ;;  %v3943_v36 = vshll.u32 %v3765_v28, 16 }
 0x262   : > { %15831 = vst [vmem:[#allocation31_spill] sm:$0xff] %v12732_v39  ;;  %v2095_v46 = vadd.f32 %v2046_v42, %v15832_v9  ;;  %v3923_v11 = vrot.slane %v3922_v22, 4  ;;  %v3933_v15 = vrot.slane %v3932_v13, 4  ;;  %v15835_v42 = vld [vmem:[#allocation15_spill] sm:$0xff]  ;;  %v4507_v9 = vsel %vm12057_vm14, %v10448_v58, %v4506_v27 }
 0x263   : > { %v2341_v25 = vpop.f32.mrf.mxu3  ;;  %v3953_v22 = vshrl.u32 %v3766_v45, 16  ;;  %v4594_v27 = vunpack.c.l.b16 %v4507_v9 }
 0x264   : > { %v2385_v14 = vadd.f32 %v2336_v24, %v2095_v46  ;;  %v3928_v17 = vsel %vm11481_vm4, %v3923_v11, %v3927_v50  ;;  %v3938_v52 = vsel %vm11481_vm4, %v3933_v15, %v3937_v8  ;;  %v3942_v50 = vrot.slane %v3940_v30, 4  ;;  %v10947_v15 = vld [vmem:[#allocation2 + $0x48] sm:$0xff] }
 0x265   : > { %v4192_v58 = vunpack.c.l.b16 %v3928_v17  ;;  %v3945_v8 = vrot.slane %v3943_v36, 5  ;;  %v3959_v30 = vshll.u32 %v3767_v54, 16 }
 0x266   : > { %v12735_v2 = vpop.f32.mrf.mxu0  ;;  %10410 = vmatmul.msk.bf16.gmra.mxu2 %vm1356_vm5, %v10946_v33  ;;  %v12739_v48 = vadd.f32 %v12696_v31, %v2385_v14  ;;  %v4510_v33 = vsel %vm12057_vm14, %v4508_v43, %v4509_v10  ;;  %v4193_v43 = vunpack.c.l.b16 %v3938_v52  ;;  %v15837_v10 = vld [vmem:[#allocation16_spill] sm:$0xff] }
 0x267   : > { %v3946_v17 = vor.u32 %v3945_v8, %v3942_v50  ;;  %v3768_v50 = vld [vmem:[#allocation2 + $0x6c] sm:$0xf] }
 0x268   : > { %15833 = vst [vmem:[#allocation14_spill] sm:$0xff] %v12739_v48  ;;  %10431 = vmatmul.msk.bf16.gmra.mxu3 %vm1356_vm5, %v4218_v41  ;;  %v4595_v41 = vunpack.c.l.b16 %v4510_v33  ;;  %v4219_v48 = vpack.c.b16 %v4193_v43, %v4192_v58  ;;  %v4411_v33 = vld [vmem:[#allocation2 + $0x60] sm:$0xe]  ;;  %v3961_v58 = vrot.slane %v3959_v30, 5 }
 0x269   : > { %10467 = vmatmul.msk.bf16.gmra.mxu0 %vm1356_vm5, %v4620_v4  ;;  %v2049_v24 = vpop.f32.mrf.mxu2 }
 0x26a   : > { %v2096_v59 = vadd.f32 %v2049_v24, %v15835_v42  ;;  %v3404_v24 = vpop.f32.mrf.mxu1 }
 0x26b   : > { %v2344_v46 = vpop.f32.mrf.mxu3 }
 0x26c   : > { %v2386_v31 = vadd.f32 %v2339_v5, %v2096_v59  ;;  %v3949_v5 = vshll.u32 %v3766_v45, 16  ;;  %v3955_v59 = vrot.slane %v3953_v22, 4  ;;  %v4516_v22 = vrot.slane %v3767_v54, 5 }
 0x26e   : > { %v12754_v14 = vpop.f32.mrf.mxu0  ;;  %v3044_v4 = vadd.f32 %v12711_v34, %v2386_v31  ;;  %v3951_v42 = vrot.slane %v3949_v5, 5  ;;  %v4621_v31 = vpack.c.b16 %v4595_v41, %v4594_v27  ;;  %v10449_v5 = vrot.slane %v4411_v33, 9  ;;  %v15839_v27 = vld [vmem:[#allocation17_spill] sm:$0xff] }
 0x270   : > { %v12757_v13 = vadd.f32 %v3399_v38, %v3044_v4  ;;  %v4513_v38 = vrot.slane %v3766_v45, 5  ;;  %v3956_v52 = vor.u32 %v3955_v59, %v3951_v42  ;;  %v3947_v45 = vrot.slane %v3946_v17, 4 }
 0x271   : > { %v2051_v20 = vpop.f32.mrf.mxu2 }
 0x272   : > { %15836 = vst [vmem:[#allocation15_spill] sm:$0xff] %v12757_v13  ;;  %v2097_v11 = vadd.f32 %v2051_v20, %v15837_v10  ;;  %v3957_v41 = vrot.slane %v3956_v52, 4  ;;  %v12769_v43 = vpop.f32.mrf.mxu1  ;;  %v3769_v10 = vld [vmem:[#allocation2 + $0x70] sm:$0xf] }
 0x273   : > { %v2346_v28 = vpop.f32.mrf.mxu3  ;;  %15840 = vst [vmem:[#allocation17_spill] sm:$0xff] %v12769_v43  ;;  %v3973_v33 = vshll.u32 %v3769_v10, 16  ;;  %v3977_v17 = vshrl.u32 %v3769_v10, 16 }
 0x274   : > { %v2387_v34 = vadd.f32 %v2341_v25, %v2097_v11  ;;  %v4515_v25 = vrot.slane %v4513_v38, 4 }
 0x276   : > { %v12760_v4 = vpop.f32.mrf.mxu0  ;;  %10411 = vmatmul.msk.bf16.gmra.mxu2 %vm1356_vm5, %v10947_v15  ;;  %v12764_v9 = vadd.f32 %v12724_v47, %v2387_v34  ;;  %v4514_v15 = vsel %vm12057_vm14, %v10449_v5, %v4513_v38  ;;  %v4517_v59 = vsel %vm12057_vm14, %v4515_v25, %v4516_v22  ;;  %v3962_v34 = vsel %vm11481_vm4, %v3957_v41, %v3961_v58  ;;  %v15842_v5 = vld [vmem:[#allocation18_spill] sm:$0xff]  ;;  %v3770_v41 = vld [vmem:[#allocation2 + $0x74] sm:$0x1] }
 0x277   : > { %v4596_v30 = vunpack.c.l.b16 %v4514_v15  ;;  %v4195_v25 = vunpack.c.l.b16 %v3962_v34 }
 0x278   : > { %15838 = vst [vmem:[#allocation16_spill] sm:$0xff] %v12764_v9  ;;  %10432 = vmatmul.msk.bf16.gmra.mxu3 %vm1356_vm5, %v4219_v48  ;;  %v3952_v48 = vsel %vm11481_vm4, %v3947_v45, %v3951_v42  ;;  %v3975_v42 = vrot.slane %v3973_v33, 5  ;;  %v3979_v45 = vrot.slane %v3977_v17, 4  ;;  %v3772_v33 = vld [vmem:[#allocation2 + $0x7c] sm:$0xf]  ;;  %v15844_v17 = vld [vmem:[#allocation19_spill] sm:$0xff] }
 0x279   : > { %10468 = vmatmul.msk.bf16.gmra.mxu0 %vm1356_vm5, %v4621_v31  ;;  %v2054_v36 = vpop.f32.mrf.mxu2  ;;  %v3967_v31 = vshll.u32 %v3768_v50, 16 }
 0x27a   : > { %v2098_v20 = vadd.f32 %v2054_v36, %v15839_v27  ;;  %v4597_v36 = vunpack.c.l.b16 %v4517_v59  ;;  %v10948_v27 = vld [vmem:[#allocation2 + $0x54] sm:$0xff]  ;;  %v3409_v9 = vpop.f32.mrf.mxu1  ;;  %v4412_v59 = vld [vmem:[#allocation2 + $0x6c] sm:$0xe]  ;;  %v3980_v34 = vor.u32 %v3979_v45, %v3975_v42 }
 0x27b   : > { %v2349_v11 = vpop.f32.mrf.mxu3 }
 0x27c   : > { %v2388_v47 = vadd.f32 %v2344_v46, %v2098_v20  ;;  %v3964_v46 = vshrl.u32 %v3768_v50, 16  ;;  %v4194_v20 = vunpack.c.l.b16 %v3952_v48  ;;  %v4622_v50 = vpack.c.b16 %v4597_v36, %v4596_v30 }
 0x27d   : > { %v10450_v30 = vrot.slane %v4412_v59, 9 }
 0x27e   : > { %v12773_v8 = vpop.f32.mrf.mxu0  ;;  %v3046_v54 = vadd.f32 %v12735_v2, %v2388_v47  ;;  %v3966_v22 = vrot.slane %v3964_v46, 4  ;;  %v3969_v47 = vrot.slane %v3967_v31, 5  ;;  %v4220_v15 = vpack.c.b16 %v4195_v25, %v4194_v20  ;;  %v3771_v31 = vld [vmem:[#allocation2 + $0x78] sm:$0xf] }
 0x27f   : > { %v3983_v46 = vshll.u32 %v3770_v41, 16  ;;  %v3991_v20 = vshll.u32 %v3771_v31, 16  ;;  %v3997_v25 = vshll.u32 %v3772_v33, 16 }
 0x280   : > { %v12782_v52 = vadd.f32 %v3404_v24, %v3046_v54  ;;  %v4520_v54 = vrot.slane %v3769_v10, 5  ;;  %v3970_v48 = vor.u32 %v3969_v47, %v3966_v22  ;;  %v3988_v10 = vshrl.u32 %v3771_v31, 16 }
 0x281   : > { %v2056_v38 = vpop.f32.mrf.mxu2  ;;  %v4001_v22 = vshrl.u32 %v3772_v33, 16  ;;  %v3999_v31 = vrot.slane %v3997_v25, 5 }
 0x282   : > { %15841 = vst [vmem:[#allocation33_spill] sm:$0xff] %v12782_v52  ;;  %v2099_v2 = vadd.f32 %v2056_v38, %v15842_v5  ;;  %v4522_v36 = vrot.slane %v4520_v54, 4  ;;  %v4523_v5 = vrot.slane %v3770_v41, 5  ;;  %v12801_v41 = vpop.f32.mrf.mxu1  ;;  %v4527_v52 = vrot.slane %v3772_v33, 5 }
 0x283   : > { %v2351_v58 = vpop.f32.mrf.mxu3  ;;  %15845 = vst [vmem:[#allocation19_spill] sm:$0xff] %v12801_v41 }
 0x284   : > { %v2389_v43 = vadd.f32 %v2346_v28, %v2099_v2  ;;  %v3985_v2 = vrot.slane %v3983_v46, 5  ;;  %v3993_v46 = vrot.slane %v3991_v20, 5 }
 0x286   : > { %v12785_v13 = vpop.f32.mrf.mxu0  ;;  %10412 = vmatmul.msk.bf16.gmra.mxu2 %vm1356_vm5, %v10948_v27  ;;  %v12789_v24 = vadd.f32 %v12754_v14, %v2389_v43  ;;  %v3971_v14 = vrot.slane %v3970_v48, 4  ;;  %v3981_v43 = vrot.slane %v3980_v34, 4  ;;  %v3990_v48 = vrot.slane %v3988_v10, 4 }
 0x288   : > { %15843 = vst [vmem:[#allocation18_spill] sm:$0xff] %v12789_v24  ;;  %10433 = vmatmul.msk.bf16.gmra.mxu3 %vm1356_vm5, %v4220_v15  ;;  %v4524_v15 = vsel %vm12057_vm14, %v4522_v36, %v4523_v5  ;;  %v3976_v59 = vsel %vm11481_vm4, %v3971_v14, %v3975_v42  ;;  %v10949_v5 = vld [vmem:[#allocation2 + $0x60] sm:$0xff]  ;;  %v4413_v14 = vld [vmem:[#allocation2 + $0x78] sm:$0xe]  ;;  %v3994_v39 = vor.u32 %v3993_v46, %v3990_v48 }
 0x289   : > { %10469 = vmatmul.msk.bf16.gmra.mxu0 %vm1356_vm5, %v4622_v50  ;;  %v2059_v28 = vpop.f32.mrf.mxu2  ;;  %v4196_v41 = vunpack.c.l.b16 %v3976_v59  ;;  %v15849_v46 = vld [vmem:[#allocation21_spill] sm:$0xff] }
 0x28a   : > { %v2100_v38 = vadd.f32 %v2059_v28, %v15844_v17  ;;  %v4521_v28 = vsel %vm12057_vm14, %v10450_v30, %v4520_v54  ;;  %v4599_v54 = vunpack.c.l.b16 %v4524_v15  ;;  %v3773_v30 = vld [vmem:[#allocation2 + $0x80] sm:$0x1]  ;;  %v3995_v59 = vrot.slane %v3994_v39, 4  ;;  %v3414_v48 = vpop.f32.mrf.mxu1 }
 0x28b   : > { %v2354_v47 = vpop.f32.mrf.mxu3  ;;  %v4530_v15 = vrot.slane %v3773_v30, 5 }
 0x28c   : > { %v2390_v27 = vadd.f32 %v2349_v11, %v2100_v38  ;;  %v3986_v11 = vsel %vm11481_vm4, %v3981_v43, %v3985_v2  ;;  %v4598_v38 = vunpack.c.l.b16 %v4521_v28  ;;  %v4007_v2 = vshll.u32 %v3773_v30, 16 }
 0x28d   : > { %v4197_v24 = vunpack.c.l.b16 %v3986_v11  ;;  %v4529_v28 = vrot.slane %v4527_v52, 4  ;;  %v4000_v39 = vsel %vm11481_vm4, %v3995_v59, %v3999_v31 }
 0x28e   : > { %v12794_v45 = vpop.f32.mrf.mxu0  ;;  %v3048_v50 = vadd.f32 %v12760_v4, %v2390_v27  ;;  %v4003_v4 = vrot.slane %v4001_v22, 4  ;;  %v15847_v27 = vld [vmem:[#allocation20_spill] sm:$0xff]  ;;  %v4623_v10 = vpack.c.b16 %v4599_v54, %v4598_v38  ;;  %v3774_v38 = vld [vmem:[#allocation2 + $0x84] sm:$0xf] }
 0x28f   : > { %v4221_v22 = vpack.c.b16 %v4197_v24, %v4196_v41  ;;  %v4531_v41 = vsel %vm12057_vm14, %v4529_v28, %v4530_v15 }
 0x290   : > { %v12807_v34 = vadd.f32 %v3409_v9, %v3048_v50  ;;  %v4004_v43 = vor.u32 %v4003_v4, %v3999_v31  ;;  %v10451_v50 = vrot.slane %v4413_v14, 9  ;;  %v4414_v31 = vld [vmem:[#allocation2 + $0x84] sm:$0xe] }
 0x291   : > { %v2061_v17 = vpop.f32.mrf.mxu2 }
 0x292   : > { %15846 = vst [vmem:[#allocation34_spill] sm:$0xff] %v12807_v34  ;;  %v2101_v36 = vadd.f32 %v2061_v17, %v15847_v27  ;;  %v4005_v33 = vrot.slane %v4004_v43, 4  ;;  %v3775_v17 = vld [vmem:[#allocation2 + $0x88] sm:$0xf]  ;;  %v4012_v27 = vshrl.u32 %v3774_v38, 16 }
 0x293   : > { %v2356_v9 = vpop.f32.mrf.mxu3 }
 0x294   : > { %v2391_v42 = vadd.f32 %v2351_v58, %v2101_v36  ;;  %v4009_v58 = vrot.slane %v4007_v2, 5  ;;  %v4015_v36 = vshll.u32 %v3774_v38, 16  ;;  %v4601_v2 = vunpack.c.l.b16 %v4531_v41  ;;  %v3776_v38 = vld [vmem:[#allocation2 + $0x8c] sm:$0x1] }
 0x295   : > { %v4014_v28 = vrot.slane %v4012_v27, 4 }
 0x296   : > { %v12810_v20 = vpop.f32.mrf.mxu0  ;;  %10413 = vmatmul.msk.bf16.gmra.mxu2 %vm1356_vm5, %v10949_v5  ;;  %v12814_v25 = vadd.f32 %v12773_v8, %v2391_v42  ;;  %v4528_v8 = vsel %vm12057_vm14, %v10451_v50, %v4527_v52  ;;  %v4010_v54 = vsel %vm11481_vm4, %v4005_v33, %v4009_v58  ;;  %v4021_v5 = vshll.u32 %v3775_v17, 16  ;;  %v15851_v58 = vld [vmem:[#allocation22_spill] sm:$0xff] }
 0x297   : > { %v4025_v42 = vshrl.u32 %v3775_v17, 16  ;;  %v4600_v52 = vunpack.c.l.b16 %v4528_v8  ;;  %v4017_v15 = vrot.slane %v4015_v36, 5  ;;  %v10452_v8 = vrot.slane %v4414_v31, 9  ;;  %v5340_v36 = vld [vmem:[#allocation3] sm:$0xf] }
 0x298   : > { %15848 = vst [vmem:[#allocation20_spill] sm:$0xff] %v12814_v25  ;;  %10434 = vmatmul.msk.bf16.gmra.mxu3 %vm1356_vm5, %v4221_v22  ;;  %v4199_v22 = vunpack.c.l.b16 %v4010_v54  ;;  %v12832_v59 = vrot.slane %v4021_v5, 5  ;;  %v5394_v31 = vshll.u32 %v5340_v36, 16 }
 0x299   : > { %10470 = vmatmul.msk.bf16.gmra.mxu0 %vm1356_vm5, %v4623_v10  ;;  %v2064_v11 = vpop.f32.mrf.mxu2  ;;  %v4198_v10 = vunpack.c.l.b16 %v4000_v39  ;;  %v4027_v33 = vrot.slane %v4025_v42, 4  ;;  %v4624_v41 = vpack.c.b16 %v4601_v2, %v4600_v52  ;;  %v4018_v54 = vor.u32 %v4017_v15, %v4014_v28 }
 0x29a   : > { %v2102_v4 = vadd.f32 %v2064_v11, %v15849_v46  ;;  %v10950_v46 = vld [vmem:[#allocation2 + $0x6c] sm:$0xff] }
 0x29b   : > { %v2359_v30 = vpop.f32.mrf.mxu3  ;;  %v4222_v39 = vpack.c.b16 %v4199_v22, %v4198_v10  ;;  %v4028_v27 = vor.u32 %v4027_v33, %v12832_v59  ;;  %v4537_v10 = vrot.slane %v3776_v38, 5  ;;  %v3777_v22 = vld [vmem:[#allocation2 + $0x90] sm:$0xf]  ;;  %v4019_v33 = vrot.slane %v4018_v54, 4 }
 0x29c   : > { %v2392_v24 = vadd.f32 %v2354_v47, %v2102_v4  ;;  %v12835_v4 = vpop.f32.mrf.mxu1  ;;  %v4039_v54 = vshll.u32 %v3777_v22, 16 }
 0x29d   : > { %15852 = vst [vmem:[#allocation22_spill] sm:$0xff] %v12835_v4  ;;  %v15854_v4 = vld [vmem:[#allocation23_spill] sm:$0xff] }
 0x29e   : > { %v12827_v14 = vpop.f32.mrf.mxu0  ;;  %v3050_v43 = vadd.f32 %v12785_v13, %v2392_v24 }
 0x2a0   : > { %v12830_v47 = vadd.f32 %v3414_v48, %v3050_v43  ;;  %v4534_v48 = vrot.slane %v3775_v17, 5  ;;  %v4031_v43 = vshll.u32 %v3776_v38, 16 }
 0x2a1   : > { %v2066_v50 = vpop.f32.mrf.mxu2 }
 0x2a2   : > { %15850 = vst [vmem:[#allocation21_spill] sm:$0xff] %v12830_v47  ;;  %v2103_v11 = vadd.f32 %v2066_v50, %v15851_v58  ;;  %v5341_v50 = vld [vmem:[#allocation3 + $0x4] sm:$0xf]  ;;  %v4535_v52 = vsel %vm12057_vm14, %v10452_v8, %v4534_v48  ;;  %v4536_v2 = vrot.slane %v4534_v48, 4  ;;  %v3778_v8 = vld [vmem:[#allocation2 + $0x94] sm:$0xf] }
 0x2a3   : > { %v12837_v24 = vpop.f32.mrf.mxu3  ;;  %v5400_v17 = vshll.u32 %v5341_v50, 16  ;;  %v5404_v58 = vshrl.u32 %v5341_v50, 16  ;;  %v4033_v50 = vrot.slane %v4031_v43, 5  ;;  %v4036_v48 = vshrl.u32 %v3777_v22, 16 }
 0x2a4   : > { %v2393_v13 = vadd.f32 %v2356_v9, %v2103_v11  ;;  %v5391_v9 = vshrl.u32 %v5340_v36, 16  ;;  %v5374_v11 = vld [vmem:[#allocation3 + $0x8] sm:$0x1]  ;;  %v4029_v36 = vrot.slane %v4028_v27, 4 }
 0x2a5   : > { %v5410_v47 = vshll.u32 %v5374_v11, 16 }
 0x2a6   : > { %v12840_v5 = vpop.f32.mrf.mxu0  ;;  %10414 = vmatmul.msk.bf16.gmra.mxu2 %vm1356_vm5, %v10950_v46  ;;  %v12844_v42 = vadd.f32 %v12794_v45, %v2393_v13  ;;  %v5393_v28 = vrot.slane %v5391_v9, 4  ;;  %v5396_v45 = vrot.slane %v5394_v31, 5  ;;  %v5402_v46 = vrot.slane %v5400_v17, 5  ;;  %v3419_v17 = vpop.f32.mrf.mxu1 }
 0x2a7   : > { %v5406_v13 = vrot.slane %v5404_v58, 4  ;;  %v5412_v34 = vrot.slane %v5410_v47, 5  ;;  %v4602_v58 = vunpack.c.l.b16 %v4535_v52 }
 0x2a8   : > { %15853 = vst [vmem:[#allocation35_spill] sm:$0xff] %v12844_v42  ;;  %10435 = vmatmul.msk.bf16.gmra.mxu3 %vm1356_vm5, %v4222_v39  ;;  %v5397_v38 = vor.u32 %v5396_v45, %v5393_v28 }
 0x2a9   : > { %10471 = vmatmul.msk.bf16.gmra.mxu0 %vm1356_vm5, %v4624_v41  ;;  %v2069_v15 = vpop.f32.mrf.mxu2  ;;  %v5407_v25 = vor.u32 %v5406_v13, %v5402_v46  ;;  %v4538_v41 = vsel %vm12057_vm14, %v4536_v2, %v4537_v10  ;;  %v4049_v2 = vshrl.u32 %v3778_v8, 16  ;;  %v4038_v10 = vrot.slane %v4036_v48, 4 }
 0x2aa   : > { %v2104_v42 = vadd.f32 %v2069_v15, %v15854_v4  ;;  %v4024_v4 = vsel %vm11481_vm4, %v4019_v33, %v12832_v59  ;;  %v5398_v39 = vrot.slane %v5397_v38, 4  ;;  %v4603_v47 = vunpack.c.l.b16 %v4538_v41 }
 0x2ab   : > { %v12853_v31 = vpop.f32.mrf.mxu3  ;;  %v5408_v27 = vrot.slane %v5407_v25, 4  ;;  %v4041_v25 = vrot.slane %v4039_v54, 5  ;;  %v4200_v45 = vunpack.c.l.b16 %v4024_v4  ;;  %v4051_v48 = vrot.slane %v4049_v2, 4 }
 0x2ac   : > { %v2394_v9 = vadd.f32 %v2359_v30, %v2104_v42  ;;  %v4034_v30 = vsel %vm11481_vm4, %v4029_v36, %v4033_v50  ;;  %v4045_v42 = vshll.u32 %v3778_v8, 16  ;;  %v5403_v52 = vsel %vm11481_vm4, %v5398_v39, %v5402_v46  ;;  %v4415_v36 = vld [vmem:[#allocation2 + $0x90] sm:$0xe]  ;;  %v12872_v46 = vld [vmem:[#allocation2 + $0xa0] sm:$0xf] }
 0x2ad   : > { %v5413_v22 = vsel %vm11481_vm4, %v5408_v27, %v5412_v34  ;;  %v5777_v15 = vunpack.c.l.b16 %v5403_v52  ;;  %v4201_v13 = vunpack.c.l.b16 %v4034_v30  ;;  %v15856_v50 = vld [vmem:[#allocation24_spill] sm:$0xff]  ;;  %v3780_v39 = vld [vmem:[#allocation2 + $0x9c] sm:$0xf]  ;;  %v3779_v34 = vld [vmem:[#allocation2 + $0x98] sm:$0x1]  ;;  %v4625_v27 = vpack.c.b16 %v4603_v47, %v4602_v58 }
 0x2ae   : > { %v12858_v43 = vpop.f32.mrf.mxu0  ;;  %v3052_v28 = vadd.f32 %v12810_v20, %v2394_v9  ;;  %v5778_v33 = vunpack.c.l.b16 %v5413_v22  ;;  %v10951_v20 = vld [vmem:[#allocation2 + $0x78] sm:$0xff]  ;;  %v12870_v9 = vrot.slane %v4045_v42, 5  ;;  %v4042_v52 = vor.u32 %v4041_v25, %v4038_v10 }
 0x2af   : > { %v4060_v30 = vshrl.u32 %v3780_v39, 16  ;;  %v4063_v22 = vshll.u32 %v3780_v39, 16  ;;  %v4069_v42 = vshll.u32 %v12872_v46, 16  ;;  %v4073_v2 = vshrl.u32 %v12872_v46, 16 }
 0x2b0   : > { %v12867_v59 = vadd.f32 %v3419_v17, %v3052_v28  ;;  %v5809_v41 = vpack.c.b16 %v5778_v33, %v5777_v15  ;;  %v4541_v17 = vrot.slane %v3778_v8, 5  ;;  %v10453_v28 = vrot.slane %v4415_v36, 9 }
 0x2b1   : > { %v2071_v11 = vpop.f32.mrf.mxu2  ;;  %v4052_v58 = vor.u32 %v4051_v48, %v12870_v9  ;;  %v4055_v47 = vshll.u32 %v3779_v34, 16  ;;  %v4544_v25 = vrot.slane %v3779_v34, 5  ;;  %v4416_v34 = vld [vmem:[#allocation2 + $0x9c] sm:$0xe] }
 0x2b2   : > { %15855 = vst [vmem:[#allocation23_spill] sm:$0xff] %v12867_v59  ;;  %v2105_v38 = vadd.f32 %v2071_v11, %v15856_v50  ;;  %10483 = vmatmul.msk.bf16.vlgmr.msra.gmra.mxu1 %vm1356_vm5, %v5809_v41  ;;  %v4543_v10 = vrot.slane %v4541_v17, 4  ;;  %v12889_v33 = vsel %vm12057_vm14, %v10453_v28, %v4541_v17  ;;  %v4043_v11 = vrot.slane %v4042_v52, 4  ;;  %v3782_v41 = vld [vmem:[#allocation2 + $0xa4] sm:$0x1] }
 0x2b3   : > { %v12876_v4 = vpop.f32.mrf.mxu3  ;;  %v4062_v50 = vrot.slane %v4060_v30, 4  ;;  %v4057_v48 = vrot.slane %v4055_v47, 5  ;;  %v4548_v17 = vrot.slane %v12872_v46, 5  ;;  %v10978_v30 = vld [vmem:[#allocation9] sm:$0xff] }
 0x2b4   : > { %v2395_v54 = vadd.f32 %v12837_v24, %v2105_v38  ;;  %v4223_v24 = vpack.c.b16 %v4201_v13, %v4200_v45  ;;  %v4065_v38 = vrot.slane %v4063_v22, 5  ;;  %v4053_v13 = vrot.slane %v4052_v58, 4  ;;  %v10980_v22 = vld [vmem:[#allocation9 + $0x10] sm:$0xff]  ;;  %6109 = vmatpush.bf16.msrb.mxu2 %v10978_v30 }
 0x2b5   : > { %v4545_v39 = vsel %vm12057_vm14, %v4543_v10, %v4544_v25  ;;  %v4048_v52 = vsel %vm11481_vm4, %v4043_v11, %v12870_v9  ;;  %v10454_v25 = vrot.slane %v4416_v34, 9  ;;  %6463 = vmatpush.bf16.msrb.mxu3 %v10980_v22  ;;  %v4550_v9 = vrot.slane %v4548_v17, 4  ;;  %v10952_v30 = vld [vmem:[#allocation2 + $0x84] sm:$0xff] }
 0x2b6   : > { %v12880_v15 = vpop.f32.mrf.mxu0  ;;  %10415 = vmatmul.msk.bf16.gmra.mxu2 %vm1356_vm5, %v10951_v20  ;;  %v12884_v8 = vadd.f32 %v12827_v14, %v2395_v54  ;;  %v12892_v20 = vrot.slane %v4069_v42, 5  ;;  %v4075_v14 = vrot.slane %v4073_v2, 4  ;;  %v4066_v42 = vor.u32 %v4065_v38, %v4062_v50  ;;  %v4417_v22 = vld [vmem:[#allocation2 + $0xa8] sm:$0xe] }
 0x2b7   : > { %v4079_v2 = vshll.u32 %v3782_v41, 16  ;;  %v4605_v47 = vunpack.c.l.b16 %v4545_v39  ;;  %v4058_v10 = vsel %vm11481_vm4, %v4053_v13, %v4057_v48  ;;  %v4551_v11 = vrot.slane %v3782_v41, 5 }
 0x2b8   : > { %15857 = vst [vmem:[#allocation24_spill] sm:$0xff] %v12884_v8  ;;  %10436 = vmatmul.msk.bf16.gmra.mxu3 %vm1356_vm5, %v4223_v24  ;;  %v4076_v46 = vor.u32 %v4075_v14, %v12892_v20  ;;  %v4202_v14 = vunpack.c.l.b16 %v4048_v52  ;;  %v4203_v39 = vunpack.c.l.b16 %v4058_v10  ;;  %v4067_v8 = vrot.slane %v4066_v42, 4 }
 0x2b9   : > { %10472 = vmatmul.msk.bf16.gmra.mxu0 %vm1356_vm5, %v4625_v27  ;;  %v3635_v36 = vpop.f32.mrf.mxu2  ;;  %v12903_v27 = vld [vmem:[%s15788_s2] ss:$0 sm:$0xff]  ;;  %v4081_v13 = vrot.slane %v4079_v2, 5  ;;  %v4552_v52 = vsel %vm12057_vm14, %v4550_v9, %v4551_v11 }
 0x2ba   : > { %v3715_v45 = vadd.f32 %v3635_v36, %v12366_v57  ;;  %v4604_v57 = vunpack.c.l.b16 %v12889_v33  ;;  %v3783_v33 = vld [vmem:[#allocation2 + $0xa8] sm:$0xf]  ;;  %v4077_v59 = vrot.slane %v4076_v46, 4  ;;  %v3785_v46 = vld [vmem:[#allocation2 + $0xb0] sm:$0x1] }
 0x2bb   : > { %v12906_v28 = vpop.f32.mrf.mxu3  ;;  %v4084_v36 = vshrl.u32 %v3783_v33, 16  ;;  %v4087_v50 = vshll.u32 %v3783_v33, 16 }
 0x2bc   : > { %v4373_v54 = vadd.f32 %v12853_v31, %v3715_v45  ;;  %v12912_v31 = vld [vmem:[#allocation2 + $0xac] sm:$0xf]  ;;  %v4082_v11 = vsel %vm11481_vm4, %v4077_v59, %v4081_v13  ;;  %v4103_v13 = vshll.u32 %v3785_v46, 16 }
 0x2bd   : > { %v4093_v45 = vshll.u32 %v12912_v31, 16  ;;  %v4086_v41 = vrot.slane %v4084_v36, 4  ;;  %v4089_v23 = vrot.slane %v4087_v50, 5  ;;  %v4555_v33 = vrot.slane %v12912_v31, 5 }
 0x2be   : > { %v4775_v24 = vadd.f32 %v12840_v5, %v4373_v54  ;;  %v12915_v58 = vpop.f32.mrf.mxu0  ;;  %v4097_v5 = vshrl.u32 %v12912_v31, 16  ;;  %v4224_v36 = vpack.c.b16 %v4203_v39, %v4202_v14  ;;  %v4558_v14 = vrot.slane %v3785_v46, 5  ;;  %v5228_v39 = vld [vmem:[#allocation3 + $0xc] sm:$0xf] }
 0x2bf   : > { %v12929_v2 = vrot.slane %v4093_v45, 5  ;;  %v4090_v45 = vor.u32 %v4089_v23, %v4086_v41  ;;  %v12949_v59 = vunpack.c.l.b16 %v4082_v11 }
 0x2c0   : > { %v4811_v38 = vadd.f32 %v12903_v27, %v4775_v24  ;;  %v4549_v24 = vsel %vm12057_vm14, %v10454_v25, %v4548_v17  ;;  %v4099_v10 = vrot.slane %v4097_v5, 4  ;;  %v4072_v17 = vsel %vm11481_vm4, %v4067_v8, %v12892_v20 }
 0x2c1   : > { %v3637_v54 = vpop.f32.mrf.mxu2  ;;  %v10455_v25 = vrot.slane %v4417_v22, 9  ;;  %v4606_v5 = vunpack.c.l.b16 %v4549_v24  ;;  %v4091_v41 = vrot.slane %v4090_v45, 4  ;;  %v12960_v24 = vadd.f32 %v12480_v6, %v12562_v35  ;;  %v3786_v45 = vld [vmem:[#allocation2 + $0xb4] sm:$0xf] }
 0x2c2   : > { %v4843_v48 = vmax.f32 %v4811_v38, 0.0  ;;  %v3716_v34 = vadd.f32 %v3637_v54, %v12377_v12  ;;  %v4626_v38 = vpack.c.b16 %v4605_v47, %v4604_v57  ;;  %v4607_v57 = vunpack.c.l.b16 %v4552_v52 }
 0x2c3   : > { %v12931_v12 = vpop.f32.mrf.mxu3  ;;  %v4557_v47 = vrot.slane %v4555_v33, 4  ;;  %v12953_v23 = vsel %vm12057_vm14, %v10455_v25, %v4555_v33  ;;  %v3787_v25 = vld [vmem:[#allocation2 + $0xb8] sm:$0xf]  ;;  %v4096_v11 = vsel %vm11481_vm4, %v4091_v41, %v12929_v2 }
 0x2c4   : > { %v4875_v0 = vpack.c.bf16 %v4843_v48, %v4843_v48  ;;  %v4374_v42 = vadd.f32 %v12876_v4, %v3716_v34  ;;  %v10997_v4 = vld [vmem:[#allocation9 + $0x18] sm:$0xff]  ;;  %v12947_v34 = vunpack.c.l.b16 %v4072_v17  ;;  %v4105_v17 = vrot.slane %v4103_v13, 5 }
 0x2c5   : > { %6753 = vmatpush.bf16.msrb.mxu0 %v10997_v4  ;;  %v12964_v52 = vsel %vm12057_vm14, %v4557_v47, %v4558_v14  ;;  %v4108_v47 = vshrl.u32 %v3786_v45, 16  ;;  %v4111_v14 = vshll.u32 %v3786_v45, 16 }
 0x2c6   : > { %v4908_v50 = vshrl.u32 %v4875_v0, 16  ;;  %v4776_v9 = vadd.f32 %v12858_v43, %v4374_v42  ;;  %v12937_v31 = vpop.f32.mrf.mxu0  ;;  %10416 = vmatmul.msk.bf16.gmra.mxu2 %vm1356_vm5, %v10952_v30  ;;  %v4911_v8 = vshll.u32 %v4875_v0, 16  ;;  %v4100_v43 = vor.u32 %v4099_v10, %v12929_v2  ;;  %v3788_v2 = vld [vmem:[#allocation2 + $0xbc] sm:$0x1] }
 0x2c7   : > { %v4225_v6 = vpack.c.b16 %v12949_v59, %v12947_v34  ;;  %v4565_v45 = vrot.slane %v3788_v2, 5 }
 0x2c8   : > { %v12942_v54 = vrot.slane %v4908_v50, 7  ;;  %v4812_v20 = vadd.f32 %v12903_v27, %v4776_v9  ;;  %10437 = vmatmul.msk.bf16.gmra.mxu3 %vm1356_vm5, %v4224_v36  ;;  %v4101_v10 = vrot.slane %v4100_v43, 4  ;;  %v10998_v36 = vld [vmem:[#allocation9 + $0x20] sm:$0xff] }
 0x2c9   : > { %10473 = vmatmul.msk.bf16.gmra.mxu0 %vm1356_vm5, %v4626_v38  ;;  %v3640_v48 = vpop.f32.mrf.mxu2  ;;  %v12971_v38 = vpack.c.b16 %v4607_v57, %v4606_v5  ;;  %7411 = vmatpush.bf16.msrb.mxu1 %v10998_v36  ;;  %v10953_v36 = vld [vmem:[#allocation2 + $0x90] sm:$0xff] }
 0x2ca   : > { %v4913_v0 = vor.u32 %v4911_v8, %v12942_v54  ;;  %v4844_v30 = vmax.f32 %v4812_v20, 0.0  ;;  %v3717_v22 = vadd.f32 %v3640_v48, %v12406_v44  ;;  %v4914_v5 = vrot.slane %v12942_v54, 4  ;;  %v5232_v20 = vld [vmem:[#allocation3 + $0x14] sm:$0x1] }
 0x2cb   : > { %v12969_v44 = vpop.f32.mrf.mxu3  ;;  %v4106_v13 = vsel %vm11481_vm4, %v4101_v10, %v4105_v17  ;;  %v4113_v54 = vrot.slane %v4111_v14, 5 }
 0x2cc   : > { %v5229_v33 = vsel %vm11705_vm10, %v4913_v0, %v5228_v39  ;;  %v4876_v42 = vpack.c.bf16 %v4844_v30, %v4844_v30  ;;  %v4375_v46 = vadd.f32 %v12906_v28, %v3717_v22  ;;  %v4117_v39 = vshll.u32 %v3787_v25, 16  ;;  %v4418_v30 = vld [vmem:[#allocation2 + $0xb4] sm:$0xe] }
 0x2cd   : > { %5230 = vst [vmem:[#allocation3 + $0xc] sm:$0xf] %v5229_v33  ;;  %v12987_v0 = vunpack.c.l.b16 %v4096_v11  ;;  %v4110_v22 = vrot.slane %v4108_v47, 4  ;;  %v4121_v28 = vshrl.u32 %v3787_v25, 16 }
 0x2ce   : > { %v4916_v50 = vshrl.u32 %v4876_v42, 16  ;;  %v4777_v9 = vadd.f32 %v12880_v15, %v4375_v46  ;;  %v12977_v4 = vpop.f32.mrf.mxu0  ;;  %v4919_v57 = vshll.u32 %v4876_v42, 16  ;;  %v4562_v15 = vrot.slane %v3787_v25, 5 }
 0x2d0   : > { %v4918_v8 = vrot.slane %v4916_v50, 7  ;;  %v4813_v43 = vadd.f32 %v12903_v27, %v4777_v9  ;;  %v10456_v50 = vrot.slane %v4418_v30, 9  ;;  %v4564_v9 = vrot.slane %v4562_v15, 4 }
 0x2d1   : > { %v3642_v48 = vpop.f32.mrf.mxu2 }
 0x2d2   : > { %v4921_v41 = vor.u32 %v4919_v57, %v4918_v8  ;;  %v4923_v33 = vrot.slane %v4918_v8, 4  ;;  %v4845_v42 = vmax.f32 %v4813_v43, 0.0  ;;  %v3718_v46 = vadd.f32 %v3642_v48, %v12419_v62 }
 0x2d3   : > { %v12996_v57 = vpop.f32.mrf.mxu3  ;;  %v12998_v8 = vunpack.c.l.b16 %v4106_v13  ;;  %v4114_v43 = vor.u32 %v4113_v54, %v4110_v22  ;;  %v4119_v13 = vrot.slane %v4117_v39, 5  ;;  %v4123_v54 = vrot.slane %v4121_v28, 4 }
 0x2d4   : > { %v4922_v35 = vsel %vm11691_vm9, %v4914_v5, %v4921_v41  ;;  %v5233_v10 = vsel %vm11719_vm11, %v4923_v33, %v5232_v20  ;;  %v4877_v17 = vpack.c.bf16 %v4845_v42, %v4845_v42  ;;  %v4376_v11 = vadd.f32 %v12931_v12, %v3718_v46  ;;  %v5342_v47 = vld [vmem:[#allocation3 + $0xc] sm:$0xf]  ;;  %v5235_v46 = vld [vmem:[#allocation3 + $0x18] sm:$0xf] }
 0x2d5   : > { %5231 = vst.msk [vmem:[#allocation3 + $0x10] sm:$0xf] %vm279_vm0, %v4922_v35  ;;  %v5415_v62 = vshrl.u32 %v5342_v47, 16  ;;  %v5418_v14 = vshll.u32 %v5342_v47, 16  ;;  %v4563_v12 = vsel %vm12057_vm14, %v10456_v50, %v4562_v15  ;;  %v4566_v35 = vsel %vm12057_vm14, %v4564_v9, %v4565_v45 }
 0x2d6   : > { %5234 = vst [vmem:[#allocation3 + $0x14] sm:$0x1] %v5233_v10  ;;  %v4925_v25 = vshrl.u32 %v4877_v17, 16  ;;  %v4778_v5 = vadd.f32 %v12915_v58, %v4376_v11  ;;  %v13001_v48 = vpop.f32.mrf.mxu0  ;;  %10417 = vmatmul.msk.bf16.gmra.mxu2 %vm1356_vm5, %v10953_v36  ;;  %v4928_v20 = vshll.u32 %v4877_v17, 16  ;;  %v4127_v58 = vshll.u32 %v3788_v2, 16  ;;  %v15858_v2 = vld [vmem:[#allocation25_spill] sm:$0xff] }
 0x2d7   : > { %v5417_v30 = vrot.slane %v5415_v62, 4  ;;  %v5420_v41 = vrot.slane %v5418_v14, 5  ;;  %v13013_v42 = vadd.f32 %v12530_v51, %v12601_v49  ;;  %v4610_v36 = vunpack.c.l.b16 %v4563_v12 }
 0x2d8   : > { %v13008_v33 = vrot.slane %v4925_v25, 7  ;;  %v4814_v22 = vadd.f32 %v12903_v27, %v4778_v5  ;;  %v4611_v50 = vunpack.c.l.b16 %v4566_v35  ;;  %v4115_v9 = vrot.slane %v4114_v43, 4  ;;  %10438 = vmatmul.msk.bf16.gmra.mxu3 %vm1356_vm5, %v4225_v6 }
 0x2d9   : > { %10474 = vmatmul.msk.bf16.gmra.mxu0 %vm1356_vm5, %v12971_v38  ;;  %v3645_v15 = vpop.f32.mrf.mxu2  ;;  %v13019_v39 = vadd.f32 %v12569_v56, %v12633_v61  ;;  %v15859_v51 = vunpack.c.l.b16 %v12953_v23  ;;  %v15860_v49 = vunpack.c.l.b16 %v12964_v52  ;;  %v5421_v17 = vor.u32 %v5420_v41, %v5417_v30 }
 0x2da   : > { %v4930_v45 = vor.u32 %v4928_v20, %v13008_v33  ;;  %v4846_v28 = vmax.f32 %v4814_v22, 0.0  ;;  %v3719_v10 = vadd.f32 %v3645_v15, %v15858_v2  ;;  %v4226_v56 = vpack.c.b16 %v12998_v8, %v12987_v0 }
 0x2db   : > { %v13031_v38 = vpack.c.b16 %v15860_v49, %v15859_v51  ;;  %v4124_v61 = vor.u32 %v4123_v54, %v4119_v13  ;;  %v4129_v59 = vrot.slane %v4127_v58, 5  ;;  %v13040_v23 = vpop.f32.mrf.mxu3  ;;  %v13046_v43 = vpack.c.b16 %v4611_v50, %v4610_v36  ;;  %v5239_v50 = vld [vmem:[#allocation3 + $0x20] sm:$0x1] }
 0x2dc   : > { %v5236_v11 = vsel %vm11705_vm10, %v4930_v45, %v5235_v46  ;;  %v4878_v47 = vpack.c.bf16 %v4846_v28, %v4846_v28  ;;  %v4377_v62 = vadd.f32 %v12969_v44, %v3719_v10  ;;  %v13038_v34 = vld [vmem:[#allocation3 + $0x10] sm:$0xf]  ;;  %v4120_v25 = vsel %vm11481_vm4, %v4115_v9, %v4119_v13  ;;  %v3789_v13 = vld [vmem:[#allocation2 + $0xc0] sm:$0xf] }
 0x2dd   : > { %5237 = vst [vmem:[#allocation3 + $0x18] sm:$0xf] %v5236_v11  ;;  %v13042_v52 = vld [vmem:[#allocation3 + $0x14] sm:$0x1]  ;;  %v5424_v6 = vshll.u32 %v13038_v34, 16  ;;  %v5428_v14 = vshrl.u32 %v13038_v34, 16  ;;  %v13056_v36 = vunpack.c.l.b16 %v4120_v25 }
 0x2de   : > { %v4931_v5 = vrot.slane %v13008_v33, 4  ;;  %v4933_v44 = vshrl.u32 %v4878_v47, 16  ;;  %v4779_v12 = vadd.f32 %v12937_v31, %v4377_v62  ;;  %v13052_v35 = vpop.f32.mrf.mxu0  ;;  %v5434_v20 = vshll.u32 %v13042_v52, 16  ;;  %v4419_v62 = vld [vmem:[#allocation2 + $0xc0] sm:$0xe] }
 0x2df   : > { %v5422_v30 = vrot.slane %v5421_v17, 4  ;;  %v5426_v41 = vrot.slane %v5424_v6, 5  ;;  %v5430_v22 = vrot.slane %v5428_v14, 4  ;;  %v4125_v54 = vrot.slane %v4124_v61, 4  ;;  %v10954_v17 = vld [vmem:[#allocation2 + $0x9c] sm:$0xff] }
 0x2e0   : > { %v4935_v58 = vrot.slane %v4933_v44, 7  ;;  %v4936_v46 = vshll.u32 %v4878_v47, 16  ;;  %v4815_v15 = vadd.f32 %v12903_v27, %v4779_v12  ;;  %v5436_v45 = vrot.slane %v5434_v20, 5  ;;  %v13063_v61 = vld [vmem:[#allocation2 + $0xc4] sm:$0xf] }
 0x2e1   : > { %v3647_v33 = vpop.f32.mrf.mxu2  ;;  %v5427_v31 = vsel %vm11481_vm4, %v5422_v30, %v5426_v41  ;;  %v5431_v9 = vor.u32 %v5430_v22, %v5426_v41  ;;  %v4130_v28 = vsel %vm11481_vm4, %v4125_v54, %v4129_v59  ;;  %v4569_v6 = vrot.slane %v13063_v61, 5 }
 0x2e2   : > { %v4938_v2 = vor.u32 %v4936_v46, %v4935_v58  ;;  %v4940_v10 = vrot.slane %v4935_v58, 4  ;;  %v4847_v51 = vmax.f32 %v4815_v15, 0.0  ;;  %v3720_v49 = vadd.f32 %v3647_v33, %v12473_v7  ;;  %v13078_v58 = vld [vmem:[#allocation2 + $0xc8] sm:$0x1] }
 0x2e3   : > { %v5432_v11 = vrot.slane %v5431_v9, 4  ;;  %v5779_v47 = vunpack.c.l.b16 %v5427_v31  ;;  %v4132_v14 = vshrl.u32 %v3789_v13, 16  ;;  %v13072_v7 = vpop.f32.mrf.mxu3  ;;  %v13076_v54 = vunpack.c.l.b16 %v4130_v28 }
 0x2e4   : > { %v4939_v25 = vsel %vm11691_vm9, %v4931_v5, %v4938_v2  ;;  %v5240_v59 = vsel %vm11719_vm11, %v4940_v10, %v5239_v50  ;;  %v4879_v44 = vpack.c.bf16 %v4847_v51, %v4847_v51  ;;  %v4378_v12 = vadd.f32 %v12996_v57, %v3720_v49  ;;  %v5344_v20 = vld [vmem:[#allocation3 + $0x18] sm:$0xf]  ;;  %v5242_v49 = vld [vmem:[#allocation3 + $0x24] sm:$0xf] }
 0x2e5   : > { %5238 = vst.msk [vmem:[#allocation3 + $0x1c] sm:$0xf] %vm279_vm0, %v4939_v25  ;;  %v5437_v30 = vsel %vm11481_vm4, %v5432_v11, %v5436_v45  ;;  %v5439_v41 = vshrl.u32 %v5344_v20, 16  ;;  %v5442_v22 = vshll.u32 %v5344_v20, 16  ;;  %v10457_v50 = vrot.slane %v4419_v62, 9 }
 0x2e6   : > { %5241 = vst [vmem:[#allocation3 + $0x20] sm:$0x1] %v5240_v59  ;;  %v4942_v5 = vshrl.u32 %v4879_v44, 16  ;;  %v4780_v46 = vadd.f32 %v12977_v4, %v4378_v12  ;;  %v13081_v15 = vpop.f32.mrf.mxu0  ;;  %10418 = vmatmul.msk.bf16.gmra.mxu2 %vm1356_vm5, %v10954_v17  ;;  %v5780_v57 = vunpack.c.l.b16 %v5437_v30  ;;  %v4945_v33 = vshll.u32 %v4879_v44, 16 }
 0x2e7   : > { %v5441_v31 = vrot.slane %v5439_v41, 4  ;;  %v5444_v9 = vrot.slane %v5442_v22, 5  ;;  %v4571_v45 = vrot.slane %v4569_v6, 4  ;;  %v4572_v51 = vrot.slane %v13078_v58, 5 }
 0x2e8   : > { %v13084_v2 = vrot.slane %v4942_v5, 7  ;;  %v4816_v28 = vadd.f32 %v12903_v27, %v4780_v46  ;;  %v5810_v10 = vpack.c.b16 %v5780_v57, %v5779_v47  ;;  %v4134_v17 = vrot.slane %v4132_v14, 4  ;;  %10439 = vmatmul.msk.bf16.gmra.mxu3 %vm1356_vm5, %v4226_v56 }
 0x2e9   : > { %10475 = vmatmul.msk.bf16.gmra.mxu0 %vm1356_vm5, %v13031_v38  ;;  %v3650_v4 = vpop.f32.mrf.mxu2  ;;  %v5445_v11 = vor.u32 %v5444_v9, %v5441_v31  ;;  %v4135_v25 = vshll.u32 %v3789_v13, 16  ;;  %v4141_v62 = vshll.u32 %v13063_v61, 16  ;;  %v13100_v38 = vsel %vm12057_vm14, %v10457_v50, %v4569_v6 }
 0x2ea   : > { %v4947_v59 = vor.u32 %v4945_v33, %v13084_v2  ;;  %v4848_v44 = vmax.f32 %v4816_v28, 0.0  ;;  %v3721_v12 = vadd.f32 %v3650_v4, %v12509_v32  ;;  %10484 = vmatmul.msk.bf16.gmra.mxu1 %vm1356_vm5, %v5810_v10  ;;  %v4948_v13 = vrot.slane %v13084_v2, 4 }
 0x2eb   : > { %v5446_v47 = vrot.slane %v5445_v11, 4  ;;  %v4227_v14 = vpack.c.b16 %v13076_v54, %v13056_v36  ;;  %v4137_v20 = vrot.slane %v4135_v25, 5  ;;  %v13112_v8 = vsel %vm12057_vm14, %v4571_v45, %v4572_v51  ;;  %v13114_v56 = vpop.f32.mrf.mxu3 }
 0x2ec   : > { %v5243_v32 = vsel %vm11705_vm10, %v4947_v59, %v5242_v49  ;;  %v4880_v30 = vpack.c.bf16 %v4848_v44, %v4848_v44  ;;  %v4379_v41 = vadd.f32 %v13040_v23, %v3721_v12  ;;  %v13108_v0 = vld [vmem:[#allocation3 + $0x1c] sm:$0xf]  ;;  %v4612_v46 = vunpack.c.l.b16 %v13100_v38 }
 0x2ed   : > { %5244 = vst [vmem:[#allocation3 + $0x24] sm:$0xf] %v5243_v32  ;;  %v13116_v6 = vld [vmem:[#allocation3 + $0x20] sm:$0x1]  ;;  %v5448_v22 = vshll.u32 %v13108_v0, 16  ;;  %v5452_v5 = vshrl.u32 %v13108_v0, 16  ;;  %v4138_v57 = vor.u32 %v4137_v20, %v4134_v17  ;;  %v4613_v28 = vunpack.c.l.b16 %v13112_v8 }
 0x2ee   : > { %v4950_v50 = vshrl.u32 %v4880_v30, 16  ;;  %v4781_v23 = vadd.f32 %v13001_v48, %v4379_v41  ;;  %v13122_v33 = vpop.f32.mrf.mxu0  ;;  %v5458_v31 = vshll.u32 %v13116_v6, 16  ;;  %v4143_v9 = vrot.slane %v4141_v62, 5  ;;  %v5246_v17 = vld [vmem:[#allocation3 + $0x2c] sm:$0x1] }
 0x2ef   : > { %v5450_v45 = vrot.slane %v5448_v22, 5  ;;  %v5454_v2 = vrot.slane %v5452_v5, 4  ;;  %v4139_v10 = vrot.slane %v4138_v57, 4  ;;  %v4953_v49 = vshll.u32 %v4880_v30, 16  ;;  %v10955_v22 = vld [vmem:[#allocation2 + $0xa8] sm:$0xff] }
 0x2f0   : > { %v4952_v51 = vrot.slane %v4950_v50, 7  ;;  %v4817_v4 = vadd.f32 %v12903_v27, %v4781_v23  ;;  %v4145_v11 = vshrl.u32 %v13063_v61, 16  ;;  %v5460_v44 = vrot.slane %v5458_v31, 5 }
 0x2f1   : > { %v3652_v25 = vpop.f32.mrf.mxu2  ;;  %v5451_v48 = vsel %vm11481_vm4, %v5446_v47, %v5450_v45  ;;  %v5455_v59 = vor.u32 %v5454_v2, %v5450_v45  ;;  %v4151_v62 = vshll.u32 %v13078_v58, 16  ;;  %v4144_v5 = vsel %vm11481_vm4, %v4139_v10, %v4143_v9 }
 0x2f2   : > { %v4955_v12 = vor.u32 %v4953_v49, %v4952_v51  ;;  %v4957_v20 = vrot.slane %v4952_v51, 4  ;;  %v4849_v32 = vmax.f32 %v4817_v4, 0.0  ;;  %v3722_v41 = vadd.f32 %v3652_v25, %v12523_v26  ;;  %v4420_v49 = vld [vmem:[#allocation2 + $0xcc] sm:$0xe] }
 0x2f3   : > { %v5456_v30 = vrot.slane %v5455_v59, 4  ;;  %v4147_v61 = vrot.slane %v4145_v11, 4  ;;  %v4153_v57 = vrot.slane %v4151_v62, 5  ;;  %v13140_v26 = vpop.f32.mrf.mxu3 }
 0x2f4   : > { %v4956_v50 = vsel %vm11691_vm9, %v4948_v13, %v4955_v12  ;;  %v5247_v47 = vsel %vm11719_vm11, %v4957_v20, %v5246_v17  ;;  %v4881_v23 = vpack.c.bf16 %v4849_v32, %v4849_v32  ;;  %v4380_v58 = vadd.f32 %v13072_v7, %v3722_v41  ;;  %v5346_v31 = vld [vmem:[#allocation3 + $0x24] sm:$0xf]  ;;  %v13148_v20 = vld [vmem:[#allocation2 + $0xd4] sm:$0x1]  ;;  %v13153_v41 = vld [vmem:[#allocation2 + $0xd0] sm:$0xf] }
 0x2f5   : > { %5245 = vst.msk [vmem:[#allocation3 + $0x28] sm:$0xf] %vm279_vm0, %v4956_v50  ;;  %v5461_v45 = vsel %vm11481_vm4, %v5456_v30, %v5460_v44  ;;  %v5463_v2 = vshrl.u32 %v5346_v31, 16  ;;  %v5466_v10 = vshll.u32 %v5346_v31, 16  ;;  %v4148_v51 = vor.u32 %v4147_v61, %v4143_v9  ;;  %v5249_v30 = vld [vmem:[#allocation3 + $0x30] sm:$0xf] }
 0x2f6   : > { %5248 = vst [vmem:[#allocation3 + $0x2c] sm:$0x1] %v5247_v47  ;;  %v4959_v13 = vshrl.u32 %v4881_v23, 16  ;;  %v4782_v4 = vadd.f32 %v13052_v35, %v4380_v58  ;;  %v13145_v11 = vpop.f32.mrf.mxu0  ;;  %10419 = vmatmul.msk.bf16.gmra.mxu2 %vm1356_vm5, %v10955_v22  ;;  %v5781_v7 = vunpack.c.l.b16 %v5451_v48  ;;  %v5782_v17 = vunpack.c.l.b16 %v5461_v45 }
 0x2f7   : > { %v4962_v25 = vshll.u32 %v4881_v23, 16  ;;  %v5465_v59 = vrot.slane %v5463_v2, 4  ;;  %v5468_v62 = vrot.slane %v5466_v10, 5  ;;  %v4149_v12 = vrot.slane %v4148_v51, 4 }
 0x2f8   : > { %v13150_v44 = vrot.slane %v4959_v13, 7  ;;  %v4818_v9 = vadd.f32 %v12903_v27, %v4782_v4  ;;  %v5811_v32 = vpack.c.b16 %v5782_v17, %v5781_v7  ;;  %v10458_v35 = vrot.slane %v4420_v49, 9  ;;  %10440 = vmatmul.msk.bf16.gmra.mxu3 %vm1356_vm5, %v4227_v14  ;;  %v3792_v14 = vld [vmem:[#allocation2 + $0xcc] sm:$0xf] }
 0x2f9   : > { %10476 = vmatmul.msk.bf16.gmra.mxu0 %vm1356_vm5, %v13046_v43  ;;  %v3655_v48 = vpop.f32.mrf.mxu2  ;;  %v5469_v22 = vor.u32 %v5468_v62, %v5465_v59  ;;  %v4154_v61 = vsel %vm11481_vm4, %v4149_v12, %v4153_v57  ;;  %v13159_v50 = vunpack.c.l.b16 %v4144_v5  ;;  %v4576_v47 = vrot.slane %v13153_v41, 5 }
 0x2fa   : > { %v4964_v23 = vor.u32 %v4962_v25, %v13150_v44  ;;  %v4850_v58 = vmax.f32 %v4818_v9, 0.0  ;;  %v3723_v31 = vadd.f32 %v3655_v48, %v12551_v37  ;;  %10485 = vmatmul.msk.bf16.gmra.mxu1 %vm1356_vm5, %v5811_v32  ;;  %v4579_v43 = vrot.slane %v13148_v20, 5 }
 0x2fb   : > { %v4965_v57 = vrot.slane %v13150_v44, 4  ;;  %v13171_v5 = vunpack.c.l.b16 %v4154_v61  ;;  %v13175_v45 = vsel %vm12057_vm14, %v10458_v35, %v4576_v47  ;;  %v4578_v2 = vrot.slane %v4576_v47, 4  ;;  %v13182_v49 = vpop.f32.mrf.mxu3 }
 0x2fc   : > { %v5250_v37 = vsel %vm11705_vm10, %v4964_v23, %v5249_v30  ;;  %v4882_v10 = vpack.c.bf16 %v4850_v58, %v4850_v58  ;;  %v4381_v51 = vadd.f32 %v13114_v56, %v3723_v31  ;;  %v13180_v36 = vld [vmem:[#allocation3 + $0x28] sm:$0xf]  ;;  %v5470_v54 = vrot.slane %v5469_v22, 4 }
 0x2fd   : > { %5251 = vst [vmem:[#allocation3 + $0x30] sm:$0xf] %v5250_v37  ;;  %v4630_v13 = vpack.c.b16 %v4613_v28, %v4612_v46  ;;  %v13188_v4 = vld [vmem:[#allocation3 + $0x2c] sm:$0x1]  ;;  %v5472_v7 = vshll.u32 %v13180_v36, 16  ;;  %v5476_v17 = vshrl.u32 %v13180_v36, 16  ;;  %v4614_v56 = vunpack.c.l.b16 %v13175_v45 }
 0x2fe   : > { %v4967_v25 = vshrl.u32 %v4882_v10, 16  ;;  %v4783_v59 = vadd.f32 %v13081_v15, %v4381_v51  ;;  %v13194_v62 = vpop.f32.mrf.mxu0  ;;  %v5482_v12 = vshll.u32 %v13188_v4, 16  ;;  %v4228_v38 = vpack.c.b16 %v13171_v5, %v13159_v50  ;;  %v5253_v15 = vld [vmem:[#allocation3 + $0x38] sm:$0x1]  ;;  %v10956_v5 = vld [vmem:[#allocation2 + $0xb4] sm:$0xff] }
 0x2ff   : > { %v5474_v8 = vrot.slane %v5472_v7, 5  ;;  %v5478_v46 = vrot.slane %v5476_v17, 4  ;;  %v13201_v28 = vsel %vm12057_vm14, %v4578_v2, %v4579_v43  ;;  %v4156_v44 = vshrl.u32 %v3792_v14, 16 }
 0x300   : > { %v4969_v9 = vrot.slane %v4967_v25, 7  ;;  %v4970_v32 = vshll.u32 %v4882_v10, 16  ;;  %v4819_v35 = vadd.f32 %v12903_v27, %v4783_v59  ;;  %v4159_v30 = vshll.u32 %v3792_v14, 16 }
 0x301   : > { %v3657_v48 = vpop.f32.mrf.mxu2  ;;  %v5475_v22 = vsel %vm11481_vm4, %v5470_v54, %v5474_v8  ;;  %v5479_v61 = vor.u32 %v5478_v46, %v5474_v8  ;;  %v5484_v47 = vrot.slane %v5482_v12, 5  ;;  %v4158_v50 = vrot.slane %v4156_v44, 4 }
 0x302   : > { %v4972_v23 = vor.u32 %v4970_v32, %v4969_v9  ;;  %v4974_v58 = vrot.slane %v4969_v9, 4  ;;  %v4851_v31 = vmax.f32 %v4819_v35, 0.0  ;;  %v3724_v43 = vadd.f32 %v3657_v48, %v12960_v24 }
 0x303   : > { %v5480_v2 = vrot.slane %v5479_v61, 4  ;;  %v5783_v37 = vunpack.c.l.b16 %v5475_v22  ;;  %v4161_v10 = vrot.slane %v4159_v30, 5  ;;  %v4165_v51 = vshll.u32 %v13153_v41, 16  ;;  %v13214_v59 = vpop.f32.mrf.mxu3  ;;  %v6191_v22 = vld [vmem:[#allocation3] sm:$0xe] }
 0x304   : > { %v4973_v14 = vsel %vm11691_vm9, %v4965_v57, %v4972_v23  ;;  %v5254_v54 = vsel %vm11719_vm11, %v4974_v58, %v5253_v15  ;;  %v4883_v7 = vpack.c.bf16 %v4851_v31, %v4851_v31  ;;  %v4382_v17 = vadd.f32 %v13140_v26, %v3724_v43  ;;  %v5348_v25 = vld [vmem:[#allocation3 + $0x30] sm:$0xf]  ;;  %v5256_v58 = vld [vmem:[#allocation3 + $0x3c] sm:$0xf] }
 0x305   : > { %5252 = vst.msk [vmem:[#allocation3 + $0x34] sm:$0xf] %vm279_vm0, %v4973_v14  ;;  %v5485_v24 = vsel %vm11481_vm4, %v5480_v2, %v5484_v47  ;;  %v5487_v12 = vshrl.u32 %v5348_v25, 16  ;;  %v5490_v8 = vshll.u32 %v5348_v25, 16  ;;  %v4162_v46 = vor.u32 %v4161_v10, %v4158_v50 }
 0x306   : > { %5255 = vst [vmem:[#allocation3 + $0x38] sm:$0x1] %v5254_v54  ;;  %v4976_v44 = vshrl.u32 %v4883_v7, 16  ;;  %v4979_v57 = vshll.u32 %v4883_v7, 16  ;;  %v4784_v9 = vadd.f32 %v13122_v33, %v4382_v17  ;;  %v13219_v32 = vpop.f32.mrf.mxu0  ;;  %10420 = vmatmul.msk.bf16.gmra.mxu2 %vm1356_vm5, %v10956_v5  ;;  %v5784_v26 = vunpack.c.l.b16 %v5485_v24  ;;  %v11128_v24 = vld [vmem:[#allocation3 + $0x4] sm:$0xf] }
 0x307   : > { %v5489_v35 = vrot.slane %v5487_v12, 4  ;;  %v5492_v30 = vrot.slane %v5490_v8, 5  ;;  %v4163_v15 = vrot.slane %v4162_v46, 4  ;;  %v4167_v48 = vrot.slane %v4165_v51, 5 }
 0x308   : > { %v13222_v61 = vrot.slane %v4976_v44, 7  ;;  %v4820_v47 = vadd.f32 %v12903_v27, %v4784_v9  ;;  %v5812_v50 = vpack.c.b16 %v5784_v26, %v5783_v37  ;;  %v4169_v23 = vshrl.u32 %v13153_v41, 16  ;;  %10441 = vmatmul.msk.bf16.gmra.mxu3 %vm1356_vm5, %v4228_v38 }
 0x309   : > { %10477 = vmatmul.msk.bf16.gmra.mxu0 %vm1356_vm5, %v4630_v13  ;;  %v3660_v33 = vpop.f32.mrf.mxu2  ;;  %v4615_v31 = vunpack.c.l.b16 %v13201_v28  ;;  %v5493_v43 = vor.u32 %v5492_v30, %v5489_v35  ;;  %v4168_v5 = vsel %vm11481_vm4, %v4163_v15, %v4167_v48  ;;  %v4175_v2 = vshll.u32 %v13148_v20, 16 }
 0x30a   : > { %v4981_v10 = vor.u32 %v4979_v57, %v13222_v61  ;;  %v4852_v51 = vmax.f32 %v4820_v47, 0.0  ;;  %v3725_v14 = vadd.f32 %v3660_v33, %v12590_v40  ;;  %10486 = vmatmul.msk.bf16.gmra.mxu1 %vm1356_vm5, %v5812_v50  ;;  %v10583_v41 = vrot.slane %v6191_v22, 9 }
 0x30b   : > { %v4982_v13 = vrot.slane %v13222_v61, 4  ;;  %v5494_v37 = vrot.slane %v5493_v43, 4  ;;  %v4171_v28 = vrot.slane %v4169_v23, 4  ;;  %v4177_v54 = vrot.slane %v4175_v2, 5  ;;  %v13241_v12 = vpop.f32.mrf.mxu3  ;;  %v5260_v23 = vld [vmem:[#allocation3 + $0x44] sm:$0x1] }
 0x30c   : > { %v5257_v7 = vsel %vm11705_vm10, %v4981_v10, %v5256_v58  ;;  %v4884_v17 = vpack.c.bf16 %v4852_v51, %v4852_v51  ;;  %v4383_v20 = vadd.f32 %v13182_v49, %v3725_v14  ;;  %v13239_v25 = vld [vmem:[#allocation3 + $0x34] sm:$0xf]  ;;  %v6241_v40 = vrot.slane %v11128_v24, 5  ;;  %v11129_v43 = vld [vmem:[#allocation3 + $0x8] sm:$0x1] }
 0x30d   : > { %5258 = vst [vmem:[#allocation3 + $0x3c] sm:$0xf] %v5257_v7  ;;  %v13245_v38 = vpack.c.b16 %v4615_v31, %v4614_v56  ;;  %v13247_v8 = vld [vmem:[#allocation3 + $0x38] sm:$0x1]  ;;  %v5496_v46 = vshll.u32 %v13239_v25, 16  ;;  %v5500_v44 = vshrl.u32 %v13239_v25, 16  ;;  %v4172_v57 = vor.u32 %v4171_v28, %v4167_v48 }
 0x30e   : > { %v4984_v9 = vshrl.u32 %v4884_v17, 16  ;;  %v4987_v49 = vshll.u32 %v4884_v17, 16  ;;  %v4785_v26 = vadd.f32 %v13145_v11, %v4383_v20  ;;  %v13252_v35 = vpop.f32.mrf.mxu0  ;;  %v13254_v30 = vunpack.c.l.b16 %v4168_v5  ;;  %v10957_v28 = vld [vmem:[#allocation2 + $0xc0] sm:$0xff] }
 0x30f   : > { %v5498_v15 = vrot.slane %v5496_v46, 5  ;;  %v5502_v22 = vrot.slane %v5500_v44, 4  ;;  %v5506_v45 = vshll.u32 %v13247_v8, 16  ;;  %v4173_v56 = vrot.slane %v4172_v57, 4  ;;  %v6192_v44 = vld [vmem:[#allocation3 + $0xc] sm:$0xe] }
 0x310   : > { %v4986_v61 = vrot.slane %v4984_v9, 7  ;;  %v4821_v47 = vadd.f32 %v12903_v27, %v4785_v26  ;;  %v13260_v50 = vsel %vm12057_vm14, %v10583_v41, %v6241_v40  ;;  %v6243_v48 = vrot.slane %v6241_v40, 4 }
 0x311   : > { %v3662_v58 = vpop.f32.mrf.mxu2  ;;  %v5499_v11 = vsel %vm11481_vm4, %v5494_v37, %v5498_v15  ;;  %v5503_v33 = vor.u32 %v5502_v22, %v5498_v15  ;;  %v4178_v31 = vsel %vm11481_vm4, %v4173_v56, %v4177_v54  ;;  %v6244_v5 = vrot.slane %v11129_v43, 5 }
 0x312   : > { %v4989_v2 = vor.u32 %v4987_v49, %v4986_v61  ;;  %v4991_v10 = vrot.slane %v4986_v61, 4  ;;  %v4853_v51 = vmax.f32 %v4821_v47, 0.0  ;;  %v3726_v14 = vadd.f32 %v3662_v58, %v13013_v42  ;;  %v6193_v58 = vld [vmem:[#allocation3 + $0x18] sm:$0xe] }
 0x313   : > { %v5504_v41 = vrot.slane %v5503_v33, 4  ;;  %v5508_v7 = vrot.slane %v5506_v45, 5  ;;  %v5785_v17 = vunpack.c.l.b16 %v5499_v11  ;;  %v4213_v20 = vunpack.c.l.b16 %v4178_v31  ;;  %v13273_v57 = vpop.f32.mrf.mxu3 }
 0x314   : > { %v4990_v24 = vsel %vm11691_vm9, %v4982_v13, %v4989_v2  ;;  %v5261_v37 = vsel %vm11719_vm11, %v4991_v10, %v5260_v23  ;;  %v4885_v40 = vpack.c.bf16 %v4853_v51, %v4853_v51  ;;  %v4384_v54 = vadd.f32 %v13214_v59, %v3726_v14  ;;  %v5350_v46 = vld [vmem:[#allocation3 + $0x3c] sm:$0xf] }
 0x315   : > { %5259 = vst.msk [vmem:[#allocation3 + $0x40] sm:$0xf] %vm279_vm0, %v4990_v24  ;;  %v5509_v42 = vsel %vm11481_vm4, %v5504_v41, %v5508_v7  ;;  %v5511_v9 = vshrl.u32 %v5350_v46, 16  ;;  %v5514_v49 = vshll.u32 %v5350_v46, 16  ;;  %v6245_v13 = vsel %vm12057_vm14, %v6243_v48, %v6244_v5 }
 0x316   : > { %5262 = vst [vmem:[#allocation3 + $0x44] sm:$0x1] %v5261_v37  ;;  %v4993_v26 = vshrl.u32 %v4885_v40, 16  ;;  %v4786_v15 = vadd.f32 %v13194_v62, %v4384_v54  ;;  %v13280_v22 = vpop.f32.mrf.mxu0  ;;  %10421 = vmatmul.msk.bf16.gmra.mxu2 %vm1356_vm5, %v10957_v28  ;;  %v5786_v59 = vunpack.c.l.b16 %v5509_v42  ;;  %v4229_v45 = vpack.c.b16 %v4213_v20, %v13254_v30  ;;  %v5263_v62 = vld [vmem:[#allocation3 + $0x48] sm:$0xf] }
 0x317   : > { %v4996_v56 = vshll.u32 %v4885_v40, 16  ;;  %v5513_v61 = vrot.slane %v5511_v9, 4  ;;  %v5516_v47 = vrot.slane %v5514_v49, 5  ;;  %v10584_v23 = vrot.slane %v6192_v44, 9 }
 0x318   : > { %v13284_v11 = vrot.slane %v4993_v26, 7  ;;  %v4822_v48 = vadd.f32 %v12903_v27, %v4786_v15  ;;  %v5813_v33 = vpack.c.b16 %v5786_v59, %v5785_v17  ;;  %v6248_v31 = vrot.slane %v13038_v34, 5  ;;  %10442 = vmatmul.msk.bf16.gmra.mxu3 %vm1356_vm5, %v4229_v45 }
 0x319   : > { %10478 = vmatmul.msk.bf16.gmra.mxu0 %vm1356_vm5, %v13245_v38  ;;  %v3665_v43 = vpop.f32.mrf.mxu2  ;;  %v5517_v5 = vor.u32 %v5516_v47, %v5513_v61  ;;  %v6354_v30 = vunpack.c.l.b16 %v13260_v50  ;;  %v6355_v2 = vunpack.c.l.b16 %v6245_v13  ;;  %v6251_v10 = vrot.slane %v13042_v52, 5  ;;  %v13322_v61 = vld [vmem:[%s15788_s2] ss:$0 sm:$0xff] }
 0x31a   : > { %v4998_v51 = vor.u32 %v4996_v56, %v13284_v11  ;;  %v4854_v14 = vmax.f32 %v4822_v48, 0.0  ;;  %v3727_v28 = vadd.f32 %v3665_v43, %v12624_v18  ;;  %10487 = vmatmul.msk.bf16.gmra.mxu1 %vm1356_vm5, %v5813_v33  ;;  %v10585_v27 = vrot.slane %v6193_v58, 9 }
 0x31b   : > { %v4999_v34 = vrot.slane %v13284_v11, 4  ;;  %v6249_v38 = vsel %vm12057_vm14, %v10584_v23, %v6248_v31  ;;  %v6250_v41 = vrot.slane %v6248_v31, 4  ;;  %v6255_v50 = vrot.slane %v13108_v0, 5  ;;  %v13305_v24 = vpop.f32.mrf.mxu3  ;;  %v5267_v23 = vld [vmem:[#allocation3 + $0x50] sm:$0x1] }
 0x31c   : > { %v5264_v52 = vsel %vm11705_vm10, %v4998_v51, %v5263_v62  ;;  %v4886_v7 = vpack.c.bf16 %v4854_v14, %v4854_v14  ;;  %v4385_v17 = vadd.f32 %v13241_v12, %v3727_v28  ;;  %v13303_v18 = vld [vmem:[#allocation3 + $0x40] sm:$0xf]  ;;  %v5518_v20 = vrot.slane %v5517_v5, 4 }
 0x31d   : > { %5265 = vst [vmem:[#allocation3 + $0x48] sm:$0xf] %v5264_v52  ;;  %v13307_v37 = vld [vmem:[#allocation3 + $0x44] sm:$0x1]  ;;  %v5520_v40 = vshll.u32 %v13303_v18, 16  ;;  %v5524_v54 = vshrl.u32 %v13303_v18, 16  ;;  %v13311_v46 = vpack.c.b16 %v6355_v2, %v6354_v30  ;;  %v6252_v0 = vsel %vm12057_vm14, %v6250_v41, %v6251_v10 }
 0x31e   : > { %v5001_v44 = vshrl.u32 %v4886_v7, 16  ;;  %v4787_v12 = vadd.f32 %v13219_v32, %v4385_v17  ;;  %v13316_v42 = vpop.f32.mrf.mxu0  ;;  %v5530_v9 = vshll.u32 %v13307_v37, 16  ;;  %v6356_v49 = vunpack.c.l.b16 %v6249_v38  ;;  %v10958_v2 = vld [vmem:[#allocation2 + $0xcc] sm:$0xff] }
 0x31f   : > { %v5522_v13 = vrot.slane %v5520_v40, 5  ;;  %v5526_v26 = vrot.slane %v5524_v54, 4  ;;  %v6357_v15 = vunpack.c.l.b16 %v6252_v0  ;;  %v6257_v59 = vrot.slane %v6255_v50, 4 }
 0x320   : > { %v5003_v45 = vrot.slane %v5001_v44, 7  ;;  %v5004_v56 = vshll.u32 %v4886_v7, 16  ;;  %v4823_v47 = vadd.f32 %v13322_v61, %v4787_v12  ;;  %v6256_v32 = vsel %vm12057_vm14, %v10585_v27, %v6255_v50  ;;  %v10981_v12 = vld [vmem:[#allocation3 + $0xc] sm:$0xff] }
 0x321   : > { %v3667_v58 = vpop.f32.mrf.mxu2  ;;  %v5527_v11 = vor.u32 %v5526_v26, %v5522_v13  ;;  %v5532_v48 = vrot.slane %v5530_v9, 5  ;;  %v13327_v33 = vpack.c.b16 %v6357_v15, %v6356_v49  ;;  %v6258_v31 = vrot.slane %v13116_v6, 5 }
 0x322   : > { %v5006_v62 = vor.u32 %v5004_v56, %v5003_v45  ;;  %v5008_v43 = vrot.slane %v5003_v45, 4  ;;  %v4855_v5 = vmax.f32 %v4823_v47, 0.0  ;;  %v3728_v30 = vadd.f32 %v3667_v58, %v13019_v39  ;;  %v6194_v39 = vld [vmem:[#allocation3 + $0x24] sm:$0xe]  ;;  %v5270_v56 = vld [vmem:[#allocation3 + $0x54] sm:$0xf] }
 0x323   : > { %v5523_v10 = vsel %vm11481_vm4, %v5518_v20, %v5522_v13  ;;  %v5528_v51 = vrot.slane %v5527_v11, 4  ;;  %v6259_v14 = vsel %vm12057_vm14, %v6257_v59, %v6258_v31  ;;  %v6358_v28 = vunpack.c.l.b16 %v6256_v32  ;;  %v13341_v52 = vpop.f32.mrf.mxu3 }
 0x324   : > { %v5007_v27 = vsel %vm11691_vm9, %v4999_v34, %v5006_v62  ;;  %v5268_v6 = vsel %vm11719_vm11, %v5008_v43, %v5267_v23  ;;  %v4887_v38 = vpack.c.bf16 %v4855_v5, %v4855_v5  ;;  %v4386_v41 = vadd.f32 %v13273_v57, %v3728_v30  ;;  %v5352_v50 = vld [vmem:[#allocation3 + $0x48] sm:$0xf] }
 0x325   : > { %5266 = vst.msk [vmem:[#allocation3 + $0x4c] sm:$0xf] %vm279_vm0, %v5007_v27  ;;  %v5533_v7 = vsel %vm11481_vm4, %v5528_v51, %v5532_v48  ;;  %v5535_v17 = vshrl.u32 %v5352_v50, 16  ;;  %v5538_v20 = vshll.u32 %v5352_v50, 16  ;;  %v6359_v40 = vunpack.c.l.b16 %v6259_v14  ;;  %v15861_v62 = vld [vmem:[#allocation26_spill] sm:$0xff] }
 0x326   : > { %5269 = vst [vmem:[#allocation3 + $0x50] sm:$0x1] %v5268_v6  ;;  %v5010_v34 = vshrl.u32 %v4887_v38, 16  ;;  %v4788_v54 = vadd.f32 %v13252_v35, %v4386_v41  ;;  %v13346_v0 = vpop.f32.mrf.mxu0  ;;  %10422 = vmatmul.msk.bf16.gmra.mxu2 %vm1356_vm5, %v10958_v2  ;;  %v5787_v57 = vunpack.c.l.b16 %v5523_v10  ;;  %v5788_v44 = vunpack.c.l.b16 %v5533_v7 }
 0x327   : > { %v13349_v9 = vpack.c.b16 %v6359_v40, %v6358_v28  ;;  %v10586_v49 = vrot.slane %v6194_v39, 9  ;;  %v6262_v13 = vrot.slane %v13180_v36, 5  ;;  %v5013_v15 = vshll.u32 %v4887_v38, 16 }
 0x328   : > { %v13352_v26 = vrot.slane %v5010_v34, 7  ;;  %v4824_v59 = vadd.f32 %v13322_v61, %v4788_v54  ;;  %v5814_v45 = vpack.c.b16 %v5788_v44, %v5787_v57  ;;  %v5537_v47 = vrot.slane %v5535_v17, 4  ;;  %10603 = vmatmul.msk.bf16.vlgmr.msrb.gmra.mxu3 %vm1356_vm5, %v13311_v46 }
 0x329   : > { %10687 = vmatmul.msk.bf16.vlgmr.msrb.gmra.mxu0 %vm1356_vm5, %v10981_v12  ;;  %v3670_v35 = vpop.f32.mrf.mxu2  ;;  %v5540_v32 = vrot.slane %v5538_v20, 5  ;;  %v6264_v23 = vrot.slane %v6262_v13, 4  ;;  %v6265_v58 = vrot.slane %v13188_v4, 5  ;;  %v6263_v31 = vsel %vm12057_vm14, %v10586_v49, %v6262_v13  ;;  %v6195_v4 = vld [vmem:[#allocation3 + $0x30] sm:$0xe] }
 0x32a   : > { %v5015_v11 = vor.u32 %v5013_v15, %v13352_v26  ;;  %v4856_v48 = vmax.f32 %v4824_v59, 0.0  ;;  %v3729_v36 = vadd.f32 %v3670_v35, %v12652_v63  ;;  %10488 = vmatmul.msk.bf16.gmra.mxu1 %vm1356_vm5, %v5814_v45  ;;  %v3439_v43 = vadd.f32 %v15861_v62, %v12661_v21  ;;  %v5274_v12 = vld [vmem:[#allocation3 + $0x5c] sm:$0x1] }
 0x32b   : > { %v6266_v5 = vsel %vm12057_vm14, %v6264_v23, %v6265_v58  ;;  %v6269_v30 = vrot.slane %v13239_v25, 5  ;;  %v13374_v14 = vpop.f32.mrf.mxu3  ;;  %v5541_v21 = vor.u32 %v5540_v32, %v5537_v47  ;;  %v6360_v25 = vunpack.c.l.b16 %v6263_v31  ;;  %v10962_v32 = vld [vmem:[#allocation3] sm:$0xff] }
 0x32c   : > { %v5271_v63 = vsel %vm11705_vm10, %v5015_v11, %v5270_v56  ;;  %v4888_v2 = vpack.c.bf16 %v4856_v48, %v4856_v48  ;;  %v4387_v10 = vadd.f32 %v13305_v24, %v3729_v36  ;;  %v13372_v51 = vld [vmem:[#allocation3 + $0x4c] sm:$0xf]  ;;  %v6361_v46 = vunpack.c.l.b16 %v6266_v5 }
 0x32d   : > { %5272 = vst [vmem:[#allocation3 + $0x54] sm:$0xf] %v5271_v63  ;;  %v13376_v28 = vld [vmem:[#allocation3 + $0x50] sm:$0x1]  ;;  %v5544_v27 = vshll.u32 %v13372_v51, 16  ;;  %v5548_v6 = vshrl.u32 %v13372_v51, 16 }
 0x32e   : > { %v5018_v38 = vshrl.u32 %v4888_v2, 16  ;;  %v4789_v41 = vadd.f32 %v13280_v22, %v4387_v10  ;;  %v13381_v50 = vpop.f32.mrf.mxu0  ;;  %v5554_v24 = vshll.u32 %v13376_v28, 16  ;;  %v10587_v39 = vrot.slane %v6195_v4, 9 }
 0x32f   : > { %v5546_v7 = vrot.slane %v5544_v27, 5  ;;  %v5550_v17 = vrot.slane %v5548_v6, 4  ;;  %v13384_v20 = vpack.c.b16 %v6361_v46, %v6360_v25  ;;  %v6271_v40 = vrot.slane %v6269_v30, 4 }
 0x330   : > { %v5016_v34 = vrot.slane %v13352_v26, 4  ;;  %v5020_v54 = vrot.slane %v5018_v38, 7  ;;  %v5021_v57 = vshll.u32 %v4888_v2, 16  ;;  %v4825_v44 = vadd.f32 %v13322_v61, %v4789_v41  ;;  %v6196_v41 = vld [vmem:[#allocation3 + $0x3c] sm:$0xe] }
 0x331   : > { %v3672_v49 = vpop.f32.mrf.mxu2  ;;  %v5542_v13 = vrot.slane %v5541_v21, 4  ;;  %v5551_v22 = vor.u32 %v5550_v17, %v5546_v7  ;;  %v6270_v15 = vsel %vm12057_vm14, %v10587_v39, %v6269_v30  ;;  %v6272_v59 = vrot.slane %v13247_v8, 5 }
 0x332   : > { %v5023_v45 = vor.u32 %v5021_v57, %v5020_v54  ;;  %v5025_v56 = vrot.slane %v5020_v54, 4  ;;  %v4857_v35 = vmax.f32 %v4825_v44, 0.0  ;;  %v3730_v47 = vadd.f32 %v3672_v49, %v3439_v43 }
 0x333   : > { %v5547_v26 = vsel %vm11481_vm4, %v5542_v13, %v5546_v7  ;;  %v5552_v23 = vrot.slane %v5551_v22, 4  ;;  %v5556_v58 = vrot.slane %v5554_v24, 5  ;;  %v6273_v11 = vsel %vm12057_vm14, %v6271_v40, %v6272_v59  ;;  %v13401_v62 = vpop.f32.mrf.mxu3  ;;  %v5277_v24 = vld [vmem:[#allocation3 + $0x60] sm:$0xf] }
 0x334   : > { %v5024_v48 = vsel %vm11691_vm9, %v5016_v34, %v5023_v45  ;;  %v5275_v36 = vsel %vm11719_vm11, %v5025_v56, %v5274_v12  ;;  %v4889_v8 = vpack.c.bf16 %v4857_v35, %v4857_v35  ;;  %v4388_v31 = vadd.f32 %v13341_v52, %v3730_v47  ;;  %v10982_v52 = vld [vmem:[#allocation3 + $0x18] sm:$0xff]  ;;  %v5354_v22 = vld [vmem:[#allocation3 + $0x54] sm:$0xf] }
 0x335   : > { %5273 = vst.msk [vmem:[#allocation3 + $0x58] sm:$0xf] %vm279_vm0, %v5024_v48  ;;  %v5557_v43 = vsel %vm11481_vm4, %v5552_v23, %v5556_v58  ;;  %v6362_v5 = vunpack.c.l.b16 %v6270_v15  ;;  %v6363_v4 = vunpack.c.l.b16 %v6273_v11  ;;  %v5789_v10 = vunpack.c.l.b16 %v5547_v26  ;;  %v5281_v58 = vld [vmem:[#allocation3 + $0x68] sm:$0x1] }
 0x336   : > { %5276 = vst [vmem:[#allocation3 + $0x5c] sm:$0x1] %v5275_v36  ;;  %v5027_v30 = vshrl.u32 %v4889_v8, 16  ;;  %v4790_v63 = vadd.f32 %v13316_v42, %v4388_v31  ;;  %v13406_v2 = vpop.f32.mrf.mxu0  ;;  %10567 = vmatmul.msk.bf16.vlgmr.msrb.gmra.mxu2 %vm1356_vm5, %v10962_v32  ;;  %v5790_v46 = vunpack.c.l.b16 %v5557_v43  ;;  %v5030_v6 = vshll.u32 %v4889_v8, 16 }
 0x337   : > { %v13409_v21 = vpack.c.b16 %v6363_v4, %v6362_v5  ;;  %v10588_v34 = vrot.slane %v6196_v41, 9  ;;  %v6276_v54 = vrot.slane %v13303_v18, 5  ;;  %v6279_v49 = vrot.slane %v13307_v37, 5 }
 0x338   : > { %v5029_v27 = vrot.slane %v5027_v30, 7  ;;  %v4826_v25 = vadd.f32 %v13322_v61, %v4790_v63  ;;  %v5815_v38 = vpack.c.b16 %v5790_v46, %v5789_v10  ;;  %10604 = vmatmul.msk.bf16.gmra.mxu3 %vm1356_vm5, %v13327_v33  ;;  %v5562_v35 = vshll.u32 %v5354_v22, 16 }
 0x339   : > { %10688 = vmatmul.msk.bf16.gmra.mxu0 %vm1356_vm5, %v10982_v52  ;;  %v3675_v39 = vpop.f32.mrf.mxu2  ;;  %v6278_v23 = vrot.slane %v6276_v54, 4  ;;  %v6277_v8 = vsel %vm12057_vm14, %v10588_v34, %v6276_v54  ;;  %v10983_v54 = vld [vmem:[#allocation3 + $0x24] sm:$0xff] }
 0x33a   : > { %v5032_v42 = vor.u32 %v5030_v6, %v5029_v27  ;;  %v4858_v7 = vmax.f32 %v4826_v25, 0.0  ;;  %v3731_v17 = vadd.f32 %v3675_v39, %v12680_v19  ;;  %10489 = vmatmul.msk.bf16.gmra.mxu1 %vm1356_vm5, %v5815_v38  ;;  %v5033_v40 = vrot.slane %v5029_v27, 4  ;;  %v10963_v38 = vld [vmem:[#allocation3 + $0xc] sm:$0xff] }
 0x33b   : > { %v3441_v19 = vadd.f32 %v12638_v29, %v12687_v1  ;;  %v13424_v13 = vpop.f32.mrf.mxu3  ;;  %v6280_v46 = vsel %vm12057_vm14, %v6278_v23, %v6279_v49 }
 0x33c   : > { %v5278_v57 = vsel %vm11705_vm10, %v5032_v42, %v5277_v24  ;;  %v4890_v44 = vpack.c.bf16 %v4858_v7, %v4858_v7  ;;  %v4389_v12 = vadd.f32 %v13374_v14, %v3731_v17  ;;  %v13426_v33 = vld [vmem:[#allocation3 + $0x58] sm:$0xf]  ;;  %v5559_v14 = vshrl.u32 %v5354_v22, 16 }
 0x33d   : > { %5279 = vst [vmem:[#allocation3 + $0x60] sm:$0xf] %v5278_v57  ;;  %v13431_v56 = vld [vmem:[#allocation3 + $0x5c] sm:$0x1]  ;;  %v5568_v37 = vshll.u32 %v13426_v33, 16  ;;  %v5572_v29 = vshrl.u32 %v13426_v33, 16  ;;  %v6364_v42 = vunpack.c.l.b16 %v6277_v8  ;;  %v6365_v7 = vunpack.c.l.b16 %v6280_v46 }
 0x33e   : > { %v5035_v15 = vshrl.u32 %v4890_v44, 16  ;;  %v5038_v59 = vshll.u32 %v4890_v44, 16  ;;  %v4791_v18 = vadd.f32 %v13346_v0, %v4389_v12  ;;  %v13429_v45 = vpop.f32.mrf.mxu0  ;;  %v5578_v1 = vshll.u32 %v13431_v56, 16 }
 0x33f   : > { %v5561_v26 = vrot.slane %v5559_v14, 4  ;;  %v5564_v0 = vrot.slane %v5562_v35, 5  ;;  %v5570_v48 = vrot.slane %v5568_v37, 5  ;;  %v5574_v36 = vrot.slane %v5572_v29, 4  ;;  %v15862_v37 = vld [vmem:[#allocation28_spill] sm:$0xff] }
 0x340   : > { %v5037_v47 = vrot.slane %v5035_v15, 7  ;;  %v4827_v32 = vadd.f32 %v13322_v61, %v4791_v18  ;;  %v5580_v10 = vrot.slane %v5578_v1, 5  ;;  %v13457_v44 = vpack.c.b16 %v6365_v7, %v6364_v42  ;;  %v6197_v15 = vld [vmem:[#allocation3 + $0x48] sm:$0xe] }
 0x341   : > { %v3677_v11 = vpop.f32.mrf.mxu2  ;;  %v5565_v30 = vor.u32 %v5564_v0, %v5561_v26  ;;  %v5575_v63 = vor.u32 %v5574_v36, %v5570_v48  ;;  %v6283_v26 = vrot.slane %v13372_v51, 5  ;;  %v6286_v0 = vrot.slane %v13376_v28, 5  ;;  %v15864_v36 = vld [vmem:[#allocation27_spill] sm:$0xff] }
 0x342   : > { %v5040_v31 = vor.u32 %v5038_v59, %v5037_v47  ;;  %v5042_v43 = vrot.slane %v5037_v47, 4  ;;  %v4859_v5 = vmax.f32 %v4827_v32, 0.0  ;;  %v3732_v4 = vadd.f32 %v3677_v11, %v3441_v19 }
 0x343   : > { %v13447_v41 = vpop.f32.mrf.mxu3  ;;  %v5566_v24 = vrot.slane %v5565_v30, 4  ;;  %v5576_v39 = vrot.slane %v5575_v63, 4  ;;  %v10589_v32 = vrot.slane %v6197_v15, 9 }
 0x344   : > { %v5041_v52 = vsel %vm11691_vm9, %v5033_v40, %v5040_v31  ;;  %v5282_v27 = vsel %vm11719_vm11, %v5042_v43, %v5281_v58  ;;  %v4891_v6 = vpack.c.bf16 %v4859_v5, %v4859_v5  ;;  %v4390_v25 = vadd.f32 %v13401_v62, %v3732_v4  ;;  %v13471_v31 = vpop.f32.mrf.mxu1  ;;  %v5356_v43 = vld [vmem:[#allocation3 + $0x60] sm:$0xf] }
 0x345   : > { %5280 = vst.msk [vmem:[#allocation3 + $0x64] sm:$0xf] %vm279_vm0, %v5041_v52  ;;  %v5571_v62 = vsel %vm11481_vm4, %v5566_v24, %v5570_v48  ;;  %v5581_v57 = vsel %vm11481_vm4, %v5576_v39, %v5580_v10  ;;  %v15863_v48 = vld [vmem:[#allocation30_spill] sm:$0xff]  ;;  %v5583_v63 = vshrl.u32 %v5356_v43, 16  ;;  %v5586_v10 = vshll.u32 %v5356_v43, 16 }
 0x346   : > { %5283 = vst [vmem:[#allocation3 + $0x68] sm:$0x1] %v5282_v27  ;;  %v5044_v17 = vshrl.u32 %v4891_v6, 16  ;;  %v4792_v34 = vadd.f32 %v13381_v50, %v4390_v25  ;;  %v13450_v40 = vpop.f32.mrf.mxu0  ;;  %10568 = vmatmul.msk.bf16.gmra.mxu2 %vm1356_vm5, %v10963_v38  ;;  %v5047_v49 = vshll.u32 %v4891_v6, 16  ;;  %v5792_v22 = vunpack.c.l.b16 %v5581_v57  ;;  %v5284_v50 = vld [vmem:[#allocation3 + $0x6c] sm:$0xf] }
 0x347   : > { %v5791_v18 = vunpack.c.l.b16 %v5571_v62  ;;  %v3443_v8 = vadd.f32 %v15864_v36, %v15863_v48  ;;  %v5585_v38 = vrot.slane %v5583_v63, 4  ;;  %v6285_v24 = vrot.slane %v6283_v26, 4  ;;  %v5288_v39 = vld [vmem:[#allocation3 + $0x74] sm:$0x1] }
 0x348   : > { %v5046_v12 = vrot.slane %v5044_v17, 7  ;;  %v4828_v19 = vadd.f32 %v13322_v61, %v4792_v34  ;;  %10605 = vmatmul.msk.bf16.gmra.mxu3 %vm1356_vm5, %v13349_v9  ;;  %v6284_v34 = vsel %vm12057_vm14, %v10589_v32, %v6283_v26 }
 0x349   : > { %10689 = vmatmul.msk.bf16.gmra.mxu0 %vm1356_vm5, %v10983_v54  ;;  %v3680_v59 = vpop.f32.mrf.mxu2  ;;  %v5816_v47 = vpack.c.b16 %v5792_v22, %v5791_v18  ;;  %v6287_v15 = vsel %vm12057_vm14, %v6285_v24, %v6286_v0  ;;  %v6366_v26 = vunpack.c.l.b16 %v6284_v34  ;;  %v15866_v34 = vld [vmem:[#allocation14_spill] sm:$0xff] }
 0x34a   : > { %v5049_v14 = vor.u32 %v5047_v49, %v5046_v12  ;;  %v4860_v35 = vmax.f32 %v4828_v19, 0.0  ;;  %v3733_v29 = vadd.f32 %v3680_v59, %v15862_v37  ;;  %v5050_v1 = vrot.slane %v5046_v12, 4 }
 0x34b   : > { %10490 = vmatmul.msk.bf16.gmra.mxu1 %vm1356_vm5, %v5816_v47  ;;  %v13474_v9 = vpop.f32.mrf.mxu3 }
 0x34c   : > { %v5285_v23 = vsel %vm11705_vm10, %v5049_v14, %v5284_v50  ;;  %v4892_v58 = vpack.c.bf16 %v4860_v35, %v4860_v35  ;;  %v4391_v11 = vadd.f32 %v13424_v13, %v3733_v29  ;;  %v13476_v51 = vld [vmem:[#allocation3 + $0x64] sm:$0xf]  ;;  %v10964_v35 = vld [vmem:[#allocation3 + $0x18] sm:$0xff]  ;;  %v13497_v37 = vpop.f32.mrf.mxu1 }
 0x34d   : > { %5286 = vst [vmem:[#allocation3 + $0x6c] sm:$0xf] %v5285_v23  ;;  %v13481_v28 = vld [vmem:[#allocation3 + $0x68] sm:$0x1]  ;;  %v5592_v46 = vshll.u32 %v13476_v51, 16  ;;  %v5596_v52 = vshrl.u32 %v13476_v51, 16  ;;  %v6367_v23 = vunpack.c.l.b16 %v6287_v15 }
 0x34e   : > { %v5052_v5 = vshrl.u32 %v4892_v58, 16  ;;  %v5055_v4 = vshll.u32 %v4892_v58, 16  ;;  %v4793_v30 = vadd.f32 %v13406_v2, %v4391_v11  ;;  %v13479_v13 = vpop.f32.mrf.mxu0  ;;  %v5602_v27 = vshll.u32 %v13481_v28, 16 }
 0x34f   : > { %v5588_v2 = vrot.slane %v5586_v10, 5  ;;  %v5594_v7 = vrot.slane %v5592_v46, 5  ;;  %v5598_v17 = vrot.slane %v5596_v52, 4  ;;  %v13509_v36 = vpack.c.b16 %v6367_v23, %v6366_v26 }
 0x350   : > { %v5054_v6 = vrot.slane %v5052_v5, 7  ;;  %v4829_v25 = vadd.f32 %v13322_v61, %v4793_v30  ;;  %v5604_v22 = vrot.slane %v5602_v27, 5  ;;  %v6198_v30 = vld [vmem:[#allocation3 + $0x54] sm:$0xe] }
 0x351   : > { %v3682_v42 = vpop.f32.mrf.mxu2  ;;  %v5589_v49 = vor.u32 %v5588_v2, %v5585_v38  ;;  %v5599_v19 = vor.u32 %v5598_v17, %v5594_v7  ;;  %v15865_v27 = vld [vmem:[#allocation31_spill] sm:$0xff]  ;;  %v10590_v24 = vrot.slane %v6198_v30, 9  ;;  %v6293_v17 = vrot.slane %v13431_v56, 5 }
 0x352   : > { %v5057_v54 = vor.u32 %v5055_v4, %v5054_v6  ;;  %v5059_v62 = vrot.slane %v5054_v6, 4  ;;  %v4861_v57 = vmax.f32 %v4829_v25, 0.0  ;;  %v3734_v12 = vadd.f32 %v3682_v42, %v3443_v8 }
 0x353   : > { %v13499_v29 = vpop.f32.mrf.mxu3  ;;  %v5590_v47 = vrot.slane %v5589_v49, 4  ;;  %v5600_v32 = vrot.slane %v5599_v19, 4 }
 0x354   : > { %v5058_v50 = vsel %vm11691_vm9, %v5050_v1, %v5057_v54  ;;  %v5289_v59 = vsel %vm11719_vm11, %v5059_v62, %v5288_v39  ;;  %v4893_v18 = vpack.c.bf16 %v4861_v57, %v4861_v57  ;;  %v4392_v14 = vadd.f32 %v13447_v41, %v3734_v12  ;;  %v10984_v41 = vld [vmem:[#allocation3 + $0x30] sm:$0xff]  ;;  %v15867_v54 = vld [vmem:[#allocation29_spill] sm:$0xff]  ;;  %v5358_v57 = vld [vmem:[#allocation3 + $0x6c] sm:$0xf]  ;;  %v13533_v15 = vpop.f32.mrf.mxu1 }
 0x355   : > { %5287 = vst.msk [vmem:[#allocation3 + $0x70] sm:$0xf] %vm279_vm0, %v5058_v50  ;;  %v5595_v0 = vsel %vm11481_vm4, %v5590_v47, %v5594_v7  ;;  %v5605_v48 = vsel %vm11481_vm4, %v5600_v32, %v5604_v22  ;;  %v6290_v39 = vrot.slane %v13426_v33, 5  ;;  %v3445_v62 = vadd.f32 %v15867_v54, %v15866_v34 }
 0x356   : > { %5290 = vst [vmem:[#allocation3 + $0x74] sm:$0x1] %v5289_v59  ;;  %v5061_v58 = vshrl.u32 %v4893_v18, 16  ;;  %v4794_v1 = vadd.f32 %v13429_v45, %v4392_v14  ;;  %v13502_v11 = vpop.f32.mrf.mxu0  ;;  %10569 = vmatmul.msk.bf16.gmra.mxu2 %vm1356_vm5, %v10964_v35  ;;  %v5064_v43 = vshll.u32 %v4893_v18, 16  ;;  %v5794_v4 = vunpack.c.l.b16 %v5605_v48  ;;  %v5291_v45 = vld [vmem:[#allocation3 + $0x78] sm:$0xf] }
 0x357   : > { %v5793_v10 = vunpack.c.l.b16 %v5595_v0  ;;  %v5607_v56 = vshrl.u32 %v5358_v57, 16  ;;  %v5610_v50 = vshll.u32 %v5358_v57, 16  ;;  %v6292_v26 = vrot.slane %v6290_v39, 4 }
 0x358   : > { %v5063_v8 = vrot.slane %v5061_v58, 7  ;;  %v4830_v5 = vadd.f32 %v13322_v61, %v4794_v1  ;;  %10606 = vmatmul.msk.bf16.gmra.mxu3 %vm1356_vm5, %v13384_v20  ;;  %v6291_v0 = vsel %vm12057_vm14, %v10590_v24, %v6290_v39 }
 0x359   : > { %10690 = vmatmul.msk.bf16.gmra.mxu0 %vm1356_vm5, %v10984_v41  ;;  %v3685_v63 = vpop.f32.mrf.mxu2  ;;  %v5817_v38 = vpack.c.b16 %v5794_v4, %v5793_v10  ;;  %v5609_v32 = vrot.slane %v5607_v56, 4  ;;  %v5612_v58 = vrot.slane %v5610_v50, 5  ;;  %v6199_v56 = vld [vmem:[#allocation3 + $0x60] sm:$0xe]  ;;  %v5298_v50 = vld [vmem:[#allocation3 + $0x84] sm:$0xf] }
 0x35a   : > { %v5066_v46 = vor.u32 %v5064_v43, %v5063_v8  ;;  %v4862_v52 = vmax.f32 %v4830_v5, 0.0  ;;  %v3735_v6 = vadd.f32 %v3685_v63, %v15865_v27  ;;  %v5067_v25 = vrot.slane %v5063_v8, 4 }
 0x35b   : > { %10491 = vmatmul.msk.bf16.gmra.mxu1 %vm1356_vm5, %v5817_v38  ;;  %v13524_v20 = vpop.f32.mrf.mxu3  ;;  %v5613_v4 = vor.u32 %v5612_v58, %v5609_v32  ;;  %v6294_v63 = vsel %vm12057_vm14, %v6292_v26, %v6293_v17  ;;  %v6297_v58 = vrot.slane %v13476_v51, 5 }
 0x35c   : > { %v5292_v42 = vsel %vm11705_vm10, %v5066_v46, %v5291_v45  ;;  %v4894_v2 = vpack.c.bf16 %v4862_v52, %v4862_v52  ;;  %v4393_v7 = vadd.f32 %v13474_v9, %v3735_v6  ;;  %v13526_v12 = vld [vmem:[#allocation3 + $0x70] sm:$0xf]  ;;  %v10965_v6 = vld [vmem:[#allocation3 + $0x24] sm:$0xff] }
 0x35d   : > { %5293 = vst [vmem:[#allocation3 + $0x78] sm:$0xf] %v5292_v42  ;;  %v13531_v9 = vld [vmem:[#allocation3 + $0x74] sm:$0x1]  ;;  %v5616_v59 = vshll.u32 %v13526_v12, 16  ;;  %v5620_v18 = vshrl.u32 %v13526_v12, 16  ;;  %v6368_v42 = vunpack.c.l.b16 %v6291_v0 }
 0x35e   : > { %v5069_v33 = vshrl.u32 %v4894_v2, 16  ;;  %v5072_v49 = vshll.u32 %v4894_v2, 16  ;;  %v4795_v19 = vadd.f32 %v13450_v40, %v4393_v7  ;;  %v13529_v22 = vpop.f32.mrf.mxu0  ;;  %v5626_v14 = vshll.u32 %v13531_v9, 16  ;;  %v5295_v40 = vld [vmem:[#allocation3 + $0x80] sm:$0x1] }
 0x35f   : > { %v5618_v1 = vrot.slane %v5616_v59, 5  ;;  %v5622_v41 = vrot.slane %v5620_v18, 4  ;;  %v5614_v24 = vrot.slane %v5613_v4, 4  ;;  %v6369_v2 = vunpack.c.l.b16 %v6294_v63 }
 0x360   : > { %v5071_v35 = vrot.slane %v5069_v33, 7  ;;  %v4831_v47 = vadd.f32 %v13322_v61, %v4795_v19  ;;  %v5628_v45 = vrot.slane %v5626_v14, 5 }
 0x361   : > { %v3687_v23 = vpop.f32.mrf.mxu2  ;;  %v5623_v30 = vor.u32 %v5622_v41, %v5618_v1  ;;  %v5619_v54 = vsel %vm11481_vm4, %v5614_v24, %v5618_v1  ;;  %v13561_v57 = vpack.c.b16 %v6369_v2, %v6368_v42 }
 0x362   : > { %v5074_v48 = vor.u32 %v5072_v49, %v5071_v35  ;;  %v5076_v8 = vrot.slane %v5071_v35, 4  ;;  %v4863_v43 = vmax.f32 %v4831_v47, 0.0  ;;  %v3736_v5 = vadd.f32 %v3687_v23, %v3445_v62  ;;  %v15868_v47 = vld [vmem:[#allocation15_spill] sm:$0xff] }
 0x363   : > { %v13549_v38 = vpop.f32.mrf.mxu3  ;;  %v5624_v39 = vrot.slane %v5623_v30, 4  ;;  %v5795_v18 = vunpack.c.l.b16 %v5619_v54  ;;  %v10591_v23 = vrot.slane %v6199_v56, 9 }
 0x364   : > { %v5075_v10 = vsel %vm11691_vm9, %v5067_v25, %v5074_v48  ;;  %v5296_v46 = vsel %vm11719_vm11, %v5076_v8, %v5295_v40  ;;  %v4895_v52 = vpack.c.bf16 %v4863_v43, %v4863_v43  ;;  %v4394_v27 = vadd.f32 %v13499_v29, %v3736_v5  ;;  %v10985_v29 = vld [vmem:[#allocation3 + $0x3c] sm:$0xff]  ;;  %v5360_v4 = vld [vmem:[#allocation3 + $0x78] sm:$0xf] }
 0x365   : > { %5294 = vst.msk [vmem:[#allocation3 + $0x7c] sm:$0xf] %vm279_vm0, %v5075_v10  ;;  %v5629_v62 = vsel %vm11481_vm4, %v5624_v39, %v5628_v45  ;;  %v6300_v48 = vrot.slane %v13481_v28, 5  ;;  %v15869_v8 = vld [vmem:[#allocation16_spill] sm:$0xff]  ;;  %v5631_v28 = vshrl.u32 %v5360_v4, 16 }
 0x366   : > { %5297 = vst [vmem:[#allocation3 + $0x80] sm:$0x1] %v5296_v46  ;;  %v5078_v7 = vshrl.u32 %v4895_v52, 16  ;;  %v4796_v17 = vadd.f32 %v13479_v13, %v4394_v27  ;;  %v13552_v25 = vpop.f32.mrf.mxu0  ;;  %10570 = vmatmul.msk.bf16.gmra.mxu2 %vm1356_vm5, %v10965_v6  ;;  %v5081_v49 = vshll.u32 %v4895_v52, 16  ;;  %v5796_v13 = vunpack.c.l.b16 %v5629_v62  ;;  %v15870_v43 = vld [vmem:[#allocation32_spill] sm:$0xff] }
 0x367   : > { %v13555_v34 = vpop.f32.mrf.mxu1  ;;  %v3447_v5 = vadd.f32 %v15870_v43, %v15869_v8  ;;  %v5634_v52 = vshll.u32 %v5360_v4, 16  ;;  %v5633_v2 = vrot.slane %v5631_v28, 4 }
 0x368   : > { %v5080_v33 = vrot.slane %v5078_v7, 7  ;;  %v4832_v19 = vadd.f32 %v13322_v61, %v4796_v17  ;;  %10607 = vmatmul.msk.bf16.gmra.mxu3 %vm1356_vm5, %v13409_v21  ;;  %v5818_v40 = vpack.c.b16 %v5796_v13, %v5795_v18  ;;  %v6299_v7 = vrot.slane %v6297_v58, 4 }
 0x369   : > { %10691 = vmatmul.msk.bf16.gmra.mxu0 %vm1356_vm5, %v10985_v29  ;;  %v3690_v59 = vpop.f32.mrf.mxu2  ;;  %v5636_v29 = vrot.slane %v5634_v52, 5 }
 0x36a   : > { %v5083_v14 = vor.u32 %v5081_v49, %v5080_v33  ;;  %v4864_v35 = vmax.f32 %v4832_v19, 0.0  ;;  %v3737_v32 = vadd.f32 %v3690_v59, %v15868_v47  ;;  %v5084_v26 = vrot.slane %v5080_v33, 4 }
 0x36b   : > { %10492 = vmatmul.msk.bf16.gmra.mxu1 %vm1356_vm5, %v5818_v40  ;;  %v13576_v21 = vpop.f32.mrf.mxu3  ;;  %v6298_v33 = vsel %vm12057_vm14, %v10591_v23, %v6297_v58  ;;  %v10966_v23 = vld [vmem:[#allocation3 + $0x30] sm:$0xff] }
 0x36c   : > { %v5299_v1 = vsel %vm11705_vm10, %v5083_v14, %v5298_v50  ;;  %v4896_v41 = vpack.c.bf16 %v4864_v35, %v4864_v35  ;;  %v4395_v0 = vadd.f32 %v13524_v20, %v3737_v32  ;;  %v13578_v30 = vld [vmem:[#allocation3 + $0x7c] sm:$0xf]  ;;  %v5637_v50 = vor.u32 %v5636_v29, %v5633_v2 }
 0x36d   : > { %5300 = vst [vmem:[#allocation3 + $0x84] sm:$0xf] %v5299_v1  ;;  %v13583_v20 = vld [vmem:[#allocation3 + $0x80] sm:$0x1]  ;;  %v5640_v27 = vshll.u32 %v13578_v30, 16  ;;  %v5644_v6 = vshrl.u32 %v13578_v30, 16  ;;  %v6301_v14 = vsel %vm12057_vm14, %v6299_v7, %v6300_v48 }
 0x36e   : > { %v5086_v51 = vshrl.u32 %v4896_v41, 16  ;;  %v5089_v45 = vshll.u32 %v4896_v41, 16  ;;  %v4797_v63 = vadd.f32 %v13502_v11, %v4395_v0  ;;  %v13581_v10 = vpop.f32.mrf.mxu0  ;;  %v5650_v24 = vshll.u32 %v13583_v20, 16  ;;  %v5302_v11 = vld [vmem:[#allocation3 + $0x8c] sm:$0x1]  ;;  %v15871_v7 = vld [vmem:[#allocation33_spill] sm:$0xff] }
 0x36f   : > { %v13585_v46 = vpop.f32.mrf.mxu1  ;;  %v5642_v54 = vrot.slane %v5640_v27, 5  ;;  %v5646_v62 = vrot.slane %v5644_v6, 4  ;;  %v5638_v1 = vrot.slane %v5637_v50, 4  ;;  %v6370_v0 = vunpack.c.l.b16 %v6298_v33  ;;  %v6200_v27 = vld [vmem:[#allocation3 + $0x6c] sm:$0xe]  ;;  %v15873_v50 = vld [vmem:[#allocation17_spill] sm:$0xff] }
 0x370   : > { %v5088_v39 = vrot.slane %v5086_v51, 7  ;;  %v4833_v42 = vadd.f32 %v13322_v61, %v4797_v63  ;;  %v5652_v18 = vrot.slane %v5650_v24, 5  ;;  %v6371_v8 = vunpack.c.l.b16 %v6301_v14  ;;  %v5305_v6 = vld [vmem:[#allocation3 + $0x90] sm:$0xf] }
 0x371   : > { %v3692_v17 = vpop.f32.mrf.mxu2  ;;  %v5647_v59 = vor.u32 %v5646_v62, %v5642_v54  ;;  %v5643_v4 = vsel %vm11481_vm4, %v5638_v1, %v5642_v54  ;;  %v10592_v54 = vrot.slane %v6200_v27, 9  ;;  %v6304_v62 = vrot.slane %v13526_v12, 5 }
 0x372   : > { %v5091_v49 = vor.u32 %v5089_v45, %v5088_v39  ;;  %v5093_v19 = vrot.slane %v5088_v39, 4  ;;  %v4865_v13 = vmax.f32 %v4833_v42, 0.0  ;;  %v3738_v56 = vadd.f32 %v3692_v17, %v3447_v5 }
 0x373   : > { %v13601_v58 = vpop.f32.mrf.mxu3  ;;  %v5648_v41 = vrot.slane %v5647_v59, 4  ;;  %v13613_v45 = vpack.c.b16 %v6371_v8, %v6370_v0  ;;  %v5797_v39 = vunpack.c.l.b16 %v5643_v4 }
 0x374   : > { %v5092_v35 = vsel %vm11691_vm9, %v5084_v26, %v5091_v49  ;;  %v5303_v47 = vsel %vm11719_vm11, %v5093_v19, %v5302_v11  ;;  %v4897_v32 = vpack.c.bf16 %v4865_v13, %v4865_v13  ;;  %v4396_v40 = vadd.f32 %v13549_v38, %v3738_v56  ;;  %v10986_v38 = vld [vmem:[#allocation3 + $0x48] sm:$0xff] }
 0x375   : > { %5301 = vst.msk [vmem:[#allocation3 + $0x88] sm:$0xf] %vm279_vm0, %v5092_v35  ;;  %v5653_v51 = vsel %vm11481_vm4, %v5648_v41, %v5652_v18  ;;  %v6307_v13 = vrot.slane %v13531_v9, 5  ;;  %v15872_v56 = vld [vmem:[#allocation18_spill] sm:$0xff]  ;;  %v5362_v18 = vld [vmem:[#allocation3 + $0x84] sm:$0xf] }
 0x376   : > { %5304 = vst [vmem:[#allocation3 + $0x8c] sm:$0x1] %v5303_v47  ;;  %v5095_v48 = vshrl.u32 %v4897_v32, 16  ;;  %v4798_v43 = vadd.f32 %v13529_v22, %v4396_v40  ;;  %v13604_v26 = vpop.f32.mrf.mxu0  ;;  %10571 = vmatmul.msk.bf16.gmra.mxu2 %vm1356_vm5, %v10966_v23  ;;  %v5098_v28 = vshll.u32 %v4897_v32, 16  ;;  %v5798_v22 = vunpack.c.l.b16 %v5653_v51 }
 0x377   : > { %v13607_v5 = vpop.f32.mrf.mxu1  ;;  %v3449_v59 = vadd.f32 %v15873_v50, %v15872_v56  ;;  %v5655_v9 = vshrl.u32 %v5362_v18, 16  ;;  %v5658_v23 = vshll.u32 %v5362_v18, 16 }
 0x378   : > { %v5097_v63 = vrot.slane %v5095_v48, 7  ;;  %v4834_v52 = vadd.f32 %v13322_v61, %v4798_v43  ;;  %10608 = vmatmul.msk.bf16.gmra.mxu3 %vm1356_vm5, %v13457_v44  ;;  %v5819_v29 = vpack.c.b16 %v5798_v22, %v5797_v39 }
 0x379   : > { %10692 = vmatmul.msk.bf16.gmra.mxu0 %vm1356_vm5, %v10986_v38  ;;  %v3695_v24 = vpop.f32.mrf.mxu2  ;;  %v5657_v43 = vrot.slane %v5655_v9, 4  ;;  %v6306_v38 = vrot.slane %v6304_v62, 4  ;;  %v5660_v51 = vrot.slane %v5658_v23, 5 }
 0x37a   : > { %v5100_v42 = vor.u32 %v5098_v28, %v5097_v63  ;;  %v4866_v2 = vmax.f32 %v4834_v52, 0.0  ;;  %v3739_v11 = vadd.f32 %v3695_v24, %v15871_v7  ;;  %v5101_v17 = vrot.slane %v5097_v63, 4 }
 0x37b   : > { %10493 = vmatmul.msk.bf16.gmra.mxu1 %vm1356_vm5, %v5819_v29  ;;  %v13628_v44 = vpop.f32.mrf.mxu3  ;;  %v6305_v52 = vsel %vm12057_vm14, %v10592_v54, %v6304_v62  ;;  %v5661_v39 = vor.u32 %v5660_v51, %v5657_v43  ;;  %v6308_v7 = vsel %vm12057_vm14, %v6306_v38, %v6307_v13  ;;  %v10967_v54 = vld [vmem:[#allocation3 + $0x3c] sm:$0xff] }
 0x37c   : > { %v5306_v33 = vsel %vm11705_vm10, %v5100_v42, %v5305_v6  ;;  %v4898_v49 = vpack.c.bf16 %v4866_v2, %v4866_v2  ;;  %v4397_v19 = vadd.f32 %v13576_v21, %v3739_v11  ;;  %v13630_v14 = vld [vmem:[#allocation3 + $0x88] sm:$0xf]  ;;  %v6372_v50 = vunpack.c.l.b16 %v6305_v52 }
 0x37d   : > { %5307 = vst [vmem:[#allocation3 + $0x90] sm:$0xf] %v5306_v33  ;;  %v13635_v21 = vld [vmem:[#allocation3 + $0x8c] sm:$0x1]  ;;  %v5664_v1 = vshll.u32 %v13630_v14, 16  ;;  %v5668_v41 = vshrl.u32 %v13630_v14, 16 }
 0x37e   : > { %v5103_v12 = vshrl.u32 %v4898_v49, 16  ;;  %v5106_v35 = vshll.u32 %v4898_v49, 16  ;;  %v4799_v47 = vadd.f32 %v13552_v25, %v4397_v19  ;;  %v13633_v32 = vpop.f32.mrf.mxu0  ;;  %v5674_v0 = vshll.u32 %v13635_v21, 16  ;;  %v5309_v25 = vld [vmem:[#allocation3 + $0x98] sm:$0x1] }
 0x37f   : > { %v13637_v40 = vpop.f32.mrf.mxu1  ;;  %v5666_v63 = vrot.slane %v5664_v1, 5  ;;  %v5670_v28 = vrot.slane %v5668_v41, 4  ;;  %v5662_v19 = vrot.slane %v5661_v39, 4  ;;  %v15875_v39 = vld [vmem:[#allocation20_spill] sm:$0xff] }
 0x380   : > { %v5105_v8 = vrot.slane %v5103_v12, 7  ;;  %v4835_v48 = vadd.f32 %v13322_v61, %v4799_v47  ;;  %v5676_v2 = vrot.slane %v5674_v0, 5  ;;  %v6201_v0 = vld [vmem:[#allocation3 + $0x78] sm:$0xe] }
 0x381   : > { %v3697_v4 = vpop.f32.mrf.mxu2  ;;  %v5671_v42 = vor.u32 %v5670_v28, %v5666_v63  ;;  %v10593_v52 = vrot.slane %v6201_v0, 9 }
 0x382   : > { %v5108_v22 = vor.u32 %v5106_v35, %v5105_v8  ;;  %v5110_v27 = vrot.slane %v5105_v8, 4  ;;  %v4867_v6 = vmax.f32 %v4835_v48, 0.0  ;;  %v3740_v24 = vadd.f32 %v3697_v4, %v3449_v59  ;;  %v5312_v8 = vld [vmem:[#allocation3 + $0x9c] sm:$0xf]  ;;  %v15874_v4 = vld [vmem:[#allocation34_spill] sm:$0xff] }
 0x383   : > { %v13653_v62 = vpop.f32.mrf.mxu3  ;;  %v5672_v56 = vrot.slane %v5671_v42, 4  ;;  %v6373_v59 = vunpack.c.l.b16 %v6308_v7  ;;  %v5667_v35 = vsel %vm11481_vm4, %v5662_v19, %v5666_v63  ;;  %v15876_v42 = vld [vmem:[#allocation19_spill] sm:$0xff] }
 0x384   : > { %v5109_v11 = vsel %vm11691_vm9, %v5101_v17, %v5108_v22  ;;  %v5310_v29 = vsel %vm11719_vm11, %v5110_v27, %v5309_v25  ;;  %v4899_v33 = vpack.c.bf16 %v4867_v6, %v4867_v6  ;;  %v4398_v49 = vadd.f32 %v13601_v58, %v3740_v24  ;;  %v10987_v58 = vld [vmem:[#allocation3 + $0x54] sm:$0xff]  ;;  %v5364_v7 = vld [vmem:[#allocation3 + $0x90] sm:$0xf] }
 0x385   : > { %5308 = vst.msk [vmem:[#allocation3 + $0x94] sm:$0xf] %vm279_vm0, %v5109_v11  ;;  %v5677_v47 = vsel %vm11481_vm4, %v5672_v56, %v5676_v2  ;;  %v13665_v9 = vpack.c.b16 %v6373_v59, %v6372_v50  ;;  %v5799_v43 = vunpack.c.l.b16 %v5667_v35  ;;  %v6311_v22 = vrot.slane %v13578_v30, 5 }
 0x386   : > { %5311 = vst [vmem:[#allocation3 + $0x98] sm:$0x1] %v5310_v29  ;;  %v5112_v13 = vshrl.u32 %v4899_v33, 16  ;;  %v4800_v18 = vadd.f32 %v13581_v10, %v4398_v49  ;;  %v13656_v17 = vpop.f32.mrf.mxu0  ;;  %10572 = vmatmul.msk.bf16.gmra.mxu2 %vm1356_vm5, %v10967_v54  ;;  %v5115_v1 = vshll.u32 %v4899_v33, 16  ;;  %v5800_v10 = vunpack.c.l.b16 %v5677_v47  ;;  %v5316_v47 = vld [vmem:[#allocation3 + $0xa4] sm:$0x1] }
 0x387   : > { %v13659_v12 = vpop.f32.mrf.mxu1  ;;  %v6314_v24 = vrot.slane %v13583_v20, 5  ;;  %v3451_v2 = vadd.f32 %v15876_v42, %v15875_v39  ;;  %v5679_v20 = vshrl.u32 %v5364_v7, 16  ;;  %v5682_v19 = vshll.u32 %v5364_v7, 16 }
 0x388   : > { %v5114_v23 = vrot.slane %v5112_v13, 7  ;;  %v4836_v41 = vadd.f32 %v13322_v61, %v4800_v18  ;;  %10609 = vmatmul.msk.bf16.gmra.mxu3 %vm1356_vm5, %v13509_v36  ;;  %v5820_v28 = vpack.c.b16 %v5800_v10, %v5799_v43  ;;  %v13697_v18 = vld [vmem:[%s15788_s2] ss:$0 sm:$0xff]  ;;  %v6313_v35 = vrot.slane %v6311_v22, 4 }
 0x389   : > { %10693 = vmatmul.msk.bf16.gmra.mxu0 %vm1356_vm5, %v10987_v58  ;;  %v3700_v48 = vpop.f32.mrf.mxu2  ;;  %v5681_v58 = vrot.slane %v5679_v20, 4  ;;  %v6312_v0 = vsel %vm12057_vm14, %v10593_v52, %v6311_v22  ;;  %v10968_v52 = vld [vmem:[#allocation3 + $0x48] sm:$0xff] }
 0x38a   : > { %v5117_v38 = vor.u32 %v5115_v1, %v5114_v23  ;;  %v4868_v25 = vmax.f32 %v4836_v41, 0.0  ;;  %v3741_v51 = vadd.f32 %v3700_v48, %v15874_v4  ;;  %v5118_v63 = vrot.slane %v5114_v23, 4 }
 0x38b   : > { %10494 = vmatmul.msk.bf16.gmra.mxu1 %vm1356_vm5, %v5820_v28  ;;  %v13680_v36 = vpop.f32.mrf.mxu3  ;;  %v5684_v1 = vrot.slane %v5682_v19, 5  ;;  %v6315_v28 = vsel %vm12057_vm14, %v6313_v35, %v6314_v24  ;;  %v6374_v7 = vunpack.c.l.b16 %v6312_v0 }
 0x38c   : > { %v5313_v61 = vsel %vm11705_vm10, %v5117_v38, %v5312_v8  ;;  %v4900_v27 = vpack.c.bf16 %v4868_v25, %v4868_v25  ;;  %v4399_v6 = vadd.f32 %v13628_v44, %v3741_v51  ;;  %v13682_v11 = vld [vmem:[#allocation3 + $0x94] sm:$0xf] }
 0x38d   : > { %5314 = vst [vmem:[#allocation3 + $0x9c] sm:$0xf] %v5313_v61  ;;  %v13687_v44 = vld [vmem:[#allocation3 + $0x98] sm:$0x1]  ;;  %v5688_v56 = vshll.u32 %v13682_v11, 16  ;;  %v5692_v50 = vshrl.u32 %v13682_v11, 16  ;;  %v5685_v25 = vor.u32 %v5684_v1, %v5681_v58 }
 0x38e   : > { %v5120_v30 = vshrl.u32 %v4900_v27, 16  ;;  %v5123_v29 = vshll.u32 %v4900_v27, 16  ;;  %v4801_v33 = vadd.f32 %v13604_v26, %v4399_v6  ;;  %v13685_v49 = vpop.f32.mrf.mxu0  ;;  %v5698_v59 = vshll.u32 %v13687_v44, 16  ;;  %v15877_v1 = vld [vmem:[#allocation21_spill] sm:$0xff] }
 0x38f   : > { %v13689_v54 = vpop.f32.mrf.mxu1  ;;  %v5690_v41 = vrot.slane %v5688_v56, 5  ;;  %v5694_v10 = vrot.slane %v5692_v50, 4  ;;  %v5686_v42 = vrot.slane %v5685_v25, 4 }
 0x390   : > { %v5122_v13 = vrot.slane %v5120_v30, 7  ;;  %v4837_v26 = vadd.f32 %v13697_v18, %v4801_v33  ;;  %v5700_v51 = vrot.slane %v5698_v59, 5  ;;  %v6375_v30 = vunpack.c.l.b16 %v6315_v28 }
 0x391   : > { %v3702_v23 = vpop.f32.mrf.mxu2  ;;  %v5695_v4 = vor.u32 %v5694_v10, %v5690_v41  ;;  %v5691_v20 = vsel %vm11481_vm4, %v5686_v42, %v5690_v41 }
 0x392   : > { %v5125_v8 = vor.u32 %v5123_v29, %v5122_v13  ;;  %v5127_v48 = vrot.slane %v5122_v13, 4  ;;  %v4869_v43 = vmax.f32 %v4837_v26, 0.0  ;;  %v3742_v38 = vadd.f32 %v3702_v23, %v3451_v2  ;;  %v5319_v26 = vld [vmem:[#allocation3 + $0xa8] sm:$0xf] }
 0x393   : > { %v13710_v22 = vpop.f32.mrf.mxu3  ;;  %v5696_v2 = vrot.slane %v5695_v4, 4  ;;  %v13722_v56 = vpack.c.b16 %v6375_v30, %v6374_v7  ;;  %v5801_v35 = vunpack.c.l.b16 %v5691_v20  ;;  %v15878_v4 = vld [vmem:[#allocation35_spill] sm:$0xff] }
 0x394   : > { %v5126_v61 = vsel %vm11691_vm9, %v5118_v63, %v5125_v8  ;;  %v5317_v27 = vsel %vm11719_vm11, %v5127_v48, %v5316_v47  ;;  %v4901_v6 = vpack.c.bf16 %v4869_v43, %v4869_v43  ;;  %v4400_v39 = vadd.f32 %v13653_v62, %v3742_v38  ;;  %v10988_v62 = vld [vmem:[#allocation3 + $0x60] sm:$0xff]  ;;  %v5366_v38 = vld [vmem:[#allocation3 + $0x9c] sm:$0xf]  ;;  %v5323_v20 = vld [vmem:[#allocation3 + $0xb0] sm:$0x1] }
 0x395   : > { %5315 = vst.msk [vmem:[#allocation3 + $0xa0] sm:$0xf] %vm279_vm0, %v5126_v61  ;;  %v5701_v19 = vsel %vm11481_vm4, %v5696_v2, %v5700_v51  ;;  %v15879_v51 = vld [vmem:[#allocation22_spill] sm:$0xff]  ;;  %v5706_v42 = vshll.u32 %v5366_v38, 16 }
 0x396   : > { %5318 = vst [vmem:[#allocation3 + $0xa4] sm:$0x1] %v5317_v27  ;;  %v5129_v24 = vshrl.u32 %v4901_v6, 16  ;;  %v4802_v29 = vadd.f32 %v13633_v32, %v4400_v39  ;;  %v13713_v63 = vpop.f32.mrf.mxu0  ;;  %10573 = vmatmul.msk.bf16.gmra.mxu2 %vm1356_vm5, %v10968_v52  ;;  %v5132_v59 = vshll.u32 %v4901_v6, 16  ;;  %v5802_v32 = vunpack.c.l.b16 %v5701_v19 }
 0x397   : > { %v13716_v33 = vpop.f32.mrf.mxu1  ;;  %v3453_v28 = vadd.f32 %v15879_v51, %v15878_v4  ;;  %v5703_v39 = vshrl.u32 %v5366_v38, 16  ;;  %v5708_v19 = vrot.slane %v5706_v42, 5 }
 0x398   : > { %v5131_v50 = vrot.slane %v5129_v24, 7  ;;  %v4838_v13 = vadd.f32 %v13697_v18, %v4802_v29  ;;  %10610 = vmatmul.msk.bf16.gmra.mxu3 %vm1356_vm5, %v13561_v57  ;;  %v5821_v41 = vpack.c.b16 %v5802_v32, %v5801_v35 }
 0x399   : > { %10694 = vmatmul.msk.bf16.gmra.mxu0 %vm1356_vm5, %v10988_v62  ;;  %v3705_v58 = vpop.f32.mrf.mxu2  ;;  %v5705_v62 = vrot.slane %v5703_v39, 4 }
 0x39a   : > { %v5134_v47 = vor.u32 %v5132_v59, %v5131_v50  ;;  %v4870_v23 = vmax.f32 %v4838_v13, 0.0  ;;  %v3743_v10 = vadd.f32 %v3705_v58, %v15877_v1 }
 0x39b   : > { %10495 = vmatmul.msk.bf16.gmra.mxu1 %vm1356_vm5, %v5821_v41  ;;  %v13733_v43 = vpop.f32.mrf.mxu3 }
 0x39c   : > { %v5320_v0 = vsel %vm11705_vm10, %v5134_v47, %v5319_v26  ;;  %v4902_v8 = vpack.c.bf16 %v4870_v23, %v4870_v23  ;;  %v4401_v48 = vadd.f32 %v13680_v36, %v3743_v10  ;;  %v13735_v25 = vld [vmem:[#allocation3 + $0xa0] sm:$0xf]  ;;  %v5135_v36 = vrot.slane %v5131_v50, 4 }
 0x39d   : > { %5321 = vst [vmem:[#allocation3 + $0xa8] sm:$0xf] %v5320_v0  ;;  %v13742_v6 = vld [vmem:[#allocation3 + $0xa4] sm:$0x1]  ;;  %v5712_v2 = vshll.u32 %v13735_v25, 16  ;;  %v5716_v7 = vshrl.u32 %v13735_v25, 16  ;;  %v5709_v47 = vor.u32 %v5708_v19, %v5705_v62 }
 0x39e   : > { %v5137_v61 = vshrl.u32 %v4902_v8, 16  ;;  %v4803_v57 = vadd.f32 %v13656_v17, %v4401_v48  ;;  %v13740_v27 = vpop.f32.mrf.mxu0  ;;  %v5140_v24 = vshll.u32 %v4902_v8, 16  ;;  %v5722_v32 = vshll.u32 %v13742_v6, 16  ;;  %v10969_v8 = vld [vmem:[#allocation3 + $0x54] sm:$0xff] }
 0x39f   : > { %v13744_v52 = vpop.f32.mrf.mxu1  ;;  %v5714_v59 = vrot.slane %v5712_v2, 5  ;;  %v5718_v13 = vrot.slane %v5716_v7, 4  ;;  %v5710_v38 = vrot.slane %v5709_v47, 4 }
 0x3a0   : > { %v5139_v30 = vrot.slane %v5137_v61, 7  ;;  %v4839_v29 = vadd.f32 %v13697_v18, %v4803_v57  ;;  %v5724_v51 = vrot.slane %v5722_v32, 5 }
 0x3a1   : > { %v3707_v17 = vpop.f32.mrf.mxu2  ;;  %v5719_v23 = vor.u32 %v5718_v13, %v5714_v59  ;;  %v5715_v42 = vsel %vm11481_vm4, %v5710_v38, %v5714_v59 }
 0x3a2   : > { %v5142_v50 = vor.u32 %v5140_v24, %v5139_v30  ;;  %v5144_v26 = vrot.slane %v5139_v30, 4  ;;  %v4871_v58 = vmax.f32 %v4839_v29, 0.0  ;;  %v3744_v35 = vadd.f32 %v3707_v17, %v3453_v28 }
 0x3a3   : > { %v13756_v48 = vpop.f32.mrf.mxu3  ;;  %v5720_v4 = vrot.slane %v5719_v23, 4  ;;  %v5803_v19 = vunpack.c.l.b16 %v5715_v42 }
 0x3a4   : > { %v5143_v1 = vsel %vm11691_vm9, %v5135_v36, %v5142_v50  ;;  %v5324_v10 = vsel %vm11719_vm11, %v5144_v26, %v5323_v20  ;;  %v4903_v41 = vpack.c.bf16 %v4871_v58, %v4871_v58  ;;  %v4402_v0 = vadd.f32 %v13710_v22, %v3744_v35  ;;  %v5368_v39 = vld [vmem:[#allocation3 + $0xa8] sm:$0xf]  ;;  %v10989_v22 = vld [vmem:[#allocation3 + $0x6c] sm:$0xff]  ;;  %v5326_v20 = vld [vmem:[#allocation3 + $0xb4] sm:$0xf] }
 0x3a5   : > { %5322 = vst.msk [vmem:[#allocation3 + $0xac] sm:$0xf] %vm279_vm0, %v5143_v1  ;;  %v5725_v2 = vsel %vm11481_vm4, %v5720_v4, %v5724_v51  ;;  %v5727_v7 = vshrl.u32 %v5368_v39, 16  ;;  %v5730_v30 = vshll.u32 %v5368_v39, 16  ;;  %v15881_v50 = vld [vmem:[#allocation23_spill] sm:$0xff] }
 0x3a6   : > { %5325 = vst [vmem:[#allocation3 + $0xb0] sm:$0x1] %v5324_v10  ;;  %v5146_v28 = vshrl.u32 %v4903_v41, 16  ;;  %v4804_v61 = vadd.f32 %v13685_v49, %v4402_v0  ;;  %v13759_v57 = vpop.f32.mrf.mxu0  ;;  %10574 = vmatmul.msk.bf16.gmra.mxu2 %vm1356_vm5, %v10969_v8  ;;  %v5149_v29 = vshll.u32 %v4903_v41, 16  ;;  %v5804_v62 = vunpack.c.l.b16 %v5725_v2 }
 0x3a7   : > { %15880 = vst [vmem:[#allocation25_spill] sm:$0xff] %v13759_v57  ;;  %v13762_v36 = vpop.f32.mrf.mxu1  ;;  %v5729_v58 = vrot.slane %v5727_v7, 4  ;;  %v5732_v35 = vrot.slane %v5730_v30, 5 }
 0x3a8   : > { %v5148_v24 = vrot.slane %v5146_v28, 7  ;;  %v4840_v49 = vadd.f32 %v13697_v18, %v4804_v61  ;;  %10611 = vmatmul.msk.bf16.gmra.mxu3 %vm1356_vm5, %v13613_v45  ;;  %v5822_v59 = vpack.c.b16 %v5804_v62, %v5803_v19  ;;  %v10999_v28 = vld [vmem:[#allocation9 + $0x28] sm:$0xff] }
 0x3a9   : > { %10695 = vmatmul.msk.bf16.gmra.mxu0 %vm1356_vm5, %v10989_v22  ;;  %v3710_v17 = vpop.f32.mrf.mxu2  ;;  %v5733_v22 = vor.u32 %v5732_v35, %v5729_v58  ;;  %7813 = vmatpush.bf16.msra.mxu2 %v10999_v28 }
 0x3aa   : > { %v5151_v13 = vor.u32 %v5149_v29, %v5148_v24  ;;  %v4872_v32 = vmax.f32 %v4840_v49, 0.0  ;;  %v3745_v26 = vadd.f32 %v3710_v17, %v15881_v50  ;;  %v5330_v49 = vld [vmem:[#allocation3 + $0xbc] sm:$0x1] }
 0x3ab   : > { %10496 = vmatmul.msk.bf16.gmra.mxu1 %vm1356_vm5, %v5822_v59  ;;  %v13779_v41 = vpop.f32.mrf.mxu3  ;;  %v5734_v50 = vrot.slane %v5733_v22, 4 }
 0x3ac   : > { %v5327_v47 = vsel %vm11705_vm10, %v5151_v13, %v5326_v20  ;;  %v4904_v23 = vpack.c.bf16 %v4872_v32, %v4872_v32  ;;  %v4403_v1 = vadd.f32 %v13733_v43, %v3745_v26  ;;  %v13776_v10 = vld [vmem:[#allocation3 + $0xac] sm:$0xf]  ;;  %v15883_v43 = vld [vmem:[#allocation24_spill] sm:$0xff] }
 0x3ad   : > { %5328 = vst [vmem:[#allocation3 + $0xb4] sm:$0xf] %v5327_v47  ;;  %v5736_v0 = vshll.u32 %v13776_v10, 16  ;;  %v13785_v4 = vld [vmem:[#allocation3 + $0xb0] sm:$0x1]  ;;  %v5740_v51 = vshrl.u32 %v13776_v10, 16  ;;  %v3455_v61 = vadd.f32 %v13471_v31, %v15883_v43 }
 0x3ae   : > { %v5154_v8 = vshrl.u32 %v4904_v23, 16  ;;  %v4805_v45 = vadd.f32 %v13713_v63, %v4403_v1  ;;  %v13783_v38 = vpop.f32.mrf.mxu0  ;;  %v5157_v7 = vshll.u32 %v4904_v23, 16  ;;  %v5152_v63 = vrot.slane %v5148_v24, 4  ;;  %v11016_v31 = vld [vmem:[#allocation9 + $0x30] sm:$0xff]  ;;  %v10970_v47 = vld [vmem:[#allocation3 + $0x60] sm:$0xff] }
 0x3af   : > { %15882 = vst [vmem:[#allocation26_spill] sm:$0xff] %v13783_v38  ;;  %v13790_v39 = vpop.f32.mrf.mxu1  ;;  %v5738_v42 = vrot.slane %v5736_v0, 5  ;;  %v5742_v29 = vrot.slane %v5740_v51, 4  ;;  %v5746_v20 = vshll.u32 %v13785_v4, 16  ;;  %8104 = vmatpush.bf16.msra.mxu3 %v11016_v31  ;;  %v11017_v31 = vld [vmem:[#allocation9 + $0x38] sm:$0xff] }
 0x3b0   : > { %v5156_v2 = vrot.slane %v5154_v8, 7  ;;  %v4841_v30 = vadd.f32 %v13697_v18, %v4805_v45  ;;  %8762 = vmatpush.bf16.msra.mxu0 %v11017_v31 }
 0x3b1   : > { %v3712_v62 = vpop.f32.mrf.mxu2  ;;  %v5743_v26 = vor.u32 %v5742_v29, %v5738_v42  ;;  %v5748_v8 = vrot.slane %v5746_v20, 5 }
 0x3b2   : > { %v5159_v17 = vor.u32 %v5157_v7, %v5156_v2  ;;  %v5161_v19 = vrot.slane %v5156_v2, 4  ;;  %v4873_v13 = vmax.f32 %v4841_v30, 0.0  ;;  %v3746_v32 = vadd.f32 %v3712_v62, %v3455_v61  ;;  %v10990_v2 = vld [vmem:[#allocation3 + $0x78] sm:$0xff] }
 0x3b3   : > { %v13800_v1 = vpop.f32.mrf.mxu3  ;;  %v5744_v0 = vrot.slane %v5743_v26, 4  ;;  %v6202_v26 = vld [vmem:[#allocation3 + $0x84] sm:$0xe] }
 0x3b4   : > { %v5160_v59 = vsel %vm11691_vm9, %v5152_v63, %v5159_v17  ;;  %v5331_v58 = vsel %vm11719_vm11, %v5161_v19, %v5330_v49  ;;  %v4905_v35 = vpack.c.bf16 %v4873_v13, %v4873_v13  ;;  %v4404_v24 = vadd.f32 %v13756_v48, %v3746_v32  ;;  %v5370_v23 = vld [vmem:[#allocation3 + $0xb4] sm:$0xf] }
 0x3b5   : > { %5329 = vst.msk [vmem:[#allocation3 + $0xb8] sm:$0xf] %vm279_vm0, %v5160_v59  ;;  %v5751_v45 = vshrl.u32 %v5370_v23, 16  ;;  %v5754_v51 = vshll.u32 %v5370_v23, 16  ;;  %v5739_v48 = vsel %vm11481_vm4, %v5734_v50, %v5738_v42  ;;  %v5749_v7 = vsel %vm11481_vm4, %v5744_v0, %v5748_v8 }
 0x3b6   : > { %5332 = vst [vmem:[#allocation3 + $0xbc] sm:$0x1] %v5331_v58  ;;  %v5163_v28 = vshrl.u32 %v4905_v35, 16  ;;  %v4806_v43 = vadd.f32 %v13740_v27, %v4404_v24  ;;  %v13803_v61 = vpop.f32.mrf.mxu0  ;;  %10575 = vmatmul.msk.bf16.gmra.mxu2 %vm1356_vm5, %v10970_v47  ;;  %v5166_v29 = vshll.u32 %v4905_v35, 16  ;;  %v5806_v49 = vunpack.c.l.b16 %v5749_v7  ;;  %v5333_v27 = vld [vmem:[#allocation3 + $0xc0] sm:$0xf] }
 0x3b7   : > { %15884 = vst [vmem:[#allocation28_spill] sm:$0xff] %v13803_v61  ;;  %v13808_v22 = vpop.f32.mrf.mxu1  ;;  %v5805_v20 = vunpack.c.l.b16 %v5739_v48  ;;  %v5753_v17 = vrot.slane %v5751_v45, 4  ;;  %v5756_v19 = vrot.slane %v5754_v51, 5  ;;  %v13827_v24 = vld [vmem:[#allocation3 + $0x10] sm:$0xf]  ;;  %v11018_v45 = vld [vmem:[#allocation9 + $0x40] sm:$0xff] }
 0x3b8   : > { %v13812_v30 = vrot.slane %v5163_v28, 7  ;;  %v4842_v63 = vadd.f32 %v13697_v18, %v4806_v43  ;;  %10612 = vmatmul.msk.bf16.gmra.mxu3 %vm1356_vm5, %v13665_v9  ;;  %v10594_v51 = vrot.slane %v6202_v26, 9  ;;  %v6318_v28 = vrot.slane %v13630_v14, 5  ;;  %9164 = vmatpush.bf16.msra.mxu1 %v11018_v45  ;;  %v13999_v61 = vld [vmem:[#allocation3 + $0x38] sm:$0x1] }
 0x3b9   : > { %10696 = vmatmul.msk.bf16.gmra.mxu0 %vm1356_vm5, %v10990_v2  ;;  %v6111_v62 = vpop.f32.mrf.mxu2  ;;  %v5823_v50 = vpack.c.b16 %v5806_v49, %v5805_v20  ;;  %v5757_v47 = vor.u32 %v5756_v19, %v5753_v17  ;;  %v6925_v2 = vshll.u32 %v13827_v24, 16  ;;  %v6929_v7 = vshrl.u32 %v13827_v24, 16  ;;  %v5337_v17 = vld [vmem:[#allocation3 + $0xc8] sm:$0x1] }
 0x3ba   : > { %v5168_v42 = vor.u32 %v5166_v29, %v13812_v30  ;;  %v4874_v13 = vmax.f32 %v4842_v63, 0.0  ;;  %v6112_v32 = vadd.f32 %v6111_v62, %v13497_v37  ;;  %v6320_v62 = vrot.slane %v6318_v28, 4 }
 0x3bb   : > { %10497 = vmatmul.msk.bf16.gmra.mxu1 %vm1356_vm5, %v5823_v50  ;;  %v13830_v37 = vpop.f32.mrf.mxu3  ;;  %v5169_v20 = vrot.slane %v13812_v30, 4  ;;  %v5758_v14 = vrot.slane %v5757_v47, 4 }
 0x3bc   : > { %v5334_v18 = vsel %vm11705_vm10, %v5168_v42, %v5333_v27  ;;  %v4906_v59 = vpack.c.bf16 %v4874_v13, %v4874_v13  ;;  %v13823_v58 = vadd.f32 %v13779_v41, %v6112_v32  ;;  %v13825_v35 = vld [vmem:[#allocation3 + $0xb8] sm:$0xf]  ;;  %v6319_v27 = vsel %vm12057_vm14, %v10594_v51, %v6318_v28 }
 0x3bd   : > { %5335 = vst [vmem:[#allocation3 + $0xc0] sm:$0xf] %v5334_v18  ;;  %v13832_v9 = vld [vmem:[#allocation3 + $0xbc] sm:$0x1]  ;;  %v5760_v60 = vshll.u32 %v13825_v35, 16  ;;  %v5764_v23 = vshrl.u32 %v13825_v35, 16  ;;  %v6376_v30 = vunpack.c.l.b16 %v6319_v27 }
 0x3be   : > { %15885 = vst [vmem:[#allocation30_spill] sm:$0xff] %v13823_v58  ;;  %v5171_v0 = vshrl.u32 %v4906_v59, 16  ;;  %v13836_v41 = vpop.f32.mrf.mxu0  ;;  %v5770_v8 = vshll.u32 %v13832_v9, 16  ;;  %v5174_v63 = vshll.u32 %v4906_v59, 16  ;;  %v6321_v13 = vrot.slane %v13635_v21, 5 }
 0x3bf   : > { %15886 = vst [vmem:[#allocation27_spill] sm:$0xff] %v13836_v41  ;;  %v5762_v43 = vrot.slane %v5760_v60, 5  ;;  %v5766_v48 = vrot.slane %v5764_v23, 4  ;;  %v13842_v49 = vpop.f32.mrf.mxu1  ;;  %v6867_v60 = vld [vmem:[#allocation3 + $0xc] sm:$0xf]  ;;  %v6931_v27 = vrot.slane %v6929_v7, 4 }
 0x3c0   : > { %v5173_v29 = vrot.slane %v5171_v0, 7  ;;  %v5772_v26 = vrot.slane %v5770_v8, 5  ;;  %v6322_v23 = vsel %vm12057_vm14, %v6320_v62, %v6321_v13  ;;  %v14097_v58 = vld [vmem:[#allocation3 + $0x50] sm:$0x1] }
 0x3c1   : > { %v6113_v19 = vpop.f32.mrf.mxu2  ;;  %v5767_v42 = vor.u32 %v5766_v48, %v5762_v43  ;;  %v5763_v18 = vsel %vm11481_vm4, %v5758_v14, %v5762_v43  ;;  %v6377_v8 = vunpack.c.l.b16 %v6322_v23  ;;  %v6916_v43 = vshrl.u32 %v6867_v60, 16  ;;  %v10991_v48 = vld [vmem:[#allocation3 + $0x84] sm:$0xff]  ;;  %v13874_v14 = vld [vmem:[#allocation3 + $0x14] sm:$0x1] }
 0x3c2   : > { %v5176_v32 = vor.u32 %v5174_v63, %v5173_v29  ;;  %v5178_v31 = vrot.slane %v5173_v29, 4  ;;  %v6114_v50 = vadd.f32 %v6113_v19, %v13533_v15  ;;  %v10971_v15 = vld [vmem:[#allocation3 + $0x6c] sm:$0xff]  ;;  %v6919_v29 = vshll.u32 %v6867_v60, 16 }
 0x3c3   : > { %v5768_v59 = vrot.slane %v5767_v42, 4  ;;  %v6472_v45 = vpop.f32.mrf.mxu3  ;;  %v13866_v3 = vpack.c.b16 %v6377_v8, %v6376_v30  ;;  %v6927_v63 = vrot.slane %v6925_v2, 5  ;;  %v6918_v42 = vrot.slane %v6916_v43, 4 }
 0x3c4   : > { %v5177_v47 = vsel %vm11691_vm9, %v5169_v20, %v5176_v32  ;;  %v5338_v21 = vsel %vm11719_vm11, %v5178_v31, %v5337_v17  ;;  %v13858_v0 = vadd.f32 %v13800_v1, %v6114_v50  ;;  %v5807_v1 = vunpack.c.l.b16 %v5763_v18  ;;  %v6203_v50 = vld [vmem:[#allocation3 + $0x90] sm:$0xe]  ;;  %v6870_v18 = vld [vmem:[#allocation3 + $0x18] sm:$0xf] }
 0x3c5   : > { %5336 = vst.msk [vmem:[#allocation3 + $0xc4] sm:$0xf] %vm279_vm0, %v5177_v47  ;;  %v5773_v51 = vsel %vm11481_vm4, %v5768_v59, %v5772_v26  ;;  %v6921_v13 = vrot.slane %v6919_v29, 5  ;;  %v6932_v32 = vor.u32 %v6931_v27, %v6927_v63  ;;  %v6935_v7 = vshll.u32 %v13874_v14, 16  ;;  %v13885_v47 = vld [vmem:[#allocation3 + $0x1c] sm:$0xf] }
 0x3c6   : > { %15887 = vst [vmem:[#allocation31_spill] sm:$0xff] %v13858_v0  ;;  %v13863_v28 = vpop.f32.mrf.mxu0  ;;  %10576 = vmatmul.msk.bf16.gmra.mxu2 %vm1356_vm5, %v10971_v15  ;;  %v5808_v53 = vunpack.c.l.b16 %v5773_v51  ;;  %v6325_v26 = vrot.slane %v13682_v11, 5  ;;  %v6328_v30 = vrot.slane %v13687_v44, 5  ;;  %v6940_v8 = vshrl.u32 %v6870_v18, 16 }
 0x3c7   : > { %5339 = vst [vmem:[#allocation3 + $0xc8] sm:$0x1] %v5338_v21  ;;  %v6922_v59 = vor.u32 %v6921_v13, %v6918_v42  ;;  %v6933_v60 = vrot.slane %v6932_v32, 4  ;;  %v6937_v15 = vrot.slane %v6935_v7, 5  ;;  %v6943_v43 = vshll.u32 %v6870_v18, 16 }
 0x3c8   : > { %15888 = vst [vmem:[#allocation14_spill] sm:$0xff] %v13863_v28  ;;  %v5824_v20 = vpack.c.b16 %v5808_v53, %v5807_v1  ;;  %v13869_v17 = vpop.f32.mrf.mxu1  ;;  %10613 = vmatmul.msk.bf16.gmra.mxu3 %vm1356_vm5, %v13722_v56  ;;  %v10595_v56 = vrot.slane %v6203_v50, 9  ;;  %v6327_v23 = vrot.slane %v6325_v26, 4  ;;  %v6949_v27 = vshll.u32 %v13885_v47, 16  ;;  %v13909_v18 = vld [vmem:[#allocation3 + $0x1c] sm:$0xf] }
 0x3c9   : > { %10697 = vmatmul.msk.bf16.gmra.mxu0 %vm1356_vm5, %v10991_v48  ;;  %v6116_v62 = vpop.f32.mrf.mxu2  ;;  %v6923_v29 = vrot.slane %v6922_v59, 4  ;;  %v6938_v44 = vsel %vm11481_vm4, %v6933_v60, %v6937_v15  ;;  %v6942_v50 = vrot.slane %v6940_v8, 4  ;;  %v13958_v28 = vld [vmem:[#allocation3 + $0x2c] sm:$0x1] }
 0x3ca   : > { %v6117_v19 = vadd.f32 %v6116_v62, %v13555_v34  ;;  %v6329_v11 = vsel %vm12057_vm14, %v6327_v23, %v6328_v30  ;;  %v6953_v62 = vshrl.u32 %v13885_v47, 16  ;;  %v7303_v7 = vunpack.c.l.b16 %v6938_v44  ;;  %v13913_v30 = vld [vmem:[#allocation3 + $0x20] sm:$0x1] }
 0x3cb   : > { %10498 = vmatmul.msk.bf16.gmra.mxu1 %vm1356_vm5, %v5824_v20  ;;  %v6475_v2 = vpop.f32.mrf.mxu3  ;;  %v6379_v1 = vunpack.c.l.b16 %v6329_v11  ;;  %v13911_v59 = vrot.slane %v6949_v27, 5  ;;  %v8945_v44 = vrot.slane %v13913_v30, 5 }
 0x3cc   : > { %v13877_v31 = vadd.f32 %v13830_v37, %v6117_v19  ;;  %v6326_v37 = vsel %vm12057_vm14, %v10595_v56, %v6325_v26  ;;  %v10972_v19 = vld [vmem:[#allocation3 + $0x78] sm:$0xff]  ;;  %v6945_v26 = vrot.slane %v6943_v43, 5  ;;  %v6955_v60 = vrot.slane %v6953_v62, 4 }
 0x3cd   : > { %v6378_v48 = vunpack.c.l.b16 %v6326_v37  ;;  %v8876_v56 = vld [vmem:[#allocation3 + $0x18] sm:$0xe] }
 0x3ce   : > { %15889 = vst [vmem:[#allocation29_spill] sm:$0xff] %v13877_v31  ;;  %v13882_v34 = vpop.f32.mrf.mxu0  ;;  %v10863_v37 = vrot.slane %v8876_v56, 9  ;;  %v6946_v43 = vor.u32 %v6945_v26, %v6942_v50  ;;  %v6873_v26 = vld [vmem:[#allocation3 + $0x24] sm:$0xf]  ;;  %v14036_v31 = vld [vmem:[#allocation3 + $0x38] sm:$0x1] }
 0x3cf   : > { %15890 = vst [vmem:[#allocation15_spill] sm:$0xff] %v13882_v34  ;;  %v13900_v42 = vpack.c.b16 %v6379_v1, %v6378_v48  ;;  %v6956_v48 = vor.u32 %v6955_v60, %v13911_v59  ;;  %v13956_v34 = vld [vmem:[#allocation3 + $0x34] sm:$0xf] }
 0x3d0   : > { %v13891_v51 = vpop.f32.mrf.mxu1 }
 0x3d1   : > { %v6118_v21 = vpop.f32.mrf.mxu2 }
 0x3d2   : > { %v6119_v53 = vadd.f32 %v6118_v21, %v13585_v46  ;;  %v6928_v46 = vsel %vm11481_vm4, %v6923_v29, %v6927_v63  ;;  %v8942_v21 = vrot.slane %v13909_v18, 5 }
 0x3d3   : > { %v13902_v13 = vpop.f32.mrf.mxu3  ;;  %v7302_v23 = vunpack.c.l.b16 %v6928_v46  ;;  %v6332_v46 = vrot.slane %v13735_v25, 5 }
 0x3d4   : > { %v13898_v20 = vadd.f32 %v6472_v45, %v6119_v53  ;;  %v10992_v45 = vld [vmem:[#allocation3 + $0x90] sm:$0xff]  ;;  %v13922_v53 = vld [vmem:[#allocation3 + $0x20] sm:$0x1]  ;;  %v8943_v1 = vsel %vm12057_vm14, %v10863_v37, %v8942_v21  ;;  %v8944_v29 = vrot.slane %v8942_v21, 4  ;;  %v6335_v21 = vrot.slane %v13742_v6, 5 }
 0x3d5   : > { %v7334_v11 = vpack.c.b16 %v7303_v7, %v7302_v23  ;;  %v6959_v62 = vshll.u32 %v13922_v53, 16  ;;  %v6947_v23 = vrot.slane %v6946_v43, 4  ;;  %v6334_v37 = vrot.slane %v6332_v46, 4 }
 0x3d6   : > { %15891 = vst [vmem:[#allocation16_spill] sm:$0xff] %v13898_v20  ;;  %v13906_v32 = vpop.f32.mrf.mxu0  ;;  %10577 = vmatmul.msk.bf16.gmra.mxu2 %vm1356_vm5, %v10972_v19  ;;  %v6204_v19 = vld [vmem:[#allocation3 + $0x9c] sm:$0xe]  ;;  %v8946_v7 = vsel %vm12057_vm14, %v8944_v29, %v8945_v44 }
 0x3d7   : > { %15892 = vst [vmem:[#allocation32_spill] sm:$0xff] %v13906_v32  ;;  %v10596_v56 = vrot.slane %v6204_v19, 9  ;;  %v9056_v60 = vunpack.c.l.b16 %v8946_v7  ;;  %v6961_v19 = vrot.slane %v6959_v62, 5  ;;  %v6952_v62 = vsel %vm11481_vm4, %v6947_v23, %v13911_v59  ;;  %v6876_v23 = vld [vmem:[#allocation3 + $0x30] sm:$0xf] }
 0x3d8   : > { %v13917_v15 = vpop.f32.mrf.mxu1  ;;  %10614 = vmatmul.msk.bf16.gmra.mxu3 %vm1356_vm5, %v13866_v3  ;;  %v13934_v3 = vld [vmem:[#allocation3 + $0x28] sm:$0xf]  ;;  %v8952_v59 = vrot.slane %v13958_v28, 5  ;;  %v6988_v41 = vshrl.u32 %v6876_v23, 16  ;;  %v6991_v20 = vshll.u32 %v6876_v23, 16 }
 0x3d9   : > { %10698 = vmatmul.msk.bf16.gmra.mxu0 %vm1356_vm5, %v10992_v45  ;;  %v6121_v63 = vpop.f32.mrf.mxu2  ;;  %v9055_v45 = vunpack.c.l.b16 %v8943_v1  ;;  %v6977_v25 = vshrl.u32 %v13934_v3, 16  ;;  %v6336_v1 = vsel %vm12057_vm14, %v6334_v37, %v6335_v21  ;;  %v10973_v37 = vld [vmem:[#allocation3 + $0x84] sm:$0xff] }
 0x3da   : > { %v6122_v8 = vadd.f32 %v6121_v63, %v13607_v5  ;;  %v6957_v63 = vrot.slane %v6956_v48, 4  ;;  %v6381_v32 = vunpack.c.l.b16 %v6336_v1  ;;  %v6997_v1 = vshll.u32 %v13956_v34, 16 }
 0x3db   : > { %10707 = vmatmul.msk.bf16.vlgmr.msrb.gmra.mxu1 %vm1356_vm5, %v7334_v11  ;;  %v13931_v5 = vpop.f32.mrf.mxu3  ;;  %v6333_v11 = vsel %vm12057_vm14, %v10596_v56, %v6332_v46  ;;  %v13948_v29 = vpack.c.b16 %v9056_v60, %v9055_v45  ;;  %v8877_v46 = vld [vmem:[#allocation3 + $0x24] sm:$0xe]  ;;  %v6967_v45 = vshll.u32 %v6873_v26, 16  ;;  %v6979_v21 = vrot.slane %v6977_v25, 4 }
 0x3dc   : > { %v13928_v27 = vadd.f32 %v6475_v2, %v6122_v8  ;;  %v13941_v2 = vld [vmem:[#allocation3 + $0x28] sm:$0xf]  ;;  %v6973_v8 = vshll.u32 %v13934_v3, 16  ;;  %v6380_v7 = vunpack.c.l.b16 %v6333_v11  ;;  %v6962_v56 = vsel %vm11481_vm4, %v6957_v63, %v6961_v19 }
 0x3dd   : > { %15895 = vst [vmem:[#allocation17_spill] sm:$0xff] %v13948_v29  ;;  %v8949_v43 = vrot.slane %v13941_v2, 5  ;;  %v10864_v29 = vrot.slane %v8877_v46, 9  ;;  %v7001_v63 = vshrl.u32 %v13956_v34, 16  ;;  %v7305_v25 = vunpack.c.l.b16 %v6962_v56 }
 0x3de   : > { %15893 = vst [vmem:[#allocation33_spill] sm:$0xff] %v13928_v27  ;;  %v13939_v50 = vpop.f32.mrf.mxu0  ;;  %v13970_v11 = vpack.c.b16 %v6381_v32, %v6380_v7  ;;  %v10993_v32 = vld [vmem:[#allocation3 + $0x9c] sm:$0xff]  ;;  %v6969_v19 = vrot.slane %v6967_v45, 5  ;;  %v7304_v46 = vunpack.c.l.b16 %v6952_v62 }
 0x3df   : > { %15894 = vst [vmem:[#allocation18_spill] sm:$0xff] %v13939_v50  ;;  %v6964_v50 = vshrl.u32 %v6873_v26, 16  ;;  %v8951_v27 = vrot.slane %v8949_v43, 4  ;;  %v13977_v26 = vld [vmem:[#allocation3 + $0x2c] sm:$0x1] }
 0x3e0   : > { %v13953_v48 = vpop.f32.mrf.mxu1  ;;  %v7335_v62 = vpack.c.b16 %v7305_v25, %v7304_v46 }
 0x3e1   : > { %v6123_v44 = vpop.f32.mrf.mxu2  ;;  %v8953_v7 = vsel %vm12057_vm14, %v8951_v27, %v8952_v59  ;;  %v7003_v27 = vrot.slane %v7001_v63, 4  ;;  %v6339_v63 = vrot.slane %v13776_v10, 5 }
 0x3e2   : > { %v6124_v6 = vadd.f32 %v6123_v44, %v13637_v40  ;;  %v13968_v40 = vrot.slane %v6973_v8, 5 }
 0x3e3   : > { %v13972_v44 = vpop.f32.mrf.mxu3  ;;  %v6341_v46 = vrot.slane %v6339_v63, 4 }
 0x3e4   : > { %v13966_v60 = vadd.f32 %v13902_v13, %v6124_v6  ;;  %v6966_v13 = vrot.slane %v6964_v50, 4  ;;  %v8950_v6 = vsel %vm12057_vm14, %v10864_v29, %v8949_v43  ;;  %v9058_v43 = vunpack.c.l.b16 %v8953_v7 }
 0x3e5   : > { %v9057_v29 = vunpack.c.l.b16 %v8950_v6  ;;  %v7007_v7 = vshll.u32 %v13999_v61, 16 }
 0x3e6   : > { %15896 = vst [vmem:[#allocation34_spill] sm:$0xff] %v13966_v60  ;;  %10578 = vmatmul.msk.bf16.gmra.mxu2 %vm1356_vm5, %v10973_v37  ;;  %v13980_v8 = vpop.f32.mrf.mxu0  ;;  %v6980_v37 = vor.u32 %v6979_v21, %v13968_v40  ;;  %v6983_v60 = vshll.u32 %v13977_v26, 16  ;;  %v6970_v21 = vor.u32 %v6969_v19, %v6966_v13 }
 0x3e7   : > { %15897 = vst [vmem:[#allocation20_spill] sm:$0xff] %v13980_v8  ;;  %v13989_v8 = vrot.slane %v6997_v1, 5  ;;  %v14001_v1 = vpack.c.b16 %v9058_v43, %v9057_v29 }
 0x3e8   : > { %v13991_v56 = vpop.f32.mrf.mxu1  ;;  %10615 = vmatmul.msk.bf16.gmra.mxu3 %vm1356_vm5, %v13900_v42  ;;  %v6205_v42 = vld [vmem:[#allocation3 + $0xa8] sm:$0xe]  ;;  %v6985_v6 = vrot.slane %v6983_v60, 5  ;;  %v6971_v19 = vrot.slane %v6970_v21, 4 }
 0x3e9   : > { %10699 = vmatmul.msk.bf16.gmra.mxu0 %vm1356_vm5, %v10993_v32  ;;  %v6126_v50 = vpop.f32.mrf.mxu2  ;;  %15898 = vst [vmem:[#allocation19_spill] sm:$0xff] %v13991_v56  ;;  %v6981_v32 = vrot.slane %v6980_v37, 4  ;;  %v7004_v13 = vor.u32 %v7003_v27, %v13989_v8  ;;  %v10597_v25 = vrot.slane %v6205_v42, 9  ;;  %v6342_v37 = vrot.slane %v13785_v4, 5 }
 0x3ea   : > { %v6127_v45 = vadd.f32 %v6126_v50, %v13659_v12  ;;  %15900 = vst [vmem:[#allocation35_spill] sm:$0xff] %v14001_v1  ;;  %v6990_v12 = vrot.slane %v6988_v41, 4  ;;  %v6993_v50 = vrot.slane %v6991_v20, 5  ;;  %v6879_v20 = vld [vmem:[#allocation3 + $0x3c] sm:$0xf]  ;;  %v6976_v27 = vsel %vm11481_vm4, %v6971_v19, %v13968_v40 }
 0x3eb   : > { %10708 = vmatmul.msk.bf16.gmra.mxu1 %vm1356_vm5, %v7335_v62  ;;  %v14004_v23 = vpop.f32.mrf.mxu3  ;;  %v6340_v41 = vsel %vm12057_vm14, %v10597_v25, %v6339_v63  ;;  %v6343_v43 = vsel %vm12057_vm14, %v6341_v46, %v6342_v37  ;;  %v14023_v62 = vld [vmem:[#allocation3 + $0x40] sm:$0xf]  ;;  %v7005_v42 = vrot.slane %v7004_v13, 4  ;;  %v8878_v25 = vld [vmem:[#allocation3 + $0x30] sm:$0xe]  ;;  %v7015_v40 = vshll.u32 %v6879_v20, 16 }
 0x3ec   : > { %v13997_v59 = vadd.f32 %v13931_v5, %v6127_v45  ;;  %v14008_v5 = vld [vmem:[#allocation3 + $0x34] sm:$0xf]  ;;  %v6986_v45 = vsel %vm11481_vm4, %v6981_v32, %v6985_v6  ;;  %v6994_v29 = vor.u32 %v6993_v50, %v6990_v12  ;;  %v6382_v63 = vunpack.c.l.b16 %v6340_v41 }
 0x3ed   : > { %v8956_v4 = vrot.slane %v14008_v5, 5  ;;  %v6383_v6 = vunpack.c.l.b16 %v6343_v43  ;;  %v7307_v1 = vunpack.c.l.b16 %v6986_v45  ;;  %v10974_v50 = vld [vmem:[#allocation3 + $0x90] sm:$0xff]  ;;  %v7021_v46 = vshll.u32 %v14023_v62, 16  ;;  %v10994_v43 = vld [vmem:[#allocation3 + $0xa8] sm:$0xff] }
 0x3ee   : > { %15899 = vst [vmem:[#allocation21_spill] sm:$0xff] %v13997_v59  ;;  %v14016_v10 = vpop.f32.mrf.mxu0  ;;  %v7012_v59 = vshrl.u32 %v6879_v20, 16  ;;  %v7025_v37 = vshrl.u32 %v14023_v62, 16  ;;  %v10865_v13 = vrot.slane %v8878_v25, 9  ;;  %v14041_v45 = vrot.slane %v6994_v29, 4 }
 0x3ef   : > { %15901 = vst [vmem:[#allocation22_spill] sm:$0xff] %v14016_v10  ;;  %v7009_v10 = vrot.slane %v7007_v7, 5  ;;  %v14032_v19 = vpack.c.b16 %v6383_v6, %v6382_v63  ;;  %v8958_v41 = vrot.slane %v8956_v4, 4  ;;  %v7306_v7 = vunpack.c.l.b16 %v6976_v27  ;;  %v14045_v20 = vld [vmem:[#allocation3 + $0x40] sm:$0xf] }
 0x3f0   : > { %v14026_v21 = vpop.f32.mrf.mxu1  ;;  %v7017_v63 = vrot.slane %v7015_v40, 5  ;;  %v8957_v6 = vsel %vm12057_vm14, %v10865_v13, %v8956_v4  ;;  %v8959_v25 = vrot.slane %v14036_v31, 5  ;;  %v14050_v38 = vrot.slane %v7021_v46, 5  ;;  %v14052_v29 = vld [vmem:[#allocation3 + $0x44] sm:$0x1] }
 0x3f1   : > { %v6128_v60 = vpop.f32.mrf.mxu2  ;;  %15902 = vst [vmem:[#allocation23_spill] sm:$0xff] %v14026_v21  ;;  %v7027_v27 = vrot.slane %v7025_v37, 4  ;;  %v8218_v13 = vld [vmem:[#allocation3 + $0x18] sm:$0xf] }
 0x3f2   : > { %v6129_v32 = vadd.f32 %v6128_v60, %v13689_v54  ;;  %v8879_v60 = vld [vmem:[#allocation3 + $0x3c] sm:$0xe]  ;;  %v8960_v4 = vsel %vm12057_vm14, %v8958_v41, %v8959_v25  ;;  %v8966_v25 = vrot.slane %v14052_v29, 5 }
 0x3f3   : > { %v14038_v54 = vpop.f32.mrf.mxu3  ;;  %v10866_v40 = vrot.slane %v8879_v60, 9 }
 0x3f4   : > { %v14030_v12 = vadd.f32 %v13972_v44, %v6129_v32  ;;  %v7010_v44 = vsel %vm11481_vm4, %v7005_v42, %v7009_v10  ;;  %v7014_v32 = vrot.slane %v7012_v59, 4  ;;  %v14059_v42 = vld [vmem:[#allocation3 + $0x44] sm:$0x1] }
 0x3f5   : > { %v14069_v37 = vunpack.c.l.b16 %v7010_v44  ;;  %v14081_v44 = vld [vmem:[#allocation3 + $0x4c] sm:$0xf] }
 0x3f6   : > { %15903 = vst [vmem:[#allocation24_spill] sm:$0xff] %v14030_v12  ;;  %10579 = vmatmul.msk.bf16.gmra.mxu2 %vm1356_vm5, %v10974_v50  ;;  %v7336_v12 = vpack.c.b16 %v7307_v1, %v7306_v7  ;;  %v8963_v1 = vrot.slane %v14045_v20, 5  ;;  %v9059_v7 = vunpack.c.l.b16 %v8957_v6  ;;  %v14071_v59 = vpop.f32.mrf.mxu0  ;;  %v7018_v0 = vor.u32 %v7017_v63, %v7014_v32  ;;  %v6206_v63 = vld [vmem:[#allocation3 + $0xb4] sm:$0xe] }
 0x3f7   : > { %15905 = vst [vmem:[#allocation37_spill] sm:$0xff] %v14071_v59 }
 0x3f8   : > { %v14064_v50 = vpop.f32.mrf.mxu1  ;;  %10616 = vmatmul.msk.bf16.gmra.mxu3 %vm1356_vm5, %v13970_v11  ;;  %v8964_v41 = vsel %vm12057_vm14, %v10866_v40, %v8963_v1  ;;  %v8965_v60 = vrot.slane %v8963_v1, 4  ;;  %v7031_v11 = vshll.u32 %v14059_v42, 16  ;;  %v8270_v40 = vshll.u32 %v8218_v13, 16 }
 0x3f9   : > { %10700 = vmatmul.msk.bf16.gmra.mxu0 %vm1356_vm5, %v10994_v43  ;;  %v6131_v10 = vpop.f32.mrf.mxu2  ;;  %15904 = vst [vmem:[#allocation36_spill] sm:$0xff] %v14064_v50  ;;  %v9060_v43 = vunpack.c.l.b16 %v8960_v4  ;;  %v8267_v4 = vshrl.u32 %v8218_v13, 16  ;;  %v10598_v1 = vrot.slane %v6206_v63, 9  ;;  %v7019_v57 = vrot.slane %v7018_v0, 4 }
 0x3fa   : > { %v6132_v46 = vadd.f32 %v6131_v10, %v13716_v33  ;;  %v7028_v33 = vor.u32 %v7027_v27, %v14050_v38  ;;  %v6346_v10 = vrot.slane %v13825_v35, 5  ;;  %v8276_v27 = vshll.u32 %v13909_v18, 16 }
 0x3fb   : > { %v14083_v6 = vpack.c.b16 %v9060_v43, %v9059_v7  ;;  %10709 = vmatmul.msk.bf16.gmra.mxu1 %vm1356_vm5, %v7336_v12  ;;  %v14086_v32 = vpop.f32.mrf.mxu3  ;;  %v6349_v7 = vrot.slane %v13832_v9, 5  ;;  %v8280_v12 = vshrl.u32 %v13909_v18, 16  ;;  %v7530_v43 = vld [vmem:[#allocation3 + $0x48] sm:$0xe]  ;;  %v7033_v35 = vrot.slane %v7031_v11, 5 }
 0x3fc   : > { %v14077_v50 = vadd.f32 %v14004_v23, %v6132_v46  ;;  %v8967_v23 = vsel %vm12057_vm14, %v8965_v60, %v8966_v25  ;;  %v9061_v46 = vunpack.c.l.b16 %v8964_v41  ;;  %v6347_v13 = vsel %vm12057_vm14, %v10598_v1, %v6346_v10  ;;  %v14103_v18 = vld [vmem:[#allocation3 + $0x4c] sm:$0xf] }
 0x3fd   : > { %15907 = vst [vmem:[#allocation39_spill] sm:$0xff] %v14083_v6  ;;  %v9062_v59 = vunpack.c.l.b16 %v8967_v23  ;;  %v7626_v6 = vrot.slane %v14081_v44, 5  ;;  %v7029_v41 = vrot.slane %v7028_v33, 4  ;;  %v8269_v9 = vrot.slane %v8267_v4, 4  ;;  %v10975_v4 = vld [vmem:[#allocation3 + $0x9c] sm:$0xff] }
 0x3fe   : > { %15906 = vst [vmem:[#allocation38_spill] sm:$0xff] %v14077_v50  ;;  %v6348_v50 = vrot.slane %v6346_v10, 4  ;;  %v8272_v23 = vrot.slane %v8270_v40, 5  ;;  %v6384_v11 = vunpack.c.l.b16 %v6347_v13  ;;  %v10728_v10 = vrot.slane %v7530_v43, 9  ;;  %v14119_v13 = vpop.f32.mrf.mxu0 }
 0x3ff   : > { %v14099_v60 = vpack.c.b16 %v9062_v59, %v9061_v46  ;;  %v14108_v1 = vrot.slane %v8276_v27, 5  ;;  %v8282_v59 = vrot.slane %v8280_v12, 4  ;;  %v7628_v46 = vrot.slane %v7626_v6, 4  ;;  %15910 = vst [vmem:[#allocation42_spill] sm:$0xff] %v14119_v13 }
 0x400   : > { %v6350_v63 = vsel %vm12057_vm14, %v6348_v50, %v6349_v7  ;;  %v14105_v21 = vpop.f32.mrf.mxu1  ;;  %v7629_v33 = vrot.slane %v14097_v58, 5  ;;  %v7627_v7 = vsel %vm12057_vm14, %v10728_v10, %v7626_v6  ;;  %v15911_v12 = vsel %vm11481_vm4, %v14041_v45, %v13989_v8  ;;  %v10995_v8 = vld [vmem:[#allocation3 + $0xb4] sm:$0xff] }
 0x401   : > { %15908 = vst [vmem:[#allocation40_spill] sm:$0xff] %v14099_v60  ;;  %v6133_v25 = vpop.f32.mrf.mxu2  ;;  %v6385_v56 = vunpack.c.l.b16 %v6350_v63  ;;  %v8880_v60 = vld [vmem:[#allocation3 + $0x48] sm:$0xe]  ;;  %v7308_v43 = vunpack.c.l.b16 %v15911_v12  ;;  %v8273_v63 = vor.u32 %v8272_v23, %v8269_v9  ;;  %v7714_v10 = vunpack.c.l.b16 %v7627_v7 }
 0x402   : > { %v6134_v0 = vadd.f32 %v6133_v25, %v13744_v52  ;;  %v8970_v52 = vrot.slane %v14103_v18, 5  ;;  %v7630_v6 = vsel %vm12057_vm14, %v7628_v46, %v7629_v33  ;;  %v7034_v25 = vsel %vm11481_vm4, %v7029_v41, %v7033_v35 }
 0x403   : > { %v14114_v40 = vpack.c.b16 %v6385_v56, %v6384_v11  ;;  %v14121_v27 = vpop.f32.mrf.mxu3  ;;  %v7024_v56 = vsel %vm11481_vm4, %v7019_v57, %v14050_v38  ;;  %v10867_v11 = vrot.slane %v8880_v60, 9  ;;  %v7337_v45 = vpack.c.b16 %v14069_v37, %v7308_v43  ;;  %v8221_v38 = vld [vmem:[#allocation3 + $0x24] sm:$0xf]  ;;  %v7525_v60 = vld [vmem:[#allocation3 + $0xc] sm:$0xe] }
 0x404   : > { %v14112_v50 = vadd.f32 %v14038_v54, %v6134_v0  ;;  %v14131_v54 = vld [vmem:[#allocation3 + $0x50] sm:$0x1]  ;;  %v7591_v0 = vrot.slane %v13827_v24, 5  ;;  %v7715_v12 = vunpack.c.l.b16 %v7630_v6  ;;  %v8283_v57 = vor.u32 %v8282_v59, %v14108_v1 }
 0x405   : > { %v8971_v46 = vsel %vm12057_vm14, %v10867_v11, %v8970_v52  ;;  %v8972_v33 = vrot.slane %v8970_v52, 4  ;;  %v14145_v41 = vunpack.c.l.b16 %v7024_v56  ;;  %v14147_v24 = vunpack.c.l.b16 %v7034_v25 }
 0x406   : > { %15909 = vst [vmem:[#allocation41_spill] sm:$0xff] %v14112_v50  ;;  %10580 = vmatmul.msk.bf16.gmra.mxu2 %vm1356_vm5, %v10975_v4  ;;  %v8973_v4 = vrot.slane %v14131_v54, 5  ;;  %v8286_v37 = vshll.u32 %v13913_v30, 16  ;;  %v14150_v9 = vpack.c.b16 %v7715_v12, %v7714_v10  ;;  %v8274_v7 = vrot.slane %v8273_v63, 4 }
 0x407   : > { %v7593_v52 = vrot.slane %v7591_v0, 4  ;;  %v8291_v56 = vshrl.u32 %v8221_v38, 16  ;;  %v8294_v6 = vshll.u32 %v8221_v38, 16  ;;  %v9063_v25 = vunpack.c.l.b16 %v8971_v46  ;;  %v14171_v46 = vld [vmem:[#allocation3 + $0x58] sm:$0xf] }
 0x408   : > { %15912 = vst [vmem:[#allocation43_spill] sm:$0xff] %v14150_v9  ;;  %v14152_v23 = vpop.f32.mrf.mxu1  ;;  %10617 = vmatmul.msk.bf16.gmra.mxu3 %vm1356_vm5, %v14032_v19  ;;  %v8974_v43 = vsel %vm12057_vm14, %v8972_v33, %v8973_v4  ;;  %v10723_v10 = vrot.slane %v7525_v60, 9  ;;  %v7594_v12 = vrot.slane %v13874_v14, 5  ;;  %v8279_v19 = vsel %vm11481_vm4, %v8274_v7, %v14108_v1  ;;  %v14179_v4 = vpop.f32.mrf.mxu0 }
 0x409   : > { %10701 = vmatmul.msk.bf16.gmra.mxu0 %vm1356_vm5, %v10995_v8  ;;  %v6136_v35 = vpop.f32.mrf.mxu2  ;;  %v9064_v11 = vunpack.c.l.b16 %v8974_v43  ;;  %v8284_v8 = vrot.slane %v8283_v57, 4  ;;  %v8300_v63 = vshll.u32 %v13941_v2, 16  ;;  %v8304_v38 = vshrl.u32 %v13941_v2, 16  ;;  %15915 = vst [vmem:[#allocation46_spill] sm:$0xff] %v14179_v4  ;;  %v14183_v2 = vld [vmem:[#allocation3 + $0x5c] sm:$0x1] }
 0x40a   : > { %v6137_v59 = vadd.f32 %v6136_v35, %v13762_v36  ;;  %v8288_v57 = vrot.slane %v8286_v37, 5  ;;  %v7592_v14 = vsel %vm12057_vm14, %v10723_v10, %v7591_v0  ;;  %v8293_v35 = vrot.slane %v8291_v56, 4 }
 0x40b   : > { %10710 = vmatmul.msk.bf16.gmra.mxu1 %vm1356_vm5, %v7337_v45  ;;  %v14164_v36 = vpop.f32.mrf.mxu3  ;;  %v14173_v33 = vpack.c.b16 %v9064_v11, %v9063_v25  ;;  %v7595_v45 = vsel %vm12057_vm14, %v7593_v52, %v7594_v12  ;;  %v8296_v60 = vrot.slane %v8294_v6, 5  ;;  %v14188_v7 = vunpack.c.l.b16 %v8279_v19  ;;  %v6882_v6 = vld [vmem:[#allocation3 + $0x48] sm:$0xf] }
 0x40c   : > { %v14160_v30 = vadd.f32 %v14086_v32, %v6137_v59  ;;  %v7531_v32 = vld [vmem:[#allocation3 + $0x54] sm:$0xe]  ;;  %v7633_v59 = vrot.slane %v14171_v46, 5  ;;  %v8289_v37 = vsel %vm11481_vm4, %v8284_v8, %v8288_v57  ;;  %v7598_v0 = vrot.slane %v13885_v47, 5 }
 0x40d   : > { %15914 = vst [vmem:[#allocation45_spill] sm:$0xff] %v14173_v33  ;;  %v10729_v43 = vrot.slane %v7531_v32, 9  ;;  %v7704_v25 = vunpack.c.l.b16 %v7592_v14  ;;  %v7705_v11 = vunpack.c.l.b16 %v7595_v45  ;;  %v8302_v10 = vrot.slane %v8300_v63, 5  ;;  %v7526_v63 = vld [vmem:[#allocation3 + $0x18] sm:$0xe] }
 0x40e   : > { %15913 = vst [vmem:[#allocation44_spill] sm:$0xff] %v14160_v30  ;;  %v8306_v12 = vrot.slane %v8304_v38, 4  ;;  %v7635_v4 = vrot.slane %v7633_v59, 4  ;;  %v7636_v8 = vrot.slane %v14183_v2, 5  ;;  %v14197_v19 = vunpack.c.l.b16 %v8289_v37  ;;  %v14201_v38 = vld [vmem:[#allocation3 + $0x58] sm:$0xf] }
 0x40f   : > { %v7634_v33 = vsel %vm12057_vm14, %v10729_v43, %v7633_v59  ;;  %v7045_v47 = vshll.u32 %v14081_v44, 16  ;;  %v7049_v32 = vshrl.u32 %v14081_v44, 16  ;;  %v8297_v57 = vor.u32 %v8296_v60, %v8293_v35 }
 0x410   : > { %v14191_v1 = vpop.f32.mrf.mxu1  ;;  %v8310_v45 = vshll.u32 %v13958_v28, 16  ;;  %v7600_v43 = vrot.slane %v7598_v0, 4  ;;  %v7637_v59 = vsel %vm12057_vm14, %v7635_v4, %v7636_v8  ;;  %v7039_v13 = vshll.u32 %v6882_v6, 16 }
 0x411   : > { %v6138_v52 = vpop.f32.mrf.mxu2  ;;  %v7716_v30 = vunpack.c.l.b16 %v7634_v33  ;;  %v7717_v44 = vunpack.c.l.b16 %v7637_v59  ;;  %v8307_v35 = vor.u32 %v8306_v12, %v8302_v10  ;;  %v10724_v60 = vrot.slane %v7526_v63, 9  ;;  %v14228_v63 = vld [vmem:[#allocation3 + $0x5c] sm:$0x1] }
 0x412   : > { %v6139_v56 = vadd.f32 %v6138_v52, %v13790_v39  ;;  %v10976_v39 = vld [vmem:[#allocation3 + $0xa8] sm:$0xff]  ;;  %v7036_v52 = vshrl.u32 %v6882_v6, 16  ;;  %v14214_v28 = vrot.slane %v7045_v47, 5  ;;  %v7051_v50 = vrot.slane %v7049_v32, 4  ;;  %v14230_v47 = vpop.f32.mrf.mxu0 }
 0x413   : > { %v14209_v37 = vpop.f32.mrf.mxu3  ;;  %v8298_v9 = vrot.slane %v8297_v57, 4  ;;  %v14216_v4 = vpack.c.b16 %v7717_v44, %v7716_v30  ;;  %v14220_v33 = vpack.c.b16 %v7705_v11, %v7704_v25  ;;  %v14222_v8 = vrot.slane %v8310_v45, 5  ;;  %15918 = vst [vmem:[#allocation49_spill] sm:$0xff] %v14230_v47 }
 0x414   : > { %v14204_v14 = vadd.f32 %v14121_v27, %v6139_v56  ;;  %v7601_v27 = vrot.slane %v13922_v53, 5  ;;  %v15793_v56 = vrot.slane %v14201_v38, 5  ;;  %v14226_v12 = vsel %vm12057_vm14, %v10724_v60, %v7598_v0  ;;  %v8224_v53 = vld [vmem:[#allocation3 + $0x30] sm:$0xf] }
 0x415   : > { %15917 = vst [vmem:[#allocation48_spill] sm:$0xff] %v14216_v4  ;;  %v7038_v32 = vrot.slane %v7036_v52, 4  ;;  %v7041_v57 = vrot.slane %v7039_v13, 5  ;;  %v8303_v25 = vsel %vm11481_vm4, %v8298_v9, %v8302_v10  ;;  %v14244_v59 = vrot.slane %v8307_v35, 4 }
 0x416   : > { %15916 = vst [vmem:[#allocation47_spill] sm:$0xff] %v14204_v14  ;;  %10581 = vmatmul.msk.bf16.gmra.mxu2 %vm1356_vm5, %v10976_v39  ;;  %v10996_v14 = vld [vmem:[#allocation3 + $0xc0] sm:$0xff]  ;;  %v14237_v11 = vsel %vm12057_vm14, %v7600_v43, %v7601_v27  ;;  %v8979_v13 = vrot.slane %v15793_v56, 4  ;;  %v7052_v9 = vor.u32 %v7051_v50, %v14214_v28  ;;  %v8315_v10 = vshrl.u32 %v8224_v53, 16 }
 0x417   : > { %v7527_v39 = vld [vmem:[#allocation3 + $0x24] sm:$0xe]  ;;  %v8318_v43 = vshll.u32 %v8224_v53, 16  ;;  %v8980_v52 = vrot.slane %v14228_v63, 5  ;;  %v7042_v50 = vor.u32 %v7041_v57, %v7038_v32  ;;  %v7055_v27 = vshll.u32 %v14097_v58, 16 }
 0x418   : > { %v14239_v0 = vpop.f32.mrf.mxu1  ;;  %10618 = vmatmul.msk.bf16.gmra.mxu3 %vm1356_vm5, %v14114_v40  ;;  %v7706_v40 = vunpack.c.l.b16 %v14226_v12  ;;  %v10725_v35 = vrot.slane %v7527_v39, 9  ;;  %v7707_v53 = vunpack.c.l.b16 %v14237_v11  ;;  %v7608_v58 = vrot.slane %v13977_v26, 5  ;;  %v8881_v32 = vld [vmem:[#allocation3 + $0x54] sm:$0xe] }
 0x419   : > { %10702 = vmatmul.msk.bf16.gmra.mxu0 %vm1356_vm5, %v10996_v14  ;;  %v6141_v30 = vpop.f32.mrf.mxu2  ;;  %15919 = vst [vmem:[#allocation50_spill] sm:$0xff] %v14239_v0  ;;  %v7605_v14 = vrot.slane %v13934_v3, 5  ;;  %v15921_v3 = vpack.c.b16 %v14147_v24, %v14145_v41  ;;  %v8313_v41 = vsel %vm11481_vm4, %v14244_v59, %v14222_v8  ;;  %v7053_v57 = vrot.slane %v7052_v9, 4 }
 0x41a   : > { %v6142_v45 = vadd.f32 %v6141_v30, %v13808_v22  ;;  %v14254_v22 = vunpack.c.l.b16 %v8303_v25  ;;  %v14265_v30 = vld [vmem:[#allocation3 + $0x64] sm:$0xf]  ;;  %v14269_v25 = vsel %vm12057_vm14, %v8979_v13, %v8980_v52  ;;  %v14280_v11 = vrot.slane %v8315_v10, 4  ;;  %v6885_v52 = vld [vmem:[#allocation3 + $0x54] sm:$0xf]  ;;  %v14297_v0 = vpop.f32.mrf.mxu0 }
 0x41b   : > { %10711 = vmatmul.msk.bf16.gmra.mxu1 %vm1356_vm5, %v15921_v3  ;;  %v14261_v60 = vpop.f32.mrf.mxu3  ;;  %v14277_v24 = vsel %vm12057_vm14, %v10725_v35, %v7605_v14  ;;  %v7607_v12 = vrot.slane %v7605_v14, 4  ;;  %v14282_v39 = vrot.slane %v8318_v43, 5  ;;  %v7640_v13 = vrot.slane %v14265_v30, 5  ;;  %15922 = vst [vmem:[#allocation52_spill] sm:$0xff] %v14297_v0 }
 0x41c   : > { %v14252_v44 = vadd.f32 %v14164_v36, %v6142_v45  ;;  %v7532_v36 = vld [vmem:[#allocation3 + $0x60] sm:$0xe]  ;;  %v14284_v45 = vld [vmem:[#allocation3 + $0x68] sm:$0x1]  ;;  %v7069_v8 = vshll.u32 %v14171_v46, 16  ;;  %v8324_v59 = vshll.u32 %v14008_v5, 16 }
 0x41d   : > { %v8328_v35 = vshrl.u32 %v14008_v5, 16  ;;  %v10730_v14 = vrot.slane %v7532_v36, 9  ;;  %v7043_v26 = vrot.slane %v7042_v50, 4  ;;  %v7057_v6 = vrot.slane %v7055_v27, 5 }
 0x41e   : > { %15920 = vst [vmem:[#allocation51_spill] sm:$0xff] %v14252_v44  ;;  %v7073_v9 = vshrl.u32 %v14171_v46, 16  ;;  %v10868_v10 = vrot.slane %v8881_v32, 9  ;;  %v7642_v44 = vrot.slane %v7640_v13, 4  ;;  %v7643_v4 = vrot.slane %v14284_v45, 5 }
 0x41f   : > { %v7641_v47 = vsel %vm12057_vm14, %v10730_v14, %v7640_v13  ;;  %v7048_v5 = vsel %vm11481_vm4, %v7043_v26, %v14214_v28  ;;  %v7058_v46 = vsel %vm11481_vm4, %v7053_v57, %v7057_v6  ;;  %v7060_v50 = vshrl.u32 %v6885_v52, 16  ;;  %v14309_v13 = vld [vmem:[#allocation3 + $0x64] sm:$0xf] }
 0x420   : > { %v14291_v43 = vpop.f32.mrf.mxu1  ;;  %v7063_v27 = vshll.u32 %v6885_v52, 16  ;;  %v14307_v32 = vrot.slane %v7069_v8, 5  ;;  %v7644_v14 = vsel %vm12057_vm14, %v7642_v44, %v7643_v4  ;;  %v7075_v6 = vrot.slane %v7073_v9, 4 }
 0x421   : > { %v6143_v3 = vpop.f32.mrf.mxu2  ;;  %v7718_v57 = vunpack.c.l.b16 %v7641_v47  ;;  %v7719_v52 = vunpack.c.l.b16 %v7644_v14  ;;  %v14323_v8 = vrot.slane %v8324_v59, 5  ;;  %v8330_v0 = vrot.slane %v8328_v35, 4  ;;  %v11000_v47 = vld [vmem:[#allocation3 + $0x18] sm:$0xff] }
 0x422   : > { %v6144_v56 = vadd.f32 %v6143_v3, %v13842_v49  ;;  %v10977_v49 = vld [vmem:[#allocation3 + $0xb4] sm:$0xff]  ;;  %v15924_v3 = vrot.slane %v14201_v38, 5  ;;  %v7313_v44 = vunpack.c.l.b16 %v7058_v46  ;;  %v7312_v9 = vunpack.c.l.b16 %v7048_v5 }
 0x423   : > { %v14317_v26 = vpop.f32.mrf.mxu3  ;;  %v14329_v14 = vunpack.c.l.b16 %v8313_v41  ;;  %v15926_v59 = vpack.c.b16 %v14197_v19, %v14188_v7  ;;  %v7062_v46 = vrot.slane %v7060_v50, 4  ;;  %v7065_v5 = vrot.slane %v7063_v27, 5 }
 0x424   : > { %v14305_v36 = vadd.f32 %v14209_v37, %v6144_v56  ;;  %v8978_v28 = vsel %vm12057_vm14, %v10868_v10, %v15924_v3  ;;  %v9066_v37 = vunpack.c.l.b16 %v14269_v25  ;;  %v14321_v56 = vpack.c.b16 %v7707_v53, %v7706_v40  ;;  %v14337_v53 = vld [vmem:[#allocation3 + $0x68] sm:$0x1] }
 0x425   : > { %v9065_v10 = vunpack.c.l.b16 %v8978_v28  ;;  %v15794_v3 = vrot.slane %v14309_v13, 5  ;;  %v8321_v25 = vor.u32 %v14282_v39, %v14280_v11  ;;  %v14335_v40 = vsel %vm12057_vm14, %v7607_v12, %v7608_v58  ;;  %v14344_v28 = vld [vmem:[#allocation3 + $0x30] sm:$0xe] }
 0x426   : > { %15923 = vst [vmem:[#allocation53_spill] sm:$0xff] %v14305_v36  ;;  %10582 = vmatmul.msk.bf16.gmra.mxu2 %vm1356_vm5, %v10977_v49  ;;  %v14326_v36 = vpack.c.b16 %v7719_v52, %v7718_v57  ;;  %v7076_v41 = vor.u32 %v7075_v6, %v14307_v32  ;;  %v8227_v49 = vld [vmem:[#allocation3 + $0x3c] sm:$0xf]  ;;  %v8331_v7 = vor.u32 %v8330_v0, %v14323_v8  ;;  %v8334_v19 = vshll.u32 %v14036_v31, 16 }
 0x427   : > { %v14346_v11 = vpack.c.b16 %v9066_v37, %v9065_v10  ;;  %v15795_v58 = vrot.slane %v13956_v34, 5  ;;  %v7339_v50 = vpack.c.b16 %v7313_v44, %v7312_v9  ;;  %v7079_v27 = vshll.u32 %v14183_v2, 16  ;;  %v14365_v10 = vpop.f32.mrf.mxu0  ;;  %v14388_v9 = vld [vmem:[#allocation3 + $0x74] sm:$0x1] }
 0x428   : > { %15925 = vst [vmem:[#allocation54_spill] sm:$0xff] %v14326_v36  ;;  %v14348_v39 = vpop.f32.mrf.mxu1  ;;  %10827 = vmatmul.msk.bf16.vlgmr.msra.gmra.mxu3 %vm1356_vm5, %v11000_v47  ;;  %v8986_v6 = vrot.slane %v15794_v3, 4  ;;  %v8987_v57 = vrot.slane %v14337_v53, 5  ;;  %v8339_v37 = vshrl.u32 %v8227_v49, 16  ;;  %v7066_v2 = vor.u32 %v7065_v5, %v7062_v46  ;;  %v14371_v47 = vld [vmem:[#allocation3 + $0x70] sm:$0xf] }
 0x429   : > { %10847 = vmatmul.msk.bf16.vlgmr.msra.gmra.mxu0 %vm1356_vm5, %v15926_v59  ;;  %v6146_v35 = vpop.f32.mrf.mxu2  ;;  %15927 = vst [vmem:[#allocation55_spill] sm:$0xff] %v14346_v11  ;;  %v7077_v44 = vrot.slane %v7076_v41, 4  ;;  %v6888_v46 = vld [vmem:[#allocation3 + $0x60] sm:$0xf]  ;;  %v7533_v41 = vld [vmem:[#allocation3 + $0x6c] sm:$0xe] }
 0x42a   : > { %15928 = vst [vmem:[#allocation56_spill] sm:$0xff] %v14348_v39  ;;  %v6147_v12 = vadd.f32 %v6146_v35, %v13869_v17  ;;  %v14362_v17 = vrot.slane %v8321_v25, 4  ;;  %v8686_v25 = vpack.c.b16 %v14329_v14, %v14254_v22  ;;  %v14383_v35 = vrot.slane %v8334_v19, 5  ;;  %v8882_v5 = vld [vmem:[#allocation3 + $0x60] sm:$0xe]  ;;  %v11001_v39 = vld [vmem:[#allocation3 + $0x24] sm:$0xff] }
 0x42b   : > { %15930 = vst [vmem:[#allocation58_spill] sm:$0xff] %v14365_v10  ;;  %10712 = vmatmul.msk.bf16.gmra.mxu1 %vm1356_vm5, %v7339_v50  ;;  %v14368_v31 = vpop.f32.mrf.mxu3  ;;  %v14386_v50 = vrot.slane %v8331_v7, 4  ;;  %v7647_v22 = vrot.slane %v14371_v47, 5  ;;  %v14395_v14 = vrot.slane %v8339_v37, 4  ;;  %v8348_v19 = vshll.u32 %v14045_v20, 16 }
 0x42c   : > { %v14360_v52 = vadd.f32 %v14261_v60, %v6147_v12  ;;  %v14375_v60 = vsel %vm12057_vm14, %v8986_v6, %v8987_v57  ;;  %v7081_v12 = vrot.slane %v7079_v27, 5  ;;  %v14392_v6 = vrot.slane %v15795_v58, 4 }
 0x42d   : > { %v8342_v57 = vshll.u32 %v8227_v49, 16  ;;  %v8352_v4 = vshrl.u32 %v14045_v20, 16  ;;  %v7067_v27 = vrot.slane %v7066_v2, 4  ;;  %v7084_v59 = vshrl.u32 %v6888_v46, 16 }
 0x42e   : > { %15929 = vst [vmem:[#allocation57_spill] sm:$0xff] %v14360_v52  ;;  %v7082_v7 = vsel %vm11481_vm4, %v7077_v44, %v7081_v12  ;;  %v10731_v3 = vrot.slane %v7533_v41, 9  ;;  %v7087_v10 = vshll.u32 %v6888_v46, 16  ;;  %v7649_v37 = vrot.slane %v7647_v22, 4 }
 0x42f   : > { %v7650_v49 = vrot.slane %v14388_v9, 5  ;;  %v7093_v52 = vshll.u32 %v14265_v30, 16  ;;  %v7097_v20 = vshrl.u32 %v14265_v30, 16  ;;  %v10869_v36 = vrot.slane %v8882_v5, 9 }
 0x430   : > { %v14401_v11 = vpop.f32.mrf.mxu1  ;;  %v7648_v2 = vsel %vm12057_vm14, %v10731_v3, %v7647_v22  ;;  %v8344_v41 = vrot.slane %v8342_v57, 5  ;;  %v14412_v12 = vrot.slane %v8348_v19, 5  ;;  %v7072_v30 = vsel %vm11481_vm4, %v7067_v27, %v14307_v32  ;;  %v8230_v57 = vld [vmem:[#allocation3 + $0x48] sm:$0xf] }
 0x431   : > { %v6148_v0 = vpop.f32.mrf.mxu2  ;;  %15931 = vst [vmem:[#allocation59_spill] sm:$0xff] %v14401_v11  ;;  %v14414_v11 = vld [vmem:[#allocation3 + $0x70] sm:$0xf]  ;;  %v8354_v46 = vrot.slane %v8352_v4, 4  ;;  %v15933_v5 = vrot.slane %v14309_v13, 5  ;;  %v7086_v22 = vrot.slane %v7084_v59, 4  ;;  %v7720_v19 = vunpack.c.l.b16 %v7648_v2 }
 0x432   : > { %v6149_v58 = vadd.f32 %v6148_v0, %v13891_v51  ;;  %v7651_v51 = vsel %vm12057_vm14, %v7649_v37, %v7650_v49  ;;  %v9068_v37 = vunpack.c.l.b16 %v14375_v60  ;;  %v14430_v49 = vpop.f32.mrf.mxu0  ;;  %v14432_v32 = vrot.slane %v7093_v52, 5 }
 0x433   : > { %v14418_v0 = vpop.f32.mrf.mxu3  ;;  %v7721_v3 = vunpack.c.l.b16 %v7651_v51  ;;  %v7099_v4 = vrot.slane %v7097_v20, 4  ;;  %v15796_v27 = vrot.slane %v14414_v11, 5  ;;  %v7314_v51 = vunpack.c.l.b16 %v7072_v30 }
 0x434   : > { %v14410_v44 = vadd.f32 %v14317_v26, %v6149_v58  ;;  %v8985_v26 = vsel %vm12057_vm14, %v10869_v36, %v15933_v5  ;;  %v7315_v58 = vunpack.c.l.b16 %v7082_v7  ;;  %v14439_v36 = vld [vmem:[#allocation3 + $0x74] sm:$0x1]  ;;  %v8345_v52 = vor.u32 %v8344_v41, %v14395_v14 }
 0x435   : > { %v14441_v59 = vpack.c.b16 %v7721_v3, %v7720_v19  ;;  %v9067_v60 = vunpack.c.l.b16 %v8985_v26  ;;  %v8355_v7 = vor.u32 %v8354_v46, %v14412_v12  ;;  %v8358_v20 = vshll.u32 %v14052_v29, 16  ;;  %v14451_v3 = vld [vmem:[#allocation3 + $0x3c] sm:$0xe] }
 0x436   : > { %15932 = vst [vmem:[#allocation60_spill] sm:$0xff] %v14410_v44  ;;  %10743 = vmatmul.msk.bf16.vlgmr.msra.gmra.mxu2 %vm1356_vm5, %v14220_v33  ;;  %v7089_v44 = vrot.slane %v7087_v10, 5  ;;  %v8337_v33 = vsel %vm11481_vm4, %v14386_v50, %v14383_v35  ;;  %v8363_v2 = vshrl.u32 %v8230_v57, 16  ;;  %v7340_v35 = vpack.c.b16 %v7315_v58, %v7314_v51 }
 0x437   : > { %v8366_v50 = vshll.u32 %v8230_v57, 16  ;;  %v14453_v26 = vpack.c.b16 %v9068_v37, %v9067_v60  ;;  %v7100_v14 = vor.u32 %v7099_v4, %v14432_v32  ;;  %v8993_v41 = vrot.slane %v15796_v27, 4 }
 0x438   : > { %v14447_v30 = vpop.f32.mrf.mxu1  ;;  %10828 = vmatmul.msk.bf16.gmra.mxu3 %vm1356_vm5, %v11001_v39  ;;  %v8994_v29 = vrot.slane %v14439_v36, 5  ;;  %v7103_v58 = vshll.u32 %v14284_v45, 16  ;;  %v8658_v19 = vunpack.c.l.b16 %v8337_v33  ;;  %v15938_v37 = vrot.slane %v13999_v61, 5  ;;  %v14488_v45 = vld [vmem:[#allocation3 + $0x7c] sm:$0xf] }
 0x439   : > { %10848 = vmatmul.msk.bf16.gmra.mxu0 %vm1356_vm5, %v8686_v25  ;;  %v6151_v10 = vpop.f32.mrf.mxu2  ;;  %15934 = vst [vmem:[#allocation61_spill] sm:$0xff] %v14453_v26  ;;  %v7090_v25 = vor.u32 %v7089_v44, %v7086_v22  ;;  %v15936_v44 = vrot.slane %v13956_v34, 5  ;;  %v15937_v22 = vrot.slane %v14344_v28, 9  ;;  %v14497_v4 = vrot.slane %v8355_v7, 4  ;;  %v14513_v7 = vld [vmem:[#allocation3 + $0x80] sm:$0x1] }
 0x43a   : > { %v6152_v5 = vadd.f32 %v6151_v10, %v13917_v15  ;;  %v15935_v15 = vsel %vm11481_vm4, %v14362_v17, %v14323_v8  ;;  %v14486_v8 = vsel %vm12057_vm14, %v14392_v6, %v15938_v37  ;;  %v14493_v28 = vsel %vm12057_vm14, %v8993_v41, %v8994_v29 }
 0x43b   : > { %v14467_v39 = vunpack.c.l.b16 %v15935_v15  ;;  %v14476_v57 = vsel %vm12057_vm14, %v15937_v22, %v15936_v44  ;;  %10713 = vmatmul.msk.bf16.gmra.mxu1 %vm1356_vm5, %v7340_v35  ;;  %v14495_v17 = vrot.slane %v8345_v52, 4  ;;  %v14499_v51 = vrot.slane %v8358_v20, 5  ;;  %v7534_v20 = vld [vmem:[#allocation3 + $0x78] sm:$0xe]  ;;  %v8883_v44 = vld [vmem:[#allocation3 + $0x6c] sm:$0xe] }
 0x43c   : > { %v14460_v46 = vadd.f32 %v14368_v31, %v6152_v5  ;;  %v14479_v31 = vpop.f32.mrf.mxu3  ;;  %v7091_v33 = vrot.slane %v7090_v25, 4  ;;  %v7101_v60 = vrot.slane %v7100_v14, 4  ;;  %v14502_v6 = vrot.slane %v8363_v2, 4  ;;  %v14516_v25 = vpop.f32.mrf.mxu0  ;;  %v6891_v14 = vld [vmem:[#allocation3 + $0x6c] sm:$0xf] }
 0x43d   : > { %v14504_v10 = vrot.slane %v8366_v50, 5  ;;  %v7105_v5 = vrot.slane %v7103_v58, 5  ;;  %v15939_v35 = vunpack.c.l.b16 %v14277_v24  ;;  %v15940_v41 = vunpack.c.l.b16 %v14335_v40  ;;  %15941 = vst [vmem:[#allocation62_spill] sm:$0xff] %v14516_v25 }
 0x43e   : > { %v7654_v15 = vrot.slane %v14488_v45, 5  ;;  %v8687_v50 = vpack.c.b16 %v8658_v19, %v14467_v39  ;;  %v7117_v58 = vshll.u32 %v14371_v47, 16  ;;  %v7121_v24 = vshrl.u32 %v14371_v47, 16 }
 0x43f   : > { %v14510_v29 = vpack.c.b16 %v15940_v41, %v15939_v35  ;;  %v7096_v35 = vsel %vm11481_vm4, %v7091_v33, %v14432_v32  ;;  %v8372_v41 = vshll.u32 %v14103_v18, 16  ;;  %v8376_v39 = vshrl.u32 %v14103_v18, 16 }
 0x440   : > { %v14522_v22 = vpop.f32.mrf.mxu1  ;;  %v7106_v19 = vsel %vm11481_vm4, %v7101_v60, %v7105_v5  ;;  %v10732_v34 = vrot.slane %v7534_v20, 9  ;;  %v7656_v47 = vrot.slane %v7654_v15, 4  ;;  %v7657_v40 = vrot.slane %v14513_v7, 5 }
 0x441   : > { %v6153_v2 = vpop.f32.mrf.mxu2  ;;  %v7108_v61 = vshrl.u32 %v6891_v14, 16  ;;  %v14538_v32 = vrot.slane %v7117_v58, 5  ;;  %v7123_v33 = vrot.slane %v7121_v24, 4  ;;  %v14546_v5 = vrot.slane %v8372_v41, 5 }
 0x442   : > { %v6154_v37 = vadd.f32 %v6153_v2, %v13953_v48  ;;  %v7111_v48 = vshll.u32 %v6891_v14, 16  ;;  %v10870_v2 = vrot.slane %v8883_v44, 9  ;;  %v7655_v18 = vsel %vm12057_vm14, %v10732_v34, %v7654_v15 }
 0x443   : > { %v7658_v60 = vsel %vm12057_vm14, %v7656_v47, %v7657_v40  ;;  %v7622_v20 = vrot.slane %v14059_v42, 5  ;;  %v15943_v14 = vrot.slane %v14414_v11, 5  ;;  %v7317_v24 = vunpack.c.l.b16 %v7106_v19  ;;  %v11002_v42 = vld [vmem:[#allocation3 + $0x30] sm:$0xff] }
 0x444   : > { %v14534_v52 = vadd.f32 %v14418_v0, %v6154_v37  ;;  %v14536_v27 = vpop.f32.mrf.mxu3  ;;  %v8378_v0 = vrot.slane %v8376_v39, 4  ;;  %v8351_v34 = vsel %vm11481_vm4, %v14495_v17, %v14412_v12  ;;  %v9070_v15 = vunpack.c.l.b16 %v14493_v28 }
 0x445   : > { %v8992_v58 = vsel %vm12057_vm14, %v10870_v2, %v15943_v14  ;;  %v7316_v40 = vunpack.c.l.b16 %v7096_v35  ;;  %v8369_v44 = vor.u32 %v14504_v10, %v14502_v6  ;;  %v7722_v37 = vunpack.c.l.b16 %v7655_v18  ;;  %v14572_v10 = vld [vmem:[#allocation3 + $0x7c] sm:$0xf]  ;;  %v8233_v18 = vld [vmem:[#allocation3 + $0x54] sm:$0xf] }
 0x446   : > { %15942 = vst [vmem:[#allocation63_spill] sm:$0xff] %v14534_v52  ;;  %10744 = vmatmul.msk.bf16.gmra.mxu2 %vm1356_vm5, %v14321_v56  ;;  %v8361_v56 = vsel %vm11481_vm4, %v14497_v4, %v14499_v51  ;;  %v7723_v41 = vunpack.c.l.b16 %v7658_v60  ;;  %v7110_v19 = vrot.slane %v7108_v61, 4  ;;  %v7113_v47 = vrot.slane %v7111_v48, 5  ;;  %v15944_v4 = vld [vmem:[#allocation19_spill] sm:$0xff] }
 0x447   : > { %v7124_v12 = vor.u32 %v7123_v33, %v14538_v32  ;;  %v9069_v17 = vunpack.c.l.b16 %v8992_v58  ;;  %v8379_v28 = vor.u32 %v8378_v0, %v14546_v5  ;;  %v8382_v6 = vshll.u32 %v14131_v54, 16 }
 0x448   : > { %v14566_v2 = vpop.f32.mrf.mxu1  ;;  %10829 = vmatmul.msk.bf16.gmra.mxu3 %vm1356_vm5, %v11002_v42  ;;  %v14574_v35 = vpack.c.b16 %v7723_v41, %v7722_v37  ;;  %v7341_v61 = vpack.c.b16 %v7317_v24, %v7316_v40  ;;  %v14578_v48 = vunpack.c.l.b16 %v8351_v34  ;;  %v7127_v33 = vshll.u32 %v14388_v9, 16 }
 0x449   : > { %10849 = vmatmul.msk.bf16.gmra.mxu0 %vm1356_vm5, %v8687_v50  ;;  %v6156_v39 = vpop.f32.mrf.mxu2  ;;  %v14576_v50 = vpop.f32.mrf.mxu0  ;;  %v14581_v60 = vpack.c.b16 %v9070_v15, %v9069_v17  ;;  %v14586_v0 = vunpack.c.l.b16 %v8361_v56  ;;  %v15948_v54 = vrot.slane %v14023_v62, 5  ;;  %v8396_v42 = vshll.u32 %v14201_v38, 16  ;;  %v14595_v15 = vld [vmem:[#allocation3 + $0x88] sm:$0xf]  ;;  %v7535_v62 = vld [vmem:[#allocation3 + $0x84] sm:$0xe] }
 0x44a   : > { %v6157_v51 = vadd.f32 %v6156_v39, %v15944_v4  ;;  %15945 = vst [vmem:[#allocation19_spill] sm:$0xff] %v14576_v50  ;;  %v7114_v34 = vor.u32 %v7113_v47, %v7110_v19  ;;  %v7125_v40 = vrot.slane %v7124_v12, 4  ;;  %v8400_v9 = vshrl.u32 %v14201_v38, 16  ;;  %v6894_v19 = vld [vmem:[#allocation3 + $0x78] sm:$0xf] }
 0x44b   : > { %15946 = vst [vmem:[#allocation64_spill] sm:$0xff] %v14581_v60  ;;  %v7621_v58 = vrot.slane %v15948_v54, 4  ;;  %10714 = vmatmul.msk.bf16.gmra.mxu1 %vm1356_vm5, %v7341_v61  ;;  %v14598_v37 = vrot.slane %v8369_v44, 4  ;;  %v8380_v56 = vrot.slane %v8379_v28, 4  ;;  %v8384_v41 = vrot.slane %v8382_v6, 5 }
 0x44c   : > { %v14584_v14 = vadd.f32 %v14479_v31, %v6157_v51  ;;  %v14592_v24 = vpop.f32.mrf.mxu3  ;;  %v8998_v31 = vrot.slane %v14572_v10, 5  ;;  %v8387_v39 = vshrl.u32 %v8233_v18, 16  ;;  %v7129_v17 = vrot.slane %v7127_v33, 5  ;;  %v14614_v28 = vld [vmem:[#allocation3 + $0x80] sm:$0x1] }
 0x44d   : > { %v15949_v4 = vunpack.c.l.b16 %v14476_v57  ;;  %v15950_v51 = vunpack.c.l.b16 %v14486_v8  ;;  %v15951_v47 = vmov %v15948_v54  ;;  %v15952_v38 = vrot.slane %v14451_v3, 9  ;;  %v14624_v33 = vld [vmem:[#allocation3 + $0x8c] sm:$0x1] }
 0x44e   : > { %15947 = vst [vmem:[#allocation65_spill] sm:$0xff] %v14584_v14  ;;  %v8390_v44 = vshll.u32 %v8233_v18, 16  ;;  %v8688_v6 = vpack.c.b16 %v14586_v0, %v14578_v48  ;;  %v14620_v57 = vsel %vm12057_vm14, %v7621_v58, %v7622_v20  ;;  %v14622_v8 = vrot.slane %v8396_v42, 5  ;;  %v15953_v48 = vld [vmem:[#allocation23_spill] sm:$0xff]  ;;  %v8884_v14 = vld [vmem:[#allocation3 + $0x78] sm:$0xe] }
 0x44f   : > { %v14604_v61 = vpack.c.b16 %v15950_v51, %v15949_v4  ;;  %v14612_v12 = vsel %vm12057_vm14, %v15952_v38, %v15951_v47  ;;  %v7661_v3 = vrot.slane %v14595_v15, 5  ;;  %v7115_v4 = vrot.slane %v7114_v34, 4 }
 0x450   : > { %v7130_v18 = vsel %vm11481_vm4, %v7125_v40, %v7129_v17  ;;  %v8402_v51 = vrot.slane %v8400_v9, 4  ;;  %v9000_v47 = vrot.slane %v8998_v31, 4  ;;  %v14629_v38 = vpop.f32.mrf.mxu1  ;;  %v7132_v20 = vshrl.u32 %v6894_v19, 16 }
 0x451   : > { %v6158_v54 = vpop.f32.mrf.mxu2  ;;  %v7141_v58 = vshll.u32 %v14488_v45, 16  ;;  %v7145_v42 = vshrl.u32 %v14488_v45, 16  ;;  %v10733_v60 = vrot.slane %v7535_v62, 9  ;;  %v7663_v26 = vrot.slane %v7661_v3, 4 }
 0x452   : > { %v6159_v0 = vadd.f32 %v6158_v54, %v15953_v48  ;;  %v7664_v50 = vrot.slane %v14624_v33, 5  ;;  %v9001_v34 = vrot.slane %v14614_v28, 5  ;;  %v7120_v9 = vsel %vm11481_vm4, %v7115_v4, %v14538_v32  ;;  %v14642_v48 = vpop.f32.mrf.mxu0 }
 0x453   : > { %v7135_v17 = vshll.u32 %v6894_v19, 16  ;;  %v8389_v54 = vrot.slane %v8387_v39, 4  ;;  %15955 = vst [vmem:[#allocation66_spill] sm:$0xff] %v14642_v48  ;;  %v8392_v45 = vrot.slane %v8390_v44, 5  ;;  %v7662_v62 = vsel %vm12057_vm14, %v10733_v60, %v7661_v3  ;;  %v11003_v3 = vld [vmem:[#allocation3 + $0x3c] sm:$0xff] }
 0x454   : > { %v14637_v40 = vadd.f32 %v14536_v27, %v6159_v0  ;;  %v14644_v25 = vpop.f32.mrf.mxu3  ;;  %v7665_v52 = vsel %vm12057_vm14, %v7663_v26, %v7664_v50  ;;  %v9002_v27 = vsel %vm12057_vm14, %v9000_v47, %v9001_v34  ;;  %v7319_v32 = vunpack.c.l.b16 %v7130_v18  ;;  %v15957_v18 = vld [vmem:[#allocation25_spill] sm:$0xff] }
 0x455   : > { %v8385_v39 = vsel %vm11481_vm4, %v8380_v56, %v8384_v41  ;;  %v8403_v19 = vor.u32 %v8402_v51, %v14622_v8  ;;  %v10871_v4 = vrot.slane %v8884_v14, 9  ;;  %v7318_v44 = vunpack.c.l.b16 %v7120_v9 }
 0x456   : > { %15954 = vst [vmem:[#allocation23_spill] sm:$0xff] %v14637_v40  ;;  %10745 = vmatmul.msk.bf16.gmra.mxu2 %vm1356_vm5, %v14510_v29  ;;  %v7134_v0 = vrot.slane %v7132_v20, 4  ;;  %v14657_v48 = vrot.slane %v7141_v58, 5  ;;  %v7147_v60 = vrot.slane %v7145_v42, 4  ;;  %v7137_v26 = vrot.slane %v7135_v17, 5  ;;  %v15956_v29 = vld [vmem:[#allocation30_spill] sm:$0xff] }
 0x457   : > { %v7724_v50 = vunpack.c.l.b16 %v7662_v62  ;;  %v7725_v40 = vunpack.c.l.b16 %v7665_v52  ;;  %v8999_v47 = vsel %vm12057_vm14, %v10871_v4, %v8998_v31  ;;  %v6835_v34 = vadd.f32 %v15957_v18, %v15956_v29  ;;  %v8236_v20 = vld [vmem:[#allocation3 + $0x60] sm:$0xf]  ;;  %v15958_v52 = vld [vmem:[#allocation36_spill] sm:$0xff]  ;;  %v14673_v17 = vld [vmem:[#allocation3 + $0x88] sm:$0xf] }
 0x458   : > { %v8375_v14 = vsel %vm11481_vm4, %v14598_v37, %v14546_v5  ;;  %v14668_v41 = vunpack.c.l.b16 %v8385_v39  ;;  %v8393_v51 = vor.u32 %v8392_v45, %v8389_v54  ;;  %v7413_v58 = vpop.f32.mrf.mxu1  ;;  %v7342_v9 = vpack.c.b16 %v7319_v32, %v7318_v44  ;;  %10830 = vmatmul.msk.bf16.gmra.mxu3 %vm1356_vm5, %v11003_v3 }
 0x459   : > { %10850 = vmatmul.msk.bf16.gmra.mxu0 %vm1356_vm5, %v8688_v6  ;;  %v6161_v56 = vpop.f32.mrf.mxu2  ;;  %v8406_v31 = vshll.u32 %v14228_v63, 16  ;;  %v14675_v6 = vpack.c.b16 %v7725_v40, %v7724_v50  ;;  %v14677_v62 = vadd.f32 %v7413_v58, %v6835_v34  ;;  %v7148_v5 = vor.u32 %v7147_v60, %v14657_v48  ;;  %v15962_v58 = vld [vmem:[#allocation31_spill] sm:$0xff] }
 0x45a   : > { %v6162_v42 = vadd.f32 %v6161_v56, %v15958_v52  ;;  %v9071_v37 = vunpack.c.l.b16 %v8999_v47  ;;  %v9072_v39 = vunpack.c.l.b16 %v9002_v27  ;;  %v7138_v45 = vor.u32 %v7137_v26, %v7134_v0  ;;  %v14696_v26 = vpop.f32.mrf.mxu0  ;;  %v15963_v52 = vld [vmem:[#allocation26_spill] sm:$0xff] }
 0x45b   : > { %v8404_v4 = vrot.slane %v8403_v19, 4  ;;  %v8411_v32 = vshrl.u32 %v8236_v20, 16  ;;  %10715 = vmatmul.msk.bf16.gmra.mxu1 %vm1356_vm5, %v7342_v9  ;;  %v14686_v63 = vunpack.c.l.b16 %v8375_v14  ;;  %v7151_v40 = vshll.u32 %v14513_v7, 16  ;;  %v14694_v19 = vld [vmem:[#allocation3 + $0x94] sm:$0xf]  ;;  %15961 = vst [vmem:[#allocation36_spill] sm:$0xff] %v14696_v26 }
 0x45c   : > { %v14681_v54 = vadd.f32 %v14592_v24, %v6162_v42  ;;  %v14684_v44 = vpop.f32.mrf.mxu3  ;;  %v14689_v3 = vpack.c.b16 %v9072_v39, %v9071_v37  ;;  %v15797_v60 = vrot.slane %v14673_v17, 5  ;;  %v8408_v50 = vrot.slane %v8406_v31, 5  ;;  %v7536_v31 = vld [vmem:[#allocation3 + $0x90] sm:$0xe]  ;;  %v11004_v7 = vld [vmem:[#allocation3 + $0x48] sm:$0xff] }
 0x45d   : > { %v8414_v27 = vshll.u32 %v8236_v20, 16  ;;  %v8420_v24 = vshll.u32 %v14309_v13, 16  ;;  %v8424_v0 = vshrl.u32 %v14309_v13, 16  ;;  %v8689_v47 = vpack.c.b16 %v14668_v41, %v14686_v63  ;;  %v14708_v13 = vld [vmem:[#allocation3 + $0x8c] sm:$0x1] }
 0x45e   : > { %15959 = vst [vmem:[#allocation30_spill] sm:$0xff] %v14681_v54  ;;  %v7149_v29 = vrot.slane %v7148_v5, 4  ;;  %v7139_v34 = vrot.slane %v7138_v45, 4  ;;  %v14702_v56 = vrot.slane %v8393_v51, 4  ;;  %v8409_v14 = vsel %vm11481_vm4, %v8404_v4, %v8408_v50 }
 0x45f   : > { %15960 = vst [vmem:[#allocation25_spill] sm:$0xff] %v14689_v3  ;;  %v14706_v20 = vrot.slane %v8411_v32, 4  ;;  %v6836_v42 = vadd.f32 %v15963_v52, %v15962_v58  ;;  %v7153_v41 = vrot.slane %v7151_v40, 5  ;;  %v7668_v5 = vrot.slane %v14694_v19, 5  ;;  %v6897_v58 = vld [vmem:[#allocation3 + $0x84] sm:$0xf] }
 0x460   : > { %v9007_v37 = vrot.slane %v15797_v60, 4  ;;  %v7415_v51 = vpop.f32.mrf.mxu1  ;;  %v8416_v45 = vrot.slane %v8414_v27, 5  ;;  %v14716_v4 = vrot.slane %v8420_v24, 5  ;;  %v8426_v32 = vrot.slane %v8424_v0, 4  ;;  %v14725_v52 = vld [vmem:[#allocation3 + $0x98] sm:$0x1] }
 0x461   : > { %v6163_v9 = vpop.f32.mrf.mxu2  ;;  %v14718_v63 = vadd.f32 %v7415_v51, %v6836_v42  ;;  %v7144_v50 = vsel %vm11481_vm4, %v7139_v34, %v14657_v48  ;;  %v7154_v40 = vsel %vm11481_vm4, %v7149_v29, %v7153_v41  ;;  %v9008_v18 = vrot.slane %v14708_v13, 5  ;;  %v8885_v51 = vld [vmem:[#allocation3 + $0x84] sm:$0xe] }
 0x462   : > { %v6164_v39 = vadd.f32 %v6163_v9, %v14105_v21  ;;  %v7165_v27 = vshll.u32 %v14595_v15, 16  ;;  %v7169_v24 = vshrl.u32 %v14595_v15, 16  ;;  %v10734_v0 = vrot.slane %v7536_v31, 9 }
 0x463   : > { %v8399_v48 = vsel %vm11481_vm4, %v14702_v56, %v14622_v8  ;;  %v14739_v29 = vunpack.c.l.b16 %v8409_v14  ;;  %v7670_v34 = vrot.slane %v7668_v5, 4  ;;  %v9009_v9 = vsel %vm12057_vm14, %v9007_v37, %v9008_v18 }
 0x464   : > { %v14729_v21 = vadd.f32 %v14644_v25, %v6164_v39  ;;  %v14733_v42 = vpop.f32.mrf.mxu3  ;;  %v7156_v25 = vshrl.u32 %v6897_v58, 16  ;;  %v8417_v15 = vor.u32 %v8416_v45, %v14706_v20  ;;  %v7669_v41 = vsel %vm12057_vm14, %v10734_v0, %v7668_v5  ;;  %v14755_v45 = vpop.f32.mrf.mxu0  ;;  %v15966_v5 = vld [vmem:[#allocation29_spill] sm:$0xff]  ;;  %v15967_v0 = vld [vmem:[#allocation28_spill] sm:$0xff] }
 0x465   : > { %v7671_v31 = vrot.slane %v14725_v52, 5  ;;  %v7320_v39 = vunpack.c.l.b16 %v7144_v50  ;;  %v7321_v8 = vunpack.c.l.b16 %v7154_v40  ;;  %v8427_v56 = vor.u32 %v8426_v32, %v14716_v4  ;;  %15965 = vst [vmem:[#allocation26_spill] sm:$0xff] %v14755_v45 }
 0x466   : > { %15964 = vst [vmem:[#allocation31_spill] sm:$0xff] %v14729_v21  ;;  %10746 = vmatmul.msk.bf16.gmra.mxu2 %vm1356_vm5, %v14604_v61  ;;  %v8430_v14 = vshll.u32 %v14337_v53, 16  ;;  %v7159_v18 = vshll.u32 %v6897_v58, 16  ;;  %v14751_v37 = vrot.slane %v7165_v27, 5  ;;  %v7171_v61 = vrot.slane %v7169_v24, 4  ;;  %v15990_v21 = vld [vmem:[#allocation43_spill] sm:$0xff] }
 0x467   : > { %v7672_v20 = vsel %vm12057_vm14, %v7670_v34, %v7671_v31  ;;  %v6837_v60 = vadd.f32 %v15967_v0, %v15966_v5  ;;  %v7726_v40 = vunpack.c.l.b16 %v7669_v41  ;;  %v10872_v3 = vrot.slane %v8885_v51, 9  ;;  %v8239_v24 = vld [vmem:[#allocation3 + $0x6c] sm:$0xf] }
 0x468   : > { %v7727_v32 = vunpack.c.l.b16 %v7672_v20  ;;  %v7418_v53 = vpop.f32.mrf.mxu1  ;;  %10831 = vmatmul.msk.bf16.gmra.mxu3 %vm1356_vm5, %v11004_v7  ;;  %v7158_v27 = vrot.slane %v7156_v25, 4  ;;  %v8444_v34 = vshll.u32 %v14414_v11, 16  ;;  %v8448_v31 = vshrl.u32 %v14414_v11, 16 }
 0x469   : > { %10851 = vmatmul.msk.bf16.gmra.mxu0 %vm1356_vm5, %v8689_v47  ;;  %v6166_v50 = vpop.f32.mrf.mxu2  ;;  %v14764_v45 = vadd.f32 %v7418_v53, %v6837_v60  ;;  %v7343_v5 = vpack.c.b16 %v7321_v8, %v7320_v39  ;;  %v15969_v47 = vrot.slane %v14673_v17, 5  ;;  %v7161_v7 = vrot.slane %v7159_v18, 5 }
 0x46a   : > { %v6167_v58 = vadd.f32 %v6166_v50, %v14152_v23  ;;  %v14766_v0 = vpack.c.b16 %v7727_v32, %v7726_v40  ;;  %v7172_v25 = vor.u32 %v7171_v61, %v14751_v37  ;;  %v9074_v51 = vunpack.c.l.b16 %v9009_v9  ;;  %v14786_v32 = vld [vmem:[#allocation3 + $0xa0] sm:$0xf] }
 0x46b   : > { %v9006_v41 = vsel %vm12057_vm14, %v10872_v3, %v15969_v47  ;;  %10716 = vmatmul.msk.bf16.gmra.mxu1 %vm1356_vm5, %v7343_v5  ;;  %v8663_v60 = vunpack.c.l.b16 %v8399_v48  ;;  %v14779_v39 = vrot.slane %v8417_v15, 4  ;;  %v8435_v8 = vshrl.u32 %v8239_v24, 16 }
 0x46c   : > { %15968 = vst [vmem:[#allocation29_spill] sm:$0xff] %v14766_v0  ;;  %v14773_v23 = vadd.f32 %v14684_v44, %v6167_v58  ;;  %v14777_v11 = vpop.f32.mrf.mxu3  ;;  %v8438_v20 = vshll.u32 %v8239_v24, 16  ;;  %v15971_v50 = vunpack.c.l.b16 %v14612_v12  ;;  %v15972_v3 = vunpack.c.l.b16 %v14620_v57  ;;  %v7537_v24 = vld [vmem:[#allocation3 + $0x9c] sm:$0xe] }
 0x46d   : > { %v7175_v44 = vshll.u32 %v14624_v33, 16  ;;  %v8428_v18 = vrot.slane %v8427_v56, 4  ;;  %v9073_v9 = vunpack.c.l.b16 %v9006_v41  ;;  %v8690_v61 = vpack.c.b16 %v14739_v29, %v8663_v60  ;;  %v15974_v33 = vld [vmem:[#allocation16_spill] sm:$0xff]  ;;  %v15975_v56 = vld [vmem:[#allocation27_spill] sm:$0xff] }
 0x46e   : > { %15970 = vst [vmem:[#allocation28_spill] sm:$0xff] %v14773_v23  ;;  %v7740_v40 = vpack.c.b16 %v15972_v3, %v15971_v50  ;;  %v8432_v15 = vrot.slane %v8430_v14, 5  ;;  %v14793_v53 = vrot.slane %v8444_v34, 5  ;;  %v7162_v12 = vor.u32 %v7161_v7, %v7158_v27  ;;  %v14808_v7 = vld [vmem:[#allocation3 + $0xa4] sm:$0x1]  ;;  %v15981_v23 = vld [vmem:[#allocation50_spill] sm:$0xff] }
 0x46f   : > { %v7173_v58 = vrot.slane %v7172_v25, 4  ;;  %v8450_v57 = vrot.slane %v8448_v31, 4  ;;  %v14795_v5 = vpack.c.b16 %v9074_v51, %v9073_v9  ;;  %v6838_v47 = vadd.f32 %v15975_v56, %v15974_v33  ;;  %v14810_v25 = vld [vmem:[#allocation3 + $0x94] sm:$0xf]  ;;  %v14812_v51 = vpop.f32.mrf.mxu0  ;;  %v15994_v0 = vld [vmem:[#allocation32_spill] sm:$0xff] }
 0x470   : > { %v14799_v50 = vrot.slane %v8435_v8, 4  ;;  %v14801_v29 = vrot.slane %v8438_v20, 5  ;;  %v7675_v60 = vrot.slane %v14786_v32, 5  ;;  %v7420_v3 = vpop.f32.mrf.mxu1  ;;  %v7177_v34 = vrot.slane %v7175_v44, 5  ;;  %15976 = vst [vmem:[#allocation16_spill] sm:$0xff] %v14812_v51 }
 0x471   : > { %15973 = vst [vmem:[#allocation67_spill] sm:$0xff] %v14795_v5  ;;  %v6168_v41 = vpop.f32.mrf.mxu2  ;;  %v8433_v27 = vsel %vm11481_vm4, %v8428_v18, %v8432_v15  ;;  %v8454_v31 = vshll.u32 %v14439_v36, 16  ;;  %v14814_v8 = vadd.f32 %v7420_v3, %v6838_v47  ;;  %v6900_v20 = vld [vmem:[#allocation3 + $0x90] sm:$0xf]  ;;  %v7189_v9 = vshll.u32 %v14694_v19, 16 }
 0x472   : > { %v6169_v14 = vadd.f32 %v6168_v41, %v14191_v1  ;;  %v7193_v33 = vshrl.u32 %v14694_v19, 16  ;;  %v10735_v1 = vrot.slane %v7537_v24, 9  ;;  %v7163_v18 = vrot.slane %v7162_v12, 4  ;;  %v14842_v19 = vld [vmem:[#allocation3 + $0x98] sm:$0x1] }
 0x473   : > { %v7178_v36 = vsel %vm11481_vm4, %v7173_v58, %v7177_v34  ;;  %v8451_v15 = vor.u32 %v8450_v57, %v14793_v53  ;;  %v7677_v41 = vrot.slane %v7675_v60, 4  ;;  %v7678_v3 = vrot.slane %v14808_v7, 5 }
 0x474   : > { %v14819_v44 = vadd.f32 %v14733_v42, %v6169_v14  ;;  %v14824_v56 = vpop.f32.mrf.mxu3  ;;  %v7676_v47 = vsel %vm12057_vm14, %v10735_v1, %v7675_v60  ;;  %v7168_v42 = vsel %vm11481_vm4, %v7163_v18, %v14751_v37  ;;  %v14834_v12 = vunpack.c.l.b16 %v8433_v27  ;;  %v11005_v1 = vld [vmem:[#allocation3 + $0x54] sm:$0xff]  ;;  %v15978_v27 = vld [vmem:[#allocation33_spill] sm:$0xff]  ;;  %v15979_v18 = vld [vmem:[#allocation14_spill] sm:$0xff] }
 0x475   : > { %v7180_v58 = vshrl.u32 %v6900_v20, 16  ;;  %v7183_v57 = vshll.u32 %v6900_v20, 16  ;;  %v7323_v24 = vunpack.c.l.b16 %v7178_v36  ;;  %v14836_v14 = vrot.slane %v7189_v9, 5  ;;  %v8242_v36 = vld [vmem:[#allocation3 + $0x78] sm:$0xf] }
 0x476   : > { %15977 = vst [vmem:[#allocation27_spill] sm:$0xff] %v14819_v44  ;;  %10747 = vmatmul.msk.bf16.gmra.mxu2 %vm1356_vm5, %v7740_v40  ;;  %v7195_v34 = vrot.slane %v7193_v33, 4  ;;  %v7679_v60 = vsel %vm12057_vm14, %v7677_v41, %v7678_v3  ;;  %v8441_v48 = vor.u32 %v14801_v29, %v14799_v50  ;;  %v8452_v40 = vrot.slane %v8451_v15, 4 }
 0x477   : > { %v7728_v5 = vunpack.c.l.b16 %v7676_v47  ;;  %v7729_v37 = vunpack.c.l.b16 %v7679_v60  ;;  %v6839_v44 = vadd.f32 %v15979_v18, %v15978_v27  ;;  %v7322_v9 = vunpack.c.l.b16 %v7168_v42 }
 0x478   : > { %v8456_v33 = vrot.slane %v8454_v31, 5  ;;  %v15980_v41 = vrot.slane %v14810_v25, 5  ;;  %v7423_v51 = vpop.f32.mrf.mxu1  ;;  %10832 = vmatmul.msk.bf16.gmra.mxu3 %vm1356_vm5, %v11005_v1  ;;  %v7182_v29 = vrot.slane %v7180_v58, 4  ;;  %v7185_v15 = vrot.slane %v7183_v57, 5  ;;  %v14862_v1 = vpop.f32.mrf.mxu0  ;;  %v8886_v57 = vld [vmem:[#allocation3 + $0x90] sm:$0xe] }
 0x479   : > { %10852 = vmatmul.msk.bf16.gmra.mxu0 %vm1356_vm5, %v8690_v61  ;;  %v6171_v20 = vpop.f32.mrf.mxu2  ;;  %v14851_v47 = vpack.c.b16 %v7729_v37, %v7728_v5  ;;  %v14853_v60 = vadd.f32 %v7423_v51, %v6839_v44  ;;  %v7344_v27 = vpack.c.b16 %v7323_v24, %v7322_v9  ;;  %v7196_v61 = vor.u32 %v7195_v34, %v14836_v14  ;;  %v14881_v9 = vld [vmem:[#allocation3 + $0xac] sm:$0xf] }
 0x47a   : > { %v9014_v3 = vrot.slane %v15980_v41, 4  ;;  %v6172_v50 = vadd.f32 %v6171_v20, %v15981_v23  ;;  %v9015_v31 = vrot.slane %v14842_v19, 5  ;;  %v8457_v18 = vsel %vm11481_vm4, %v8452_v40, %v8456_v33  ;;  %15984 = vst [vmem:[#allocation50_spill] sm:$0xff] %v14862_v1 }
 0x47b   : > { %15982 = vst [vmem:[#allocation33_spill] sm:$0xff] %v14851_v47  ;;  %v8459_v23 = vshrl.u32 %v8242_v36, 16  ;;  %v8462_v20 = vshll.u32 %v8242_v36, 16  ;;  %10717 = vmatmul.msk.bf16.gmra.mxu1 %vm1356_vm5, %v7344_v27  ;;  %v15985_v51 = vsel %vm11481_vm4, %v14779_v39, %v14716_v4  ;;  %v14875_v58 = vrot.slane %v8441_v48, 4 }
 0x47c   : > { %v14858_v42 = vadd.f32 %v14777_v11, %v6172_v50  ;;  %v14865_v5 = vpop.f32.mrf.mxu3  ;;  %v14872_v44 = vunpack.c.l.b16 %v15985_v51  ;;  %v7199_v11 = vshll.u32 %v14725_v52, 16  ;;  %v9016_v24 = vsel %vm12057_vm14, %v9014_v3, %v9015_v31  ;;  %v15986_v50 = vld [vmem:[#allocation34_spill] sm:$0xff]  ;;  %v14899_v31 = vld [vmem:[#allocation3 + $0xa0] sm:$0xf] }
 0x47d   : > { %v7186_v34 = vor.u32 %v7185_v15, %v7182_v29  ;;  %v8468_v40 = vshll.u32 %v14572_v10, 16  ;;  %v8472_v37 = vshrl.u32 %v14572_v10, 16  ;;  %v7197_v39 = vrot.slane %v7196_v61, 4  ;;  %v7538_v10 = vld [vmem:[#allocation3 + $0xa8] sm:$0xe]  ;;  %v15987_v29 = vld [vmem:[#allocation15_spill] sm:$0xff] }
 0x47e   : > { %15983 = vst [vmem:[#allocation14_spill] sm:$0xff] %v14858_v42  ;;  %v8691_v4 = vpack.c.b16 %v14834_v12, %v14872_v44  ;;  %v14889_v48 = vunpack.c.l.b16 %v8457_v18  ;;  %v7213_v33 = vshll.u32 %v14786_v32, 16  ;;  %v14892_v36 = vrot.slane %v8459_v23, 4  ;;  %v14905_v42 = vld [vmem:[#allocation3 + $0xb0] sm:$0x1] }
 0x47f   : > { %v14894_v41 = vrot.slane %v8462_v20, 5  ;;  %v10873_v3 = vrot.slane %v8886_v57, 9  ;;  %v6840_v15 = vadd.f32 %v15987_v29, %v15986_v50  ;;  %v7201_v27 = vrot.slane %v7199_v11, 5  ;;  %v6903_v50 = vld [vmem:[#allocation3 + $0x9c] sm:$0xf] }
 0x480   : > { %v7217_v61 = vshrl.u32 %v14786_v32, 16  ;;  %v7682_v18 = vrot.slane %v14881_v9, 5  ;;  %v7425_v51 = vpop.f32.mrf.mxu1  ;;  %v7187_v23 = vrot.slane %v7186_v34, 4  ;;  %v14903_v52 = vrot.slane %v8468_v40, 5 }
 0x481   : > { %v6173_v12 = vpop.f32.mrf.mxu2  ;;  %v8474_v20 = vrot.slane %v8472_v37, 4  ;;  %v14907_v57 = vadd.f32 %v7425_v51, %v6840_v15  ;;  %v7202_v11 = vsel %vm11481_vm4, %v7197_v39, %v7201_v27  ;;  %v10736_v32 = vrot.slane %v7538_v10, 9  ;;  %v8887_v37 = vld [vmem:[#allocation3 + $0x9c] sm:$0xe] }
 0x482   : > { %v6174_v44 = vadd.f32 %v6173_v12, %v14291_v43  ;;  %v15988_v29 = vrot.slane %v14810_v25, 5  ;;  %v14918_v34 = vrot.slane %v7213_v33, 5  ;;  %v9076_v40 = vunpack.c.l.b16 %v9016_v24 }
 0x483   : > { %v9019_v15 = vrot.slane %v14899_v31, 5  ;;  %v7219_v51 = vrot.slane %v7217_v61, 4  ;;  %v7683_v39 = vsel %vm12057_vm14, %v10736_v32, %v7682_v18  ;;  %v7684_v10 = vrot.slane %v7682_v18, 4  ;;  %v14935_v32 = vld [vmem:[#allocation3 + $0xa4] sm:$0x1] }
 0x484   : > { %v9013_v1 = vsel %vm12057_vm14, %v10873_v3, %v15988_v29  ;;  %v14916_v43 = vadd.f32 %v14824_v56, %v6174_v44  ;;  %v14921_v12 = vpop.f32.mrf.mxu3  ;;  %v7685_v27 = vrot.slane %v14905_v42, 5  ;;  %v7192_v56 = vsel %vm11481_vm4, %v7187_v23, %v14836_v14  ;;  %v14933_v44 = vpop.f32.mrf.mxu0  ;;  %v15993_v23 = vld [vmem:[#allocation21_spill] sm:$0xff] }
 0x485   : > { %v7204_v24 = vshrl.u32 %v6903_v50, 16  ;;  %v8465_v33 = vor.u32 %v14894_v41, %v14892_v36  ;;  %v9075_v3 = vunpack.c.l.b16 %v9013_v1  ;;  %15991 = vst [vmem:[#allocation15_spill] sm:$0xff] %v14933_v44  ;;  %v7325_v61 = vunpack.c.l.b16 %v7202_v11 }
 0x486   : > { %15989 = vst [vmem:[#allocation34_spill] sm:$0xff] %v14916_v43  ;;  %10748 = vmatmul.msk.bf16.gmra.mxu2 %vm1356_vm5, %v15990_v21  ;;  %v7207_v29 = vshll.u32 %v6903_v50, 16  ;;  %v7686_v18 = vsel %vm12057_vm14, %v7684_v10, %v7685_v27  ;;  %v10874_v43 = vrot.slane %v8887_v37, 9  ;;  %v11006_v21 = vld [vmem:[#allocation3 + $0x60] sm:$0xff]  ;;  %v7730_v26 = vunpack.c.l.b16 %v7683_v39  ;;  %v15995_v10 = vld [vmem:[#allocation56_spill] sm:$0xff] }
 0x487   : > { %v7731_v54 = vunpack.c.l.b16 %v7686_v18  ;;  %v14939_v47 = vpack.c.b16 %v9076_v40, %v9075_v3  ;;  %v9021_v14 = vrot.slane %v9019_v15, 4  ;;  %v6841_v36 = vadd.f32 %v15994_v0, %v15993_v23 }
 0x488   : > { %v7324_v41 = vunpack.c.l.b16 %v7192_v56  ;;  %v7220_v11 = vor.u32 %v7219_v51, %v14918_v34  ;;  %v8475_v50 = vor.u32 %v8474_v20, %v14903_v52  ;;  %v7428_v44 = vpop.f32.mrf.mxu1  ;;  %10833 = vmatmul.msk.bf16.gmra.mxu3 %vm1356_vm5, %v11006_v21  ;;  %v9020_v40 = vsel %vm12057_vm14, %v10874_v43, %v9019_v15 }
 0x489   : > { %15992 = vst [vmem:[#allocation43_spill] sm:$0xff] %v14939_v47  ;;  %10853 = vmatmul.msk.bf16.gmra.mxu0 %vm1356_vm5, %v8691_v4  ;;  %v6176_v1 = vpop.f32.mrf.mxu2  ;;  %v14948_v39 = vpack.c.b16 %v7731_v54, %v7730_v26  ;;  %v9022_v0 = vrot.slane %v14935_v32, 5  ;;  %v14953_v27 = vadd.f32 %v7428_v44, %v6841_v36  ;;  %v7223_v56 = vshll.u32 %v14808_v7, 16 }
 0x48a   : > { %v6177_v37 = vadd.f32 %v6176_v1, %v15995_v10  ;;  %v7345_v4 = vpack.c.b16 %v7325_v61, %v7324_v41  ;;  %v8478_v51 = vshll.u32 %v14614_v28, 16  ;;  %v7206_v3 = vrot.slane %v7204_v24, 4  ;;  %v14970_v61 = vld [vmem:[#allocation3 + $0xb8] sm:$0xf]  ;;  %v6906_v1 = vld [vmem:[#allocation3 + $0xa8] sm:$0xf] }
 0x48b   : > { %15996 = vst [vmem:[#allocation21_spill] sm:$0xff] %v14948_v39  ;;  %v7209_v18 = vrot.slane %v7207_v29, 5  ;;  %v9023_v54 = vsel %vm12057_vm14, %v9021_v14, %v9022_v0  ;;  %v8476_v43 = vrot.slane %v8475_v50, 4  ;;  %v9077_v15 = vunpack.c.l.b16 %v9020_v40  ;;  %v7539_v10 = vld [vmem:[#allocation3 + $0xb4] sm:$0xe]  ;;  %v11008_v39 = vld [vmem:[#allocation3 + $0x78] sm:$0xff] }
 0x48c   : > { %v14958_v20 = vadd.f32 %v14865_v5, %v6177_v37  ;;  %10718 = vmatmul.msk.bf16.gmra.mxu1 %vm1356_vm5, %v7345_v4  ;;  %v14963_v26 = vpop.f32.mrf.mxu3  ;;  %v9078_v44 = vunpack.c.l.b16 %v9023_v54  ;;  %v15998_v28 = vsel %vm11481_vm4, %v14875_v58, %v14793_v53  ;;  %v7221_v5 = vrot.slane %v7220_v11, 4  ;;  %v14979_v53 = vpop.f32.mrf.mxu0  ;;  %v16001_v58 = vld [vmem:[#allocation24_spill] sm:$0xff]  ;;  %v16002_v11 = vld [vmem:[#allocation18_spill] sm:$0xff] }
 0x48d   : > { %v8667_v7 = vunpack.c.l.b16 %v15998_v28  ;;  %v7225_v24 = vrot.slane %v7223_v56, 5  ;;  %v14972_v29 = vrot.slane %v8465_v33, 4  ;;  %v8480_v21 = vrot.slane %v8478_v51, 5  ;;  %16000 = vst [vmem:[#allocation68_spill] sm:$0xff] %v14979_v53  ;;  %v16003_v56 = vld [vmem:[#allocation59_spill] sm:$0xff] }
 0x48e   : > { %15997 = vst [vmem:[#allocation32_spill] sm:$0xff] %v14958_v20  ;;  %v14974_v14 = vpack.c.b16 %v9078_v44, %v9077_v15  ;;  %v7210_v36 = vor.u32 %v7209_v18, %v7206_v3  ;;  %v7237_v41 = vshll.u32 %v14881_v9, 16  ;;  %v7241_v50 = vshrl.u32 %v14881_v9, 16  ;;  %v8245_v3 = vld [vmem:[#allocation3 + $0x84] sm:$0xf]  ;;  %v16008_v20 = vld [vmem:[#allocation20_spill] sm:$0xff] }
 0x48f   : > { %v8692_v23 = vpack.c.b16 %v14889_v48, %v8667_v7  ;;  %v6842_v37 = vadd.f32 %v16002_v11, %v16001_v58  ;;  %v8471_v33 = vsel %vm11481_vm4, %v14972_v29, %v14903_v52  ;;  %v8481_v48 = vsel %vm11481_vm4, %v8476_v43, %v8480_v21  ;;  %v14995_v15 = vld [vmem:[#allocation3 + $0xbc] sm:$0x1] }
 0x490   : > { %15999 = vst [vmem:[#allocation56_spill] sm:$0xff] %v14974_v14  ;;  %v7689_v0 = vrot.slane %v14970_v61, 5  ;;  %v7430_v4 = vpop.f32.mrf.mxu1  ;;  %v7226_v51 = vsel %vm11481_vm4, %v7221_v5, %v7225_v24  ;;  %v8492_v18 = vshll.u32 %v14673_v17, 16  ;;  %v8496_v54 = vshrl.u32 %v14673_v17, 16  ;;  %v15004_v5 = vld [vmem:[#allocation3 + $0xac] sm:$0xf] }
 0x491   : > { %v6178_v40 = vpop.f32.mrf.mxu2  ;;  %v14997_v44 = vadd.f32 %v7430_v4, %v6842_v37  ;;  %v7228_v52 = vshrl.u32 %v6906_v1, 16  ;;  %v7231_v28 = vshll.u32 %v6906_v1, 16  ;;  %v10737_v43 = vrot.slane %v7539_v10, 9  ;;  %v16006_v1 = vld [vmem:[#allocation48_spill] sm:$0xff] }
 0x492   : > { %v6179_v9 = vadd.f32 %v6178_v40, %v16003_v56  ;;  %v7211_v29 = vrot.slane %v7210_v36, 4  ;;  %v15002_v21 = vrot.slane %v7237_v41, 5  ;;  %v7243_v58 = vrot.slane %v7241_v50, 4 }
 0x493   : > { %16004 = vst [vmem:[#allocation24_spill] sm:$0xff] %v14997_v44  ;;  %v8483_v11 = vshrl.u32 %v8245_v3, 16  ;;  %v7690_v17 = vsel %vm12057_vm14, %v10737_v43, %v7689_v0  ;;  %v7691_v37 = vrot.slane %v7689_v0, 4  ;;  %v7692_v40 = vrot.slane %v14995_v15, 5  ;;  %v15110_v44 = vld [vmem:[#allocation3 + $0xc8] sm:$0x1] }
 0x494   : > { %v15000_v7 = vadd.f32 %v14921_v12, %v6179_v9  ;;  %v15006_v24 = vpop.f32.mrf.mxu3  ;;  %v7216_v12 = vsel %vm11481_vm4, %v7211_v29, %v14918_v34  ;;  %v7327_v36 = vunpack.c.l.b16 %v7226_v51  ;;  %v8486_v41 = vshll.u32 %v8245_v3, 16  ;;  %v11007_v9 = vld [vmem:[#allocation3 + $0x6c] sm:$0xff] }
 0x495   : > { %v15016_v50 = vrot.slane %v8492_v18, 5  ;;  %v7230_v10 = vrot.slane %v7228_v52, 4  ;;  %v7233_v4 = vrot.slane %v7231_v28, 5  ;;  %v7693_v56 = vsel %vm12057_vm14, %v7691_v37, %v7692_v40 }
 0x496   : > { %16005 = vst [vmem:[#allocation18_spill] sm:$0xff] %v15000_v7  ;;  %10749 = vmatmul.msk.bf16.gmra.mxu2 %vm1356_vm5, %v16006_v1  ;;  %v9026_v0 = vrot.slane %v15004_v5, 5  ;;  %v7244_v43 = vor.u32 %v7243_v58, %v15002_v21  ;;  %v8498_v14 = vrot.slane %v8496_v54, 4  ;;  %v7732_v1 = vunpack.c.l.b16 %v7690_v17  ;;  %v16007_v7 = vld [vmem:[#allocation38_spill] sm:$0xff]  ;;  %v15034_v17 = vld [vmem:[#allocation3 + $0xb0] sm:$0x1] }
 0x497   : > { %v7733_v47 = vunpack.c.l.b16 %v7693_v56  ;;  %v6843_v34 = vadd.f32 %v16008_v20, %v16007_v7  ;;  %v7326_v3 = vunpack.c.l.b16 %v7216_v12  ;;  %v15025_v18 = vunpack.c.l.b16 %v8481_v48 }
 0x498   : > { %v15027_v52 = vrot.slane %v8483_v11, 4  ;;  %v7433_v28 = vpop.f32.mrf.mxu1  ;;  %10834 = vmatmul.msk.bf16.gmra.mxu3 %vm1356_vm5, %v11007_v9  ;;  %v7247_v54 = vshll.u32 %v14905_v42, 16  ;;  %v15032_v58 = vrot.slane %v8486_v41, 5  ;;  %v7234_v11 = vor.u32 %v7233_v4, %v7230_v10  ;;  %v8888_v41 = vld [vmem:[#allocation3 + $0xa8] sm:$0xe] }
 0x499   : > { %10854 = vmatmul.msk.bf16.gmra.mxu0 %vm1356_vm5, %v8692_v23  ;;  %v6181_v51 = vpop.f32.mrf.mxu2  ;;  %v15036_v20 = vpack.c.b16 %v7733_v47, %v7732_v1  ;;  %v15038_v23 = vpop.f32.mrf.mxu0  ;;  %v15040_v7 = vadd.f32 %v7433_v28, %v6843_v34  ;;  %v7346_v48 = vpack.c.b16 %v7327_v36, %v7326_v3  ;;  %v9028_v37 = vrot.slane %v9026_v0, 4  ;;  %v15054_v4 = vld [vmem:[#allocation3 + $0xc4] sm:$0xf] }
 0x49a   : > { %v6182_v29 = vadd.f32 %v6181_v51, %v14447_v30  ;;  %16010 = vst [vmem:[#allocation48_spill] sm:$0xff] %v15038_v23  ;;  %v15045_v30 = vunpack.c.l.b16 %v8471_v33  ;;  %v7245_v12 = vrot.slane %v7244_v43, 4  ;;  %v8499_v42 = vor.u32 %v8498_v14, %v15016_v50  ;;  %v6909_v14 = vld [vmem:[#allocation3 + $0xb4] sm:$0xf]  ;;  %v16013_v34 = vld [vmem:[#allocation41_spill] sm:$0xff]  ;;  %v16014_v51 = vld [vmem:[#allocation22_spill] sm:$0xff] }
 0x49b   : > { %16009 = vst [vmem:[#allocation59_spill] sm:$0xff] %v15036_v20  ;;  %v9029_v56 = vrot.slane %v15034_v17, 5  ;;  %v7249_v10 = vrot.slane %v7247_v54, 5  ;;  %v7235_v33 = vrot.slane %v7234_v11, 4  ;;  %v10875_v43 = vrot.slane %v8888_v41, 9 }
 0x49c   : > { %16011 = vst [vmem:[#allocation38_spill] sm:$0xff] %v15040_v7  ;;  %v15043_v40 = vadd.f32 %v14963_v26, %v6182_v29  ;;  %10719 = vmatmul.msk.bf16.gmra.mxu1 %vm1356_vm5, %v7346_v48  ;;  %v15049_v47 = vpop.f32.mrf.mxu3  ;;  %v8693_v36 = vpack.c.b16 %v15025_v18, %v15045_v30  ;;  %v15056_v26 = vld [vmem:[#allocation3 + $0xb8] sm:$0xf]  ;;  %v6844_v3 = vadd.f32 %v16014_v51, %v16013_v34  ;;  %v15066_v28 = vrot.slane %v8499_v42, 4  ;;  %v7540_v54 = vld [vmem:[#allocation3 + $0xc0] sm:$0xe] }
 0x49d   : > { %v9030_v1 = vsel %vm12057_vm14, %v9028_v37, %v9029_v56  ;;  %v7250_v18 = vsel %vm11481_vm4, %v7245_v12, %v7249_v10  ;;  %v7240_v11 = vsel %vm11481_vm4, %v7235_v33, %v15002_v21  ;;  %v7696_v30 = vrot.slane %v15054_v4, 5  ;;  %v8889_v41 = vld [vmem:[#allocation3 + $0xb4] sm:$0xe]  ;;  %v15077_v51 = vld [vmem:[#allocation3 + $0xc8] sm:$0x1] }
 0x49e   : > { %16012 = vst [vmem:[#allocation20_spill] sm:$0xff] %v15043_v40  ;;  %v9027_v37 = vsel %vm12057_vm14, %v10875_v43, %v9026_v0  ;;  %v9033_v56 = vrot.slane %v15056_v26, 5  ;;  %v7252_v42 = vshrl.u32 %v6909_v14, 16  ;;  %v7255_v10 = vshll.u32 %v6909_v14, 16  ;;  %v15086_v43 = vld [vmem:[#allocation3 + $0xbc] sm:$0x1] }
 0x49f   : > { %v9080_v9 = vunpack.c.l.b16 %v9030_v1  ;;  %v7329_v7 = vunpack.c.l.b16 %v7250_v18  ;;  %v7261_v21 = vshll.u32 %v14970_v61, 16  ;;  %v10738_v33 = vrot.slane %v7540_v54, 9  ;;  %v15092_v1 = vld [vmem:[#allocation3 + $0xc4] sm:$0xf] }
 0x4a0   : > { %v7435_v34 = vpop.f32.mrf.mxu1  ;;  %v7265_v0 = vshrl.u32 %v14970_v61, 16  ;;  %v9079_v23 = vunpack.c.l.b16 %v9027_v37  ;;  %v7698_v18 = vrot.slane %v7696_v30, 4  ;;  %v7699_v54 = vrot.slane %v15077_v51, 5  ;;  %v16019_v61 = vld [vmem:[#allocation44_spill] sm:$0xff] }
 0x4a1   : > { %v6183_v48 = vpop.f32.mrf.mxu2  ;;  %v15079_v29 = vadd.f32 %v7435_v34, %v6844_v3  ;;  %v7697_v3 = vsel %vm12057_vm14, %v10738_v33, %v7696_v30  ;;  %v16018_v34 = vld [vmem:[#allocation54_spill] sm:$0xff]  ;;  %v15103_v53 = vrot.slane %v7261_v21, 5  ;;  %v9036_v20 = vrot.slane %v15086_v43, 5 }
 0x4a2   : > { %v6184_v12 = vadd.f32 %v6183_v48, %v14522_v22  ;;  %v10876_v22 = vrot.slane %v8889_v41, 9  ;;  %v15088_v48 = vpop.f32.mrf.mxu0  ;;  %v7328_v41 = vunpack.c.l.b16 %v7240_v11  ;;  %v7700_v33 = vsel %vm12057_vm14, %v7698_v18, %v7699_v54 }
 0x4a3   : > { %16015 = vst [vmem:[#allocation41_spill] sm:$0xff] %v15079_v29  ;;  %v7254_v29 = vrot.slane %v7252_v42, 4  ;;  %v7735_v11 = vunpack.c.l.b16 %v7700_v33  ;;  %v7257_v21 = vrot.slane %v7255_v10, 5  ;;  %v9043_v10 = vrot.slane %v15110_v44, 5 }
 0x4a4   : > { %v15083_v40 = vadd.f32 %v15006_v24, %v6184_v12  ;;  %16017 = vst [vmem:[#allocation69_spill] sm:$0xff] %v15088_v48  ;;  %v15090_v14 = vpop.f32.mrf.mxu3  ;;  %v9035_v24 = vrot.slane %v9033_v56, 4  ;;  %v16020_v12 = vld [vmem:[#allocation37_spill] sm:$0xff]  ;;  %v9034_v30 = vsel %vm12057_vm14, %v10876_v22, %v9033_v56  ;;  %v7347_v42 = vpack.c.b16 %v7329_v7, %v7328_v41 }
 0x4a5   : > { %v6845_v37 = vadd.f32 %v16020_v12, %v16019_v61  ;;  %v8890_v48 = vld [vmem:[#allocation3 + $0xc0] sm:$0xe]  ;;  %v7734_v61 = vunpack.c.l.b16 %v7697_v3  ;;  %v9081_v3 = vunpack.c.l.b16 %v9034_v30  ;;  %v16022_v30 = vor.u32 %v15032_v58, %v15027_v52  ;;  %v16023_v52 = vld [vmem:[#allocation47_spill] sm:$0xff]  ;;  %v16024_v58 = vld [vmem:[#allocation42_spill] sm:$0xff] }
 0x4a6   : > { %16016 = vst [vmem:[#allocation22_spill] sm:$0xff] %v15083_v40  ;;  %10750 = vmatmul.msk.bf16.gmra.mxu2 %vm1356_vm5, %v16018_v34  ;;  %v15101_v40 = vpack.c.b16 %v9080_v9, %v9079_v23  ;;  %v7267_v34 = vrot.slane %v7265_v0, 4  ;;  %v9040_v23 = vrot.slane %v15092_v1, 5  ;;  %v9037_v18 = vsel %vm12057_vm14, %v9035_v24, %v9036_v20 }
 0x4a7   : > { %v10877_v54 = vrot.slane %v8890_v48, 9  ;;  %v15118_v0 = vpack.c.b16 %v7735_v11, %v7734_v61  ;;  %v9082_v12 = vunpack.c.l.b16 %v9037_v18  ;;  %v16021_v24 = vshll.u32 %v14708_v13, 16  ;;  %v8248_v11 = vld [vmem:[#allocation3 + $0x90] sm:$0xf] }
 0x4a8   : > { %v7438_v56 = vpop.f32.mrf.mxu1  ;;  %10835 = vmatmul.msk.bf16.gmra.mxu3 %vm1356_vm5, %v11008_v39  ;;  %v9042_v7 = vrot.slane %v9040_v23, 4  ;;  %v7268_v48 = vor.u32 %v7267_v34, %v15103_v53  ;;  %v8490_v61 = vrot.slane %v16022_v30, 4  ;;  %v7258_v13 = vor.u32 %v7257_v21, %v7254_v29 }
 0x4a9   : > { %10855 = vmatmul.msk.bf16.gmra.mxu0 %vm1356_vm5, %v8693_v36  ;;  %v6186_v9 = vpop.f32.mrf.mxu2  ;;  %v15120_v33 = vadd.f32 %v7438_v56, %v6845_v37  ;;  %v9041_v36 = vsel %vm12057_vm14, %v10877_v54, %v9040_v23  ;;  %v8504_v37 = vrot.slane %v16021_v24, 5  ;;  %v8516_v18 = vshll.u32 %v14810_v25, 16 }
 0x4aa   : > { %v6187_v22 = vadd.f32 %v6186_v9, %v14566_v2  ;;  %v15129_v2 = vpack.c.b16 %v9082_v12, %v9081_v3  ;;  %v9044_v41 = vsel %vm12057_vm14, %v9042_v7, %v9043_v10  ;;  %v9083_v23 = vunpack.c.l.b16 %v9041_v36  ;;  %v15140_v9 = vpop.f32.mrf.mxu0 }
 0x4ab   : > { %v9084_v34 = vunpack.c.l.b16 %v9044_v41  ;;  %v8520_v54 = vshrl.u32 %v14810_v25, 16  ;;  %v7269_v56 = vrot.slane %v7268_v48, 4  ;;  %v8495_v12 = vsel %vm11481_vm4, %v8490_v61, %v15016_v50 }
 0x4ac   : > { %v15126_v20 = vadd.f32 %v15049_v47, %v6187_v22  ;;  %10720 = vmatmul.msk.bf16.gmra.mxu1 %vm1356_vm5, %v7347_v42  ;;  %v8106_v39 = vpop.f32.mrf.mxu3  ;;  %v7271_v47 = vshll.u32 %v14995_v15, 16  ;;  %v8505_v42 = vsel %vm11481_vm4, %v15066_v28, %v8504_v37  ;;  %v6846_v15 = vadd.f32 %v16024_v58, %v16023_v52 }
 0x4ad   : > { %v15147_v22 = vpack.c.b16 %v9084_v34, %v9083_v23  ;;  %v8507_v36 = vshrl.u32 %v8248_v11, 16  ;;  %v8672_v29 = vunpack.c.l.b16 %v8505_v42  ;;  %v8510_v10 = vshll.u32 %v8248_v11, 16  ;;  %v6912_v23 = vld [vmem:[#allocation3 + $0xc0] sm:$0xf] }
 0x4ae   : > { %v7273_v21 = vrot.slane %v7271_v47, 5  ;;  %v7259_v25 = vrot.slane %v7258_v13, 4  ;;  %v15157_v48 = vrot.slane %v8516_v18, 5  ;;  %v8522_v37 = vrot.slane %v8520_v54, 4  ;;  %v11009_v54 = vld [vmem:[#allocation3 + $0x84] sm:$0xff] }
 0x4af   : > { %v7285_v50 = vshll.u32 %v15054_v4, 16  ;;  %v7289_v61 = vshrl.u32 %v15054_v4, 16  ;;  %v8509_v11 = vrot.slane %v8507_v36, 4  ;;  %v8512_v13 = vrot.slane %v8510_v10, 5 }
 0x4b0   : > { %v7440_v7 = vpop.f32.mrf.mxu1  ;;  %v7274_v30 = vsel %vm11481_vm4, %v7269_v56, %v7273_v21  ;;  %v7264_v47 = vsel %vm11481_vm4, %v7259_v25, %v15103_v53  ;;  %v8523_v18 = vor.u32 %v8522_v37, %v15157_v48  ;;  %v7276_v56 = vshrl.u32 %v6912_v23, 16 }
 0x4b1   : > { %v6188_v3 = vpop.f32.mrf.mxu2  ;;  %v15155_v24 = vadd.f32 %v7440_v7, %v6846_v15  ;;  %v7331_v42 = vunpack.c.l.b16 %v7274_v30  ;;  %v7279_v52 = vshll.u32 %v6912_v23, 16  ;;  %v7287_v4 = vrot.slane %v7285_v50, 5 }
 0x4b2   : > { %v6189_v28 = vadd.f32 %v6188_v3, %v14629_v38  ;;  %v8671_v38 = vunpack.c.l.b16 %v8495_v12  ;;  %v7291_v58 = vrot.slane %v7289_v61, 4  ;;  %v15172_v15 = vpop.f32.mrf.mxu0  ;;  %v16025_v3 = vld [vmem:[#allocation51_spill] sm:$0xff]  ;;  %v7330_v36 = vunpack.c.l.b16 %v7264_v47 }
 0x4b3   : > { %v8513_v25 = vor.u32 %v8512_v13, %v8509_v11  ;;  %v8524_v37 = vrot.slane %v8523_v18, 4  ;;  %v7278_v50 = vrot.slane %v7276_v56, 4  ;;  %v7281_v61 = vrot.slane %v7279_v52, 5  ;;  %v16027_v18 = vld [vmem:[#allocation53_spill] sm:$0xff] }
 0x4b4   : > { %v15160_v41 = vadd.f32 %v15090_v14, %v6189_v28  ;;  %v8108_v34 = vpop.f32.mrf.mxu3  ;;  %v8694_v14 = vpack.c.b16 %v8672_v29, %v8671_v38  ;;  %v8526_v29 = vshll.u32 %v14842_v19, 16  ;;  %v7348_v10 = vpack.c.b16 %v7331_v42, %v7330_v36  ;;  %v16028_v56 = vld [vmem:[#allocation49_spill] sm:$0xff] }
 0x4b5   : > { %v7292_v38 = vor.u32 %v7291_v58, %v7287_v4  ;;  %v7295_v47 = vshll.u32 %v15077_v51, 16  ;;  %v7282_v42 = vor.u32 %v7281_v61, %v7278_v50  ;;  %v6848_v52 = vadd.f32 %v16028_v56, %v16027_v18 }
 0x4b6   : > { %10751 = vmatmul.msk.bf16.gmra.mxu2 %vm1356_vm5, %v14441_v59  ;;  %v16026_v59 = vld [vmem:[#allocation46_spill] sm:$0xff]  ;;  %v8528_v23 = vrot.slane %v8526_v29, 5 }
 0x4b7   : > { %v6847_v12 = vadd.f32 %v16026_v59, %v16025_v3  ;;  %v7293_v11 = vrot.slane %v7292_v38, 4 }
 0x4b8   : > { %v7443_v7 = vpop.f32.mrf.mxu1  ;;  %10836 = vmatmul.msk.bf16.gmra.mxu3 %vm1356_vm5, %v11009_v54  ;;  %v8540_v54 = vshll.u32 %v14899_v31, 16  ;;  %v8529_v19 = vsel %vm11481_vm4, %v8524_v37, %v8528_v23  ;;  %v11010_v23 = vld [vmem:[#allocation3 + $0x90] sm:$0xff] }
 0x4b9   : > { %10856 = vmatmul.msk.bf16.gmra.mxu0 %vm1356_vm5, %v8694_v14  ;;  %v7815_v53 = vpop.f32.mrf.mxu2  ;;  %v15180_v21 = vadd.f32 %v7443_v7, %v6847_v12  ;;  %v8251_v14 = vld [vmem:[#allocation3 + $0x9c] sm:$0xf]  ;;  %v7297_v12 = vrot.slane %v7295_v47, 5 }
 0x4ba   : > { %v7895_v28 = vadd.f32 %v7815_v53, %v14677_v62  ;;  %v8514_v62 = vrot.slane %v8513_v25, 4  ;;  %v8531_v53 = vshrl.u32 %v8251_v14, 16  ;;  %v15196_v36 = vpop.f32.mrf.mxu0  ;;  %v8542_v29 = vrot.slane %v8540_v54, 5  ;;  %v16030_v54 = vld [vmem:[#allocation52_spill] sm:$0xff] }
 0x4bb   : > { %v7283_v25 = vrot.slane %v7282_v42, 4  ;;  %v7298_v37 = vsel %vm11481_vm4, %v7293_v11, %v7297_v12 }
 0x4bc   : > { %v15182_v30 = vadd.f32 %v8106_v39, %v7895_v28  ;;  %10721 = vmatmul.msk.bf16.gmra.mxu1 %vm1356_vm5, %v7348_v10  ;;  %v8544_v39 = vshrl.u32 %v14899_v31, 16  ;;  %v8111_v13 = vpop.f32.mrf.mxu3  ;;  %v8519_v51 = vsel %vm11481_vm4, %v8514_v62, %v15157_v48  ;;  %v8674_v28 = vunpack.c.l.b16 %v8529_v19 }
 0x4bd   : > { %v8534_v31 = vshll.u32 %v8251_v14, 16  ;;  %v8673_v50 = vunpack.c.l.b16 %v8519_v51  ;;  %v7288_v48 = vsel %vm11481_vm4, %v7283_v25, %v7287_v4  ;;  %v7333_v38 = vunpack.c.l.b16 %v7298_v37  ;;  %v16031_v25 = vld [vmem:[#allocation60_spill] sm:$0xff]  ;;  %v16032_v37 = vld [vmem:[#allocation58_spill] sm:$0xff] }
 0x4be   : > { %v8533_v47 = vrot.slane %v8531_v53, 4  ;;  %v7332_v11 = vunpack.c.l.b16 %v7288_v48 }
 0x4bf   : > { %v8695_v61 = vpack.c.b16 %v8674_v28, %v8673_v50  ;;  %v8536_v62 = vrot.slane %v8534_v31, 5  ;;  %v8254_v28 = vld [vmem:[#allocation3 + $0xa8] sm:$0xf]  ;;  %v8568_v31 = vshrl.u32 %v15004_v5, 16 }
 0x4c0   : > { %v7445_v3 = vpop.f32.mrf.mxu1 }
 0x4c1   : > { %v7817_v58 = vpop.f32.mrf.mxu2  ;;  %v15198_v7 = vadd.f32 %v7445_v3, %v6848_v52  ;;  %v7349_v52 = vpack.c.b16 %v7333_v38, %v7332_v11  ;;  %v8537_v3 = vor.u32 %v8536_v62, %v8533_v47  ;;  %v8555_v47 = vshrl.u32 %v8254_v28, 16  ;;  %v11011_v11 = vld [vmem:[#allocation3 + $0x9c] sm:$0xff] }
 0x4c2   : > { %v7896_v59 = vadd.f32 %v7817_v58, %v14718_v63  ;;  %v8546_v63 = vrot.slane %v8544_v39, 4  ;;  %v15218_v51 = vpop.f32.mrf.mxu0 }
 0x4c3   : > { %v8538_v53 = vrot.slane %v8537_v3, 4 }
 0x4c4   : > { %v15200_v10 = vadd.f32 %v8108_v34, %v7896_v59  ;;  %v8547_v14 = vor.u32 %v8546_v63, %v8542_v29  ;;  %v16029_v34 = vld [vmem:[#allocation57_spill] sm:$0xff]  ;;  %v8113_v4 = vpop.f32.mrf.mxu3 }
 0x4c5   : > { %v6849_v19 = vadd.f32 %v16030_v54, %v16029_v34  ;;  %v8570_v54 = vrot.slane %v8568_v31, 4 }
 0x4c6   : > { %10752 = vmatmul.msk.bf16.gmra.mxu2 %vm1356_vm5, %v14574_v35  ;;  %v8550_v35 = vshll.u32 %v14935_v32, 16  ;;  %v8548_v59 = vrot.slane %v8547_v14, 4  ;;  %v8564_v32 = vshll.u32 %v15004_v5, 16  ;;  %v8558_v14 = vshll.u32 %v8254_v28, 16  ;;  %v16033_v28 = vld [vmem:[#allocation17_spill] sm:$0xff] }
 0x4c8   : > { %v7448_v39 = vpop.f32.mrf.mxu1  ;;  %10837 = vmatmul.msk.bf16.gmra.mxu3 %vm1356_vm5, %v11010_v23  ;;  %v8552_v12 = vrot.slane %v8550_v35, 5  ;;  %v8566_v34 = vrot.slane %v8564_v32, 5  ;;  %v6851_v35 = vadd.f32 %v14430_v49, %v14460_v46 }
 0x4c9   : > { %10857 = vmatmul.msk.bf16.gmra.mxu0 %vm1356_vm5, %v8695_v61  ;;  %v7820_v42 = vpop.f32.mrf.mxu2  ;;  %v15214_v56 = vadd.f32 %v7448_v39, %v6849_v19  ;;  %v8543_v61 = vsel %vm11481_vm4, %v8538_v53, %v8542_v29  ;;  %v8557_v39 = vrot.slane %v8555_v47, 4  ;;  %v8560_v29 = vrot.slane %v8558_v14, 5 }
 0x4ca   : > { %v7897_v18 = vadd.f32 %v7820_v42, %v14764_v45  ;;  %v8553_v45 = vsel %vm11481_vm4, %v8548_v59, %v8552_v12  ;;  %v8675_v19 = vunpack.c.l.b16 %v8543_v61  ;;  %v15236_v42 = vpop.f32.mrf.mxu0 }
 0x4cb   : > { %v8676_v23 = vunpack.c.l.b16 %v8553_v45  ;;  %v8561_v53 = vor.u32 %v8560_v29, %v8557_v39  ;;  %v16036_v29 = vld [vmem:[#allocation29_spill] sm:$0xff] }
 0x4cc   : > { %v15216_v58 = vadd.f32 %v8111_v13, %v7897_v18  ;;  %10722 = vmatmul.msk.bf16.gmra.mxu1 %vm1356_vm5, %v7349_v52  ;;  %v6850_v13 = vadd.f32 %v16032_v37, %v16031_v25  ;;  %v8116_v5 = vpop.f32.mrf.mxu3  ;;  %v8571_v18 = vor.u32 %v8570_v54, %v8566_v34  ;;  %v8588_v25 = vshll.u32 %v15056_v26, 16 }
 0x4cd   : > { %v8562_v32 = vrot.slane %v8561_v53, 4 }
 0x4ce   : > { %v8572_v45 = vrot.slane %v8571_v18, 4 }
 0x4cf   : > { %v8567_v47 = vsel %vm11481_vm4, %v8562_v32, %v8566_v34  ;;  %v16037_v34 = vld [vmem:[#allocation65_spill] sm:$0xff] }
 0x4d0   : > { %v7450_v50 = vpop.f32.mrf.mxu1  ;;  %v8677_v39 = vunpack.c.l.b16 %v8567_v47  ;;  %v16041_v47 = vld [vmem:[#allocation66_spill] sm:$0xff] }
 0x4d1   : > { %v7822_v63 = vpop.f32.mrf.mxu2  ;;  %v15230_v38 = vadd.f32 %v7450_v50, %v6850_v13  ;;  %v16034_v13 = vld [vmem:[#allocation63_spill] sm:$0xff] }
 0x4d2   : > { %v7898_v48 = vadd.f32 %v7822_v63, %v14814_v8  ;;  %v8696_v8 = vpack.c.b16 %v8676_v23, %v8675_v19  ;;  %v15254_v37 = vpop.f32.mrf.mxu0  ;;  %v16035_v63 = vld [vmem:[#allocation62_spill] sm:$0xff] }
 0x4d3   : > { %v6852_v50 = vadd.f32 %v16035_v63, %v16034_v13  ;;  %v16039_v13 = vld [vmem:[#allocation35_spill] sm:$0xff] }
 0x4d4   : > { %v15232_v62 = vadd.f32 %v8113_v4, %v7898_v48  ;;  %v8118_v46 = vpop.f32.mrf.mxu3 }
 0x4d6   : > { %10753 = vmatmul.msk.bf16.gmra.mxu2 %vm1356_vm5, %v14675_v6  ;;  %v8574_v6 = vshll.u32 %v15034_v17, 16  ;;  %v8592_v17 = vshrl.u32 %v15056_v26, 16  ;;  %v8590_v26 = vrot.slane %v8588_v25, 5 }
 0x4d8   : > { %v7453_v52 = vpop.f32.mrf.mxu1  ;;  %10838 = vmatmul.msk.bf16.gmra.mxu3 %vm1356_vm5, %v11011_v11  ;;  %v8576_v49 = vrot.slane %v8574_v6, 5  ;;  %v8594_v11 = vrot.slane %v8592_v17, 4  ;;  %v16038_v6 = vld [vmem:[#allocation19_spill] sm:$0xff] }
 0x4d9   : > { %10858 = vmatmul.msk.bf16.gmra.mxu0 %vm1356_vm5, %v8696_v8  ;;  %v7825_v4 = vpop.f32.mrf.mxu2  ;;  %v15244_v59 = vadd.f32 %v7453_v52, %v6851_v35  ;;  %v11012_v35 = vld [vmem:[#allocation3 + $0xa8] sm:$0xff]  ;;  %v6853_v53 = vadd.f32 %v16038_v6, %v16037_v34 }
 0x4da   : > { %v7899_v3 = vadd.f32 %v7825_v4, %v14853_v60  ;;  %v8577_v31 = vsel %vm11481_vm4, %v8572_v45, %v8576_v49  ;;  %v8257_v60 = vld [vmem:[#allocation3 + $0xb4] sm:$0xf]  ;;  %v8595_v52 = vor.u32 %v8594_v11, %v8590_v26  ;;  %v15273_v32 = vpop.f32.mrf.mxu0  ;;  %v16042_v11 = vld [vmem:[#allocation24_spill] sm:$0xff] }
 0x4db   : > { %v8678_v54 = vunpack.c.l.b16 %v8577_v31  ;;  %v8582_v8 = vshll.u32 %v8257_v60, 16 }
 0x4dc   : > { %v15246_v12 = vadd.f32 %v8116_v5, %v7899_v3  ;;  %10883 = vmatmul.msk.bf16.vlgmr.msra.gmra.mxu1 %vm1356_vm5, %v16033_v28  ;;  %v8579_v5 = vshrl.u32 %v8257_v60, 16  ;;  %v8121_v3 = vpop.f32.mrf.mxu3  ;;  %v8596_v17 = vrot.slane %v8595_v52, 4 }
 0x4dd   : > { %v8697_v18 = vpack.c.b16 %v8678_v54, %v8677_v39 }
 0x4de   : > { %v8581_v4 = vrot.slane %v8579_v5, 4 }
 0x4e0   : > { %v7455_v61 = vpop.f32.mrf.mxu1 }
 0x4e1   : > { %v7827_v48 = vpop.f32.mrf.mxu2  ;;  %v15261_v14 = vadd.f32 %v7455_v61, %v6852_v50  ;;  %v8612_v61 = vshll.u32 %v15092_v1, 16 }
 0x4e2   : > { %v7900_v23 = vadd.f32 %v7827_v48, %v14907_v57  ;;  %v8584_v57 = vrot.slane %v8582_v8, 5  ;;  %v8260_v48 = vld [vmem:[#allocation3 + $0xc0] sm:$0xf]  ;;  %v15294_v6 = vpop.f32.mrf.mxu0 }
 0x4e3   : > { %v8614_v34 = vrot.slane %v8612_v61, 5 }
 0x4e4   : > { %v15263_v19 = vadd.f32 %v8118_v46, %v7900_v23  ;;  %v8598_v46 = vshll.u32 %v15086_v43, 16  ;;  %v8585_v25 = vor.u32 %v8584_v57, %v8581_v4  ;;  %v8616_v43 = vshrl.u32 %v15092_v1, 16  ;;  %v16040_v23 = vld [vmem:[#allocation23_spill] sm:$0xff] }
 0x4e5   : > { %v6854_v54 = vadd.f32 %v16041_v47, %v16040_v23  ;;  %v8603_v57 = vshrl.u32 %v8260_v48, 16  ;;  %v16046_v23 = vld [vmem:[#allocation39_spill] sm:$0xff] }
 0x4e6   : > { %10754 = vmatmul.msk.bf16.gmra.mxu2 %vm1356_vm5, %v16036_v29  ;;  %v8600_v63 = vrot.slane %v8598_v46, 5  ;;  %v8586_v50 = vrot.slane %v8585_v25, 4  ;;  %v8618_v1 = vrot.slane %v8616_v43, 4 }
 0x4e7   : > { %v8605_v46 = vrot.slane %v8603_v57, 4 }
 0x4e8   : > { %v7458_v28 = vpop.f32.mrf.mxu1  ;;  %10839 = vmatmul.msk.bf16.gmra.mxu3 %vm1356_vm5, %v11012_v35  ;;  %v8591_v29 = vsel %vm11481_vm4, %v8586_v50, %v8590_v26  ;;  %v8619_v25 = vor.u32 %v8618_v1, %v8614_v34  ;;  %v16049_v1 = vld [vmem:[#allocation21_spill] sm:$0xff] }
 0x4e9   : > { %10859 = vmatmul.msk.bf16.gmra.mxu0 %vm1356_vm5, %v8697_v18  ;;  %v7830_v45 = vpop.f32.mrf.mxu2  ;;  %v15275_v31 = vadd.f32 %v7458_v28, %v6853_v53  ;;  %v8123_v18 = vpop.f32.mrf.mxu3  ;;  %v8679_v53 = vunpack.c.l.b16 %v8591_v29 }
 0x4ea   : > { %v7901_v49 = vadd.f32 %v7830_v45, %v14953_v27  ;;  %v8601_v27 = vsel %vm11481_vm4, %v8596_v17, %v8600_v63  ;;  %v16043_v45 = vld [vmem:[#allocation33_spill] sm:$0xff]  ;;  %v16044_v17 = vld [vmem:[#allocation30_spill] sm:$0xff]  ;;  %v8620_v43 = vrot.slane %v8619_v25, 4 }
 0x4eb   : > { %v8680_v4 = vunpack.c.l.b16 %v8601_v27  ;;  %v8622_v27 = vshll.u32 %v15110_v44, 16 }
 0x4ec   : > { %v15277_v60 = vadd.f32 %v8121_v3, %v7901_v49  ;;  %10884 = vmatmul.msk.bf16.gmra.mxu1 %vm1356_vm5, %v16039_v13  ;;  %v8606_v3 = vshll.u32 %v8260_v48, 16  ;;  %v11013_v49 = vld [vmem:[#allocation3 + $0xb4] sm:$0xff] }
 0x4ed   : > { %v8698_v28 = vpack.c.b16 %v8680_v4, %v8679_v53  ;;  %v16045_v13 = vld [vmem:[#allocation36_spill] sm:$0xff]  ;;  %v8624_v47 = vrot.slane %v8622_v27, 5 }
 0x4ee   : > { %v8608_v26 = vrot.slane %v8606_v3, 5  ;;  %v6855_v63 = vadd.f32 %v16045_v13, %v16044_v17  ;;  %v16052_v17 = vld [vmem:[#allocation40_spill] sm:$0xff]  ;;  %v16053_v13 = vld [vmem:[#allocation27_spill] sm:$0xff] }
 0x4f0   : > { %v7460_v8 = vpop.f32.mrf.mxu1  ;;  %v8609_v61 = vor.u32 %v8608_v26, %v8605_v46  ;;  %v16051_v46 = vld [vmem:[#allocation16_spill] sm:$0xff] }
 0x4f1   : > { %v7832_v5 = vpop.f32.mrf.mxu2  ;;  %v15290_v35 = vadd.f32 %v7460_v8, %v6854_v54  ;;  %v15307_v54 = vpop.f32.mrf.mxu0  ;;  %v8625_v8 = vsel %vm11481_vm4, %v8620_v43, %v8624_v47  ;;  %v8263_v43 = vld [vmem:[#allocation3 + $0xcc] sm:$0xf]  ;;  %v15335_v47 = vld [vmem:[#allocation3 + $0xd4] sm:$0x1] }
 0x4f2   : > { %v7902_v39 = vadd.f32 %v7832_v5, %v16042_v11  ;;  %v8610_v5 = vrot.slane %v8609_v61, 4  ;;  %v16047_v11 = vld [vmem:[#allocation31_spill] sm:$0xff]  ;;  %v8682_v57 = vunpack.c.l.b16 %v8625_v8  ;;  %v8630_v8 = vshll.u32 %v8263_v43, 16 }
 0x4f4   : > { %v15292_v52 = vadd.f32 %v8123_v18, %v7902_v39  ;;  %v16048_v39 = vld [vmem:[#allocation26_spill] sm:$0xff]  ;;  %v8615_v44 = vsel %vm11481_vm4, %v8610_v5, %v8614_v34  ;;  %v8627_v5 = vshrl.u32 %v8263_v43, 16 }
 0x4f5   : > { %v6856_v29 = vadd.f32 %v16048_v39, %v16047_v11  ;;  %v8681_v3 = vunpack.c.l.b16 %v8615_v44  ;;  %v11015_v44 = vld [vmem:[#allocation3 + $0xcc] sm:$0xff] }
 0x4f6   : > { %10755 = vmatmul.msk.bf16.gmra.mxu2 %vm1356_vm5, %v16043_v45  ;;  %v11014_v45 = vld [vmem:[#allocation3 + $0xc0] sm:$0xff] }
 0x4f7   : > { %v8699_v53 = vpack.c.b16 %v8682_v57, %v8681_v3  ;;  %v8629_v57 = vrot.slane %v8627_v5, 4  ;;  %v8632_v3 = vrot.slane %v8630_v8, 5  ;;  %v16058_v8 = vld [vmem:[#allocation45_spill] sm:$0xff] }
 0x4f8   : > { %v7463_v50 = vpop.f32.mrf.mxu1  ;;  %10840 = vmatmul.msk.bf16.gmra.mxu3 %vm1356_vm5, %v11013_v49  ;;  %v16050_v49 = vld [vmem:[#allocation28_spill] sm:$0xff] }
 0x4f9   : > { %10860 = vmatmul.msk.bf16.gmra.mxu0 %vm1356_vm5, %v8698_v28  ;;  %v15303_v48 = vadd.f32 %v7463_v50, %v6855_v63  ;;  %v15319_v28 = vpop.f32.mrf.mxu0  ;;  %v6857_v26 = vadd.f32 %v16051_v46, %v16050_v49  ;;  %v16054_v63 = vld [vmem:[#allocation50_spill] sm:$0xff]  ;;  %v8633_v49 = vor.u32 %v8632_v3, %v8629_v57  ;;  %v16060_v3 = vld [vmem:[#allocation68_spill] sm:$0xff] }
 0x4fa   : > { %v6858_v50 = vadd.f32 %v16054_v63, %v16053_v13  ;;  %v16056_v46 = vld [vmem:[#allocation14_spill] sm:$0xff] }
 0x4fc   : > { %10885 = vmatmul.msk.bf16.gmra.mxu1 %vm1356_vm5, %v16046_v23  ;;  %v15333_v23 = vld [vmem:[#allocation3 + $0xd0] sm:$0xf] }
 0x4fd   : > { %v8636_v11 = vshll.u32 %v15333_v23, 16  ;;  %v8640_v39 = vshrl.u32 %v15333_v23, 16 }
 0x500   : > { %v7465_v18 = vpop.f32.mrf.mxu1 }
 0x501   : > { %v15315_v4 = vadd.f32 %v7465_v18, %v6856_v29  ;;  %v8646_v29 = vshll.u32 %v15335_v47, 16  ;;  %v16055_v18 = vld [vmem:[#allocation59_spill] sm:$0xff] }
 0x503   : > { %v8648_v13 = vrot.slane %v8646_v29, 5  ;;  %v16059_v29 = vld [vmem:[#allocation34_spill] sm:$0xff] }
 0x506   : > { %10756 = vmatmul.msk.bf16.gmra.mxu2 %vm1356_vm5, %v16049_v1  ;;  %v8638_v1 = vrot.slane %v8636_v11, 5 }
 0x508   : > { %10841 = vmatmul.msk.bf16.gmra.mxu3 %vm1356_vm5, %v11014_v45  ;;  %v15342_v45 = vpop.f32.mrf.mxu0 }
 0x509   : > { %10861 = vmatmul.msk.bf16.gmra.mxu0 %vm1356_vm5, %v8699_v53  ;;  %v7468_v25 = vpop.f32.mrf.mxu1  ;;  %v8642_v53 = vrot.slane %v8640_v39, 4 }
 0x50a   : > { %v15325_v34 = vadd.f32 %v7468_v25, %v6857_v26  ;;  %v16057_v26 = vld [vmem:[#allocation15_spill] sm:$0xff] }
 0x50b   : > { %v6859_v25 = vadd.f32 %v16057_v26, %v16056_v46  ;;  %v16062_v26 = vld [vmem:[#allocation48_spill] sm:$0xff] }
 0x50c   : > { %10886 = vmatmul.msk.bf16.gmra.mxu1 %vm1356_vm5, %v16052_v17  ;;  %v8643_v17 = vor.u32 %v8642_v53, %v8638_v1  ;;  %v6860_v53 = vadd.f32 %v16060_v3, %v16059_v29  ;;  %v16069_v29 = vld [vmem:[#allocation61_spill] sm:$0xff]  ;;  %v16070_v3 = vld [vmem:[#allocation22_spill] sm:$0xff] }
 0x50e   : > { %v8644_v43 = vrot.slane %v8643_v17, 4 }
 0x510   : > { %v8649_v11 = vsel %vm11481_vm4, %v8644_v43, %v8648_v13  ;;  %v16065_v43 = vld [vmem:[#allocation69_spill] sm:$0xff] }
 0x511   : > { %v7470_v27 = vpop.f32.mrf.mxu1 }
 0x512   : > { %v15331_v61 = vadd.f32 %v7470_v27, %v6858_v50  ;;  %v8634_v50 = vrot.slane %v8633_v49, 4 }
 0x514   : > { %v8639_v5 = vsel %vm11481_vm4, %v8634_v50, %v8638_v1  ;;  %v16061_v1 = vld [vmem:[#allocation32_spill] sm:$0xff]  ;;  %v16064_v50 = vld [vmem:[#allocation18_spill] sm:$0xff] }
 0x515   : > { %v8683_v39 = vunpack.c.l.b16 %v8639_v5  ;;  %v6862_v5 = vadd.f32 %v16065_v43, %v16064_v50 }
 0x516   : > { %10757 = vmatmul.msk.bf16.gmra.mxu2 %vm1356_vm5, %v16055_v18  ;;  %v8684_v18 = vunpack.c.l.b16 %v8649_v11 }
 0x518   : > { %10842 = vmatmul.msk.bf16.gmra.mxu3 %vm1356_vm5, %v11015_v44  ;;  %v8700_v57 = vpack.c.b16 %v8684_v18, %v8683_v39  ;;  %v15357_v44 = vpop.f32.mrf.mxu0  ;;  %v16067_v39 = vld [vmem:[#allocation20_spill] sm:$0xff] }
 0x519   : > { %v7473_v63 = vpop.f32.mrf.mxu1  ;;  %v6863_v18 = vadd.f32 %v15140_v9, %v16067_v39  ;;  %v16073_v39 = vld [vmem:[#allocation64_spill] sm:$0xff] }
 0x51a   : > { %v15347_v27 = vadd.f32 %v7473_v63, %v6859_v25  ;;  %10862 = vmatmul.msk.bf16.gmra.mxu0 %vm1356_vm5, %v8700_v57  ;;  %v6861_v25 = vadd.f32 %v16062_v26, %v16061_v1  ;;  %v16063_v63 = vld [vmem:[#allocation55_spill] sm:$0xff] }
 0x51b   : > { %v9314_v26 = vld [vmem:[#allocation2 + $0xc] sm:$0xf] }
 0x51c   : > { %10887 = vmatmul.msk.bf16.gmra.mxu1 %vm1356_vm5, %v16058_v8 }
 0x521   : > { %v7475_v49 = vpop.f32.mrf.mxu1 }
 0x522   : > { %v15360_v46 = vadd.f32 %v7475_v49, %v6860_v53  ;;  %v6864_v53 = vadd.f32 %v15172_v15, %v16070_v3 }
 0x526   : > { %10758 = vmatmul.msk.bf16.gmra.mxu2 %vm1356_vm5, %v15118_v0 }
 0x529   : > { %v7478_v17 = vpop.f32.mrf.mxu1 }
 0x52a   : > { %v15366_v13 = vadd.f32 %v7478_v17, %v6861_v25  ;;  %v9363_v25 = vshrl.u32 %v9314_v26, 16  ;;  %v9366_v17 = vshll.u32 %v9314_v26, 16  ;;  %v9316_v26 = vld [vmem:[#allocation2 + $0x14] sm:$0x1] }
 0x52c   : > { %10888 = vmatmul.msk.bf16.gmra.mxu1 %vm1356_vm5, %v16063_v63  ;;  %v6865_v63 = vadd.f32 %v15196_v36, %v15126_v20  ;;  %v9365_v43 = vrot.slane %v9363_v25, 4 }
 0x531   : > { %v7480_v8 = vpop.f32.mrf.mxu1 }
 0x532   : > { %v15372_v11 = vadd.f32 %v7480_v8, %v6862_v5  ;;  %v9368_v5 = vrot.slane %v9366_v17, 5  ;;  %v9315_v8 = vld [vmem:[#allocation2 + $0x10] sm:$0xf] }
 0x534   : > { %16066 = vst [vmem:[#allocation54_spill] sm:$0xff] %v15372_v11  ;;  %v9369_v15 = vor.u32 %v9368_v5, %v9365_v43  ;;  %v8844_v43 = vadd.f32 %v15236_v42, %v15182_v30 }
 0x536   : > { %v9370_v20 = vrot.slane %v9369_v15, 4 }
 0x539   : > { %v7483_v57 = vpop.f32.mrf.mxu1 }
 0x53a   : > { %v15376_v0 = vadd.f32 %v7483_v57, %v6863_v18  ;;  %v9376_v18 = vshrl.u32 %v9315_v8, 16  ;;  %v9372_v57 = vshll.u32 %v9315_v8, 16 }
 0x53c   : > { %16068 = vst [vmem:[#allocation44_spill] sm:$0xff] %v15376_v0  ;;  %10889 = vmatmul.msk.bf16.gmra.mxu1 %vm1356_vm5, %v16069_v29  ;;  %v6866_v29 = vadd.f32 %v15218_v51, %v15160_v41  ;;  %v9374_v36 = vrot.slane %v9372_v57, 5  ;;  %v15401_v41 = vld [vmem:[%s15790_s4] ss:$0 sm:$0xff]  ;;  %v9325_v0 = vld [vmem:[#allocation2 + $0x38] sm:$0x1] }
 0x53e   : > { %v9375_v17 = vsel %vm11481_vm4, %v9370_v20, %v9374_v36  ;;  %v16075_v20 = vld [vmem:[#allocation25_spill] sm:$0xff] }
 0x53f   : > { %v9778_v5 = vunpack.c.l.bf16 %v9375_v17  ;;  %v15408_v17 = vpop.f32.mrf.mxu2 }
 0x541   : > { %v7485_v49 = vpop.f32.mrf.mxu1 }
 0x542   : > { %v15382_v1 = vadd.f32 %v7485_v49, %v6864_v53  ;;  %v9378_v53 = vrot.slane %v9376_v18, 4 }
 0x544   : > { %16071 = vst [vmem:[#allocation37_spill] sm:$0xff] %v15382_v1  ;;  %v9379_v25 = vor.u32 %v9378_v53, %v9374_v36 }
 0x546   : > { %v9380_v8 = vrot.slane %v9379_v25, 4 }
 0x549   : > { %v7488_v50 = vpop.f32.mrf.mxu1 }
 0x54a   : > { %v15386_v9 = vadd.f32 %v7488_v50, %v6865_v63  ;;  %v9317_v63 = vld [vmem:[#allocation2 + $0x18] sm:$0xf]  ;;  %v9382_v50 = vshll.u32 %v9316_v26, 16 }
 0x54c   : > { %16072 = vst [vmem:[#allocation47_spill] sm:$0xff] %v15386_v9  ;;  %10890 = vmatmul.msk.bf16.gmra.mxu1 %vm1356_vm5, %v16073_v39  ;;  %v9387_v39 = vshrl.u32 %v9317_v63, 16  ;;  %v9390_v9 = vshll.u32 %v9317_v63, 16  ;;  %v9384_v15 = vrot.slane %v9382_v50, 5 }
 0x54e   : > { %v9389_v57 = vrot.slane %v9387_v39, 4  ;;  %v9385_v42 = vsel %vm11481_vm4, %v9380_v8, %v9384_v15  ;;  %v15419_v15 = vpop.f32.mrf.mxu3 }
 0x54f   : > { %v9779_v39 = vunpack.c.l.bf16 %v9385_v42 }
 0x551   : > { %v7490_v3 = vpop.f32.mrf.mxu1 }
 0x552   : > { %v15392_v49 = vadd.f32 %v7490_v3, %v6866_v29  ;;  %v9392_v29 = vrot.slane %v9390_v9, 5  ;;  %v9318_v3 = vld [vmem:[#allocation2 + $0x1c] sm:$0xf]  ;;  %v8845_v9 = vadd.f32 %v15254_v37, %v15200_v10 }
 0x553   : > { %v9400_v36 = vshrl.u32 %v9318_v3, 16  ;;  %v9396_v63 = vshll.u32 %v9318_v3, 16 }
 0x554   : > { %16074 = vst [vmem:[#allocation42_spill] sm:$0xff] %v15392_v49  ;;  %v9393_v26 = vor.u32 %v9392_v29, %v9389_v57 }
 0x555   : > { %v9398_v49 = vrot.slane %v9396_v63, 5  ;;  %v15427_v63 = vpop.f32.mrf.mxu2 }
 0x559   : > { %v9166_v51 = vpop.f32.mrf.mxu1 }
 0x55a   : > { %v9246_v18 = vadd.f32 %v9166_v51, %v8844_v43  ;;  %v9402_v43 = vrot.slane %v9400_v36, 4 }
 0x55c   : > { %v9282_v53 = vadd.f32 %v15401_v41, %v9246_v18  ;;  %10891 = vmatmul.msk.bf16.gmra.mxu1 %vm1356_vm5, %v16075_v20  ;;  %v9394_v20 = vrot.slane %v9393_v26, 4  ;;  %v9403_v10 = vor.u32 %v9402_v43, %v9398_v49  ;;  %v8846_v26 = vadd.f32 %v15273_v32, %v15216_v58 }
 0x55e   : > { %v9810_v30 = vadd.f32 %v9778_v5, %v9282_v53  ;;  %v9319_v5 = vld [vmem:[#allocation2 + $0x20] sm:$0x1]  ;;  %v9320_v53 = vld [vmem:[#allocation2 + $0x24] sm:$0xf]  ;;  %v9399_v29 = vsel %vm11481_vm4, %v9394_v20, %v9398_v49  ;;  %v9321_v49 = vld [vmem:[#allocation2 + $0x28] sm:$0xf] }
 0x55f   : > { %v9406_v37 = vshll.u32 %v9319_v5, 16  ;;  %v9411_v3 = vshrl.u32 %v9320_v53, 16  ;;  %v9414_v36 = vshll.u32 %v9320_v53, 16  ;;  %v16076_v53 = vld [vmem:[#allocation67_spill] sm:$0xff] }
 0x560   : > { %v9842_v25 = vmax.f32 %v9810_v30, 0.0  ;;  %v15423_v30 = vpop.f32.mrf.mxu0 }
 0x561   : > { %v9168_v50 = vpop.f32.mrf.mxu1  ;;  %v9408_v43 = vrot.slane %v9406_v37, 5  ;;  %v9416_v5 = vrot.slane %v9414_v36, 5  ;;  %v15436_v37 = vpop.f32.mrf.mxu3 }
 0x562   : > { %v9874_v51 = vpack.c.bf16 %v9842_v25, %v9842_v25  ;;  %v9247_v18 = vadd.f32 %v9168_v50, %v8845_v9  ;;  %v9780_v9 = vunpack.c.l.bf16 %v9399_v29  ;;  %v9404_v50 = vrot.slane %v9403_v10, 4 }
 0x563   : > { %v9420_v10 = vshll.u32 %v9321_v49, 16 }
 0x564   : > { %9906 = vst.msk [vmem:[%s15414_s30] sm:$0xf] %vm279_vm0, %v9874_v51  ;;  %v9283_v8 = vadd.f32 %v15401_v41, %v9247_v18  ;;  %v9413_v18 = vrot.slane %v9411_v3, 4  ;;  %v9409_v32 = vsel %vm11481_vm4, %v9404_v50, %v9408_v43  ;;  %v8847_v3 = vadd.f32 %v15294_v6, %v15232_v62  ;;  %v15442_v50 = vpop.f32.mrf.mxu2  ;;  %v9323_v43 = vld [vmem:[#allocation2 + $0x30] sm:$0xf] }
 0x566   : > { %v9811_v57 = vadd.f32 %v9779_v39, %v9283_v8  ;;  %v9424_v8 = vshrl.u32 %v9321_v49, 16 }
 0x568   : > { %v9843_v42 = vmax.f32 %v9811_v57, 0.0  ;;  %v9417_v57 = vor.u32 %v9416_v5, %v9413_v18 }
 0x569   : > { %v9171_v25 = vpop.f32.mrf.mxu1 }
 0x56a   : > { %v9875_v51 = vpack.c.bf16 %v9843_v42, %v9843_v42  ;;  %v9248_v39 = vadd.f32 %v9171_v25, %v8846_v26  ;;  %v9781_v42 = vunpack.c.l.bf16 %v9409_v32  ;;  %v9426_v26 = vrot.slane %v9424_v8, 4  ;;  %v15440_v25 = vpop.f32.mrf.mxu0 }
 0x56b   : > { %v9435_v8 = vshrl.u32 %v9323_v43, 16 }
 0x56c   : > { %9907 = vst.msk [vmem:[%s15414_s30 + $0x4] sm:$0xf] %vm279_vm0, %v9875_v51  ;;  %v9284_v20 = vadd.f32 %v15401_v41, %v9248_v39  ;;  %10892 = vmatmul.msk.bf16.gmra.mxu1 %vm1356_vm5, %v16076_v53  ;;  %v9322_v53 = vld [vmem:[#allocation2 + $0x2c] sm:$0x1] }
 0x56d   : > { %v9430_v49 = vshll.u32 %v9322_v53, 16  ;;  %v9437_v53 = vrot.slane %v9435_v8, 4  ;;  %v8849_v8 = vadd.f32 %v15319_v28, %v15263_v19 }
 0x56e   : > { %v9812_v58 = vadd.f32 %v9780_v9, %v9284_v20  ;;  %v9418_v9 = vrot.slane %v9417_v57, 4  ;;  %v9422_v20 = vrot.slane %v9420_v10, 5  ;;  %v8848_v57 = vadd.f32 %v15307_v54, %v15246_v12  ;;  %v15451_v10 = vpop.f32.mrf.mxu3  ;;  %v15460_v12 = vpop.f32.mrf.mxu2 }
 0x570   : > { %v9844_v29 = vmax.f32 %v9812_v58, 0.0  ;;  %v9427_v5 = vor.u32 %v9426_v26, %v9422_v20  ;;  %v9423_v6 = vsel %vm11481_vm4, %v9418_v9, %v9422_v20  ;;  %v9438_v58 = vshll.u32 %v9323_v43, 16  ;;  %v16077_v20 = vld [vmem:[#allocation43_spill] sm:$0xff] }
 0x571   : > { %v9173_v36 = vpop.f32.mrf.mxu1 }
 0x572   : > { %v9876_v51 = vpack.c.bf16 %v9844_v29, %v9844_v29  ;;  %v9249_v39 = vadd.f32 %v9173_v36, %v8847_v3  ;;  %v9782_v3 = vunpack.c.l.bf16 %v9423_v6  ;;  %v9428_v36 = vrot.slane %v9427_v5, 4  ;;  %v15453_v1 = vpop.f32.mrf.mxu0 }
 0x574   : > { %9908 = vst.msk [vmem:[%s15414_s30 + $0x8] sm:$0xf] %vm279_vm0, %v9876_v51  ;;  %v9285_v18 = vadd.f32 %v15401_v41, %v9249_v39  ;;  %v9432_v51 = vrot.slane %v9430_v49, 5 }
 0x576   : > { %v9813_v62 = vadd.f32 %v9781_v42, %v9285_v18  ;;  %v9440_v42 = vrot.slane %v9438_v58, 5  ;;  %v9324_v18 = vld [vmem:[#allocation2 + $0x34] sm:$0xf]  ;;  %v9433_v5 = vsel %vm11481_vm4, %v9428_v36, %v9432_v51  ;;  %v15466_v11 = vpop.f32.mrf.mxu3 }
 0x577   : > { %v9448_v54 = vshrl.u32 %v9324_v18, 16 }
 0x578   : > { %v9845_v32 = vmax.f32 %v9813_v62, 0.0  ;;  %v9441_v49 = vor.u32 %v9440_v42, %v9437_v53  ;;  %v9444_v62 = vshll.u32 %v9324_v18, 16  ;;  %v9454_v53 = vshll.u32 %v9325_v0, 16 }
 0x579   : > { %v9176_v29 = vpop.f32.mrf.mxu1 }
 0x57a   : > { %v9877_v39 = vpack.c.bf16 %v9845_v32, %v9845_v32  ;;  %v9250_v26 = vadd.f32 %v9176_v29, %v8848_v57  ;;  %v9783_v32 = vunpack.c.l.bf16 %v9433_v5  ;;  %v9450_v57 = vrot.slane %v9448_v54, 4  ;;  %v15471_v42 = vpop.f32.mrf.mxu0  ;;  %v15475_v54 = vpop.f32.mrf.mxu2 }
 0x57b   : > { %v8850_v5 = vadd.f32 %v15342_v45, %v15277_v60 }
 0x57c   : > { %9909 = vst.msk [vmem:[%s15414_s30 + $0xc] sm:$0xf] %vm279_vm0, %v9877_v39  ;;  %v9286_v9 = vadd.f32 %v15401_v41, %v9250_v26  ;;  %10893 = vmatmul.msk.bf16.gmra.mxu1 %vm1356_vm5, %v16077_v20  ;;  %v9442_v26 = vrot.slane %v9441_v49, 4  ;;  %v9446_v20 = vrot.slane %v9444_v62, 5 }
 0x57e   : > { %v9814_v43 = vadd.f32 %v9782_v3, %v9286_v9  ;;  %v9326_v3 = vld [vmem:[#allocation2 + $0x3c] sm:$0xf]  ;;  %v9451_v51 = vor.u32 %v9450_v57, %v9446_v20  ;;  %v9447_v28 = vsel %vm11481_vm4, %v9442_v26, %v9446_v20  ;;  %v16078_v26 = vld [vmem:[#allocation56_spill] sm:$0xff]  ;;  %v15484_v20 = vpop.f32.mrf.mxu3 }
 0x57f   : > { %v9459_v18 = vshrl.u32 %v9326_v3, 16  ;;  %v9462_v9 = vshll.u32 %v9326_v3, 16  ;;  %v9784_v62 = vunpack.c.l.bf16 %v9447_v28 }
 0x580   : > { %v9846_v6 = vmax.f32 %v9814_v43, 0.0 }
 0x581   : > { %v9178_v58 = vpop.f32.mrf.mxu1  ;;  %v9461_v57 = vrot.slane %v9459_v18, 4 }
 0x582   : > { %v9878_v29 = vpack.c.bf16 %v9846_v6, %v9846_v6  ;;  %v9251_v39 = vadd.f32 %v9178_v58, %v8849_v8  ;;  %v9452_v6 = vrot.slane %v9451_v51, 4  ;;  %v9456_v8 = vrot.slane %v9454_v53, 5  ;;  %v16079_v53 = vld [vmem:[#allocation38_spill] sm:$0xff]  ;;  %v15490_v28 = vpop.f32.mrf.mxu0 }
 0x584   : > { %9910 = vst.msk [vmem:[%s15414_s30 + $0x10] sm:$0xf] %vm279_vm0, %v9878_v29  ;;  %v9287_v36 = vadd.f32 %v15401_v41, %v9251_v39  ;;  %v9327_v29 = vld [vmem:[#allocation2 + $0x40] sm:$0xf]  ;;  %v9457_v45 = vsel %vm11481_vm4, %v9452_v6, %v9456_v8 }
 0x585   : > { %v9472_v3 = vshrl.u32 %v9327_v29, 16  ;;  %v9468_v51 = vshll.u32 %v9327_v29, 16 }
 0x586   : > { %v9815_v19 = vadd.f32 %v9783_v32, %v9287_v36  ;;  %v9464_v32 = vrot.slane %v9462_v9, 5  ;;  %v8851_v9 = vadd.f32 %v15357_v44, %v15292_v52 }
 0x587   : > { %v9470_v8 = vrot.slane %v9468_v51, 5 }
 0x588   : > { %v9847_v43 = vmax.f32 %v9815_v19, 0.0  ;;  %v9465_v36 = vor.u32 %v9464_v32, %v9461_v57  ;;  %v7903_v19 = vadd.f32 %v15408_v17, %v16079_v53  ;;  %v9328_v57 = vld [vmem:[#allocation2 + $0x44] sm:$0x1]  ;;  %v9329_v32 = vld [vmem:[#allocation2 + $0x48] sm:$0xf] }
 0x589   : > { %v9181_v49 = vpop.f32.mrf.mxu1 }
 0x58a   : > { %v9879_v0 = vpack.c.bf16 %v9847_v43, %v9847_v43  ;;  %v9252_v58 = vadd.f32 %v9181_v49, %v8850_v5  ;;  %v15494_v43 = vpop.f32.mrf.mxu2  ;;  %v9785_v49 = vunpack.c.l.bf16 %v9457_v45  ;;  %v9466_v6 = vrot.slane %v9465_v36, 4  ;;  %v15502_v45 = vpop.f32.mrf.mxu3  ;;  %v16080_v36 = vld [vmem:[#allocation41_spill] sm:$0xff] }
 0x58b   : > { %v8194_v29 = vadd.f32 %v15419_v15, %v7903_v19  ;;  %v7904_v51 = vadd.f32 %v15427_v63, %v16080_v36 }
 0x58c   : > { %9911 = vst.msk [vmem:[%s15414_s30 + $0x14] sm:$0xf] %vm279_vm0, %v9879_v0  ;;  %v9288_v39 = vadd.f32 %v15401_v41, %v9252_v58  ;;  %10894 = vmatmul.msk.bf16.gmra.mxu1 %vm1356_vm5, %v16078_v26  ;;  %v9478_v26 = vshll.u32 %v9328_v57, 16  ;;  %v9471_v44 = vsel %vm11481_vm4, %v9466_v6, %v9470_v8  ;;  %v9330_v57 = vld [vmem:[#allocation2 + $0x4c] sm:$0xf] }
 0x58d   : > { %v8852_v15 = vadd.f32 %v15423_v30, %v8194_v29  ;;  %v9496_v30 = vshrl.u32 %v9330_v57, 16 }
 0x58e   : > { %v9816_v60 = vadd.f32 %v9784_v62, %v9288_v39  ;;  %v9474_v62 = vrot.slane %v9472_v3, 4  ;;  %v9486_v3 = vshll.u32 %v9329_v32, 16 }
 0x590   : > { %v9848_v18 = vmax.f32 %v9816_v60, 0.0  ;;  %v9475_v39 = vor.u32 %v9474_v62, %v9470_v8  ;;  %v9483_v60 = vshrl.u32 %v9329_v32, 16  ;;  %v15507_v62 = vpop.f32.mrf.mxu0  ;;  %v9488_v6 = vrot.slane %v9486_v3, 5 }
 0x591   : > { %v9183_v5 = vpop.f32.mrf.mxu1  ;;  %v8195_v32 = vadd.f32 %v15436_v37, %v7904_v51  ;;  %v9498_v51 = vrot.slane %v9496_v30, 4 }
 0x592   : > { %v9880_v0 = vpack.c.bf16 %v9848_v18, %v9848_v18  ;;  %v9253_v58 = vadd.f32 %v9183_v5, %v8851_v9  ;;  %v9786_v18 = vunpack.c.l.bf16 %v9471_v44  ;;  %v9476_v9 = vrot.slane %v9475_v39, 4  ;;  %v15509_v8 = vpop.f32.mrf.mxu2 }
 0x593   : > { %v9480_v5 = vrot.slane %v9478_v26, 5  ;;  %v9492_v26 = vshll.u32 %v9330_v57, 16  ;;  %v8853_v37 = vadd.f32 %v15440_v25, %v8195_v32 }
 0x594   : > { %9912 = vst.msk [vmem:[%s15414_s30 + $0x18] sm:$0xf] %vm279_vm0, %v9880_v0  ;;  %v9289_v17 = vadd.f32 %v15401_v41, %v9253_v58  ;;  %v9485_v58 = vrot.slane %v9483_v60, 4  ;;  %v15522_v60 = vpop.f32.mrf.mxu3 }
 0x596   : > { %v9817_v52 = vadd.f32 %v9785_v49, %v9289_v17  ;;  %v9481_v17 = vsel %vm11481_vm4, %v9476_v9, %v9480_v5  ;;  %v9489_v39 = vor.u32 %v9488_v6, %v9485_v58  ;;  %v9332_v9 = vld [vmem:[#allocation2 + $0x54] sm:$0xf] }
 0x597   : > { %v9787_v36 = vunpack.c.l.bf16 %v9481_v17  ;;  %v9507_v57 = vshrl.u32 %v9332_v9, 16  ;;  %v9510_v32 = vshll.u32 %v9332_v9, 16 }
 0x598   : > { %v9849_v53 = vmax.f32 %v9817_v52, 0.0  ;;  %v7905_v52 = vadd.f32 %v15442_v50, %v15120_v33 }
 0x599   : > { %v9186_v19 = vpop.f32.mrf.mxu1 }
 0x59a   : > { %v9881_v49 = vpack.c.bf16 %v9849_v53, %v9849_v53  ;;  %v9254_v0 = vadd.f32 %v9186_v19, %v8852_v15  ;;  %v9490_v15 = vrot.slane %v9489_v39, 4  ;;  %v9494_v19 = vrot.slane %v9492_v26, 5  ;;  %v15530_v25 = vpop.f32.mrf.mxu2 }
 0x59b   : > { %v8196_v5 = vadd.f32 %v15451_v10, %v7905_v52  ;;  %v7906_v10 = vadd.f32 %v15460_v12, %v15155_v24 }
 0x59c   : > { %9913 = vst.msk [vmem:[%s15414_s30 + $0x1c] sm:$0xf] %vm279_vm0, %v9881_v49  ;;  %v9290_v63 = vadd.f32 %v15401_v41, %v9254_v0  ;;  %10895 = vmatmul.msk.bf16.gmra.mxu1 %vm1356_vm5, %v15101_v40  ;;  %v15525_v49 = vpop.f32.mrf.mxu0  ;;  %v9499_v50 = vor.u32 %v9498_v51, %v9494_v19  ;;  %v9495_v6 = vsel %vm11481_vm4, %v9490_v15, %v9494_v19  ;;  %v9333_v51 = vld [vmem:[#allocation2 + $0x58] sm:$0xf] }
 0x59d   : > { %v8854_v30 = vadd.f32 %v15453_v1, %v8196_v5  ;;  %v9788_v17 = vunpack.c.l.bf16 %v9495_v6  ;;  %v9520_v1 = vshrl.u32 %v9333_v51, 16 }
 0x59e   : > { %v9818_v29 = vadd.f32 %v9786_v18, %v9290_v63  ;;  %v9331_v18 = vld [vmem:[#allocation2 + $0x50] sm:$0x1]  ;;  %v9500_v39 = vrot.slane %v9499_v50, 4 }
 0x59f   : > { %v9502_v0 = vshll.u32 %v9331_v18, 16  ;;  %v9516_v18 = vshll.u32 %v9333_v51, 16 }
 0x5a0   : > { %v9850_v44 = vmax.f32 %v9818_v29, 0.0 }
 0x5a1   : > { %v9188_v3 = vpop.f32.mrf.mxu1  ;;  %v9504_v26 = vrot.slane %v9502_v0, 5  ;;  %v9522_v0 = vrot.slane %v9520_v1, 4 }
 0x5a2   : > { %v9882_v40 = vpack.c.bf16 %v9850_v44, %v9850_v44  ;;  %v9255_v53 = vadd.f32 %v9188_v3, %v8853_v37  ;;  %v9509_v37 = vrot.slane %v9507_v57, 4  ;;  %v9512_v3 = vrot.slane %v9510_v32, 5  ;;  %v15549_v9 = vpop.f32.mrf.mxu2 }
 0x5a3   : > { %v9505_v15 = vsel %vm11481_vm4, %v9500_v39, %v9504_v26  ;;  %v9518_v32 = vrot.slane %v9516_v18, 5 }
 0x5a4   : > { %9914 = vst.msk [vmem:[%s15414_s30 + $0x20] sm:$0xf] %vm279_vm0, %v9882_v40  ;;  %v9291_v33 = vadd.f32 %v15401_v41, %v9255_v53  ;;  %v8197_v40 = vadd.f32 %v15466_v11, %v7906_v10  ;;  %v15545_v12 = vpop.f32.mrf.mxu0  ;;  %v9513_v19 = vor.u32 %v9512_v3, %v9509_v37  ;;  %v7907_v11 = vadd.f32 %v15475_v54, %v15180_v21  ;;  %v9334_v10 = vld [vmem:[#allocation2 + $0x5c] sm:$0x1] }
 0x5a5   : > { %v9523_v21 = vor.u32 %v9522_v0, %v9518_v32  ;;  %v9526_v54 = vshll.u32 %v9334_v10, 16 }
 0x5a6   : > { %v9819_v58 = vadd.f32 %v9787_v36, %v9291_v33  ;;  %v15537_v36 = vpop.f32.mrf.mxu3  ;;  %v8855_v33 = vadd.f32 %v15471_v42, %v8197_v40  ;;  %v9514_v57 = vrot.slane %v9513_v19, 4 }
 0x5a7   : > { %v9524_v1 = vrot.slane %v9523_v21, 4 }
 0x5a8   : > { %v9851_v63 = vmax.f32 %v9819_v58, 0.0  ;;  %v9519_v39 = vsel %vm11481_vm4, %v9514_v57, %v9518_v32 }
 0x5a9   : > { %v9191_v29 = vpop.f32.mrf.mxu1 }
 0x5aa   : > { %v9883_v52 = vpack.c.bf16 %v9851_v63, %v9851_v63  ;;  %v9256_v44 = vadd.f32 %v9191_v29, %v8854_v30  ;;  %v9335_v63 = vld [vmem:[#allocation2 + $0x60] sm:$0xf]  ;;  %v8198_v30 = vadd.f32 %v15484_v20, %v7907_v11  ;;  %v15567_v51 = vpop.f32.mrf.mxu2 }
 0x5ab   : > { %v9531_v26 = vshrl.u32 %v9335_v63, 16 }
 0x5ac   : > { %9915 = vst.msk [vmem:[%s15414_s30 + $0x24] sm:$0xf] %vm279_vm0, %v9883_v52  ;;  %v9292_v24 = vadd.f32 %v15401_v41, %v9256_v44  ;;  %10896 = vmatmul.msk.bf16.gmra.mxu1 %vm1356_vm5, %v15129_v2  ;;  %v9789_v2 = vunpack.c.l.bf16 %v9505_v15  ;;  %v9534_v52 = vshll.u32 %v9335_v63, 16  ;;  %v7908_v44 = vadd.f32 %v15494_v43, %v15198_v7  ;;  %v15564_v37 = vpop.f32.mrf.mxu0  ;;  %v9336_v7 = vld [vmem:[#allocation2 + $0x64] sm:$0xf] }
 0x5ad   : > { %v8856_v3 = vadd.f32 %v15490_v28, %v8198_v30  ;;  %v9047_v15 = vrot.slane %v15333_v23, 5  ;;  %v9533_v11 = vrot.slane %v9531_v26, 4  ;;  %v9050_v23 = vrot.slane %v15335_v47, 5 }
 0x5ae   : > { %v9820_v53 = vadd.f32 %v9788_v17, %v9292_v24  ;;  %v15558_v17 = vpop.f32.mrf.mxu3  ;;  %v9790_v24 = vunpack.c.l.bf16 %v9519_v39  ;;  %v8199_v43 = vadd.f32 %v15502_v45, %v7908_v44  ;;  %v9540_v32 = vshll.u32 %v9336_v7, 16 }
 0x5af   : > { %v9049_v0 = vrot.slane %v9047_v15, 4  ;;  %v7909_v45 = vadd.f32 %v15509_v8, %v15214_v56  ;;  %v9337_v56 = vld [vmem:[#allocation2 + $0x68] sm:$0x1] }
 0x5b0   : > { %v9852_v5 = vmax.f32 %v9820_v53, 0.0  ;;  %v9528_v53 = vrot.slane %v9526_v54, 5  ;;  %v9542_v44 = vrot.slane %v9540_v32, 5 }
 0x5b1   : > { %v9193_v50 = vpop.f32.mrf.mxu1  ;;  %v9051_v21 = vsel %vm12057_vm14, %v9049_v0, %v9050_v23 }
 0x5b2   : > { %v9884_v58 = vpack.c.bf16 %v9852_v5, %v9852_v5  ;;  %v9257_v6 = vadd.f32 %v9193_v50, %v8855_v33  ;;  %v9536_v5 = vrot.slane %v9534_v52, 5  ;;  %v8891_v33 = vld [vmem:[#allocation3 + $0xcc] sm:$0xe]  ;;  %v9544_v50 = vshrl.u32 %v9336_v7, 16  ;;  %v15590_v8 = vpop.f32.mrf.mxu2 }
 0x5b3   : > { %v9086_v55 = vunpack.c.l.b16 %v9051_v21 }
 0x5b4   : > { %9916 = vst.msk [vmem:[%s15414_s30 + $0x28] sm:$0xf] %vm279_vm0, %v9884_v58  ;;  %v9293_v29 = vadd.f32 %v15401_v41, %v9257_v6  ;;  %v9529_v6 = vsel %vm11481_vm4, %v9524_v1, %v9528_v53  ;;  %v9537_v57 = vor.u32 %v9536_v5, %v9533_v11  ;;  %v9546_v54 = vrot.slane %v9544_v50, 4 }
 0x5b5   : > { %v9550_v1 = vshll.u32 %v9337_v56, 16  ;;  %v7910_v11 = vadd.f32 %v15530_v25, %v15230_v38 }
 0x5b6   : > { %v9821_v42 = vadd.f32 %v9789_v2, %v9293_v29  ;;  %v10878_v2 = vrot.slane %v8891_v33, 9  ;;  %v15579_v10 = vpop.f32.mrf.mxu3  ;;  %v9791_v29 = vunpack.c.l.bf16 %v9529_v6  ;;  %v9538_v52 = vrot.slane %v9537_v57, 4  ;;  %v9339_v57 = vld [vmem:[#allocation2 + $0x70] sm:$0xf] }
 0x5b7   : > { %v8201_v32 = vadd.f32 %v15537_v36, %v7910_v11  ;;  %v9568_v25 = vshrl.u32 %v9339_v57, 16  ;;  %v7911_v36 = vadd.f32 %v15549_v9, %v15244_v59 }
 0x5b8   : > { %v9853_v20 = vmax.f32 %v9821_v42, 0.0  ;;  %v9048_v47 = vsel %vm12057_vm14, %v10878_v2, %v9047_v15  ;;  %v15588_v42 = vpop.f32.mrf.mxu0  ;;  %v9543_v15 = vsel %vm11481_vm4, %v9538_v52, %v9542_v44  ;;  %v9552_v2 = vrot.slane %v9550_v1, 5 }
 0x5b9   : > { %v9196_v40 = vpop.f32.mrf.mxu1  ;;  %v8859_v21 = vadd.f32 %v15545_v12, %v8201_v32 }
 0x5ba   : > { %v9885_v19 = vpack.c.bf16 %v9853_v20, %v9853_v20  ;;  %v9258_v18 = vadd.f32 %v9196_v40, %v8856_v3  ;;  %v9338_v20 = vld [vmem:[#allocation2 + $0x6c] sm:$0xf]  ;;  %v9085_v40 = vunpack.c.l.b16 %v9048_v47 }
 0x5bc   : > { %9917 = vst.msk [vmem:[%s15414_s30 + $0x2c] sm:$0xf] %vm279_vm0, %v9885_v19  ;;  %v9294_v28 = vadd.f32 %v15401_v41, %v9258_v18  ;;  %10897 = vmatmul.msk.bf16.gmra.mxu1 %vm1356_vm5, %v15147_v22  ;;  %v8857_v22 = vadd.f32 %v15507_v62, %v8199_v43  ;;  %v8200_v62 = vadd.f32 %v15522_v60, %v7909_v45  ;;  %v9555_v19 = vshrl.u32 %v9338_v20, 16 }
 0x5bd   : > { %v9558_v18 = vshll.u32 %v9338_v20, 16  ;;  %v9102_v33 = vpack.c.b16 %v9086_v55, %v9085_v40  ;;  %v9341_v40 = vld [vmem:[#allocation2 + $0x78] sm:$0xf]  ;;  %v8202_v55 = vadd.f32 %v15558_v17, %v7911_v36  ;;  %v7912_v17 = vadd.f32 %v15567_v51, %v15261_v14 }
 0x5be   : > { %v9822_v58 = vadd.f32 %v9790_v24, %v9294_v28  ;;  %v9547_v24 = vor.u32 %v9546_v54, %v9542_v44  ;;  %v8858_v60 = vadd.f32 %v15525_v49, %v8200_v62  ;;  %v15601_v7 = vpop.f32.mrf.mxu3  ;;  %v9792_v28 = vunpack.c.l.bf16 %v9543_v15  ;;  %v15610_v49 = vpop.f32.mrf.mxu2  ;;  %v9340_v62 = vld [vmem:[#allocation2 + $0x74] sm:$0x1] }
 0x5bf   : > { %v9560_v6 = vrot.slane %v9558_v18, 5  ;;  %v9579_v15 = vshrl.u32 %v9341_v40, 16 }
 0x5c0   : > { %v9854_v63 = vmax.f32 %v9822_v58, 0.0  ;;  %v9548_v50 = vrot.slane %v9547_v24, 4  ;;  %v9557_v58 = vrot.slane %v9555_v19, 4  ;;  %v15604_v45 = vpop.f32.mrf.mxu0  ;;  %v9574_v24 = vshll.u32 %v9340_v62, 16 }
 0x5c1   : > { %v9198_v30 = vpop.f32.mrf.mxu1  ;;  %v9582_v19 = vshll.u32 %v9341_v40, 16 }
 0x5c2   : > { %v9886_v39 = vpack.c.bf16 %v9854_v63, %v9854_v63  ;;  %v9259_v26 = vadd.f32 %v9198_v30, %v8857_v22  ;;  %v9553_v22 = vsel %vm11481_vm4, %v9548_v50, %v9552_v2  ;;  %v9561_v30 = vor.u32 %v9560_v6, %v9557_v58  ;;  %v9342_v58 = vld [vmem:[#allocation2 + $0x7c] sm:$0xf] }
 0x5c3   : > { %v8203_v6 = vadd.f32 %v15579_v10, %v7912_v17  ;;  %v9592_v14 = vshrl.u32 %v9342_v58, 16 }
 0x5c4   : > { %9918 = vst.msk [vmem:[%s15414_s30 + $0x30] sm:$0xf] %vm279_vm0, %v9886_v39  ;;  %v9295_v3 = vadd.f32 %v15401_v41, %v9259_v26  ;;  %v9793_v39 = vunpack.c.l.bf16 %v9553_v22  ;;  %v9570_v26 = vrot.slane %v9568_v25, 4  ;;  %v9562_v56 = vrot.slane %v9561_v30, 4 }
 0x5c5   : > { %v9588_v25 = vshll.u32 %v9342_v58, 16  ;;  %v7913_v22 = vadd.f32 %v15590_v8, %v15275_v31  ;;  %v8861_v30 = vadd.f32 %v15588_v42, %v8203_v6 }
 0x5c6   : > { %v9823_v53 = vadd.f32 %v9791_v29, %v9295_v3  ;;  %v9564_v29 = vshll.u32 %v9339_v57, 16  ;;  %v15617_v3 = vpop.f32.mrf.mxu3  ;;  %v15627_v18 = vpop.f32.mrf.mxu2 }
 0x5c7   : > { %v7915_v6 = vadd.f32 %v15627_v18, %v15303_v48 }
 0x5c8   : > { %v9855_v5 = vmax.f32 %v9823_v53, 0.0  ;;  %v9566_v20 = vrot.slane %v9564_v29, 5  ;;  %v15623_v12 = vpop.f32.mrf.mxu0 }
 0x5c9   : > { %v9201_v43 = vpop.f32.mrf.mxu1 }
 0x5ca   : > { %v9887_v0 = vpack.c.bf16 %v9855_v5, %v9855_v5  ;;  %v9260_v23 = vadd.f32 %v9201_v43, %v8858_v60  ;;  %v9571_v9 = vor.u32 %v9570_v26, %v9566_v20  ;;  %v9567_v53 = vsel %vm11481_vm4, %v9562_v56, %v9566_v20  ;;  %v9344_v56 = vld [vmem:[#allocation2 + $0x84] sm:$0xf] }
 0x5cb   : > { %v8860_v5 = vadd.f32 %v15564_v37, %v8202_v55  ;;  %v8204_v20 = vadd.f32 %v15601_v7, %v7913_v22  ;;  %v9603_v55 = vshrl.u32 %v9344_v56, 16 }
 0x5cc   : > { %9919 = vst.msk [vmem:[%s15414_s30 + $0x34] sm:$0xf] %vm279_vm0, %v9887_v0  ;;  %v9296_v38 = vadd.f32 %v15401_v41, %v9260_v23  ;;  %10898 = vmatmul.msk.bf16.gmra.mxu1 %vm1356_vm5, %v9102_v33  ;;  %v9794_v33 = vunpack.c.l.bf16 %v9567_v53  ;;  %v9572_v43 = vrot.slane %v9571_v9, 4  ;;  %v9581_v0 = vrot.slane %v9579_v15, 4 }
 0x5cd   : > { %v9584_v23 = vrot.slane %v9582_v19, 5  ;;  %v8862_v7 = vadd.f32 %v15604_v45, %v8204_v20 }
 0x5ce   : > { %v9824_v63 = vadd.f32 %v9792_v28, %v9296_v38  ;;  %v9576_v28 = vrot.slane %v9574_v24, 5  ;;  %v15636_v32 = vpop.f32.mrf.mxu3  ;;  %v15645_v29 = vpop.f32.mrf.mxu2  ;;  %v7914_v24 = vadd.f32 %v15610_v49, %v15290_v35 }
 0x5cf   : > { %v9585_v38 = vor.u32 %v9584_v23, %v9581_v0  ;;  %v7916_v20 = vadd.f32 %v15645_v29, %v15315_v4 }
 0x5d0   : > { %v9856_v47 = vmax.f32 %v9824_v63, 0.0  ;;  %v9577_v37 = vsel %vm11481_vm4, %v9572_v43, %v9576_v28  ;;  %v15640_v63 = vpop.f32.mrf.mxu0 }
 0x5d1   : > { %v9203_v54 = vpop.f32.mrf.mxu1  ;;  %v9586_v26 = vrot.slane %v9585_v38, 4 }
 0x5d2   : > { %v9888_v52 = vpack.c.bf16 %v9856_v47, %v9856_v47  ;;  %v9261_v44 = vadd.f32 %v9203_v54, %v8859_v21  ;;  %v9795_v47 = vunpack.c.l.bf16 %v9577_v37  ;;  %v9594_v21 = vrot.slane %v9592_v14, 4 }
 0x5d4   : > { %9920 = vst.msk [vmem:[%s15414_s30 + $0x38] sm:$0xf] %vm279_vm0, %v9888_v52  ;;  %v9297_v59 = vadd.f32 %v15401_v41, %v9261_v44  ;;  %v9590_v52 = vrot.slane %v9588_v25, 5  ;;  %v9343_v44 = vld [vmem:[#allocation2 + $0x80] sm:$0x1] }
 0x5d5   : > { %v9598_v62 = vshll.u32 %v9343_v44, 16 }
 0x5d6   : > { %v9825_v1 = vadd.f32 %v9793_v39, %v9297_v59  ;;  %v9595_v8 = vor.u32 %v9594_v21, %v9590_v52  ;;  %v9591_v40 = vsel %vm11481_vm4, %v9586_v26, %v9590_v52  ;;  %v9606_v59 = vshll.u32 %v9344_v56, 16  ;;  %v8158_v9 = vpop.f32.mrf.mxu3  ;;  %v7870_v28 = vpop.f32.mrf.mxu2 }
 0x5d7   : > { %v9796_v15 = vunpack.c.l.bf16 %v9591_v40  ;;  %v9600_v17 = vrot.slane %v9598_v62, 5 }
 0x5d8   : > { %v9857_v11 = vmax.f32 %v9825_v1, 0.0  ;;  %v9596_v19 = vrot.slane %v9595_v8, 4  ;;  %v9608_v43 = vrot.slane %v9606_v59, 5 }
 0x5d9   : > { %v9206_v60 = vpop.f32.mrf.mxu1 }
 0x5da   : > { %v9889_v50 = vpack.c.bf16 %v9857_v11, %v9857_v11  ;;  %v9262_v2 = vadd.f32 %v9206_v60, %v8860_v5  ;;  %v15656_v11 = vpop.f32.mrf.mxu0  ;;  %v9601_v0 = vsel %vm11481_vm4, %v9596_v19, %v9600_v17 }
 0x5db   : > { %v9797_v37 = vunpack.c.l.bf16 %v9601_v0 }
 0x5dc   : > { %9921 = vst.msk [vmem:[%s15414_s30 + $0x3c] sm:$0xf] %vm279_vm0, %v9889_v50  ;;  %v9298_v57 = vadd.f32 %v15401_v41, %v9262_v2  ;;  %v9345_v50 = vld [vmem:[#allocation2 + $0x88] sm:$0xf]  ;;  %v8205_v2 = vadd.f32 %v15617_v3, %v7914_v24 }
 0x5dd   : > { %v9616_v49 = vshrl.u32 %v9345_v50, 16  ;;  %v9612_v58 = vshll.u32 %v9345_v50, 16 }
 0x5de   : > { %v9826_v51 = vadd.f32 %v9794_v33, %v9298_v57  ;;  %v9605_v33 = vrot.slane %v9603_v55, 4  ;;  %v8863_v14 = vadd.f32 %v15623_v12, %v8205_v2  ;;  %v7872_v18 = vpop.f32.mrf.mxu2 }
 0x5df   : > { %v9618_v38 = vrot.slane %v9616_v49, 4 }
 0x5e0   : > { %v9858_v10 = vmax.f32 %v9826_v51, 0.0  ;;  %v9609_v23 = vor.u32 %v9608_v43, %v9605_v33  ;;  %v8161_v51 = vpop.f32.mrf.mxu3  ;;  %v7917_v43 = vadd.f32 %v7870_v28, %v15325_v34 }
 0x5e1   : > { %v9208_v36 = vpop.f32.mrf.mxu1 }
 0x5e2   : > { %v9890_v54 = vpack.c.bf16 %v9858_v10, %v9858_v10  ;;  %v9263_v39 = vadd.f32 %v9208_v36, %v8861_v30  ;;  %v9610_v10 = vrot.slane %v9609_v23, 4  ;;  %v9614_v30 = vrot.slane %v9612_v58, 5  ;;  %v9346_v36 = vld [vmem:[#allocation2 + $0x8c] sm:$0x1]  ;;  %v8819_v21 = vpop.f32.mrf.mxu0 }
 0x5e3   : > { %v9622_v12 = vshll.u32 %v9346_v36, 16 }
 0x5e4   : > { %9922 = vst.msk [vmem:[%s15414_s30 + $0x40] sm:$0xf] %vm279_vm0, %v9890_v54  ;;  %v9299_v31 = vadd.f32 %v15401_v41, %v9263_v39  ;;  %v8206_v54 = vadd.f32 %v15636_v32, %v7915_v6  ;;  %v9619_v39 = vor.u32 %v9618_v38, %v9614_v30  ;;  %v9615_v52 = vsel %vm11481_vm4, %v9610_v10, %v9614_v30  ;;  %v9349_v6 = vld [vmem:[#allocation2 + $0x98] sm:$0x1] }
 0x5e5   : > { %v9798_v62 = vunpack.c.l.bf16 %v9615_v52  ;;  %v9624_v40 = vrot.slane %v9622_v12, 5  ;;  %v9646_v34 = vshll.u32 %v9349_v6, 16  ;;  %v7918_v30 = vadd.f32 %v7872_v18, %v15331_v61 }
 0x5e6   : > { %v9827_v42 = vadd.f32 %v9795_v47, %v9299_v31  ;;  %v9347_v47 = vld [vmem:[#allocation2 + $0x90] sm:$0xf]  ;;  %v8864_v32 = vadd.f32 %v15640_v63, %v8206_v54  ;;  %v7875_v33 = vpop.f32.mrf.mxu2 }
 0x5e7   : > { %v9627_v44 = vshrl.u32 %v9347_v47, 16  ;;  %v9630_v56 = vshll.u32 %v9347_v47, 16 }
 0x5e8   : > { %v9859_v1 = vmax.f32 %v9827_v42, 0.0  ;;  %v9620_v42 = vrot.slane %v9619_v39, 4 }
 0x5e9   : > { %v9211_v53 = vpop.f32.mrf.mxu1  ;;  %v9629_v24 = vrot.slane %v9627_v44, 4 }
 0x5ea   : > { %v9891_v5 = vpack.c.bf16 %v9859_v1, %v9859_v1  ;;  %v9264_v60 = vadd.f32 %v9211_v53, %v8862_v7  ;;  %v9632_v1 = vrot.slane %v9630_v56, 5  ;;  %v8163_v7 = vpop.f32.mrf.mxu3  ;;  %v9348_v53 = vld [vmem:[#allocation2 + $0x94] sm:$0xf]  ;;  %v8821_v4 = vpop.f32.mrf.mxu0  ;;  %v9625_v63 = vsel %vm11481_vm4, %v9620_v42, %v9624_v40  ;;  %v9351_v56 = vld [vmem:[#allocation2 + $0xa0] sm:$0xf] }
 0x5eb   : > { %v9640_v17 = vshrl.u32 %v9348_v53, 16  ;;  %v7919_v40 = vadd.f32 %v7875_v33, %v15347_v27 }
 0x5ec   : > { %9923 = vst.msk [vmem:[%s15414_s30 + $0x44] sm:$0xf] %vm279_vm0, %v9891_v5  ;;  %v9300_v35 = vadd.f32 %v15401_v41, %v9264_v60  ;;  %v9633_v5 = vor.u32 %v9632_v1, %v9629_v24  ;;  %v9636_v60 = vshll.u32 %v9348_v53, 16 }
 0x5ed   : > { %v9642_v49 = vrot.slane %v9640_v17, 4 }
 0x5ee   : > { %v9828_v45 = vadd.f32 %v9796_v15, %v9300_v35  ;;  %v8207_v15 = vadd.f32 %v8158_v9, %v7916_v20  ;;  %v9799_v35 = vunpack.c.l.bf16 %v9625_v63  ;;  %v9634_v23 = vrot.slane %v9633_v5, 4  ;;  %v9352_v63 = vld [vmem:[#allocation2 + $0xa4] sm:$0x1] }
 0x5ef   : > { %v9638_v58 = vrot.slane %v9636_v60, 5  ;;  %v8209_v20 = vadd.f32 %v8163_v7, %v7918_v30  ;;  %v9353_v60 = vld [vmem:[#allocation2 + $0xa8] sm:$0xf]  ;;  %v9670_v27 = vshll.u32 %v9352_v63, 16 }
 0x5f0   : > { %v9860_v57 = vmax.f32 %v9828_v45, 0.0  ;;  %v8865_v2 = vadd.f32 %v15656_v11, %v8207_v15 }
 0x5f1   : > { %v9213_v3 = vpop.f32.mrf.mxu1  ;;  %v9643_v38 = vor.u32 %v9642_v49, %v9638_v58  ;;  %v9639_v11 = vsel %vm11481_vm4, %v9634_v23, %v9638_v58 }
 0x5f2   : > { %v9892_v25 = vpack.c.bf16 %v9860_v57, %v9860_v57  ;;  %v9265_v22 = vadd.f32 %v9213_v3, %v8863_v14  ;;  %v9350_v57 = vld [vmem:[#allocation2 + $0x9c] sm:$0xf]  ;;  %v8208_v14 = vadd.f32 %v8161_v51, %v7917_v43  ;;  %v8824_v10 = vpop.f32.mrf.mxu0  ;;  %v7877_v51 = vpop.f32.mrf.mxu2 }
 0x5f3   : > { %v9644_v39 = vrot.slane %v9643_v38, 4  ;;  %v7920_v49 = vadd.f32 %v7877_v51, %v15360_v46 }
 0x5f4   : > { %9924 = vst.msk [vmem:[%s15414_s30 + $0x48] sm:$0xf] %vm279_vm0, %v9892_v25  ;;  %v9301_v48 = vadd.f32 %v15401_v41, %v9265_v22  ;;  %v9651_v25 = vshrl.u32 %v9350_v57, 16  ;;  %v9654_v22 = vshll.u32 %v9350_v57, 16  ;;  %v8866_v47 = vadd.f32 %v8819_v21, %v8208_v14 }
 0x5f5   : > { %v9664_v21 = vshrl.u32 %v9351_v56, 16  ;;  %v9672_v14 = vrot.slane %v9670_v27, 5  ;;  %v9357_v27 = vld [vmem:[#allocation2 + $0xb8] sm:$0xf] }
 0x5f6   : > { %v9829_v26 = vadd.f32 %v9797_v37, %v9301_v48  ;;  %v8166_v37 = vpop.f32.mrf.mxu3  ;;  %v9800_v48 = vunpack.c.l.bf16 %v9639_v11  ;;  %v9653_v52 = vrot.slane %v9651_v25, 4  ;;  %v9656_v44 = vrot.slane %v9654_v22, 5 }
 0x5f7   : > { %v9666_v7 = vrot.slane %v9664_v21, 4  ;;  %v8210_v43 = vadd.f32 %v8166_v37, %v7919_v40 }
 0x5f8   : > { %v9861_v31 = vmax.f32 %v9829_v26, 0.0 }
 0x5f9   : > { %v9216_v8 = vpop.f32.mrf.mxu1 }
 0x5fa   : > { %v9893_v55 = vpack.c.bf16 %v9861_v31, %v9861_v31  ;;  %v9266_v59 = vadd.f32 %v9216_v8, %v8864_v32  ;;  %v15694_v31 = vld [vmem:[%s15790_s4] ss:$0 sm:$0xff]  ;;  %v9657_v8 = vor.u32 %v9656_v44, %v9653_v52  ;;  %v8826_v53 = vpop.f32.mrf.mxu0  ;;  %v7880_v5 = vpop.f32.mrf.mxu2 }
 0x5fc   : > { %9925 = vst.msk [vmem:[%s15414_s30 + $0x4c] sm:$0xf] %vm279_vm0, %v9893_v55  ;;  %v9302_v19 = vadd.f32 %v15401_v41, %v9266_v59  ;;  %v8867_v59 = vadd.f32 %v8821_v4, %v8209_v20  ;;  %v9658_v17 = vrot.slane %v9657_v8, 4 }
 0x5fe   : > { %v9830_v29 = vadd.f32 %v9798_v62, %v9302_v19  ;;  %v9660_v62 = vshll.u32 %v9351_v56, 16  ;;  %v8168_v42 = vpop.f32.mrf.mxu3 }
 0x5ff   : > { %v8211_v25 = vadd.f32 %v8168_v42, %v7920_v49 }
 0x600   : > { %v9862_v50 = vmax.f32 %v9830_v29, 0.0  ;;  %v9662_v29 = vrot.slane %v9660_v62, 5 }
 0x601   : > { %v9218_v9 = vpop.f32.mrf.mxu1 }
 0x602   : > { %v9894_v45 = vpack.c.bf16 %v9862_v50, %v9862_v50  ;;  %v9267_v0 = vadd.f32 %v9218_v9, %v8865_v2  ;;  %v9667_v2 = vor.u32 %v9666_v7, %v9662_v29  ;;  %v9663_v4 = vsel %vm11481_vm4, %v9658_v17, %v9662_v29  ;;  %v8829_v11 = vpop.f32.mrf.mxu0  ;;  %v7882_v30 = vpop.f32.mrf.mxu2  ;;  %v16081_v7 = vld [vmem:[#allocation54_spill] sm:$0xff] }
 0x603   : > { %v9675_v9 = vshrl.u32 %v9353_v60, 16  ;;  %v9802_v6 = vunpack.c.l.bf16 %v9663_v4 }
 0x604   : > { %9926 = vst.msk [vmem:[%s15414_s30 + $0x50] sm:$0xf] %vm279_vm0, %v9894_v45  ;;  %v9303_v3 = vadd.f32 %v15401_v41, %v9267_v0  ;;  %v9648_v41 = vrot.slane %v9646_v34, 5  ;;  %v8868_v0 = vadd.f32 %v8824_v10, %v8210_v43  ;;  %v9668_v57 = vrot.slane %v9667_v2, 4 }
 0x605   : > { %v9677_v38 = vrot.slane %v9675_v9, 4 }
 0x606   : > { %v9831_v28 = vadd.f32 %v9799_v35, %v9303_v3  ;;  %v9649_v32 = vsel %vm11481_vm4, %v9644_v39, %v9648_v41  ;;  %v9678_v35 = vshll.u32 %v9353_v60, 16  ;;  %v8171_v23 = vpop.f32.mrf.mxu3  ;;  %v9673_v10 = vsel %vm11481_vm4, %v9668_v57, %v9672_v14 }
 0x607   : > { %v9801_v1 = vunpack.c.l.bf16 %v9649_v32  ;;  %v8869_v39 = vadd.f32 %v8826_v53, %v8211_v25  ;;  %v7922_v53 = vadd.f32 %v7882_v30, %v16081_v7 }
 0x608   : > { %v9863_v36 = vmax.f32 %v9831_v28, 0.0  ;;  %v9680_v34 = vrot.slane %v9678_v35, 5  ;;  %v9354_v28 = vld [vmem:[#allocation2 + $0xac] sm:$0xf] }
 0x609   : > { %v9221_v54 = vpop.f32.mrf.mxu1  ;;  %v9688_v46 = vshrl.u32 %v9354_v28, 16  ;;  %v9684_v51 = vshll.u32 %v9354_v28, 16 }
 0x60a   : > { %v9895_v12 = vpack.c.bf16 %v9863_v36, %v9863_v36  ;;  %v9268_v26 = vadd.f32 %v9221_v54, %v8866_v47  ;;  %v9681_v47 = vor.u32 %v9680_v34, %v9677_v38  ;;  %v7921_v54 = vadd.f32 %v7880_v5, %v15366_v13  ;;  %v8831_v13 = vpop.f32.mrf.mxu0 }
 0x60b   : > { %v9686_v20 = vrot.slane %v9684_v51, 5 }
 0x60c   : > { %9927 = vst.msk [vmem:[%s15414_s30 + $0x54] sm:$0xf] %vm279_vm0, %v9895_v12  ;;  %v9304_v61 = vadd.f32 %v15694_v31, %v9268_v26  ;;  %v9803_v12 = vunpack.c.l.bf16 %v9673_v10  ;;  %v9690_v26 = vrot.slane %v9688_v46, 4  ;;  %v9682_v56 = vrot.slane %v9681_v47, 4  ;;  %v9358_v10 = vld [vmem:[#allocation2 + $0xbc] sm:$0x1] }
 0x60d   : > { %v8212_v32 = vadd.f32 %v8171_v23, %v7921_v54  ;;  %v9712_v23 = vshrl.u32 %v9357_v27, 16  ;;  %v9359_v47 = vld [vmem:[#allocation2 + $0xc0] sm:$0xf] }
 0x60e   : > { %v9832_v18 = vadd.f32 %v9800_v48, %v9304_v61  ;;  %v9355_v61 = vld [vmem:[#allocation2 + $0xb0] sm:$0x1]  ;;  %v8173_v21 = vpop.f32.mrf.mxu3  ;;  %v9691_v62 = vor.u32 %v9690_v26, %v9686_v20  ;;  %v9726_v26 = vshll.u32 %v9359_v47, 16 }
 0x60f   : > { %v9694_v42 = vshll.u32 %v9355_v61, 16  ;;  %v9714_v30 = vrot.slane %v9712_v23, 4  ;;  %v9361_v23 = vld [vmem:[#allocation2 + $0xc8] sm:$0x1] }
 0x610   : > { %v9864_v55 = vmax.f32 %v9832_v18, 0.0  ;;  %v9356_v18 = vld [vmem:[#allocation2 + $0xb4] sm:$0xf]  ;;  %v9692_v63 = vrot.slane %v9691_v62, 4 }
 0x611   : > { %v9223_v24 = vpop.f32.mrf.mxu1  ;;  %v9696_v5 = vrot.slane %v9694_v42, 5 }
 0x612   : > { %v9896_v15 = vpack.c.bf16 %v9864_v55, %v9864_v55  ;;  %v9269_v19 = vadd.f32 %v9223_v24, %v8867_v59  ;;  %v9687_v55 = vsel %vm11481_vm4, %v9682_v56, %v9686_v20  ;;  %v9699_v59 = vshrl.u32 %v9356_v18, 16 }
 0x613   : > { %v9702_v24 = vshll.u32 %v9356_v18, 16  ;;  %v9804_v29 = vunpack.c.l.bf16 %v9687_v55  ;;  %v9697_v49 = vsel %vm11481_vm4, %v9692_v63, %v9696_v5  ;;  %v9728_v55 = vrot.slane %v9726_v26, 5  ;;  %v16084_v63 = vld [vmem:[#allocation47_spill] sm:$0xff] }
 0x614   : > { %9928 = vst.msk [vmem:[%s15414_s30 + $0x58] sm:$0xf] %vm279_vm0, %v9896_v15  ;;  %v9305_v50 = vadd.f32 %v15694_v31, %v9269_v19  ;;  %v8870_v19 = vadd.f32 %v8829_v11, %v8212_v32  ;;  %v9805_v34 = vunpack.c.l.bf16 %v9697_v49 }
 0x615   : > { %v9704_v2 = vrot.slane %v9702_v24, 5 }
 0x616   : > { %v9833_v33 = vadd.f32 %v9801_v1, %v9305_v50  ;;  %v7885_v1 = vpop.f32.mrf.mxu2  ;;  %v9701_v50 = vrot.slane %v9699_v59, 4  ;;  %v8176_v9 = vpop.f32.mrf.mxu3 }
 0x618   : > { %v9865_v45 = vmax.f32 %v9833_v33, 0.0  ;;  %v8213_v33 = vadd.f32 %v8173_v21, %v7922_v53 }
 0x619   : > { %v9226_v58 = vpop.f32.mrf.mxu1 }
 0x61a   : > { %v9897_v3 = vpack.c.bf16 %v9865_v45, %v9865_v45  ;;  %v9270_v37 = vadd.f32 %v9226_v58, %v8868_v0  ;;  %v9705_v45 = vor.u32 %v9704_v2, %v9701_v50  ;;  %v9708_v0 = vshll.u32 %v9357_v27, 16  ;;  %v8834_v58 = vpop.f32.mrf.mxu0 }
 0x61c   : > { %9929 = vst.msk [vmem:[%s15414_s30 + $0x5c] sm:$0xf] %vm279_vm0, %v9897_v3  ;;  %v9306_v22 = vadd.f32 %v15694_v31, %v9270_v37  ;;  %v8871_v3 = vadd.f32 %v8831_v13, %v8213_v33  ;;  %v9706_v25 = vrot.slane %v9705_v45, 4 }
 0x61e   : > { %v9834_v36 = vadd.f32 %v9802_v6, %v9306_v22  ;;  %v16082_v6 = vld [vmem:[#allocation44_spill] sm:$0xff]  ;;  %v7887_v37 = vpop.f32.mrf.mxu2  ;;  %v9710_v22 = vrot.slane %v9708_v0, 5 }
 0x61f   : > { %v7923_v57 = vadd.f32 %v7885_v1, %v16082_v6  ;;  %v9360_v1 = vld [vmem:[#allocation2 + $0xc4] sm:$0xf] }
 0x620   : > { %v9866_v48 = vmax.f32 %v9834_v36, 0.0  ;;  %v9711_v54 = vsel %vm11481_vm4, %v9706_v25, %v9710_v22 }
 0x621   : > { %v9228_v41 = vpop.f32.mrf.mxu1  ;;  %v8214_v46 = vadd.f32 %v8176_v9, %v7923_v57  ;;  %v9806_v32 = vunpack.c.l.bf16 %v9711_v54 }
 0x622   : > { %v9898_v52 = vpack.c.bf16 %v9866_v48, %v9866_v48  ;;  %v9271_v44 = vadd.f32 %v9228_v41, %v8869_v39  ;;  %v8178_v48 = vpop.f32.mrf.mxu3  ;;  %v9715_v39 = vor.u32 %v9714_v30, %v9710_v22  ;;  %v9718_v41 = vshll.u32 %v9358_v10, 16 }
 0x623   : > { %v8872_v20 = vadd.f32 %v8834_v58, %v8214_v46 }
 0x624   : > { %9930 = vst.msk [vmem:[%s15414_s30 + $0x60] sm:$0xf] %vm279_vm0, %v9898_v52  ;;  %v9307_v8 = vadd.f32 %v15694_v31, %v9271_v44  ;;  %v16083_v52 = vld [vmem:[#allocation37_spill] sm:$0xff]  ;;  %v9716_v42 = vrot.slane %v9715_v39, 4  ;;  %v9720_v13 = vrot.slane %v9718_v41, 5 }
 0x625   : > { %v7924_v44 = vadd.f32 %v7887_v37, %v16083_v52 }
 0x626   : > { %v9835_v40 = vadd.f32 %v9803_v12, %v9307_v8  ;;  %v9723_v12 = vshrl.u32 %v9359_v47, 16  ;;  %v8836_v8 = vpop.f32.mrf.mxu0  ;;  %v7890_v62 = vpop.f32.mrf.mxu2 }
 0x627   : > { %v8215_v59 = vadd.f32 %v8178_v48, %v7924_v44  ;;  %v7925_v5 = vadd.f32 %v7890_v62, %v16084_v63 }
 0x628   : > { %v9867_v15 = vmax.f32 %v9835_v40, 0.0  ;;  %v9725_v40 = vrot.slane %v9723_v12, 4 }
 0x629   : > { %v9231_v17 = vpop.f32.mrf.mxu1 }
 0x62a   : > { %v9899_v60 = vpack.c.bf16 %v9867_v15, %v9867_v15  ;;  %v9272_v43 = vadd.f32 %v9231_v17, %v8870_v19  ;;  %v8181_v53 = vpop.f32.mrf.mxu3  ;;  %v9721_v15 = vsel %vm11481_vm4, %v9716_v42, %v9720_v13  ;;  %v9729_v19 = vor.u32 %v9728_v55, %v9725_v40 }
 0x62b   : > { %v9732_v17 = vshll.u32 %v9360_v1, 16  ;;  %v9807_v33 = vunpack.c.l.bf16 %v9721_v15  ;;  %v8216_v45 = vadd.f32 %v8181_v53, %v7925_v5 }
 0x62c   : > { %9931 = vst.msk [vmem:[%s15414_s30 + $0x64] sm:$0xf] %vm279_vm0, %v9899_v60  ;;  %v9308_v4 = vadd.f32 %v15694_v31, %v9272_v43  ;;  %v8873_v43 = vadd.f32 %v8836_v8, %v8215_v59  ;;  %v9730_v9 = vrot.slane %v9729_v19, 4 }
 0x62e   : > { %v9836_v35 = vadd.f32 %v9804_v29, %v9308_v4  ;;  %v9736_v29 = vshrl.u32 %v9360_v1, 16  ;;  %v8839_v4 = vpop.f32.mrf.mxu0  ;;  %v7892_v58 = vpop.f32.mrf.mxu2 }
 0x62f   : > { %v8874_v37 = vadd.f32 %v8839_v4, %v8216_v45 }
 0x630   : > { %v9868_v14 = vmax.f32 %v9836_v35, 0.0  ;;  %v9734_v35 = vrot.slane %v9732_v17, 5  ;;  %v9738_v49 = vrot.slane %v9736_v29, 4 }
 0x631   : > { %v9233_v38 = vpop.f32.mrf.mxu1 }
 0x632   : > { %v9900_v28 = vpack.c.bf16 %v9868_v14, %v9868_v14  ;;  %v9273_v11 = vadd.f32 %v9233_v38, %v8871_v3  ;;  %v9735_v57 = vsel %vm11481_vm4, %v9730_v9, %v9734_v35  ;;  %v9739_v14 = vor.u32 %v9738_v49, %v9734_v35  ;;  %v16085_v38 = vld [vmem:[#allocation42_spill] sm:$0xff] }
 0x633   : > { %v9742_v3 = vshll.u32 %v9361_v23, 16  ;;  %v9808_v46 = vunpack.c.l.bf16 %v9735_v57 }
 0x634   : > { %9932 = vst.msk [vmem:[%s15414_s30 + $0x68] sm:$0xf] %vm279_vm0, %v9900_v28  ;;  %v9309_v36 = vadd.f32 %v15694_v31, %v9273_v11  ;;  %v8183_v11 = vpop.f32.mrf.mxu3 }
 0x635   : > { %v9744_v10 = vrot.slane %v9742_v3, 5 }
 0x636   : > { %v9837_v51 = vadd.f32 %v9805_v34, %v9309_v36  ;;  %v7926_v34 = vadd.f32 %v7892_v58, %v16085_v38  ;;  %v9740_v36 = vrot.slane %v9739_v14, 4  ;;  %v8841_v54 = vpop.f32.mrf.mxu0 }
 0x638   : > { %v9869_v56 = vmax.f32 %v9837_v51, 0.0  ;;  %v8217_v47 = vadd.f32 %v8183_v11, %v7926_v34  ;;  %v9745_v39 = vsel %vm11481_vm4, %v9740_v36, %v9744_v10 }
 0x639   : > { %v9236_v61 = vpop.f32.mrf.mxu1 }
 0x63a   : > { %v9901_v21 = vpack.c.bf16 %v9869_v56, %v9869_v56  ;;  %v9274_v18 = vadd.f32 %v9236_v61, %v8872_v20  ;;  %v8875_v41 = vadd.f32 %v8841_v54, %v8217_v47  ;;  %v9809_v56 = vunpack.c.l.bf16 %v9745_v39 }
 0x63c   : > { %9933 = vst.msk [vmem:[%s15414_s30 + $0x6c] sm:$0xf] %vm279_vm0, %v9901_v21  ;;  %v9310_v24 = vadd.f32 %v15694_v31, %v9274_v18 }
 0x63e   : > { %v9838_v7 = vadd.f32 %v9806_v32, %v9310_v24 }
 0x640   : > { %v9870_v60 = vmax.f32 %v9838_v7, 0.0 }
 0x641   : > { %v9238_v50 = vpop.f32.mrf.mxu1 }
 0x642   : > { %v9902_v2 = vpack.c.bf16 %v9870_v60, %v9870_v60  ;;  %v9275_v27 = vadd.f32 %v9238_v50, %v8873_v43 }
 0x644   : > { %9934 = vst.msk [vmem:[%s15414_s30 + $0x70] sm:$0xf] %vm279_vm0, %v9902_v2  ;;  %v9311_v0 = vadd.f32 %v15694_v31, %v9275_v27 }
 0x646   : > { %v9839_v6 = vadd.f32 %v9807_v33, %v9311_v0 }
 0x648   : > { %v9871_v28 = vmax.f32 %v9839_v6, 0.0 }
 0x649   : > { %v9241_v25 = vpop.f32.mrf.mxu1 }
 0x64a   : > { %v9903_v22 = vpack.c.bf16 %v9871_v28, %v9871_v28  ;;  %v9276_v30 = vadd.f32 %v9241_v25, %v8874_v37 }
 0x64c   : > { %9935 = vst.msk [vmem:[%s15414_s30 + $0x74] sm:$0xf] %vm279_vm0, %v9903_v22  ;;  %v9312_v51 = vadd.f32 %v15694_v31, %v9276_v30 }
 0x64e   : > { %v9840_v48 = vadd.f32 %v9808_v46, %v9312_v51 }
 0x650   : > { %v9872_v12 = vmax.f32 %v9840_v48, 0.0 }
 0x651   : > { %v9243_v26 = vpop.f32.mrf.mxu1 }
 0x652   : > { %v9904_v52 = vpack.c.bf16 %v9872_v12, %v9872_v12  ;;  %v9277_v44 = vadd.f32 %v9243_v26, %v8875_v41 }
 0x654   : > { %9936 = vst.msk [vmem:[%s15414_s30 + $0x78] sm:$0xf] %vm279_vm0, %v9904_v52  ;;  %v9313_v20 = vadd.f32 %v15694_v31, %v9277_v44 }
 0x656   : > { %v9841_v16 = vadd.f32 %v9809_v56, %v9313_v20 }
 0x658   : > { %v9873_v61 = vmax.f32 %v9841_v16, 0.0 }
 0x65a   : > { %v9905_v21 = vpack.c.bf16 %v9873_v61, %v9873_v61 }
 0x65c   : > { %9937 = vst.msk [vmem:[%s15414_s30 + $0x7c] sm:$0xf] %vm279_vm0, %v9905_v21 }
 0x65d   : > { %11250 = shalt.err (!%p11247_p10)
}
 0x65e   : > { %s11300_s8 = smov 64   ;;  %s11301_s30 = smov 4  }
 0x65f   : > { %11032 = dma.vmem_to_hbm [thread:$0]  (%p11404_p3), %s9952_s24, 2048, %s9954_s29, %s9939_s22, %s11300_s8, %s11300_s8, %s11301_s30  }
 0x660 PF: > { %s9968_s7 = sand.u32 1, %s11281_s18   ;;  %p16086_p12 = scmp.ge.s32.totalorder %s11293_s21, 2 }
 0x661   : > { %s9969_s26 = scalar_lea.sflag [#allocation6], %s9968_s7 }
 0x662   : > { %p11046_p13 = pnand %p16086_p12, %p11367_p6 }
 0x664   : > { %p11047_p0 = pneg %p11046_p13 }
 0x666   : > { %11276 = dma.done.wait (%p11047_p0), %s9969_s26, 2048  }
 0x667   : > { %11278 = vsyncadd (%p11047_p0), %s9969_s26, 4294965248  ;;  %p19_p5 = scmp.ge.s32.totalorder %s11394_s14, 4   ;;  %s16087_s18 = smov %s11285_s19 }
 0x668   : > { %s16088_s19 = smov %s11289_s20  ;;  %s16089_s20 = smov %s11410_s23 }
 0x669   : > { %s16090_s21 = smov %s11394_s14  ;;  %21 = sbr.rel (!%p19_p5) target bundleno = 6 (0x6), region = 113 }
 0x66e   :  { %9975 = vsyncpa [#allocation5], 1 }
 0x66f   :  { %9977 = vsyncpa [#allocation5 + $0x1], 1 }
 0x670   :  { %9978 = vsyncpa [#allocation8], 1 }
 0x671   :  { %9979 = vsyncpa [#allocation6], 1 }
 0x672   :  { %9981 = vsyncpa [#allocation6 + $0x1], 1 }

</bundles_post_ra>
